<compile_context>
chip_gen: v6e
topology: v6e:2x2x1
jax: 0.10.0
libtpu: 0.0.40
codegen_flags: <defaults>
</compile_context>

<pallas_src>
import functools

import jax
import jax.numpy as jnp
from jax.experimental import pallas as pl
from jax.experimental.pallas import tpu as pltpu

C1 = 8          # first_conv output channels
C_EMB = 8       # speaker-embedding channels produced by the linear
W_FIXED = 512   # fixed by Linear(512, 8 * 512)


# ----------------------------- fused kernel ---------------------------------
def fused_forward_kernel(x_ref, emb_ref, w1_ref, b1_ref, w2_ref, b2_ref,
                         o_ref, s_ref, *, H, W, bt):
    """One grid step == `bt` batch elements.

    x_ref:   (bt, H, W)      source_sp block (f32, VMEM)
    emb_ref: (bt, 8, W)      precomputed first_line output (f32, VMEM)
    w1/b1/w2/b2:             flattened conv weights / biases in SMEM
    o_ref:   (bt, 1, H, W)   output block
    s_ref:   (9, H, W)       VMEM scratch: zero-padded shifted source planes
    """
    f32 = jnp.float32

    # Edge masks, hoisted once per grid step (the restructured loops keep only
    # ~20-30 vregs live, so these small masks fit comfortably).
    lane = jax.lax.broadcasted_iota(jnp.int32, (1, W), 1)
    row = jax.lax.broadcasted_iota(jnp.int32, (H, W), 0)
    first_lane, last_lane = lane == 0, lane == W - 1
    first_row, last_row = row == 0, row == H - 1

    # Zero-padded 3-tap shifts via XLU roll (positive axes!) + edge mask.
    def shift_x(p, dx):  # q[..., x] = p_zeropad[..., x + dx - 1]
        if dx == 1:
            return p
        if dx == 0:
            return jnp.where(first_lane, 0.0, pltpu.roll(p, shift=1, axis=1))
        return jnp.where(last_lane, 0.0, pltpu.roll(p, shift=W - 1, axis=1))

    def shift_y(p, dy):  # q[y, :] = p_zeropad[y + dy - 1, :]   (p is (H, W))
        if dy == 1:
            return p
        if dy == 0:
            return jnp.where(first_row, 0.0, pltpu.roll(p, shift=1, axis=0))
        return jnp.where(last_row, 0.0, pltpu.roll(p, shift=H - 1, axis=0))

    def do_element(b):
        # --- 9 zero-padded shifted source planes, built ONCE into scratch ---
        x = x_ref[b]                                       # (H, W)
        for dx in range(3):
            xs = shift_x(x, dx)
            for dy in range(3):
                s_ref[dy * 3 + dx] = shift_y(xs, dy)

        # --- emb half of last_conv: constant along H -> per-dy 1-D W-convs --
        e = emb_ref[b]                                     # (8, W)
        e_sh = [shift_x(e, dx) for dx in range(3)]         # 2 lane rolls total
        ec = [jnp.zeros((1, W), f32) for _ in range(3)]
        for ci in range(C_EMB):
            rows = [e_sh[dx][ci:ci + 1, :] for dx in range(3)]
            for dy in range(3):
                for dx in range(3):
                    wv = w2_ref[(C1 + ci) * 9 + dy * 3 + dx]
                    ec[dy] = ec[dy] + wv * rows[dx]

        # --- conv half: ci OUTER, one live c1 channel, 3 per-dy accumulators
        acc = [jnp.zeros((H, W), f32) for _ in range(3)]
        for ci in range(C1):
            c1 = jnp.full((H, W), b1_ref[ci], f32)         # first_conv channel ci
            for dy in range(3):
                for dx in range(3):
                    c1 = c1 + w1_ref[ci * 9 + dy * 3 + dx] * s_ref[dy * 3 + dx]
            for dx in range(3):                            # fold into last_conv
                cs = shift_x(c1, dx)
                for dy in range(3):
                    acc[dy] = acc[dy] + w2_ref[ci * 9 + dy * 3 + dx] * cs

        # --- combine.  shift_y applied once per dy (shifts are linear); the
        # emb contribution is constant along H minus the dy taps that fall in
        # the zero padding on the first / last row.
        out = (acc[1] + shift_y(acc[0], 0) + shift_y(acc[2], 2)
               + b2_ref[0]
               + (ec[0] + ec[1] + ec[2])
               - jnp.where(first_row, ec[0], 0.0)
               - jnp.where(last_row, ec[2], 0.0))
        o_ref[b, 0] = out

    # bt is small & static: fully unrolled loop amortizes per-step overhead.
    for b in range(bt):
        do_element(b)


# ------------------------------ wrapper --------------------------------------
def prepare_params(params):
    """One-time (outside jit) cast / reshape of parameters into kernel layout."""
    return {
        "wlin": params["first_line_w"].astype(jnp.float32),               # (512, 4096)
        "blin": params["first_line_b"].astype(jnp.float32),               # (4096,)
        "w1_flat": params["first_conv_w"].astype(jnp.float32).reshape(-1),  # (72,)
        "b1": params["first_conv_b"].astype(jnp.float32),                 # (8,)
        "w2_flat": params["last_conv_w"].astype(jnp.float32).reshape(-1),   # (144,)
        "b2": params["last_conv_b"].astype(jnp.float32),                  # (1,)
    }


def _pick_bt(B):
    """Batch elements per grid step: amortize step overhead, keep >=2 steps."""
    for bt in (8, 4, 2, 1):
        if B % bt == 0 and B // bt >= 2:
            return bt
    return B


def simple_model_forward(prep, source_sp, target_speaker_embed):
    B, H, W = source_sp.shape
    assert W == W_FIXED, "Linear(512, 8*512) fixes the width to 512"

    # Hoisted first_line: ONE full-batch f32 matmul at full MXU efficiency.
    emb = jnp.dot(target_speaker_embed, prep["wlin"],
                  precision=jax.lax.Precision.HIGHEST) + prep["blin"]
    emb = emb.reshape(B, C_EMB, W)

    bt = _pick_bt(B)
    kern = functools.partial(fused_forward_kernel, H=H, W=W, bt=bt)
    return pl.pallas_call(
        kern,
        out_shape=jax.ShapeDtypeStruct((B, 1, H, W), jnp.float32),
        grid=(B // bt,),
        in_specs=[
            pl.BlockSpec((bt, H, W), lambda g: (g, 0, 0)),        # source_sp block
            pl.BlockSpec((bt, C_EMB, W), lambda g: (g, 0, 0)),    # precomputed emb block
            pl.BlockSpec(memory_space=pltpu.MemorySpace.SMEM),    # first_conv weight (flat)
            pl.BlockSpec(memory_space=pltpu.MemorySpace.SMEM),    # first_conv bias
            pl.BlockSpec(memory_space=pltpu.MemorySpace.SMEM),    # last_conv weight (flat)
            pl.BlockSpec(memory_space=pltpu.MemorySpace.SMEM),    # last_conv bias
        ],
        out_specs=pl.BlockSpec((bt, 1, H, W), lambda g: (g, 0, 0, 0)),
        scratch_shapes=[pltpu.VMEM((9, H, W), jnp.float32)],      # shifted source planes
        compiler_params=pltpu.CompilerParams(
            dimension_semantics=("parallel",),                    # v7x: split batch over cores
            vmem_limit_bytes=8 * 1024 * 1024,                     # kernel uses ~0.3 MiB
        ),
    )(source_sp, emb, prep["w1_flat"], prep["b1"], prep["w2_flat"], prep["b2"])


# --------------------------- pure-JAX reference -------------------------------
def reference_forward(params, source_sp, target_speaker_embed):
    """XLA reference mirroring the PyTorch module (f32)."""
    B, H, W = source_sp.shape
    dn = ("NCHW", "OIHW", "NCHW")
    hp = jax.lax.Precision.HIGHEST
    x = source_sp[:, None, :, :]
    c1 = jax.lax.conv_general_dilated(x, params["first_conv_w"], (1, 1), "SAME",
                                      dimension_numbers=dn, precision=hp)
    c1 = c1 + params["first_conv_b"][None, :, None, None]
    emb = jnp.dot(target_speaker_embed, params["first_line_w"], precision=hp)
    emb = emb + params["first_line_b"]
    emb = jnp.broadcast_to(emb.reshape(B, C_EMB, 1, W), (B, C_EMB, H, W))
    xc = jnp.concatenate([c1, emb], axis=1)
    out = jax.lax.conv_general_dilated(xc, params["last_conv_w"], (1, 1), "SAME",
                                       dimension_numbers=dn, precision=hp)
    return out + params["last_conv_b"][None, :, None, None]


def init_params(key):
    ks = jax.random.split(key, 6)
    # Shapes match the torch module; Linear weight stored pre-transposed (in, out).
    return {
        "first_conv_w": 0.1 * jax.random.normal(ks[0], (8, 1, 3, 3), jnp.float32),
        "first_conv_b": 0.1 * jax.random.normal(ks[1], (8,), jnp.float32),
        "first_line_w": 0.02 * jax.random.normal(ks[2], (512, 8 * 512), jnp.float32),
        "first_line_b": 0.02 * jax.random.normal(ks[3], (8 * 512,), jnp.float32),
        "last_conv_w": 0.1 * jax.random.normal(ks[4], (1, 16, 3, 3), jnp.float32),
        "last_conv_b": 0.1 * jax.random.normal(ks[5], (1,), jnp.float32),
    }


if __name__ == "__main__":
    key = jax.random.PRNGKey(0)
    kp, k1, k2 = jax.random.split(key, 3)
    params = init_params(kp)
    prep = prepare_params(params)          # one-time cast/reshape, outside jit

    B, H, W = 2, 8, W_FIXED                # W=512 fixed by Linear(512, 8*512)
    source_sp = jax.random.normal(k1, (B, H, W), jnp.float32)
    target_speaker_embed = jax.random.normal(k2, (B, W), jnp.float32)

    fwd = jax.jit(simple_model_forward)
    out = fwd(prep, source_sp, target_speaker_embed)
    jax.block_until_ready(out)
    assert out.shape == (B, 1, H, W), out.shape

    # Numerical sanity check vs. the f32 XLA reference (everything f32 now).
    ref = reference_forward(params, source_sp, target_speaker_embed)
    err = float(jnp.max(jnp.abs(out - ref)))
    assert err < 2e-3, f"max abs err {err}"
    print("KERNEL_OK")
</pallas_src>

<mosaic_0001>
module attributes {stable_mosaic.version = 11 : i64} {
  func.func @fused_forward_kernel(%arg0: i32, %arg1: memref<1x8x512xf32, #tpu.memory_space<vmem>>, %arg2: memref<1x8x512xf32, #tpu.memory_space<vmem>>, %arg3: memref<72xf32, #tpu.memory_space<smem>>, %arg4: memref<8xf32, #tpu.memory_space<smem>>, %arg5: memref<144xf32, #tpu.memory_space<smem>>, %arg6: memref<1xf32, #tpu.memory_space<smem>>, %arg7: memref<1x1x8x512xf32, #tpu.memory_space<vmem>>, %arg8: memref<9x8x512xf32, #tpu.memory_space<vmem>>) attributes {dimension_semantics = [#tpu.dimension_semantics<parallel>], iteration_bounds = array<i64: 2>, scalar_prefetch = 0 : i64, scratch_operands = 1 : i64, tpu.core_type = #tpu.core_type<tc>, window_params = [{transform_indices = @transform_0, window_bounds = array<i64: 1, 8, 512>}, {transform_indices = @transform_1, window_bounds = array<i64: 1, 8, 512>}, {transform_indices = @transform_2, window_bounds = array<i64: 72>}, {transform_indices = @transform_3, window_bounds = array<i64: 8>}, {transform_indices = @transform_4, window_bounds = array<i64: 144>}, {transform_indices = @transform_5, window_bounds = array<i64: 1>}, {transform_indices = @transform_6, window_bounds = array<i64: 1, 1, 8, 512>}]} {
    %0 = tpu.iota {dimensions = array<i32: 1>} : vector<1x512xi32>
    %1 = tpu.iota {dimensions = array<i32: 0>} : vector<8x512xi32>
    %c0_i32 = arith.constant 0 : i32
    %2 = vector.broadcast %c0_i32 : i32 to vector<1x512xi32>
    %3 = arith.cmpi eq, %0, %2 : vector<1x512xi32>
    %c511_i32 = arith.constant 511 : i32
    %4 = vector.broadcast %c511_i32 : i32 to vector<1x512xi32>
    %5 = arith.cmpi eq, %0, %4 : vector<1x512xi32>
    %c0_i32_0 = arith.constant 0 : i32
    %6 = vector.broadcast %c0_i32_0 : i32 to vector<8x512xi32>
    %7 = arith.cmpi eq, %1, %6 : vector<8x512xi32>
    %c7_i32 = arith.constant 7 : i32
    %8 = vector.broadcast %c7_i32 : i32 to vector<8x512xi32>
    %9 = arith.cmpi eq, %1, %8 : vector<8x512xi32>
    %c0 = arith.constant 0 : index
    %c0_1 = arith.constant 0 : index
    %c0_2 = arith.constant 0 : index
    %10 = vector.load %arg1[%c0, %c0_1, %c0_2] : memref<1x8x512xf32, #tpu.memory_space<vmem>>, vector<1x8x512xf32>
    %11 = vector.shape_cast %10 : vector<1x8x512xf32> to vector<8x512xf32>
    %c1_i32 = arith.constant 1 : i32
    %12 = tpu.dynamic_rotate %11 by %c1_i32 dim 1 : vector<8x512xf32>, i32 -> vector<8x512xf32>
    %cst = arith.constant 0.000000e+00 : f32
    %13 = vector.shape_cast %3 : vector<1x512xi1> to vector<1x512xi1>
    %14 = vector.broadcast %13 : vector<1x512xi1> to vector<8x512xi1>
    %15 = vector.broadcast %cst : f32 to vector<8x512xf32>
    %16 = arith.select %14, %15, %12 : vector<8x512xi1>, vector<8x512xf32>
    %c1_i32_3 = arith.constant 1 : i32
    %17 = tpu.dynamic_rotate %16 by %c1_i32_3 dim 0 : vector<8x512xf32>, i32 -> vector<8x512xf32>
    %cst_4 = arith.constant 0.000000e+00 : f32
    %18 = vector.broadcast %cst_4 : f32 to vector<8x512xf32>
    %19 = arith.select %7, %18, %17 : vector<8x512xi1>, vector<8x512xf32>
    %c0_5 = arith.constant 0 : index
    %c0_6 = arith.constant 0 : index
    %c0_7 = arith.constant 0 : index
    %20 = vector.load %arg8[%c0_5, %c0_6, %c0_7] : memref<9x8x512xf32, #tpu.memory_space<vmem>>, vector<1x8x512xf32>
    %21 = vector.shape_cast %20 : vector<1x8x512xf32> to vector<8x512xf32>
    %22 = vector.shape_cast %19 : vector<8x512xf32> to vector<1x8x512xf32>
    tpu.vector_store %arg8[%c0_5, %c0_6, %c0_7], %22 {strides = array<i32>} : memref<9x8x512xf32, #tpu.memory_space<vmem>>, vector<1x8x512xf32>,
    %c3 = arith.constant 3 : index
    %c0_8 = arith.constant 0 : index
    %c0_9 = arith.constant 0 : index
    %23 = vector.load %arg8[%c3, %c0_8, %c0_9] : memref<9x8x512xf32, #tpu.memory_space<vmem>>, vector<1x8x512xf32>
    %24 = vector.shape_cast %23 : vector<1x8x512xf32> to vector<8x512xf32>
    %25 = vector.shape_cast %16 : vector<8x512xf32> to vector<1x8x512xf32>
    tpu.vector_store %arg8[%c3, %c0_8, %c0_9], %25 {strides = array<i32>} : memref<9x8x512xf32, #tpu.memory_space<vmem>>, vector<1x8x512xf32>,
    %c7_i32_10 = arith.constant 7 : i32
    %26 = tpu.dynamic_rotate %16 by %c7_i32_10 dim 0 : vector<8x512xf32>, i32 -> vector<8x512xf32>
    %cst_11 = arith.constant 0.000000e+00 : f32
    %27 = vector.broadcast %cst_11 : f32 to vector<8x512xf32>
    %28 = arith.select %9, %27, %26 : vector<8x512xi1>, vector<8x512xf32>
    %c6 = arith.constant 6 : index
    %c0_12 = arith.constant 0 : index
    %c0_13 = arith.constant 0 : index
    %29 = vector.load %arg8[%c6, %c0_12, %c0_13] : memref<9x8x512xf32, #tpu.memory_space<vmem>>, vector<1x8x512xf32>
    %30 = vector.shape_cast %29 : vector<1x8x512xf32> to vector<8x512xf32>
    %31 = vector.shape_cast %28 : vector<8x512xf32> to vector<1x8x512xf32>
    tpu.vector_store %arg8[%c6, %c0_12, %c0_13], %31 {strides = array<i32>} : memref<9x8x512xf32, #tpu.memory_space<vmem>>, vector<1x8x512xf32>,
    %c1_i32_14 = arith.constant 1 : i32
    %32 = tpu.dynamic_rotate %11 by %c1_i32_14 dim 0 : vector<8x512xf32>, i32 -> vector<8x512xf32>
    %cst_15 = arith.constant 0.000000e+00 : f32
    %33 = vector.broadcast %cst_15 : f32 to vector<8x512xf32>
    %34 = arith.select %7, %33, %32 : vector<8x512xi1>, vector<8x512xf32>
    %c1 = arith.constant 1 : index
    %c0_16 = arith.constant 0 : index
    %c0_17 = arith.constant 0 : index
    %35 = vector.load %arg8[%c1, %c0_16, %c0_17] : memref<9x8x512xf32, #tpu.memory_space<vmem>>, vector<1x8x512xf32>
    %36 = vector.shape_cast %35 : vector<1x8x512xf32> to vector<8x512xf32>
    %37 = vector.shape_cast %34 : vector<8x512xf32> to vector<1x8x512xf32>
    tpu.vector_store %arg8[%c1, %c0_16, %c0_17], %37 {strides = array<i32>} : memref<9x8x512xf32, #tpu.memory_space<vmem>>, vector<1x8x512xf32>,
    %c4 = arith.constant 4 : index
    %c0_18 = arith.constant 0 : index
    %c0_19 = arith.constant 0 : index
    %38 = vector.load %arg8[%c4, %c0_18, %c0_19] : memref<9x8x512xf32, #tpu.memory_space<vmem>>, vector<1x8x512xf32>
    %39 = vector.shape_cast %38 : vector<1x8x512xf32> to vector<8x512xf32>
    %40 = vector.shape_cast %11 : vector<8x512xf32> to vector<1x8x512xf32>
    tpu.vector_store %arg8[%c4, %c0_18, %c0_19], %40 {strides = array<i32>} : memref<9x8x512xf32, #tpu.memory_space<vmem>>, vector<1x8x512xf32>,
    %c7_i32_20 = arith.constant 7 : i32
    %41 = tpu.dynamic_rotate %11 by %c7_i32_20 dim 0 : vector<8x512xf32>, i32 -> vector<8x512xf32>
    %cst_21 = arith.constant 0.000000e+00 : f32
    %42 = vector.broadcast %cst_21 : f32 to vector<8x512xf32>
    %43 = arith.select %9, %42, %41 : vector<8x512xi1>, vector<8x512xf32>
    %c7 = arith.constant 7 : index
    %c0_22 = arith.constant 0 : index
    %c0_23 = arith.constant 0 : index
    %44 = vector.load %arg8[%c7, %c0_22, %c0_23] : memref<9x8x512xf32, #tpu.memory_space<vmem>>, vector<1x8x512xf32>
    %45 = vector.shape_cast %44 : vector<1x8x512xf32> to vector<8x512xf32>
    %46 = vector.shape_cast %43 : vector<8x512xf32> to vector<1x8x512xf32>
    tpu.vector_store %arg8[%c7, %c0_22, %c0_23], %46 {strides = array<i32>} : memref<9x8x512xf32, #tpu.memory_space<vmem>>, vector<1x8x512xf32>,
    %c511_i32_24 = arith.constant 511 : i32
    %47 = tpu.dynamic_rotate %11 by %c511_i32_24 dim 1 : vector<8x512xf32>, i32 -> vector<8x512xf32>
    %cst_25 = arith.constant 0.000000e+00 : f32
    %48 = vector.shape_cast %5 : vector<1x512xi1> to vector<1x512xi1>
    %49 = vector.broadcast %48 : vector<1x512xi1> to vector<8x512xi1>
    %50 = vector.broadcast %cst_25 : f32 to vector<8x512xf32>
    %51 = arith.select %49, %50, %47 : vector<8x512xi1>, vector<8x512xf32>
    %c1_i32_26 = arith.constant 1 : i32
    %52 = tpu.dynamic_rotate %51 by %c1_i32_26 dim 0 : vector<8x512xf32>, i32 -> vector<8x512xf32>
    %cst_27 = arith.constant 0.000000e+00 : f32
    %53 = vector.broadcast %cst_27 : f32 to vector<8x512xf32>
    %54 = arith.select %7, %53, %52 : vector<8x512xi1>, vector<8x512xf32>
    %c2 = arith.constant 2 : index
    %c0_28 = arith.constant 0 : index
    %c0_29 = arith.constant 0 : index
    %55 = vector.load %arg8[%c2, %c0_28, %c0_29] : memref<9x8x512xf32, #tpu.memory_space<vmem>>, vector<1x8x512xf32>
    %56 = vector.shape_cast %55 : vector<1x8x512xf32> to vector<8x512xf32>
    %57 = vector.shape_cast %54 : vector<8x512xf32> to vector<1x8x512xf32>
    tpu.vector_store %arg8[%c2, %c0_28, %c0_29], %57 {strides = array<i32>} : memref<9x8x512xf32, #tpu.memory_space<vmem>>, vector<1x8x512xf32>,
    %c5 = arith.constant 5 : index
    %c0_30 = arith.constant 0 : index
    %c0_31 = arith.constant 0 : index
    %58 = vector.load %arg8[%c5, %c0_30, %c0_31] : memref<9x8x512xf32, #tpu.memory_space<vmem>>, vector<1x8x512xf32>
    %59 = vector.shape_cast %58 : vector<1x8x512xf32> to vector<8x512xf32>
    %60 = vector.shape_cast %51 : vector<8x512xf32> to vector<1x8x512xf32>
    tpu.vector_store %arg8[%c5, %c0_30, %c0_31], %60 {strides = array<i32>} : memref<9x8x512xf32, #tpu.memory_space<vmem>>, vector<1x8x512xf32>,
    %c7_i32_32 = arith.constant 7 : i32
    %61 = tpu.dynamic_rotate %51 by %c7_i32_32 dim 0 : vector<8x512xf32>, i32 -> vector<8x512xf32>
    %cst_33 = arith.constant 0.000000e+00 : f32
    %62 = vector.broadcast %cst_33 : f32 to vector<8x512xf32>
    %63 = arith.select %9, %62, %61 : vector<8x512xi1>, vector<8x512xf32>
    %c8 = arith.constant 8 : index
    %c0_34 = arith.constant 0 : index
    %c0_35 = arith.constant 0 : index
    %64 = vector.load %arg8[%c8, %c0_34, %c0_35] : memref<9x8x512xf32, #tpu.memory_space<vmem>>, vector<1x8x512xf32>
    %65 = vector.shape_cast %64 : vector<1x8x512xf32> to vector<8x512xf32>
    %66 = vector.shape_cast %63 : vector<8x512xf32> to vector<1x8x512xf32>
    tpu.vector_store %arg8[%c8, %c0_34, %c0_35], %66 {strides = array<i32>} : memref<9x8x512xf32, #tpu.memory_space<vmem>>, vector<1x8x512xf32>,
    %c0_36 = arith.constant 0 : index
    %c0_37 = arith.constant 0 : index
    %c0_38 = arith.constant 0 : index
    %67 = vector.load %arg2[%c0_36, %c0_37, %c0_38] : memref<1x8x512xf32, #tpu.memory_space<vmem>>, vector<1x8x512xf32>
    %68 = vector.shape_cast %67 : vector<1x8x512xf32> to vector<8x512xf32>
    %c1_i32_39 = arith.constant 1 : i32
    %69 = tpu.dynamic_rotate %68 by %c1_i32_39 dim 1 : vector<8x512xf32>, i32 -> vector<8x512xf32>
    %cst_40 = arith.constant 0.000000e+00 : f32
    %70 = vector.shape_cast %3 : vector<1x512xi1> to vector<1x512xi1>
    %71 = vector.broadcast %70 : vector<1x512xi1> to vector<8x512xi1>
    %72 = vector.broadcast %cst_40 : f32 to vector<8x512xf32>
    %73 = arith.select %71, %72, %69 : vector<8x512xi1>, vector<8x512xf32>
    %c511_i32_41 = arith.constant 511 : i32
    %74 = tpu.dynamic_rotate %68 by %c511_i32_41 dim 1 : vector<8x512xf32>, i32 -> vector<8x512xf32>
    %cst_42 = arith.constant 0.000000e+00 : f32
    %75 = vector.shape_cast %5 : vector<1x512xi1> to vector<1x512xi1>
    %76 = vector.broadcast %75 : vector<1x512xi1> to vector<8x512xi1>
    %77 = vector.broadcast %cst_42 : f32 to vector<8x512xf32>
    %78 = arith.select %76, %77, %74 : vector<8x512xi1>, vector<8x512xf32>
    %cst_43 = arith.constant 0.000000e+00 : f32
    %79 = vector.broadcast %cst_43 : f32 to vector<1x512xf32>
    %cst_44 = arith.constant 0.000000e+00 : f32
    %80 = vector.broadcast %cst_44 : f32 to vector<1x512xf32>
    %cst_45 = arith.constant 0.000000e+00 : f32
    %81 = vector.broadcast %cst_45 : f32 to vector<1x512xf32>
    %82 = vector.extract_strided_slice %73 {offsets = [0, 0], sizes = [1, 512], strides = [1, 1]} : vector<8x512xf32> to vector<1x512xf32>
    %83 = vector.extract_strided_slice %68 {offsets = [0, 0], sizes = [1, 512], strides = [1, 1]} : vector<8x512xf32> to vector<1x512xf32>
    %84 = vector.extract_strided_slice %78 {offsets = [0, 0], sizes = [1, 512], strides = [1, 1]} : vector<8x512xf32> to vector<1x512xf32>
    %c72 = arith.constant 72 : index
    %85 = memref.load %arg5[%c72] : memref<144xf32, #tpu.memory_space<smem>>
    %86 = vector.broadcast %85 : f32 to vector<1x512xf32>
    %87 = arith.mulf %86, %82 : vector<1x512xf32>
    %88 = arith.addf %79, %87 : vector<1x512xf32>
    %c73 = arith.constant 73 : index
    %89 = memref.load %arg5[%c73] : memref<144xf32, #tpu.memory_space<smem>>
    %90 = vector.broadcast %89 : f32 to vector<1x512xf32>
    %91 = arith.mulf %90, %83 : vector<1x512xf32>
    %92 = arith.addf %88, %91 : vector<1x512xf32>
    %c74 = arith.constant 74 : index
    %93 = memref.load %arg5[%c74] : memref<144xf32, #tpu.memory_space<smem>>
    %94 = vector.broadcast %93 : f32 to vector<1x512xf32>
    %95 = arith.mulf %94, %84 : vector<1x512xf32>
    %96 = arith.addf %92, %95 : vector<1x512xf32>
    %c75 = arith.constant 75 : index
    %97 = memref.load %arg5[%c75] : memref<144xf32, #tpu.memory_space<smem>>
    %98 = vector.broadcast %97 : f32 to vector<1x512xf32>
    %99 = arith.mulf %98, %82 : vector<1x512xf32>
    %100 = arith.addf %80, %99 : vector<1x512xf32>
    %c76 = arith.constant 76 : index
    %101 = memref.load %arg5[%c76] : memref<144xf32, #tpu.memory_space<smem>>
    %102 = vector.broadcast %101 : f32 to vector<1x512xf32>
    %103 = arith.mulf %102, %83 : vector<1x512xf32>
    %104 = arith.addf %100, %103 : vector<1x512xf32>
    %c77 = arith.constant 77 : index
    %105 = memref.load %arg5[%c77] : memref<144xf32, #tpu.memory_space<smem>>
    %106 = vector.broadcast %105 : f32 to vector<1x512xf32>
    %107 = arith.mulf %106, %84 : vector<1x512xf32>
    %108 = arith.addf %104, %107 : vector<1x512xf32>
    %c78 = arith.constant 78 : index
    %109 = memref.load %arg5[%c78] : memref<144xf32, #tpu.memory_space<smem>>
    %110 = vector.broadcast %109 : f32 to vector<1x512xf32>
    %111 = arith.mulf %110, %82 : vector<1x512xf32>
    %112 = arith.addf %81, %111 : vector<1x512xf32>
    %c79 = arith.constant 79 : index
    %113 = memref.load %arg5[%c79] : memref<144xf32, #tpu.memory_space<smem>>
    %114 = vector.broadcast %113 : f32 to vector<1x512xf32>
    %115 = arith.mulf %114, %83 : vector<1x512xf32>
    %116 = arith.addf %112, %115 : vector<1x512xf32>
    %c80 = arith.constant 80 : index
    %117 = memref.load %arg5[%c80] : memref<144xf32, #tpu.memory_space<smem>>
    %118 = vector.broadcast %117 : f32 to vector<1x512xf32>
    %119 = arith.mulf %118, %84 : vector<1x512xf32>
    %120 = arith.addf %116, %119 : vector<1x512xf32>
    %121 = vector.extract_strided_slice %73 {offsets = [1, 0], sizes = [1, 512], strides = [1, 1]} : vector<8x512xf32> to vector<1x512xf32>
    %122 = vector.extract_strided_slice %68 {offsets = [1, 0], sizes = [1, 512], strides = [1, 1]} : vector<8x512xf32> to vector<1x512xf32>
    %123 = vector.extract_strided_slice %78 {offsets = [1, 0], sizes = [1, 512], strides = [1, 1]} : vector<8x512xf32> to vector<1x512xf32>
    %c81 = arith.constant 81 : index
    %124 = memref.load %arg5[%c81] : memref<144xf32, #tpu.memory_space<smem>>
    %125 = vector.broadcast %124 : f32 to vector<1x512xf32>
    %126 = arith.mulf %125, %121 : vector<1x512xf32>
    %127 = arith.addf %96, %126 : vector<1x512xf32>
    %c82 = arith.constant 82 : index
    %128 = memref.load %arg5[%c82] : memref<144xf32, #tpu.memory_space<smem>>
    %129 = vector.broadcast %128 : f32 to vector<1x512xf32>
    %130 = arith.mulf %129, %122 : vector<1x512xf32>
    %131 = arith.addf %127, %130 : vector<1x512xf32>
    %c83 = arith.constant 83 : index
    %132 = memref.load %arg5[%c83] : memref<144xf32, #tpu.memory_space<smem>>
    %133 = vector.broadcast %132 : f32 to vector<1x512xf32>
    %134 = arith.mulf %133, %123 : vector<1x512xf32>
    %135 = arith.addf %131, %134 : vector<1x512xf32>
    %c84 = arith.constant 84 : index
    %136 = memref.load %arg5[%c84] : memref<144xf32, #tpu.memory_space<smem>>
    %137 = vector.broadcast %136 : f32 to vector<1x512xf32>
    %138 = arith.mulf %137, %121 : vector<1x512xf32>
    %139 = arith.addf %108, %138 : vector<1x512xf32>
    %c85 = arith.constant 85 : index
    %140 = memref.load %arg5[%c85] : memref<144xf32, #tpu.memory_space<smem>>
    %141 = vector.broadcast %140 : f32 to vector<1x512xf32>
    %142 = arith.mulf %141, %122 : vector<1x512xf32>
    %143 = arith.addf %139, %142 : vector<1x512xf32>
    %c86 = arith.constant 86 : index
    %144 = memref.load %arg5[%c86] : memref<144xf32, #tpu.memory_space<smem>>
    %145 = vector.broadcast %144 : f32 to vector<1x512xf32>
    %146 = arith.mulf %145, %123 : vector<1x512xf32>
    %147 = arith.addf %143, %146 : vector<1x512xf32>
    %c87 = arith.constant 87 : index
    %148 = memref.load %arg5[%c87] : memref<144xf32, #tpu.memory_space<smem>>
    %149 = vector.broadcast %148 : f32 to vector<1x512xf32>
    %150 = arith.mulf %149, %121 : vector<1x512xf32>
    %151 = arith.addf %120, %150 : vector<1x512xf32>
    %c88 = arith.constant 88 : index
    %152 = memref.load %arg5[%c88] : memref<144xf32, #tpu.memory_space<smem>>
    %153 = vector.broadcast %152 : f32 to vector<1x512xf32>
    %154 = arith.mulf %153, %122 : vector<1x512xf32>
    %155 = arith.addf %151, %154 : vector<1x512xf32>
    %c89 = arith.constant 89 : index
    %156 = memref.load %arg5[%c89] : memref<144xf32, #tpu.memory_space<smem>>
    %157 = vector.broadcast %156 : f32 to vector<1x512xf32>
    %158 = arith.mulf %157, %123 : vector<1x512xf32>
    %159 = arith.addf %155, %158 : vector<1x512xf32>
    %160 = vector.extract_strided_slice %73 {offsets = [2, 0], sizes = [1, 512], strides = [1, 1]} : vector<8x512xf32> to vector<1x512xf32>
    %161 = vector.extract_strided_slice %68 {offsets = [2, 0], sizes = [1, 512], strides = [1, 1]} : vector<8x512xf32> to vector<1x512xf32>
    %162 = vector.extract_strided_slice %78 {offsets = [2, 0], sizes = [1, 512], strides = [1, 1]} : vector<8x512xf32> to vector<1x512xf32>
    %c90 = arith.constant 90 : index
    %163 = memref.load %arg5[%c90] : memref<144xf32, #tpu.memory_space<smem>>
    %164 = vector.broadcast %163 : f32 to vector<1x512xf32>
    %165 = arith.mulf %164, %160 : vector<1x512xf32>
    %166 = arith.addf %135, %165 : vector<1x512xf32>
    %c91 = arith.constant 91 : index
    %167 = memref.load %arg5[%c91] : memref<144xf32, #tpu.memory_space<smem>>
    %168 = vector.broadcast %167 : f32 to vector<1x512xf32>
    %169 = arith.mulf %168, %161 : vector<1x512xf32>
    %170 = arith.addf %166, %169 : vector<1x512xf32>
    %c92 = arith.constant 92 : index
    %171 = memref.load %arg5[%c92] : memref<144xf32, #tpu.memory_space<smem>>
    %172 = vector.broadcast %171 : f32 to vector<1x512xf32>
    %173 = arith.mulf %172, %162 : vector<1x512xf32>
    %174 = arith.addf %170, %173 : vector<1x512xf32>
    %c93 = arith.constant 93 : index
    %175 = memref.load %arg5[%c93] : memref<144xf32, #tpu.memory_space<smem>>
    %176 = vector.broadcast %175 : f32 to vector<1x512xf32>
    %177 = arith.mulf %176, %160 : vector<1x512xf32>
    %178 = arith.addf %147, %177 : vector<1x512xf32>
    %c94 = arith.constant 94 : index
    %179 = memref.load %arg5[%c94] : memref<144xf32, #tpu.memory_space<smem>>
    %180 = vector.broadcast %179 : f32 to vector<1x512xf32>
    %181 = arith.mulf %180, %161 : vector<1x512xf32>
    %182 = arith.addf %178, %181 : vector<1x512xf32>
    %c95 = arith.constant 95 : index
    %183 = memref.load %arg5[%c95] : memref<144xf32, #tpu.memory_space<smem>>
    %184 = vector.broadcast %183 : f32 to vector<1x512xf32>
    %185 = arith.mulf %184, %162 : vector<1x512xf32>
    %186 = arith.addf %182, %185 : vector<1x512xf32>
    %c96 = arith.constant 96 : index
    %187 = memref.load %arg5[%c96] : memref<144xf32, #tpu.memory_space<smem>>
    %188 = vector.broadcast %187 : f32 to vector<1x512xf32>
    %189 = arith.mulf %188, %160 : vector<1x512xf32>
    %190 = arith.addf %159, %189 : vector<1x512xf32>
    %c97 = arith.constant 97 : index
    %191 = memref.load %arg5[%c97] : memref<144xf32, #tpu.memory_space<smem>>
    %192 = vector.broadcast %191 : f32 to vector<1x512xf32>
    %193 = arith.mulf %192, %161 : vector<1x512xf32>
    %194 = arith.addf %190, %193 : vector<1x512xf32>
    %c98 = arith.constant 98 : index
    %195 = memref.load %arg5[%c98] : memref<144xf32, #tpu.memory_space<smem>>
    %196 = vector.broadcast %195 : f32 to vector<1x512xf32>
    %197 = arith.mulf %196, %162 : vector<1x512xf32>
    %198 = arith.addf %194, %197 : vector<1x512xf32>
    %199 = vector.extract_strided_slice %73 {offsets = [3, 0], sizes = [1, 512], strides = [1, 1]} : vector<8x512xf32> to vector<1x512xf32>
    %200 = vector.extract_strided_slice %68 {offsets = [3, 0], sizes = [1, 512], strides = [1, 1]} : vector<8x512xf32> to vector<1x512xf32>
    %201 = vector.extract_strided_slice %78 {offsets = [3, 0], sizes = [1, 512], strides = [1, 1]} : vector<8x512xf32> to vector<1x512xf32>
    %c99 = arith.constant 99 : index
    %202 = memref.load %arg5[%c99] : memref<144xf32, #tpu.memory_space<smem>>
    %203 = vector.broadcast %202 : f32 to vector<1x512xf32>
    %204 = arith.mulf %203, %199 : vector<1x512xf32>
    %205 = arith.addf %174, %204 : vector<1x512xf32>
    %c100 = arith.constant 100 : index
    %206 = memref.load %arg5[%c100] : memref<144xf32, #tpu.memory_space<smem>>
    %207 = vector.broadcast %206 : f32 to vector<1x512xf32>
    %208 = arith.mulf %207, %200 : vector<1x512xf32>
    %209 = arith.addf %205, %208 : vector<1x512xf32>
    %c101 = arith.constant 101 : index
    %210 = memref.load %arg5[%c101] : memref<144xf32, #tpu.memory_space<smem>>
    %211 = vector.broadcast %210 : f32 to vector<1x512xf32>
    %212 = arith.mulf %211, %201 : vector<1x512xf32>
    %213 = arith.addf %209, %212 : vector<1x512xf32>
    %c102 = arith.constant 102 : index
    %214 = memref.load %arg5[%c102] : memref<144xf32, #tpu.memory_space<smem>>
    %215 = vector.broadcast %214 : f32 to vector<1x512xf32>
    %216 = arith.mulf %215, %199 : vector<1x512xf32>
    %217 = arith.addf %186, %216 : vector<1x512xf32>
    %c103 = arith.constant 103 : index
    %218 = memref.load %arg5[%c103] : memref<144xf32, #tpu.memory_space<smem>>
    %219 = vector.broadcast %218 : f32 to vector<1x512xf32>
    %220 = arith.mulf %219, %200 : vector<1x512xf32>
    %221 = arith.addf %217, %220 : vector<1x512xf32>
    %c104 = arith.constant 104 : index
    %222 = memref.load %arg5[%c104] : memref<144xf32, #tpu.memory_space<smem>>
    %223 = vector.broadcast %222 : f32 to vector<1x512xf32>
    %224 = arith.mulf %223, %201 : vector<1x512xf32>
    %225 = arith.addf %221, %224 : vector<1x512xf32>
    %c105 = arith.constant 105 : index
    %226 = memref.load %arg5[%c105] : memref<144xf32, #tpu.memory_space<smem>>
    %227 = vector.broadcast %226 : f32 to vector<1x512xf32>
    %228 = arith.mulf %227, %199 : vector<1x512xf32>
    %229 = arith.addf %198, %228 : vector<1x512xf32>
    %c106 = arith.constant 106 : index
    %230 = memref.load %arg5[%c106] : memref<144xf32, #tpu.memory_space<smem>>
    %231 = vector.broadcast %230 : f32 to vector<1x512xf32>
    %232 = arith.mulf %231, %200 : vector<1x512xf32>
    %233 = arith.addf %229, %232 : vector<1x512xf32>
    %c107 = arith.constant 107 : index
    %234 = memref.load %arg5[%c107] : memref<144xf32, #tpu.memory_space<smem>>
    %235 = vector.broadcast %234 : f32 to vector<1x512xf32>
    %236 = arith.mulf %235, %201 : vector<1x512xf32>
    %237 = arith.addf %233, %236 : vector<1x512xf32>
    %238 = vector.extract_strided_slice %73 {offsets = [4, 0], sizes = [1, 512], strides = [1, 1]} : vector<8x512xf32> to vector<1x512xf32>
    %239 = vector.extract_strided_slice %68 {offsets = [4, 0], sizes = [1, 512], strides = [1, 1]} : vector<8x512xf32> to vector<1x512xf32>
    %240 = vector.extract_strided_slice %78 {offsets = [4, 0], sizes = [1, 512], strides = [1, 1]} : vector<8x512xf32> to vector<1x512xf32>
    %c108 = arith.constant 108 : index
    %241 = memref.load %arg5[%c108] : memref<144xf32, #tpu.memory_space<smem>>
    %242 = vector.broadcast %241 : f32 to vector<1x512xf32>
    %243 = arith.mulf %242, %238 : vector<1x512xf32>
    %244 = arith.addf %213, %243 : vector<1x512xf32>
    %c109 = arith.constant 109 : index
    %245 = memref.load %arg5[%c109] : memref<144xf32, #tpu.memory_space<smem>>
    %246 = vector.broadcast %245 : f32 to vector<1x512xf32>
    %247 = arith.mulf %246, %239 : vector<1x512xf32>
    %248 = arith.addf %244, %247 : vector<1x512xf32>
    %c110 = arith.constant 110 : index
    %249 = memref.load %arg5[%c110] : memref<144xf32, #tpu.memory_space<smem>>
    %250 = vector.broadcast %249 : f32 to vector<1x512xf32>
    %251 = arith.mulf %250, %240 : vector<1x512xf32>
    %252 = arith.addf %248, %251 : vector<1x512xf32>
    %c111 = arith.constant 111 : index
    %253 = memref.load %arg5[%c111] : memref<144xf32, #tpu.memory_space<smem>>
    %254 = vector.broadcast %253 : f32 to vector<1x512xf32>
    %255 = arith.mulf %254, %238 : vector<1x512xf32>
    %256 = arith.addf %225, %255 : vector<1x512xf32>
    %c112 = arith.constant 112 : index
    %257 = memref.load %arg5[%c112] : memref<144xf32, #tpu.memory_space<smem>>
    %258 = vector.broadcast %257 : f32 to vector<1x512xf32>
    %259 = arith.mulf %258, %239 : vector<1x512xf32>
    %260 = arith.addf %256, %259 : vector<1x512xf32>
    %c113 = arith.constant 113 : index
    %261 = memref.load %arg5[%c113] : memref<144xf32, #tpu.memory_space<smem>>
    %262 = vector.broadcast %261 : f32 to vector<1x512xf32>
    %263 = arith.mulf %262, %240 : vector<1x512xf32>
    %264 = arith.addf %260, %263 : vector<1x512xf32>
    %c114 = arith.constant 114 : index
    %265 = memref.load %arg5[%c114] : memref<144xf32, #tpu.memory_space<smem>>
    %266 = vector.broadcast %265 : f32 to vector<1x512xf32>
    %267 = arith.mulf %266, %238 : vector<1x512xf32>
    %268 = arith.addf %237, %267 : vector<1x512xf32>
    %c115 = arith.constant 115 : index
    %269 = memref.load %arg5[%c115] : memref<144xf32, #tpu.memory_space<smem>>
    %270 = vector.broadcast %269 : f32 to vector<1x512xf32>
    %271 = arith.mulf %270, %239 : vector<1x512xf32>
    %272 = arith.addf %268, %271 : vector<1x512xf32>
    %c116 = arith.constant 116 : index
    %273 = memref.load %arg5[%c116] : memref<144xf32, #tpu.memory_space<smem>>
    %274 = vector.broadcast %273 : f32 to vector<1x512xf32>
    %275 = arith.mulf %274, %240 : vector<1x512xf32>
    %276 = arith.addf %272, %275 : vector<1x512xf32>
    %277 = vector.extract_strided_slice %73 {offsets = [5, 0], sizes = [1, 512], strides = [1, 1]} : vector<8x512xf32> to vector<1x512xf32>
    %278 = vector.extract_strided_slice %68 {offsets = [5, 0], sizes = [1, 512], strides = [1, 1]} : vector<8x512xf32> to vector<1x512xf32>
    %279 = vector.extract_strided_slice %78 {offsets = [5, 0], sizes = [1, 512], strides = [1, 1]} : vector<8x512xf32> to vector<1x512xf32>
    %c117 = arith.constant 117 : index
    %280 = memref.load %arg5[%c117] : memref<144xf32, #tpu.memory_space<smem>>
    %281 = vector.broadcast %280 : f32 to vector<1x512xf32>
    %282 = arith.mulf %281, %277 : vector<1x512xf32>
    %283 = arith.addf %252, %282 : vector<1x512xf32>
    %c118 = arith.constant 118 : index
    %284 = memref.load %arg5[%c118] : memref<144xf32, #tpu.memory_space<smem>>
    %285 = vector.broadcast %284 : f32 to vector<1x512xf32>
    %286 = arith.mulf %285, %278 : vector<1x512xf32>
    %287 = arith.addf %283, %286 : vector<1x512xf32>
    %c119 = arith.constant 119 : index
    %288 = memref.load %arg5[%c119] : memref<144xf32, #tpu.memory_space<smem>>
    %289 = vector.broadcast %288 : f32 to vector<1x512xf32>
    %290 = arith.mulf %289, %279 : vector<1x512xf32>
    %291 = arith.addf %287, %290 : vector<1x512xf32>
    %c120 = arith.constant 120 : index
    %292 = memref.load %arg5[%c120] : memref<144xf32, #tpu.memory_space<smem>>
    %293 = vector.broadcast %292 : f32 to vector<1x512xf32>
    %294 = arith.mulf %293, %277 : vector<1x512xf32>
    %295 = arith.addf %264, %294 : vector<1x512xf32>
    %c121 = arith.constant 121 : index
    %296 = memref.load %arg5[%c121] : memref<144xf32, #tpu.memory_space<smem>>
    %297 = vector.broadcast %296 : f32 to vector<1x512xf32>
    %298 = arith.mulf %297, %278 : vector<1x512xf32>
    %299 = arith.addf %295, %298 : vector<1x512xf32>
    %c122 = arith.constant 122 : index
    %300 = memref.load %arg5[%c122] : memref<144xf32, #tpu.memory_space<smem>>
    %301 = vector.broadcast %300 : f32 to vector<1x512xf32>
    %302 = arith.mulf %301, %279 : vector<1x512xf32>
    %303 = arith.addf %299, %302 : vector<1x512xf32>
    %c123 = arith.constant 123 : index
    %304 = memref.load %arg5[%c123] : memref<144xf32, #tpu.memory_space<smem>>
    %305 = vector.broadcast %304 : f32 to vector<1x512xf32>
    %306 = arith.mulf %305, %277 : vector<1x512xf32>
    %307 = arith.addf %276, %306 : vector<1x512xf32>
    %c124 = arith.constant 124 : index
    %308 = memref.load %arg5[%c124] : memref<144xf32, #tpu.memory_space<smem>>
    %309 = vector.broadcast %308 : f32 to vector<1x512xf32>
    %310 = arith.mulf %309, %278 : vector<1x512xf32>
    %311 = arith.addf %307, %310 : vector<1x512xf32>
    %c125 = arith.constant 125 : index
    %312 = memref.load %arg5[%c125] : memref<144xf32, #tpu.memory_space<smem>>
    %313 = vector.broadcast %312 : f32 to vector<1x512xf32>
    %314 = arith.mulf %313, %279 : vector<1x512xf32>
    %315 = arith.addf %311, %314 : vector<1x512xf32>
    %316 = vector.extract_strided_slice %73 {offsets = [6, 0], sizes = [1, 512], strides = [1, 1]} : vector<8x512xf32> to vector<1x512xf32>
    %317 = vector.extract_strided_slice %68 {offsets = [6, 0], sizes = [1, 512], strides = [1, 1]} : vector<8x512xf32> to vector<1x512xf32>
    %318 = vector.extract_strided_slice %78 {offsets = [6, 0], sizes = [1, 512], strides = [1, 1]} : vector<8x512xf32> to vector<1x512xf32>
    %c126 = arith.constant 126 : index
    %319 = memref.load %arg5[%c126] : memref<144xf32, #tpu.memory_space<smem>>
    %320 = vector.broadcast %319 : f32 to vector<1x512xf32>
    %321 = arith.mulf %320, %316 : vector<1x512xf32>
    %322 = arith.addf %291, %321 : vector<1x512xf32>
    %c127 = arith.constant 127 : index
    %323 = memref.load %arg5[%c127] : memref<144xf32, #tpu.memory_space<smem>>
    %324 = vector.broadcast %323 : f32 to vector<1x512xf32>
    %325 = arith.mulf %324, %317 : vector<1x512xf32>
    %326 = arith.addf %322, %325 : vector<1x512xf32>
    %c128 = arith.constant 128 : index
    %327 = memref.load %arg5[%c128] : memref<144xf32, #tpu.memory_space<smem>>
    %328 = vector.broadcast %327 : f32 to vector<1x512xf32>
    %329 = arith.mulf %328, %318 : vector<1x512xf32>
    %330 = arith.addf %326, %329 : vector<1x512xf32>
    %c129 = arith.constant 129 : index
    %331 = memref.load %arg5[%c129] : memref<144xf32, #tpu.memory_space<smem>>
    %332 = vector.broadcast %331 : f32 to vector<1x512xf32>
    %333 = arith.mulf %332, %316 : vector<1x512xf32>
    %334 = arith.addf %303, %333 : vector<1x512xf32>
    %c130 = arith.constant 130 : index
    %335 = memref.load %arg5[%c130] : memref<144xf32, #tpu.memory_space<smem>>
    %336 = vector.broadcast %335 : f32 to vector<1x512xf32>
    %337 = arith.mulf %336, %317 : vector<1x512xf32>
    %338 = arith.addf %334, %337 : vector<1x512xf32>
    %c131 = arith.constant 131 : index
    %339 = memref.load %arg5[%c131] : memref<144xf32, #tpu.memory_space<smem>>
    %340 = vector.broadcast %339 : f32 to vector<1x512xf32>
    %341 = arith.mulf %340, %318 : vector<1x512xf32>
    %342 = arith.addf %338, %341 : vector<1x512xf32>
    %c132 = arith.constant 132 : index
    %343 = memref.load %arg5[%c132] : memref<144xf32, #tpu.memory_space<smem>>
    %344 = vector.broadcast %343 : f32 to vector<1x512xf32>
    %345 = arith.mulf %344, %316 : vector<1x512xf32>
    %346 = arith.addf %315, %345 : vector<1x512xf32>
    %c133 = arith.constant 133 : index
    %347 = memref.load %arg5[%c133] : memref<144xf32, #tpu.memory_space<smem>>
    %348 = vector.broadcast %347 : f32 to vector<1x512xf32>
    %349 = arith.mulf %348, %317 : vector<1x512xf32>
    %350 = arith.addf %346, %349 : vector<1x512xf32>
    %c134 = arith.constant 134 : index
    %351 = memref.load %arg5[%c134] : memref<144xf32, #tpu.memory_space<smem>>
    %352 = vector.broadcast %351 : f32 to vector<1x512xf32>
    %353 = arith.mulf %352, %318 : vector<1x512xf32>
    %354 = arith.addf %350, %353 : vector<1x512xf32>
    %355 = vector.extract_strided_slice %73 {offsets = [7, 0], sizes = [1, 512], strides = [1, 1]} : vector<8x512xf32> to vector<1x512xf32>
    %356 = vector.extract_strided_slice %68 {offsets = [7, 0], sizes = [1, 512], strides = [1, 1]} : vector<8x512xf32> to vector<1x512xf32>
    %357 = vector.extract_strided_slice %78 {offsets = [7, 0], sizes = [1, 512], strides = [1, 1]} : vector<8x512xf32> to vector<1x512xf32>
    %c135 = arith.constant 135 : index
    %358 = memref.load %arg5[%c135] : memref<144xf32, #tpu.memory_space<smem>>
    %359 = vector.broadcast %358 : f32 to vector<1x512xf32>
    %360 = arith.mulf %359, %355 : vector<1x512xf32>
    %361 = arith.addf %330, %360 : vector<1x512xf32>
    %c136 = arith.constant 136 : index
    %362 = memref.load %arg5[%c136] : memref<144xf32, #tpu.memory_space<smem>>
    %363 = vector.broadcast %362 : f32 to vector<1x512xf32>
    %364 = arith.mulf %363, %356 : vector<1x512xf32>
    %365 = arith.addf %361, %364 : vector<1x512xf32>
    %c137 = arith.constant 137 : index
    %366 = memref.load %arg5[%c137] : memref<144xf32, #tpu.memory_space<smem>>
    %367 = vector.broadcast %366 : f32 to vector<1x512xf32>
    %368 = arith.mulf %367, %357 : vector<1x512xf32>
    %369 = arith.addf %365, %368 : vector<1x512xf32>
    %c138 = arith.constant 138 : index
    %370 = memref.load %arg5[%c138] : memref<144xf32, #tpu.memory_space<smem>>
    %371 = vector.broadcast %370 : f32 to vector<1x512xf32>
    %372 = arith.mulf %371, %355 : vector<1x512xf32>
    %373 = arith.addf %342, %372 : vector<1x512xf32>
    %c139 = arith.constant 139 : index
    %374 = memref.load %arg5[%c139] : memref<144xf32, #tpu.memory_space<smem>>
    %375 = vector.broadcast %374 : f32 to vector<1x512xf32>
    %376 = arith.mulf %375, %356 : vector<1x512xf32>
    %377 = arith.addf %373, %376 : vector<1x512xf32>
    %c140 = arith.constant 140 : index
    %378 = memref.load %arg5[%c140] : memref<144xf32, #tpu.memory_space<smem>>
    %379 = vector.broadcast %378 : f32 to vector<1x512xf32>
    %380 = arith.mulf %379, %357 : vector<1x512xf32>
    %381 = arith.addf %377, %380 : vector<1x512xf32>
    %c141 = arith.constant 141 : index
    %382 = memref.load %arg5[%c141] : memref<144xf32, #tpu.memory_space<smem>>
    %383 = vector.broadcast %382 : f32 to vector<1x512xf32>
    %384 = arith.mulf %383, %355 : vector<1x512xf32>
    %385 = arith.addf %354, %384 : vector<1x512xf32>
    %c142 = arith.constant 142 : index
    %386 = memref.load %arg5[%c142] : memref<144xf32, #tpu.memory_space<smem>>
    %387 = vector.broadcast %386 : f32 to vector<1x512xf32>
    %388 = arith.mulf %387, %356 : vector<1x512xf32>
    %389 = arith.addf %385, %388 : vector<1x512xf32>
    %c143 = arith.constant 143 : index
    %390 = memref.load %arg5[%c143] : memref<144xf32, #tpu.memory_space<smem>>
    %391 = vector.broadcast %390 : f32 to vector<1x512xf32>
    %392 = arith.mulf %391, %357 : vector<1x512xf32>
    %393 = arith.addf %389, %392 : vector<1x512xf32>
    %cst_46 = arith.constant 0.000000e+00 : f32
    %394 = vector.broadcast %cst_46 : f32 to vector<8x512xf32>
    %cst_47 = arith.constant 0.000000e+00 : f32
    %395 = vector.broadcast %cst_47 : f32 to vector<8x512xf32>
    %cst_48 = arith.constant 0.000000e+00 : f32
    %396 = vector.broadcast %cst_48 : f32 to vector<8x512xf32>
    %c0_49 = arith.constant 0 : index
    %397 = memref.load %arg4[%c0_49] : memref<8xf32, #tpu.memory_space<smem>>
    %398 = vector.broadcast %397 : f32 to vector<8x512xf32>
    %c0_50 = arith.constant 0 : index
    %399 = memref.load %arg3[%c0_50] : memref<72xf32, #tpu.memory_space<smem>>
    %c0_51 = arith.constant 0 : index
    %c0_52 = arith.constant 0 : index
    %c0_53 = arith.constant 0 : index
    %400 = vector.load %arg8[%c0_51, %c0_52, %c0_53] : memref<9x8x512xf32, #tpu.memory_space<vmem>>, vector<1x8x512xf32>
    %401 = vector.shape_cast %400 : vector<1x8x512xf32> to vector<8x512xf32>
    %402 = vector.broadcast %399 : f32 to vector<8x512xf32>
    %403 = arith.mulf %402, %401 : vector<8x512xf32>
    %404 = arith.addf %398, %403 : vector<8x512xf32>
    %c1_54 = arith.constant 1 : index
    %405 = memref.load %arg3[%c1_54] : memref<72xf32, #tpu.memory_space<smem>>
    %c1_55 = arith.constant 1 : index
    %c0_56 = arith.constant 0 : index
    %c0_57 = arith.constant 0 : index
    %406 = vector.load %arg8[%c1_55, %c0_56, %c0_57] : memref<9x8x512xf32, #tpu.memory_space<vmem>>, vector<1x8x512xf32>
    %407 = vector.shape_cast %406 : vector<1x8x512xf32> to vector<8x512xf32>
    %408 = vector.broadcast %405 : f32 to vector<8x512xf32>
    %409 = arith.mulf %408, %407 : vector<8x512xf32>
    %410 = arith.addf %404, %409 : vector<8x512xf32>
    %c2_58 = arith.constant 2 : index
    %411 = memref.load %arg3[%c2_58] : memref<72xf32, #tpu.memory_space<smem>>
    %c2_59 = arith.constant 2 : index
    %c0_60 = arith.constant 0 : index
    %c0_61 = arith.constant 0 : index
    %412 = vector.load %arg8[%c2_59, %c0_60, %c0_61] : memref<9x8x512xf32, #tpu.memory_space<vmem>>, vector<1x8x512xf32>
    %413 = vector.shape_cast %412 : vector<1x8x512xf32> to vector<8x512xf32>
    %414 = vector.broadcast %411 : f32 to vector<8x512xf32>
    %415 = arith.mulf %414, %413 : vector<8x512xf32>
    %416 = arith.addf %410, %415 : vector<8x512xf32>
    %c3_62 = arith.constant 3 : index
    %417 = memref.load %arg3[%c3_62] : memref<72xf32, #tpu.memory_space<smem>>
    %c3_63 = arith.constant 3 : index
    %c0_64 = arith.constant 0 : index
    %c0_65 = arith.constant 0 : index
    %418 = vector.load %arg8[%c3_63, %c0_64, %c0_65] : memref<9x8x512xf32, #tpu.memory_space<vmem>>, vector<1x8x512xf32>
    %419 = vector.shape_cast %418 : vector<1x8x512xf32> to vector<8x512xf32>
    %420 = vector.broadcast %417 : f32 to vector<8x512xf32>
    %421 = arith.mulf %420, %419 : vector<8x512xf32>
    %422 = arith.addf %416, %421 : vector<8x512xf32>
    %c4_66 = arith.constant 4 : index
    %423 = memref.load %arg3[%c4_66] : memref<72xf32, #tpu.memory_space<smem>>
    %c4_67 = arith.constant 4 : index
    %c0_68 = arith.constant 0 : index
    %c0_69 = arith.constant 0 : index
    %424 = vector.load %arg8[%c4_67, %c0_68, %c0_69] : memref<9x8x512xf32, #tpu.memory_space<vmem>>, vector<1x8x512xf32>
    %425 = vector.shape_cast %424 : vector<1x8x512xf32> to vector<8x512xf32>
    %426 = vector.broadcast %423 : f32 to vector<8x512xf32>
    %427 = arith.mulf %426, %425 : vector<8x512xf32>
    %428 = arith.addf %422, %427 : vector<8x512xf32>
    %c5_70 = arith.constant 5 : index
    %429 = memref.load %arg3[%c5_70] : memref<72xf32, #tpu.memory_space<smem>>
    %c5_71 = arith.constant 5 : index
    %c0_72 = arith.constant 0 : index
    %c0_73 = arith.constant 0 : index
    %430 = vector.load %arg8[%c5_71, %c0_72, %c0_73] : memref<9x8x512xf32, #tpu.memory_space<vmem>>, vector<1x8x512xf32>
    %431 = vector.shape_cast %430 : vector<1x8x512xf32> to vector<8x512xf32>
    %432 = vector.broadcast %429 : f32 to vector<8x512xf32>
    %433 = arith.mulf %432, %431 : vector<8x512xf32>
    %434 = arith.addf %428, %433 : vector<8x512xf32>
    %c6_74 = arith.constant 6 : index
    %435 = memref.load %arg3[%c6_74] : memref<72xf32, #tpu.memory_space<smem>>
    %c6_75 = arith.constant 6 : index
    %c0_76 = arith.constant 0 : index
    %c0_77 = arith.constant 0 : index
    %436 = vector.load %arg8[%c6_75, %c0_76, %c0_77] : memref<9x8x512xf32, #tpu.memory_space<vmem>>, vector<1x8x512xf32>
    %437 = vector.shape_cast %436 : vector<1x8x512xf32> to vector<8x512xf32>
    %438 = vector.broadcast %435 : f32 to vector<8x512xf32>
    %439 = arith.mulf %438, %437 : vector<8x512xf32>
    %440 = arith.addf %434, %439 : vector<8x512xf32>
    %c7_78 = arith.constant 7 : index
    %441 = memref.load %arg3[%c7_78] : memref<72xf32, #tpu.memory_space<smem>>
    %c7_79 = arith.constant 7 : index
    %c0_80 = arith.constant 0 : index
    %c0_81 = arith.constant 0 : index
    %442 = vector.load %arg8[%c7_79, %c0_80, %c0_81] : memref<9x8x512xf32, #tpu.memory_space<vmem>>, vector<1x8x512xf32>
    %443 = vector.shape_cast %442 : vector<1x8x512xf32> to vector<8x512xf32>
    %444 = vector.broadcast %441 : f32 to vector<8x512xf32>
    %445 = arith.mulf %444, %443 : vector<8x512xf32>
    %446 = arith.addf %440, %445 : vector<8x512xf32>
    %c8_82 = arith.constant 8 : index
    %447 = memref.load %arg3[%c8_82] : memref<72xf32, #tpu.memory_space<smem>>
    %c8_83 = arith.constant 8 : index
    %c0_84 = arith.constant 0 : index
    %c0_85 = arith.constant 0 : index
    %448 = vector.load %arg8[%c8_83, %c0_84, %c0_85] : memref<9x8x512xf32, #tpu.memory_space<vmem>>, vector<1x8x512xf32>
    %449 = vector.shape_cast %448 : vector<1x8x512xf32> to vector<8x512xf32>
    %450 = vector.broadcast %447 : f32 to vector<8x512xf32>
    %451 = arith.mulf %450, %449 : vector<8x512xf32>
    %452 = arith.addf %446, %451 : vector<8x512xf32>
    %c1_i32_86 = arith.constant 1 : i32
    %453 = tpu.dynamic_rotate %452 by %c1_i32_86 dim 1 : vector<8x512xf32>, i32 -> vector<8x512xf32>
    %cst_87 = arith.constant 0.000000e+00 : f32
    %454 = vector.shape_cast %3 : vector<1x512xi1> to vector<1x512xi1>
    %455 = vector.broadcast %454 : vector<1x512xi1> to vector<8x512xi1>
    %456 = vector.broadcast %cst_87 : f32 to vector<8x512xf32>
    %457 = arith.select %455, %456, %453 : vector<8x512xi1>, vector<8x512xf32>
    %c0_88 = arith.constant 0 : index
    %458 = memref.load %arg5[%c0_88] : memref<144xf32, #tpu.memory_space<smem>>
    %459 = vector.broadcast %458 : f32 to vector<8x512xf32>
    %460 = arith.mulf %459, %457 : vector<8x512xf32>
    %461 = arith.addf %394, %460 : vector<8x512xf32>
    %c3_89 = arith.constant 3 : index
    %462 = memref.load %arg5[%c3_89] : memref<144xf32, #tpu.memory_space<smem>>
    %463 = vector.broadcast %462 : f32 to vector<8x512xf32>
    %464 = arith.mulf %463, %457 : vector<8x512xf32>
    %465 = arith.addf %395, %464 : vector<8x512xf32>
    %c6_90 = arith.constant 6 : index
    %466 = memref.load %arg5[%c6_90] : memref<144xf32, #tpu.memory_space<smem>>
    %467 = vector.broadcast %466 : f32 to vector<8x512xf32>
    %468 = arith.mulf %467, %457 : vector<8x512xf32>
    %469 = arith.addf %396, %468 : vector<8x512xf32>
    %c1_91 = arith.constant 1 : index
    %470 = memref.load %arg5[%c1_91] : memref<144xf32, #tpu.memory_space<smem>>
    %471 = vector.broadcast %470 : f32 to vector<8x512xf32>
    %472 = arith.mulf %471, %452 : vector<8x512xf32>
    %473 = arith.addf %461, %472 : vector<8x512xf32>
    %c4_92 = arith.constant 4 : index
    %474 = memref.load %arg5[%c4_92] : memref<144xf32, #tpu.memory_space<smem>>
    %475 = vector.broadcast %474 : f32 to vector<8x512xf32>
    %476 = arith.mulf %475, %452 : vector<8x512xf32>
    %477 = arith.addf %465, %476 : vector<8x512xf32>
    %c7_93 = arith.constant 7 : index
    %478 = memref.load %arg5[%c7_93] : memref<144xf32, #tpu.memory_space<smem>>
    %479 = vector.broadcast %478 : f32 to vector<8x512xf32>
    %480 = arith.mulf %479, %452 : vector<8x512xf32>
    %481 = arith.addf %469, %480 : vector<8x512xf32>
    %c511_i32_94 = arith.constant 511 : i32
    %482 = tpu.dynamic_rotate %452 by %c511_i32_94 dim 1 : vector<8x512xf32>, i32 -> vector<8x512xf32>
    %cst_95 = arith.constant 0.000000e+00 : f32
    %483 = vector.shape_cast %5 : vector<1x512xi1> to vector<1x512xi1>
    %484 = vector.broadcast %483 : vector<1x512xi1> to vector<8x512xi1>
    %485 = vector.broadcast %cst_95 : f32 to vector<8x512xf32>
    %486 = arith.select %484, %485, %482 : vector<8x512xi1>, vector<8x512xf32>
    %c2_96 = arith.constant 2 : index
    %487 = memref.load %arg5[%c2_96] : memref<144xf32, #tpu.memory_space<smem>>
    %488 = vector.broadcast %487 : f32 to vector<8x512xf32>
    %489 = arith.mulf %488, %486 : vector<8x512xf32>
    %490 = arith.addf %473, %489 : vector<8x512xf32>
    %c5_97 = arith.constant 5 : index
    %491 = memref.load %arg5[%c5_97] : memref<144xf32, #tpu.memory_space<smem>>
    %492 = vector.broadcast %491 : f32 to vector<8x512xf32>
    %493 = arith.mulf %492, %486 : vector<8x512xf32>
    %494 = arith.addf %477, %493 : vector<8x512xf32>
    %c8_98 = arith.constant 8 : index
    %495 = memref.load %arg5[%c8_98] : memref<144xf32, #tpu.memory_space<smem>>
    %496 = vector.broadcast %495 : f32 to vector<8x512xf32>
    %497 = arith.mulf %496, %486 : vector<8x512xf32>
    %498 = arith.addf %481, %497 : vector<8x512xf32>
    %c1_99 = arith.constant 1 : index
    %499 = memref.load %arg4[%c1_99] : memref<8xf32, #tpu.memory_space<smem>>
    %500 = vector.broadcast %499 : f32 to vector<8x512xf32>
    %c9 = arith.constant 9 : index
    %501 = memref.load %arg3[%c9] : memref<72xf32, #tpu.memory_space<smem>>
    %c0_100 = arith.constant 0 : index
    %c0_101 = arith.constant 0 : index
    %c0_102 = arith.constant 0 : index
    %502 = vector.load %arg8[%c0_100, %c0_101, %c0_102] : memref<9x8x512xf32, #tpu.memory_space<vmem>>, vector<1x8x512xf32>
    %503 = vector.shape_cast %502 : vector<1x8x512xf32> to vector<8x512xf32>
    %504 = vector.broadcast %501 : f32 to vector<8x512xf32>
    %505 = arith.mulf %504, %503 : vector<8x512xf32>
    %506 = arith.addf %500, %505 : vector<8x512xf32>
    %c10 = arith.constant 10 : index
    %507 = memref.load %arg3[%c10] : memref<72xf32, #tpu.memory_space<smem>>
    %c1_103 = arith.constant 1 : index
    %c0_104 = arith.constant 0 : index
    %c0_105 = arith.constant 0 : index
    %508 = vector.load %arg8[%c1_103, %c0_104, %c0_105] : memref<9x8x512xf32, #tpu.memory_space<vmem>>, vector<1x8x512xf32>
    %509 = vector.shape_cast %508 : vector<1x8x512xf32> to vector<8x512xf32>
    %510 = vector.broadcast %507 : f32 to vector<8x512xf32>
    %511 = arith.mulf %510, %509 : vector<8x512xf32>
    %512 = arith.addf %506, %511 : vector<8x512xf32>
    %c11 = arith.constant 11 : index
    %513 = memref.load %arg3[%c11] : memref<72xf32, #tpu.memory_space<smem>>
    %c2_106 = arith.constant 2 : index
    %c0_107 = arith.constant 0 : index
    %c0_108 = arith.constant 0 : index
    %514 = vector.load %arg8[%c2_106, %c0_107, %c0_108] : memref<9x8x512xf32, #tpu.memory_space<vmem>>, vector<1x8x512xf32>
    %515 = vector.shape_cast %514 : vector<1x8x512xf32> to vector<8x512xf32>
    %516 = vector.broadcast %513 : f32 to vector<8x512xf32>
    %517 = arith.mulf %516, %515 : vector<8x512xf32>
    %518 = arith.addf %512, %517 : vector<8x512xf32>
    %c12 = arith.constant 12 : index
    %519 = memref.load %arg3[%c12] : memref<72xf32, #tpu.memory_space<smem>>
    %c3_109 = arith.constant 3 : index
    %c0_110 = arith.constant 0 : index
    %c0_111 = arith.constant 0 : index
    %520 = vector.load %arg8[%c3_109, %c0_110, %c0_111] : memref<9x8x512xf32, #tpu.memory_space<vmem>>, vector<1x8x512xf32>
    %521 = vector.shape_cast %520 : vector<1x8x512xf32> to vector<8x512xf32>
    %522 = vector.broadcast %519 : f32 to vector<8x512xf32>
    %523 = arith.mulf %522, %521 : vector<8x512xf32>
    %524 = arith.addf %518, %523 : vector<8x512xf32>
    %c13 = arith.constant 13 : index
    %525 = memref.load %arg3[%c13] : memref<72xf32, #tpu.memory_space<smem>>
    %c4_112 = arith.constant 4 : index
    %c0_113 = arith.constant 0 : index
    %c0_114 = arith.constant 0 : index
    %526 = vector.load %arg8[%c4_112, %c0_113, %c0_114] : memref<9x8x512xf32, #tpu.memory_space<vmem>>, vector<1x8x512xf32>
    %527 = vector.shape_cast %526 : vector<1x8x512xf32> to vector<8x512xf32>
    %528 = vector.broadcast %525 : f32 to vector<8x512xf32>
    %529 = arith.mulf %528, %527 : vector<8x512xf32>
    %530 = arith.addf %524, %529 : vector<8x512xf32>
    %c14 = arith.constant 14 : index
    %531 = memref.load %arg3[%c14] : memref<72xf32, #tpu.memory_space<smem>>
    %c5_115 = arith.constant 5 : index
    %c0_116 = arith.constant 0 : index
    %c0_117 = arith.constant 0 : index
    %532 = vector.load %arg8[%c5_115, %c0_116, %c0_117] : memref<9x8x512xf32, #tpu.memory_space<vmem>>, vector<1x8x512xf32>
    %533 = vector.shape_cast %532 : vector<1x8x512xf32> to vector<8x512xf32>
    %534 = vector.broadcast %531 : f32 to vector<8x512xf32>
    %535 = arith.mulf %534, %533 : vector<8x512xf32>
    %536 = arith.addf %530, %535 : vector<8x512xf32>
    %c15 = arith.constant 15 : index
    %537 = memref.load %arg3[%c15] : memref<72xf32, #tpu.memory_space<smem>>
    %c6_118 = arith.constant 6 : index
    %c0_119 = arith.constant 0 : index
    %c0_120 = arith.constant 0 : index
    %538 = vector.load %arg8[%c6_118, %c0_119, %c0_120] : memref<9x8x512xf32, #tpu.memory_space<vmem>>, vector<1x8x512xf32>
    %539 = vector.shape_cast %538 : vector<1x8x512xf32> to vector<8x512xf32>
    %540 = vector.broadcast %537 : f32 to vector<8x512xf32>
    %541 = arith.mulf %540, %539 : vector<8x512xf32>
    %542 = arith.addf %536, %541 : vector<8x512xf32>
    %c16 = arith.constant 16 : index
    %543 = memref.load %arg3[%c16] : memref<72xf32, #tpu.memory_space<smem>>
    %c7_121 = arith.constant 7 : index
    %c0_122 = arith.constant 0 : index
    %c0_123 = arith.constant 0 : index
    %544 = vector.load %arg8[%c7_121, %c0_122, %c0_123] : memref<9x8x512xf32, #tpu.memory_space<vmem>>, vector<1x8x512xf32>
    %545 = vector.shape_cast %544 : vector<1x8x512xf32> to vector<8x512xf32>
    %546 = vector.broadcast %543 : f32 to vector<8x512xf32>
    %547 = arith.mulf %546, %545 : vector<8x512xf32>
    %548 = arith.addf %542, %547 : vector<8x512xf32>
    %c17 = arith.constant 17 : index
    %549 = memref.load %arg3[%c17] : memref<72xf32, #tpu.memory_space<smem>>
    %c8_124 = arith.constant 8 : index
    %c0_125 = arith.constant 0 : index
    %c0_126 = arith.constant 0 : index
    %550 = vector.load %arg8[%c8_124, %c0_125, %c0_126] : memref<9x8x512xf32, #tpu.memory_space<vmem>>, vector<1x8x512xf32>
    %551 = vector.shape_cast %550 : vector<1x8x512xf32> to vector<8x512xf32>
    %552 = vector.broadcast %549 : f32 to vector<8x512xf32>
    %553 = arith.mulf %552, %551 : vector<8x512xf32>
    %554 = arith.addf %548, %553 : vector<8x512xf32>
    %c1_i32_127 = arith.constant 1 : i32
    %555 = tpu.dynamic_rotate %554 by %c1_i32_127 dim 1 : vector<8x512xf32>, i32 -> vector<8x512xf32>
    %cst_128 = arith.constant 0.000000e+00 : f32
    %556 = vector.shape_cast %3 : vector<1x512xi1> to vector<1x512xi1>
    %557 = vector.broadcast %556 : vector<1x512xi1> to vector<8x512xi1>
    %558 = vector.broadcast %cst_128 : f32 to vector<8x512xf32>
    %559 = arith.select %557, %558, %555 : vector<8x512xi1>, vector<8x512xf32>
    %c9_129 = arith.constant 9 : index
    %560 = memref.load %arg5[%c9_129] : memref<144xf32, #tpu.memory_space<smem>>
    %561 = vector.broadcast %560 : f32 to vector<8x512xf32>
    %562 = arith.mulf %561, %559 : vector<8x512xf32>
    %563 = arith.addf %490, %562 : vector<8x512xf32>
    %c12_130 = arith.constant 12 : index
    %564 = memref.load %arg5[%c12_130] : memref<144xf32, #tpu.memory_space<smem>>
    %565 = vector.broadcast %564 : f32 to vector<8x512xf32>
    %566 = arith.mulf %565, %559 : vector<8x512xf32>
    %567 = arith.addf %494, %566 : vector<8x512xf32>
    %c15_131 = arith.constant 15 : index
    %568 = memref.load %arg5[%c15_131] : memref<144xf32, #tpu.memory_space<smem>>
    %569 = vector.broadcast %568 : f32 to vector<8x512xf32>
    %570 = arith.mulf %569, %559 : vector<8x512xf32>
    %571 = arith.addf %498, %570 : vector<8x512xf32>
    %c10_132 = arith.constant 10 : index
    %572 = memref.load %arg5[%c10_132] : memref<144xf32, #tpu.memory_space<smem>>
    %573 = vector.broadcast %572 : f32 to vector<8x512xf32>
    %574 = arith.mulf %573, %554 : vector<8x512xf32>
    %575 = arith.addf %563, %574 : vector<8x512xf32>
    %c13_133 = arith.constant 13 : index
    %576 = memref.load %arg5[%c13_133] : memref<144xf32, #tpu.memory_space<smem>>
    %577 = vector.broadcast %576 : f32 to vector<8x512xf32>
    %578 = arith.mulf %577, %554 : vector<8x512xf32>
    %579 = arith.addf %567, %578 : vector<8x512xf32>
    %c16_134 = arith.constant 16 : index
    %580 = memref.load %arg5[%c16_134] : memref<144xf32, #tpu.memory_space<smem>>
    %581 = vector.broadcast %580 : f32 to vector<8x512xf32>
    %582 = arith.mulf %581, %554 : vector<8x512xf32>
    %583 = arith.addf %571, %582 : vector<8x512xf32>
    %c511_i32_135 = arith.constant 511 : i32
    %584 = tpu.dynamic_rotate %554 by %c511_i32_135 dim 1 : vector<8x512xf32>, i32 -> vector<8x512xf32>
    %cst_136 = arith.constant 0.000000e+00 : f32
    %585 = vector.shape_cast %5 : vector<1x512xi1> to vector<1x512xi1>
    %586 = vector.broadcast %585 : vector<1x512xi1> to vector<8x512xi1>
    %587 = vector.broadcast %cst_136 : f32 to vector<8x512xf32>
    %588 = arith.select %586, %587, %584 : vector<8x512xi1>, vector<8x512xf32>
    %c11_137 = arith.constant 11 : index
    %589 = memref.load %arg5[%c11_137] : memref<144xf32, #tpu.memory_space<smem>>
    %590 = vector.broadcast %589 : f32 to vector<8x512xf32>
    %591 = arith.mulf %590, %588 : vector<8x512xf32>
    %592 = arith.addf %575, %591 : vector<8x512xf32>
    %c14_138 = arith.constant 14 : index
    %593 = memref.load %arg5[%c14_138] : memref<144xf32, #tpu.memory_space<smem>>
    %594 = vector.broadcast %593 : f32 to vector<8x512xf32>
    %595 = arith.mulf %594, %588 : vector<8x512xf32>
    %596 = arith.addf %579, %595 : vector<8x512xf32>
    %c17_139 = arith.constant 17 : index
    %597 = memref.load %arg5[%c17_139] : memref<144xf32, #tpu.memory_space<smem>>
    %598 = vector.broadcast %597 : f32 to vector<8x512xf32>
    %599 = arith.mulf %598, %588 : vector<8x512xf32>
    %600 = arith.addf %583, %599 : vector<8x512xf32>
    %c2_140 = arith.constant 2 : index
    %601 = memref.load %arg4[%c2_140] : memref<8xf32, #tpu.memory_space<smem>>
    %602 = vector.broadcast %601 : f32 to vector<8x512xf32>
    %c18 = arith.constant 18 : index
    %603 = memref.load %arg3[%c18] : memref<72xf32, #tpu.memory_space<smem>>
    %c0_141 = arith.constant 0 : index
    %c0_142 = arith.constant 0 : index
    %c0_143 = arith.constant 0 : index
    %604 = vector.load %arg8[%c0_141, %c0_142, %c0_143] : memref<9x8x512xf32, #tpu.memory_space<vmem>>, vector<1x8x512xf32>
    %605 = vector.shape_cast %604 : vector<1x8x512xf32> to vector<8x512xf32>
    %606 = vector.broadcast %603 : f32 to vector<8x512xf32>
    %607 = arith.mulf %606, %605 : vector<8x512xf32>
    %608 = arith.addf %602, %607 : vector<8x512xf32>
    %c19 = arith.constant 19 : index
    %609 = memref.load %arg3[%c19] : memref<72xf32, #tpu.memory_space<smem>>
    %c1_144 = arith.constant 1 : index
    %c0_145 = arith.constant 0 : index
    %c0_146 = arith.constant 0 : index
    %610 = vector.load %arg8[%c1_144, %c0_145, %c0_146] : memref<9x8x512xf32, #tpu.memory_space<vmem>>, vector<1x8x512xf32>
    %611 = vector.shape_cast %610 : vector<1x8x512xf32> to vector<8x512xf32>
    %612 = vector.broadcast %609 : f32 to vector<8x512xf32>
    %613 = arith.mulf %612, %611 : vector<8x512xf32>
    %614 = arith.addf %608, %613 : vector<8x512xf32>
    %c20 = arith.constant 20 : index
    %615 = memref.load %arg3[%c20] : memref<72xf32, #tpu.memory_space<smem>>
    %c2_147 = arith.constant 2 : index
    %c0_148 = arith.constant 0 : index
    %c0_149 = arith.constant 0 : index
    %616 = vector.load %arg8[%c2_147, %c0_148, %c0_149] : memref<9x8x512xf32, #tpu.memory_space<vmem>>, vector<1x8x512xf32>
    %617 = vector.shape_cast %616 : vector<1x8x512xf32> to vector<8x512xf32>
    %618 = vector.broadcast %615 : f32 to vector<8x512xf32>
    %619 = arith.mulf %618, %617 : vector<8x512xf32>
    %620 = arith.addf %614, %619 : vector<8x512xf32>
    %c21 = arith.constant 21 : index
    %621 = memref.load %arg3[%c21] : memref<72xf32, #tpu.memory_space<smem>>
    %c3_150 = arith.constant 3 : index
    %c0_151 = arith.constant 0 : index
    %c0_152 = arith.constant 0 : index
    %622 = vector.load %arg8[%c3_150, %c0_151, %c0_152] : memref<9x8x512xf32, #tpu.memory_space<vmem>>, vector<1x8x512xf32>
    %623 = vector.shape_cast %622 : vector<1x8x512xf32> to vector<8x512xf32>
    %624 = vector.broadcast %621 : f32 to vector<8x512xf32>
    %625 = arith.mulf %624, %623 : vector<8x512xf32>
    %626 = arith.addf %620, %625 : vector<8x512xf32>
    %c22 = arith.constant 22 : index
    %627 = memref.load %arg3[%c22] : memref<72xf32, #tpu.memory_space<smem>>
    %c4_153 = arith.constant 4 : index
    %c0_154 = arith.constant 0 : index
    %c0_155 = arith.constant 0 : index
    %628 = vector.load %arg8[%c4_153, %c0_154, %c0_155] : memref<9x8x512xf32, #tpu.memory_space<vmem>>, vector<1x8x512xf32>
    %629 = vector.shape_cast %628 : vector<1x8x512xf32> to vector<8x512xf32>
    %630 = vector.broadcast %627 : f32 to vector<8x512xf32>
    %631 = arith.mulf %630, %629 : vector<8x512xf32>
    %632 = arith.addf %626, %631 : vector<8x512xf32>
    %c23 = arith.constant 23 : index
    %633 = memref.load %arg3[%c23] : memref<72xf32, #tpu.memory_space<smem>>
    %c5_156 = arith.constant 5 : index
    %c0_157 = arith.constant 0 : index
    %c0_158 = arith.constant 0 : index
    %634 = vector.load %arg8[%c5_156, %c0_157, %c0_158] : memref<9x8x512xf32, #tpu.memory_space<vmem>>, vector<1x8x512xf32>
    %635 = vector.shape_cast %634 : vector<1x8x512xf32> to vector<8x512xf32>
    %636 = vector.broadcast %633 : f32 to vector<8x512xf32>
    %637 = arith.mulf %636, %635 : vector<8x512xf32>
    %638 = arith.addf %632, %637 : vector<8x512xf32>
    %c24 = arith.constant 24 : index
    %639 = memref.load %arg3[%c24] : memref<72xf32, #tpu.memory_space<smem>>
    %c6_159 = arith.constant 6 : index
    %c0_160 = arith.constant 0 : index
    %c0_161 = arith.constant 0 : index
    %640 = vector.load %arg8[%c6_159, %c0_160, %c0_161] : memref<9x8x512xf32, #tpu.memory_space<vmem>>, vector<1x8x512xf32>
    %641 = vector.shape_cast %640 : vector<1x8x512xf32> to vector<8x512xf32>
    %642 = vector.broadcast %639 : f32 to vector<8x512xf32>
    %643 = arith.mulf %642, %641 : vector<8x512xf32>
    %644 = arith.addf %638, %643 : vector<8x512xf32>
    %c25 = arith.constant 25 : index
    %645 = memref.load %arg3[%c25] : memref<72xf32, #tpu.memory_space<smem>>
    %c7_162 = arith.constant 7 : index
    %c0_163 = arith.constant 0 : index
    %c0_164 = arith.constant 0 : index
    %646 = vector.load %arg8[%c7_162, %c0_163, %c0_164] : memref<9x8x512xf32, #tpu.memory_space<vmem>>, vector<1x8x512xf32>
    %647 = vector.shape_cast %646 : vector<1x8x512xf32> to vector<8x512xf32>
    %648 = vector.broadcast %645 : f32 to vector<8x512xf32>
    %649 = arith.mulf %648, %647 : vector<8x512xf32>
    %650 = arith.addf %644, %649 : vector<8x512xf32>
    %c26 = arith.constant 26 : index
    %651 = memref.load %arg3[%c26] : memref<72xf32, #tpu.memory_space<smem>>
    %c8_165 = arith.constant 8 : index
    %c0_166 = arith.constant 0 : index
    %c0_167 = arith.constant 0 : index
    %652 = vector.load %arg8[%c8_165, %c0_166, %c0_167] : memref<9x8x512xf32, #tpu.memory_space<vmem>>, vector<1x8x512xf32>
    %653 = vector.shape_cast %652 : vector<1x8x512xf32> to vector<8x512xf32>
    %654 = vector.broadcast %651 : f32 to vector<8x512xf32>
    %655 = arith.mulf %654, %653 : vector<8x512xf32>
    %656 = arith.addf %650, %655 : vector<8x512xf32>
    %c1_i32_168 = arith.constant 1 : i32
    %657 = tpu.dynamic_rotate %656 by %c1_i32_168 dim 1 : vector<8x512xf32>, i32 -> vector<8x512xf32>
    %cst_169 = arith.constant 0.000000e+00 : f32
    %658 = vector.shape_cast %3 : vector<1x512xi1> to vector<1x512xi1>
    %659 = vector.broadcast %658 : vector<1x512xi1> to vector<8x512xi1>
    %660 = vector.broadcast %cst_169 : f32 to vector<8x512xf32>
    %661 = arith.select %659, %660, %657 : vector<8x512xi1>, vector<8x512xf32>
    %c18_170 = arith.constant 18 : index
    %662 = memref.load %arg5[%c18_170] : memref<144xf32, #tpu.memory_space<smem>>
    %663 = vector.broadcast %662 : f32 to vector<8x512xf32>
    %664 = arith.mulf %663, %661 : vector<8x512xf32>
    %665 = arith.addf %592, %664 : vector<8x512xf32>
    %c21_171 = arith.constant 21 : index
    %666 = memref.load %arg5[%c21_171] : memref<144xf32, #tpu.memory_space<smem>>
    %667 = vector.broadcast %666 : f32 to vector<8x512xf32>
    %668 = arith.mulf %667, %661 : vector<8x512xf32>
    %669 = arith.addf %596, %668 : vector<8x512xf32>
    %c24_172 = arith.constant 24 : index
    %670 = memref.load %arg5[%c24_172] : memref<144xf32, #tpu.memory_space<smem>>
    %671 = vector.broadcast %670 : f32 to vector<8x512xf32>
    %672 = arith.mulf %671, %661 : vector<8x512xf32>
    %673 = arith.addf %600, %672 : vector<8x512xf32>
    %c19_173 = arith.constant 19 : index
    %674 = memref.load %arg5[%c19_173] : memref<144xf32, #tpu.memory_space<smem>>
    %675 = vector.broadcast %674 : f32 to vector<8x512xf32>
    %676 = arith.mulf %675, %656 : vector<8x512xf32>
    %677 = arith.addf %665, %676 : vector<8x512xf32>
    %c22_174 = arith.constant 22 : index
    %678 = memref.load %arg5[%c22_174] : memref<144xf32, #tpu.memory_space<smem>>
    %679 = vector.broadcast %678 : f32 to vector<8x512xf32>
    %680 = arith.mulf %679, %656 : vector<8x512xf32>
    %681 = arith.addf %669, %680 : vector<8x512xf32>
    %c25_175 = arith.constant 25 : index
    %682 = memref.load %arg5[%c25_175] : memref<144xf32, #tpu.memory_space<smem>>
    %683 = vector.broadcast %682 : f32 to vector<8x512xf32>
    %684 = arith.mulf %683, %656 : vector<8x512xf32>
    %685 = arith.addf %673, %684 : vector<8x512xf32>
    %c511_i32_176 = arith.constant 511 : i32
    %686 = tpu.dynamic_rotate %656 by %c511_i32_176 dim 1 : vector<8x512xf32>, i32 -> vector<8x512xf32>
    %cst_177 = arith.constant 0.000000e+00 : f32
    %687 = vector.shape_cast %5 : vector<1x512xi1> to vector<1x512xi1>
    %688 = vector.broadcast %687 : vector<1x512xi1> to vector<8x512xi1>
    %689 = vector.broadcast %cst_177 : f32 to vector<8x512xf32>
    %690 = arith.select %688, %689, %686 : vector<8x512xi1>, vector<8x512xf32>
    %c20_178 = arith.constant 20 : index
    %691 = memref.load %arg5[%c20_178] : memref<144xf32, #tpu.memory_space<smem>>
    %692 = vector.broadcast %691 : f32 to vector<8x512xf32>
    %693 = arith.mulf %692, %690 : vector<8x512xf32>
    %694 = arith.addf %677, %693 : vector<8x512xf32>
    %c23_179 = arith.constant 23 : index
    %695 = memref.load %arg5[%c23_179] : memref<144xf32, #tpu.memory_space<smem>>
    %696 = vector.broadcast %695 : f32 to vector<8x512xf32>
    %697 = arith.mulf %696, %690 : vector<8x512xf32>
    %698 = arith.addf %681, %697 : vector<8x512xf32>
    %c26_180 = arith.constant 26 : index
    %699 = memref.load %arg5[%c26_180] : memref<144xf32, #tpu.memory_space<smem>>
    %700 = vector.broadcast %699 : f32 to vector<8x512xf32>
    %701 = arith.mulf %700, %690 : vector<8x512xf32>
    %702 = arith.addf %685, %701 : vector<8x512xf32>
    %c3_181 = arith.constant 3 : index
    %703 = memref.load %arg4[%c3_181] : memref<8xf32, #tpu.memory_space<smem>>
    %704 = vector.broadcast %703 : f32 to vector<8x512xf32>
    %c27 = arith.constant 27 : index
    %705 = memref.load %arg3[%c27] : memref<72xf32, #tpu.memory_space<smem>>
    %c0_182 = arith.constant 0 : index
    %c0_183 = arith.constant 0 : index
    %c0_184 = arith.constant 0 : index
    %706 = vector.load %arg8[%c0_182, %c0_183, %c0_184] : memref<9x8x512xf32, #tpu.memory_space<vmem>>, vector<1x8x512xf32>
    %707 = vector.shape_cast %706 : vector<1x8x512xf32> to vector<8x512xf32>
    %708 = vector.broadcast %705 : f32 to vector<8x512xf32>
    %709 = arith.mulf %708, %707 : vector<8x512xf32>
    %710 = arith.addf %704, %709 : vector<8x512xf32>
    %c28 = arith.constant 28 : index
    %711 = memref.load %arg3[%c28] : memref<72xf32, #tpu.memory_space<smem>>
    %c1_185 = arith.constant 1 : index
    %c0_186 = arith.constant 0 : index
    %c0_187 = arith.constant 0 : index
    %712 = vector.load %arg8[%c1_185, %c0_186, %c0_187] : memref<9x8x512xf32, #tpu.memory_space<vmem>>, vector<1x8x512xf32>
    %713 = vector.shape_cast %712 : vector<1x8x512xf32> to vector<8x512xf32>
    %714 = vector.broadcast %711 : f32 to vector<8x512xf32>
    %715 = arith.mulf %714, %713 : vector<8x512xf32>
    %716 = arith.addf %710, %715 : vector<8x512xf32>
    %c29 = arith.constant 29 : index
    %717 = memref.load %arg3[%c29] : memref<72xf32, #tpu.memory_space<smem>>
    %c2_188 = arith.constant 2 : index
    %c0_189 = arith.constant 0 : index
    %c0_190 = arith.constant 0 : index
    %718 = vector.load %arg8[%c2_188, %c0_189, %c0_190] : memref<9x8x512xf32, #tpu.memory_space<vmem>>, vector<1x8x512xf32>
    %719 = vector.shape_cast %718 : vector<1x8x512xf32> to vector<8x512xf32>
    %720 = vector.broadcast %717 : f32 to vector<8x512xf32>
    %721 = arith.mulf %720, %719 : vector<8x512xf32>
    %722 = arith.addf %716, %721 : vector<8x512xf32>
    %c30 = arith.constant 30 : index
    %723 = memref.load %arg3[%c30] : memref<72xf32, #tpu.memory_space<smem>>
    %c3_191 = arith.constant 3 : index
    %c0_192 = arith.constant 0 : index
    %c0_193 = arith.constant 0 : index
    %724 = vector.load %arg8[%c3_191, %c0_192, %c0_193] : memref<9x8x512xf32, #tpu.memory_space<vmem>>, vector<1x8x512xf32>
    %725 = vector.shape_cast %724 : vector<1x8x512xf32> to vector<8x512xf32>
    %726 = vector.broadcast %723 : f32 to vector<8x512xf32>
    %727 = arith.mulf %726, %725 : vector<8x512xf32>
    %728 = arith.addf %722, %727 : vector<8x512xf32>
    %c31 = arith.constant 31 : index
    %729 = memref.load %arg3[%c31] : memref<72xf32, #tpu.memory_space<smem>>
    %c4_194 = arith.constant 4 : index
    %c0_195 = arith.constant 0 : index
    %c0_196 = arith.constant 0 : index
    %730 = vector.load %arg8[%c4_194, %c0_195, %c0_196] : memref<9x8x512xf32, #tpu.memory_space<vmem>>, vector<1x8x512xf32>
    %731 = vector.shape_cast %730 : vector<1x8x512xf32> to vector<8x512xf32>
    %732 = vector.broadcast %729 : f32 to vector<8x512xf32>
    %733 = arith.mulf %732, %731 : vector<8x512xf32>
    %734 = arith.addf %728, %733 : vector<8x512xf32>
    %c32 = arith.constant 32 : index
    %735 = memref.load %arg3[%c32] : memref<72xf32, #tpu.memory_space<smem>>
    %c5_197 = arith.constant 5 : index
    %c0_198 = arith.constant 0 : index
    %c0_199 = arith.constant 0 : index
    %736 = vector.load %arg8[%c5_197, %c0_198, %c0_199] : memref<9x8x512xf32, #tpu.memory_space<vmem>>, vector<1x8x512xf32>
    %737 = vector.shape_cast %736 : vector<1x8x512xf32> to vector<8x512xf32>
    %738 = vector.broadcast %735 : f32 to vector<8x512xf32>
    %739 = arith.mulf %738, %737 : vector<8x512xf32>
    %740 = arith.addf %734, %739 : vector<8x512xf32>
    %c33 = arith.constant 33 : index
    %741 = memref.load %arg3[%c33] : memref<72xf32, #tpu.memory_space<smem>>
    %c6_200 = arith.constant 6 : index
    %c0_201 = arith.constant 0 : index
    %c0_202 = arith.constant 0 : index
    %742 = vector.load %arg8[%c6_200, %c0_201, %c0_202] : memref<9x8x512xf32, #tpu.memory_space<vmem>>, vector<1x8x512xf32>
    %743 = vector.shape_cast %742 : vector<1x8x512xf32> to vector<8x512xf32>
    %744 = vector.broadcast %741 : f32 to vector<8x512xf32>
    %745 = arith.mulf %744, %743 : vector<8x512xf32>
    %746 = arith.addf %740, %745 : vector<8x512xf32>
    %c34 = arith.constant 34 : index
    %747 = memref.load %arg3[%c34] : memref<72xf32, #tpu.memory_space<smem>>
    %c7_203 = arith.constant 7 : index
    %c0_204 = arith.constant 0 : index
    %c0_205 = arith.constant 0 : index
    %748 = vector.load %arg8[%c7_203, %c0_204, %c0_205] : memref<9x8x512xf32, #tpu.memory_space<vmem>>, vector<1x8x512xf32>
    %749 = vector.shape_cast %748 : vector<1x8x512xf32> to vector<8x512xf32>
    %750 = vector.broadcast %747 : f32 to vector<8x512xf32>
    %751 = arith.mulf %750, %749 : vector<8x512xf32>
    %752 = arith.addf %746, %751 : vector<8x512xf32>
    %c35 = arith.constant 35 : index
    %753 = memref.load %arg3[%c35] : memref<72xf32, #tpu.memory_space<smem>>
    %c8_206 = arith.constant 8 : index
    %c0_207 = arith.constant 0 : index
    %c0_208 = arith.constant 0 : index
    %754 = vector.load %arg8[%c8_206, %c0_207, %c0_208] : memref<9x8x512xf32, #tpu.memory_space<vmem>>, vector<1x8x512xf32>
    %755 = vector.shape_cast %754 : vector<1x8x512xf32> to vector<8x512xf32>
    %756 = vector.broadcast %753 : f32 to vector<8x512xf32>
    %757 = arith.mulf %756, %755 : vector<8x512xf32>
    %758 = arith.addf %752, %757 : vector<8x512xf32>
    %c1_i32_209 = arith.constant 1 : i32
    %759 = tpu.dynamic_rotate %758 by %c1_i32_209 dim 1 : vector<8x512xf32>, i32 -> vector<8x512xf32>
    %cst_210 = arith.constant 0.000000e+00 : f32
    %760 = vector.shape_cast %3 : vector<1x512xi1> to vector<1x512xi1>
    %761 = vector.broadcast %760 : vector<1x512xi1> to vector<8x512xi1>
    %762 = vector.broadcast %cst_210 : f32 to vector<8x512xf32>
    %763 = arith.select %761, %762, %759 : vector<8x512xi1>, vector<8x512xf32>
    %c27_211 = arith.constant 27 : index
    %764 = memref.load %arg5[%c27_211] : memref<144xf32, #tpu.memory_space<smem>>
    %765 = vector.broadcast %764 : f32 to vector<8x512xf32>
    %766 = arith.mulf %765, %763 : vector<8x512xf32>
    %767 = arith.addf %694, %766 : vector<8x512xf32>
    %c30_212 = arith.constant 30 : index
    %768 = memref.load %arg5[%c30_212] : memref<144xf32, #tpu.memory_space<smem>>
    %769 = vector.broadcast %768 : f32 to vector<8x512xf32>
    %770 = arith.mulf %769, %763 : vector<8x512xf32>
    %771 = arith.addf %698, %770 : vector<8x512xf32>
    %c33_213 = arith.constant 33 : index
    %772 = memref.load %arg5[%c33_213] : memref<144xf32, #tpu.memory_space<smem>>
    %773 = vector.broadcast %772 : f32 to vector<8x512xf32>
    %774 = arith.mulf %773, %763 : vector<8x512xf32>
    %775 = arith.addf %702, %774 : vector<8x512xf32>
    %c28_214 = arith.constant 28 : index
    %776 = memref.load %arg5[%c28_214] : memref<144xf32, #tpu.memory_space<smem>>
    %777 = vector.broadcast %776 : f32 to vector<8x512xf32>
    %778 = arith.mulf %777, %758 : vector<8x512xf32>
    %779 = arith.addf %767, %778 : vector<8x512xf32>
    %c31_215 = arith.constant 31 : index
    %780 = memref.load %arg5[%c31_215] : memref<144xf32, #tpu.memory_space<smem>>
    %781 = vector.broadcast %780 : f32 to vector<8x512xf32>
    %782 = arith.mulf %781, %758 : vector<8x512xf32>
    %783 = arith.addf %771, %782 : vector<8x512xf32>
    %c34_216 = arith.constant 34 : index
    %784 = memref.load %arg5[%c34_216] : memref<144xf32, #tpu.memory_space<smem>>
    %785 = vector.broadcast %784 : f32 to vector<8x512xf32>
    %786 = arith.mulf %785, %758 : vector<8x512xf32>
    %787 = arith.addf %775, %786 : vector<8x512xf32>
    %c511_i32_217 = arith.constant 511 : i32
    %788 = tpu.dynamic_rotate %758 by %c511_i32_217 dim 1 : vector<8x512xf32>, i32 -> vector<8x512xf32>
    %cst_218 = arith.constant 0.000000e+00 : f32
    %789 = vector.shape_cast %5 : vector<1x512xi1> to vector<1x512xi1>
    %790 = vector.broadcast %789 : vector<1x512xi1> to vector<8x512xi1>
    %791 = vector.broadcast %cst_218 : f32 to vector<8x512xf32>
    %792 = arith.select %790, %791, %788 : vector<8x512xi1>, vector<8x512xf32>
    %c29_219 = arith.constant 29 : index
    %793 = memref.load %arg5[%c29_219] : memref<144xf32, #tpu.memory_space<smem>>
    %794 = vector.broadcast %793 : f32 to vector<8x512xf32>
    %795 = arith.mulf %794, %792 : vector<8x512xf32>
    %796 = arith.addf %779, %795 : vector<8x512xf32>
    %c32_220 = arith.constant 32 : index
    %797 = memref.load %arg5[%c32_220] : memref<144xf32, #tpu.memory_space<smem>>
    %798 = vector.broadcast %797 : f32 to vector<8x512xf32>
    %799 = arith.mulf %798, %792 : vector<8x512xf32>
    %800 = arith.addf %783, %799 : vector<8x512xf32>
    %c35_221 = arith.constant 35 : index
    %801 = memref.load %arg5[%c35_221] : memref<144xf32, #tpu.memory_space<smem>>
    %802 = vector.broadcast %801 : f32 to vector<8x512xf32>
    %803 = arith.mulf %802, %792 : vector<8x512xf32>
    %804 = arith.addf %787, %803 : vector<8x512xf32>
    %c4_222 = arith.constant 4 : index
    %805 = memref.load %arg4[%c4_222] : memref<8xf32, #tpu.memory_space<smem>>
    %806 = vector.broadcast %805 : f32 to vector<8x512xf32>
    %c36 = arith.constant 36 : index
    %807 = memref.load %arg3[%c36] : memref<72xf32, #tpu.memory_space<smem>>
    %c0_223 = arith.constant 0 : index
    %c0_224 = arith.constant 0 : index
    %c0_225 = arith.constant 0 : index
    %808 = vector.load %arg8[%c0_223, %c0_224, %c0_225] : memref<9x8x512xf32, #tpu.memory_space<vmem>>, vector<1x8x512xf32>
    %809 = vector.shape_cast %808 : vector<1x8x512xf32> to vector<8x512xf32>
    %810 = vector.broadcast %807 : f32 to vector<8x512xf32>
    %811 = arith.mulf %810, %809 : vector<8x512xf32>
    %812 = arith.addf %806, %811 : vector<8x512xf32>
    %c37 = arith.constant 37 : index
    %813 = memref.load %arg3[%c37] : memref<72xf32, #tpu.memory_space<smem>>
    %c1_226 = arith.constant 1 : index
    %c0_227 = arith.constant 0 : index
    %c0_228 = arith.constant 0 : index
    %814 = vector.load %arg8[%c1_226, %c0_227, %c0_228] : memref<9x8x512xf32, #tpu.memory_space<vmem>>, vector<1x8x512xf32>
    %815 = vector.shape_cast %814 : vector<1x8x512xf32> to vector<8x512xf32>
    %816 = vector.broadcast %813 : f32 to vector<8x512xf32>
    %817 = arith.mulf %816, %815 : vector<8x512xf32>
    %818 = arith.addf %812, %817 : vector<8x512xf32>
    %c38 = arith.constant 38 : index
    %819 = memref.load %arg3[%c38] : memref<72xf32, #tpu.memory_space<smem>>
    %c2_229 = arith.constant 2 : index
    %c0_230 = arith.constant 0 : index
    %c0_231 = arith.constant 0 : index
    %820 = vector.load %arg8[%c2_229, %c0_230, %c0_231] : memref<9x8x512xf32, #tpu.memory_space<vmem>>, vector<1x8x512xf32>
    %821 = vector.shape_cast %820 : vector<1x8x512xf32> to vector<8x512xf32>
    %822 = vector.broadcast %819 : f32 to vector<8x512xf32>
    %823 = arith.mulf %822, %821 : vector<8x512xf32>
    %824 = arith.addf %818, %823 : vector<8x512xf32>
    %c39 = arith.constant 39 : index
    %825 = memref.load %arg3[%c39] : memref<72xf32, #tpu.memory_space<smem>>
    %c3_232 = arith.constant 3 : index
    %c0_233 = arith.constant 0 : index
    %c0_234 = arith.constant 0 : index
    %826 = vector.load %arg8[%c3_232, %c0_233, %c0_234] : memref<9x8x512xf32, #tpu.memory_space<vmem>>, vector<1x8x512xf32>
    %827 = vector.shape_cast %826 : vector<1x8x512xf32> to vector<8x512xf32>
    %828 = vector.broadcast %825 : f32 to vector<8x512xf32>
    %829 = arith.mulf %828, %827 : vector<8x512xf32>
    %830 = arith.addf %824, %829 : vector<8x512xf32>
    %c40 = arith.constant 40 : index
    %831 = memref.load %arg3[%c40] : memref<72xf32, #tpu.memory_space<smem>>
    %c4_235 = arith.constant 4 : index
    %c0_236 = arith.constant 0 : index
    %c0_237 = arith.constant 0 : index
    %832 = vector.load %arg8[%c4_235, %c0_236, %c0_237] : memref<9x8x512xf32, #tpu.memory_space<vmem>>, vector<1x8x512xf32>
    %833 = vector.shape_cast %832 : vector<1x8x512xf32> to vector<8x512xf32>
    %834 = vector.broadcast %831 : f32 to vector<8x512xf32>
    %835 = arith.mulf %834, %833 : vector<8x512xf32>
    %836 = arith.addf %830, %835 : vector<8x512xf32>
    %c41 = arith.constant 41 : index
    %837 = memref.load %arg3[%c41] : memref<72xf32, #tpu.memory_space<smem>>
    %c5_238 = arith.constant 5 : index
    %c0_239 = arith.constant 0 : index
    %c0_240 = arith.constant 0 : index
    %838 = vector.load %arg8[%c5_238, %c0_239, %c0_240] : memref<9x8x512xf32, #tpu.memory_space<vmem>>, vector<1x8x512xf32>
    %839 = vector.shape_cast %838 : vector<1x8x512xf32> to vector<8x512xf32>
    %840 = vector.broadcast %837 : f32 to vector<8x512xf32>
    %841 = arith.mulf %840, %839 : vector<8x512xf32>
    %842 = arith.addf %836, %841 : vector<8x512xf32>
    %c42 = arith.constant 42 : index
    %843 = memref.load %arg3[%c42] : memref<72xf32, #tpu.memory_space<smem>>
    %c6_241 = arith.constant 6 : index
    %c0_242 = arith.constant 0 : index
    %c0_243 = arith.constant 0 : index
    %844 = vector.load %arg8[%c6_241, %c0_242, %c0_243] : memref<9x8x512xf32, #tpu.memory_space<vmem>>, vector<1x8x512xf32>
    %845 = vector.shape_cast %844 : vector<1x8x512xf32> to vector<8x512xf32>
    %846 = vector.broadcast %843 : f32 to vector<8x512xf32>
    %847 = arith.mulf %846, %845 : vector<8x512xf32>
    %848 = arith.addf %842, %847 : vector<8x512xf32>
    %c43 = arith.constant 43 : index
    %849 = memref.load %arg3[%c43] : memref<72xf32, #tpu.memory_space<smem>>
    %c7_244 = arith.constant 7 : index
    %c0_245 = arith.constant 0 : index
    %c0_246 = arith.constant 0 : index
    %850 = vector.load %arg8[%c7_244, %c0_245, %c0_246] : memref<9x8x512xf32, #tpu.memory_space<vmem>>, vector<1x8x512xf32>
    %851 = vector.shape_cast %850 : vector<1x8x512xf32> to vector<8x512xf32>
    %852 = vector.broadcast %849 : f32 to vector<8x512xf32>
    %853 = arith.mulf %852, %851 : vector<8x512xf32>
    %854 = arith.addf %848, %853 : vector<8x512xf32>
    %c44 = arith.constant 44 : index
    %855 = memref.load %arg3[%c44] : memref<72xf32, #tpu.memory_space<smem>>
    %c8_247 = arith.constant 8 : index
    %c0_248 = arith.constant 0 : index
    %c0_249 = arith.constant 0 : index
    %856 = vector.load %arg8[%c8_247, %c0_248, %c0_249] : memref<9x8x512xf32, #tpu.memory_space<vmem>>, vector<1x8x512xf32>
    %857 = vector.shape_cast %856 : vector<1x8x512xf32> to vector<8x512xf32>
    %858 = vector.broadcast %855 : f32 to vector<8x512xf32>
    %859 = arith.mulf %858, %857 : vector<8x512xf32>
    %860 = arith.addf %854, %859 : vector<8x512xf32>
    %c1_i32_250 = arith.constant 1 : i32
    %861 = tpu.dynamic_rotate %860 by %c1_i32_250 dim 1 : vector<8x512xf32>, i32 -> vector<8x512xf32>
    %cst_251 = arith.constant 0.000000e+00 : f32
    %862 = vector.shape_cast %3 : vector<1x512xi1> to vector<1x512xi1>
    %863 = vector.broadcast %862 : vector<1x512xi1> to vector<8x512xi1>
    %864 = vector.broadcast %cst_251 : f32 to vector<8x512xf32>
    %865 = arith.select %863, %864, %861 : vector<8x512xi1>, vector<8x512xf32>
    %c36_252 = arith.constant 36 : index
    %866 = memref.load %arg5[%c36_252] : memref<144xf32, #tpu.memory_space<smem>>
    %867 = vector.broadcast %866 : f32 to vector<8x512xf32>
    %868 = arith.mulf %867, %865 : vector<8x512xf32>
    %869 = arith.addf %796, %868 : vector<8x512xf32>
    %c39_253 = arith.constant 39 : index
    %870 = memref.load %arg5[%c39_253] : memref<144xf32, #tpu.memory_space<smem>>
    %871 = vector.broadcast %870 : f32 to vector<8x512xf32>
    %872 = arith.mulf %871, %865 : vector<8x512xf32>
    %873 = arith.addf %800, %872 : vector<8x512xf32>
    %c42_254 = arith.constant 42 : index
    %874 = memref.load %arg5[%c42_254] : memref<144xf32, #tpu.memory_space<smem>>
    %875 = vector.broadcast %874 : f32 to vector<8x512xf32>
    %876 = arith.mulf %875, %865 : vector<8x512xf32>
    %877 = arith.addf %804, %876 : vector<8x512xf32>
    %c37_255 = arith.constant 37 : index
    %878 = memref.load %arg5[%c37_255] : memref<144xf32, #tpu.memory_space<smem>>
    %879 = vector.broadcast %878 : f32 to vector<8x512xf32>
    %880 = arith.mulf %879, %860 : vector<8x512xf32>
    %881 = arith.addf %869, %880 : vector<8x512xf32>
    %c40_256 = arith.constant 40 : index
    %882 = memref.load %arg5[%c40_256] : memref<144xf32, #tpu.memory_space<smem>>
    %883 = vector.broadcast %882 : f32 to vector<8x512xf32>
    %884 = arith.mulf %883, %860 : vector<8x512xf32>
    %885 = arith.addf %873, %884 : vector<8x512xf32>
    %c43_257 = arith.constant 43 : index
    %886 = memref.load %arg5[%c43_257] : memref<144xf32, #tpu.memory_space<smem>>
    %887 = vector.broadcast %886 : f32 to vector<8x512xf32>
    %888 = arith.mulf %887, %860 : vector<8x512xf32>
    %889 = arith.addf %877, %888 : vector<8x512xf32>
    %c511_i32_258 = arith.constant 511 : i32
    %890 = tpu.dynamic_rotate %860 by %c511_i32_258 dim 1 : vector<8x512xf32>, i32 -> vector<8x512xf32>
    %cst_259 = arith.constant 0.000000e+00 : f32
    %891 = vector.shape_cast %5 : vector<1x512xi1> to vector<1x512xi1>
    %892 = vector.broadcast %891 : vector<1x512xi1> to vector<8x512xi1>
    %893 = vector.broadcast %cst_259 : f32 to vector<8x512xf32>
    %894 = arith.select %892, %893, %890 : vector<8x512xi1>, vector<8x512xf32>
    %c38_260 = arith.constant 38 : index
    %895 = memref.load %arg5[%c38_260] : memref<144xf32, #tpu.memory_space<smem>>
    %896 = vector.broadcast %895 : f32 to vector<8x512xf32>
    %897 = arith.mulf %896, %894 : vector<8x512xf32>
    %898 = arith.addf %881, %897 : vector<8x512xf32>
    %c41_261 = arith.constant 41 : index
    %899 = memref.load %arg5[%c41_261] : memref<144xf32, #tpu.memory_space<smem>>
    %900 = vector.broadcast %899 : f32 to vector<8x512xf32>
    %901 = arith.mulf %900, %894 : vector<8x512xf32>
    %902 = arith.addf %885, %901 : vector<8x512xf32>
    %c44_262 = arith.constant 44 : index
    %903 = memref.load %arg5[%c44_262] : memref<144xf32, #tpu.memory_space<smem>>
    %904 = vector.broadcast %903 : f32 to vector<8x512xf32>
    %905 = arith.mulf %904, %894 : vector<8x512xf32>
    %906 = arith.addf %889, %905 : vector<8x512xf32>
    %c5_263 = arith.constant 5 : index
    %907 = memref.load %arg4[%c5_263] : memref<8xf32, #tpu.memory_space<smem>>
    %908 = vector.broadcast %907 : f32 to vector<8x512xf32>
    %c45 = arith.constant 45 : index
    %909 = memref.load %arg3[%c45] : memref<72xf32, #tpu.memory_space<smem>>
    %c0_264 = arith.constant 0 : index
    %c0_265 = arith.constant 0 : index
    %c0_266 = arith.constant 0 : index
    %910 = vector.load %arg8[%c0_264, %c0_265, %c0_266] : memref<9x8x512xf32, #tpu.memory_space<vmem>>, vector<1x8x512xf32>
    %911 = vector.shape_cast %910 : vector<1x8x512xf32> to vector<8x512xf32>
    %912 = vector.broadcast %909 : f32 to vector<8x512xf32>
    %913 = arith.mulf %912, %911 : vector<8x512xf32>
    %914 = arith.addf %908, %913 : vector<8x512xf32>
    %c46 = arith.constant 46 : index
    %915 = memref.load %arg3[%c46] : memref<72xf32, #tpu.memory_space<smem>>
    %c1_267 = arith.constant 1 : index
    %c0_268 = arith.constant 0 : index
    %c0_269 = arith.constant 0 : index
    %916 = vector.load %arg8[%c1_267, %c0_268, %c0_269] : memref<9x8x512xf32, #tpu.memory_space<vmem>>, vector<1x8x512xf32>
    %917 = vector.shape_cast %916 : vector<1x8x512xf32> to vector<8x512xf32>
    %918 = vector.broadcast %915 : f32 to vector<8x512xf32>
    %919 = arith.mulf %918, %917 : vector<8x512xf32>
    %920 = arith.addf %914, %919 : vector<8x512xf32>
    %c47 = arith.constant 47 : index
    %921 = memref.load %arg3[%c47] : memref<72xf32, #tpu.memory_space<smem>>
    %c2_270 = arith.constant 2 : index
    %c0_271 = arith.constant 0 : index
    %c0_272 = arith.constant 0 : index
    %922 = vector.load %arg8[%c2_270, %c0_271, %c0_272] : memref<9x8x512xf32, #tpu.memory_space<vmem>>, vector<1x8x512xf32>
    %923 = vector.shape_cast %922 : vector<1x8x512xf32> to vector<8x512xf32>
    %924 = vector.broadcast %921 : f32 to vector<8x512xf32>
    %925 = arith.mulf %924, %923 : vector<8x512xf32>
    %926 = arith.addf %920, %925 : vector<8x512xf32>
    %c48 = arith.constant 48 : index
    %927 = memref.load %arg3[%c48] : memref<72xf32, #tpu.memory_space<smem>>
    %c3_273 = arith.constant 3 : index
    %c0_274 = arith.constant 0 : index
    %c0_275 = arith.constant 0 : index
    %928 = vector.load %arg8[%c3_273, %c0_274, %c0_275] : memref<9x8x512xf32, #tpu.memory_space<vmem>>, vector<1x8x512xf32>
    %929 = vector.shape_cast %928 : vector<1x8x512xf32> to vector<8x512xf32>
    %930 = vector.broadcast %927 : f32 to vector<8x512xf32>
    %931 = arith.mulf %930, %929 : vector<8x512xf32>
    %932 = arith.addf %926, %931 : vector<8x512xf32>
    %c49 = arith.constant 49 : index
    %933 = memref.load %arg3[%c49] : memref<72xf32, #tpu.memory_space<smem>>
    %c4_276 = arith.constant 4 : index
    %c0_277 = arith.constant 0 : index
    %c0_278 = arith.constant 0 : index
    %934 = vector.load %arg8[%c4_276, %c0_277, %c0_278] : memref<9x8x512xf32, #tpu.memory_space<vmem>>, vector<1x8x512xf32>
    %935 = vector.shape_cast %934 : vector<1x8x512xf32> to vector<8x512xf32>
    %936 = vector.broadcast %933 : f32 to vector<8x512xf32>
    %937 = arith.mulf %936, %935 : vector<8x512xf32>
    %938 = arith.addf %932, %937 : vector<8x512xf32>
    %c50 = arith.constant 50 : index
    %939 = memref.load %arg3[%c50] : memref<72xf32, #tpu.memory_space<smem>>
    %c5_279 = arith.constant 5 : index
    %c0_280 = arith.constant 0 : index
    %c0_281 = arith.constant 0 : index
    %940 = vector.load %arg8[%c5_279, %c0_280, %c0_281] : memref<9x8x512xf32, #tpu.memory_space<vmem>>, vector<1x8x512xf32>
    %941 = vector.shape_cast %940 : vector<1x8x512xf32> to vector<8x512xf32>
    %942 = vector.broadcast %939 : f32 to vector<8x512xf32>
    %943 = arith.mulf %942, %941 : vector<8x512xf32>
    %944 = arith.addf %938, %943 : vector<8x512xf32>
    %c51 = arith.constant 51 : index
    %945 = memref.load %arg3[%c51] : memref<72xf32, #tpu.memory_space<smem>>
    %c6_282 = arith.constant 6 : index
    %c0_283 = arith.constant 0 : index
    %c0_284 = arith.constant 0 : index
    %946 = vector.load %arg8[%c6_282, %c0_283, %c0_284] : memref<9x8x512xf32, #tpu.memory_space<vmem>>, vector<1x8x512xf32>
    %947 = vector.shape_cast %946 : vector<1x8x512xf32> to vector<8x512xf32>
    %948 = vector.broadcast %945 : f32 to vector<8x512xf32>
    %949 = arith.mulf %948, %947 : vector<8x512xf32>
    %950 = arith.addf %944, %949 : vector<8x512xf32>
    %c52 = arith.constant 52 : index
    %951 = memref.load %arg3[%c52] : memref<72xf32, #tpu.memory_space<smem>>
    %c7_285 = arith.constant 7 : index
    %c0_286 = arith.constant 0 : index
    %c0_287 = arith.constant 0 : index
    %952 = vector.load %arg8[%c7_285, %c0_286, %c0_287] : memref<9x8x512xf32, #tpu.memory_space<vmem>>, vector<1x8x512xf32>
    %953 = vector.shape_cast %952 : vector<1x8x512xf32> to vector<8x512xf32>
    %954 = vector.broadcast %951 : f32 to vector<8x512xf32>
    %955 = arith.mulf %954, %953 : vector<8x512xf32>
    %956 = arith.addf %950, %955 : vector<8x512xf32>
    %c53 = arith.constant 53 : index
    %957 = memref.load %arg3[%c53] : memref<72xf32, #tpu.memory_space<smem>>
    %c8_288 = arith.constant 8 : index
    %c0_289 = arith.constant 0 : index
    %c0_290 = arith.constant 0 : index
    %958 = vector.load %arg8[%c8_288, %c0_289, %c0_290] : memref<9x8x512xf32, #tpu.memory_space<vmem>>, vector<1x8x512xf32>
    %959 = vector.shape_cast %958 : vector<1x8x512xf32> to vector<8x512xf32>
    %960 = vector.broadcast %957 : f32 to vector<8x512xf32>
    %961 = arith.mulf %960, %959 : vector<8x512xf32>
    %962 = arith.addf %956, %961 : vector<8x512xf32>
    %c1_i32_291 = arith.constant 1 : i32
    %963 = tpu.dynamic_rotate %962 by %c1_i32_291 dim 1 : vector<8x512xf32>, i32 -> vector<8x512xf32>
    %cst_292 = arith.constant 0.000000e+00 : f32
    %964 = vector.shape_cast %3 : vector<1x512xi1> to vector<1x512xi1>
    %965 = vector.broadcast %964 : vector<1x512xi1> to vector<8x512xi1>
    %966 = vector.broadcast %cst_292 : f32 to vector<8x512xf32>
    %967 = arith.select %965, %966, %963 : vector<8x512xi1>, vector<8x512xf32>
    %c45_293 = arith.constant 45 : index
    %968 = memref.load %arg5[%c45_293] : memref<144xf32, #tpu.memory_space<smem>>
    %969 = vector.broadcast %968 : f32 to vector<8x512xf32>
    %970 = arith.mulf %969, %967 : vector<8x512xf32>
    %971 = arith.addf %898, %970 : vector<8x512xf32>
    %c48_294 = arith.constant 48 : index
    %972 = memref.load %arg5[%c48_294] : memref<144xf32, #tpu.memory_space<smem>>
    %973 = vector.broadcast %972 : f32 to vector<8x512xf32>
    %974 = arith.mulf %973, %967 : vector<8x512xf32>
    %975 = arith.addf %902, %974 : vector<8x512xf32>
    %c51_295 = arith.constant 51 : index
    %976 = memref.load %arg5[%c51_295] : memref<144xf32, #tpu.memory_space<smem>>
    %977 = vector.broadcast %976 : f32 to vector<8x512xf32>
    %978 = arith.mulf %977, %967 : vector<8x512xf32>
    %979 = arith.addf %906, %978 : vector<8x512xf32>
    %c46_296 = arith.constant 46 : index
    %980 = memref.load %arg5[%c46_296] : memref<144xf32, #tpu.memory_space<smem>>
    %981 = vector.broadcast %980 : f32 to vector<8x512xf32>
    %982 = arith.mulf %981, %962 : vector<8x512xf32>
    %983 = arith.addf %971, %982 : vector<8x512xf32>
    %c49_297 = arith.constant 49 : index
    %984 = memref.load %arg5[%c49_297] : memref<144xf32, #tpu.memory_space<smem>>
    %985 = vector.broadcast %984 : f32 to vector<8x512xf32>
    %986 = arith.mulf %985, %962 : vector<8x512xf32>
    %987 = arith.addf %975, %986 : vector<8x512xf32>
    %c52_298 = arith.constant 52 : index
    %988 = memref.load %arg5[%c52_298] : memref<144xf32, #tpu.memory_space<smem>>
    %989 = vector.broadcast %988 : f32 to vector<8x512xf32>
    %990 = arith.mulf %989, %962 : vector<8x512xf32>
    %991 = arith.addf %979, %990 : vector<8x512xf32>
    %c511_i32_299 = arith.constant 511 : i32
    %992 = tpu.dynamic_rotate %962 by %c511_i32_299 dim 1 : vector<8x512xf32>, i32 -> vector<8x512xf32>
    %cst_300 = arith.constant 0.000000e+00 : f32
    %993 = vector.shape_cast %5 : vector<1x512xi1> to vector<1x512xi1>
    %994 = vector.broadcast %993 : vector<1x512xi1> to vector<8x512xi1>
    %995 = vector.broadcast %cst_300 : f32 to vector<8x512xf32>
    %996 = arith.select %994, %995, %992 : vector<8x512xi1>, vector<8x512xf32>
    %c47_301 = arith.constant 47 : index
    %997 = memref.load %arg5[%c47_301] : memref<144xf32, #tpu.memory_space<smem>>
    %998 = vector.broadcast %997 : f32 to vector<8x512xf32>
    %999 = arith.mulf %998, %996 : vector<8x512xf32>
    %1000 = arith.addf %983, %999 : vector<8x512xf32>
    %c50_302 = arith.constant 50 : index
    %1001 = memref.load %arg5[%c50_302] : memref<144xf32, #tpu.memory_space<smem>>
    %1002 = vector.broadcast %1001 : f32 to vector<8x512xf32>
    %1003 = arith.mulf %1002, %996 : vector<8x512xf32>
    %1004 = arith.addf %987, %1003 : vector<8x512xf32>
    %c53_303 = arith.constant 53 : index
    %1005 = memref.load %arg5[%c53_303] : memref<144xf32, #tpu.memory_space<smem>>
    %1006 = vector.broadcast %1005 : f32 to vector<8x512xf32>
    %1007 = arith.mulf %1006, %996 : vector<8x512xf32>
    %1008 = arith.addf %991, %1007 : vector<8x512xf32>
    %c6_304 = arith.constant 6 : index
    %1009 = memref.load %arg4[%c6_304] : memref<8xf32, #tpu.memory_space<smem>>
    %1010 = vector.broadcast %1009 : f32 to vector<8x512xf32>
    %c54 = arith.constant 54 : index
    %1011 = memref.load %arg3[%c54] : memref<72xf32, #tpu.memory_space<smem>>
    %c0_305 = arith.constant 0 : index
    %c0_306 = arith.constant 0 : index
    %c0_307 = arith.constant 0 : index
    %1012 = vector.load %arg8[%c0_305, %c0_306, %c0_307] : memref<9x8x512xf32, #tpu.memory_space<vmem>>, vector<1x8x512xf32>
    %1013 = vector.shape_cast %1012 : vector<1x8x512xf32> to vector<8x512xf32>
    %1014 = vector.broadcast %1011 : f32 to vector<8x512xf32>
    %1015 = arith.mulf %1014, %1013 : vector<8x512xf32>
    %1016 = arith.addf %1010, %1015 : vector<8x512xf32>
    %c55 = arith.constant 55 : index
    %1017 = memref.load %arg3[%c55] : memref<72xf32, #tpu.memory_space<smem>>
    %c1_308 = arith.constant 1 : index
    %c0_309 = arith.constant 0 : index
    %c0_310 = arith.constant 0 : index
    %1018 = vector.load %arg8[%c1_308, %c0_309, %c0_310] : memref<9x8x512xf32, #tpu.memory_space<vmem>>, vector<1x8x512xf32>
    %1019 = vector.shape_cast %1018 : vector<1x8x512xf32> to vector<8x512xf32>
    %1020 = vector.broadcast %1017 : f32 to vector<8x512xf32>
    %1021 = arith.mulf %1020, %1019 : vector<8x512xf32>
    %1022 = arith.addf %1016, %1021 : vector<8x512xf32>
    %c56 = arith.constant 56 : index
    %1023 = memref.load %arg3[%c56] : memref<72xf32, #tpu.memory_space<smem>>
    %c2_311 = arith.constant 2 : index
    %c0_312 = arith.constant 0 : index
    %c0_313 = arith.constant 0 : index
    %1024 = vector.load %arg8[%c2_311, %c0_312, %c0_313] : memref<9x8x512xf32, #tpu.memory_space<vmem>>, vector<1x8x512xf32>
    %1025 = vector.shape_cast %1024 : vector<1x8x512xf32> to vector<8x512xf32>
    %1026 = vector.broadcast %1023 : f32 to vector<8x512xf32>
    %1027 = arith.mulf %1026, %1025 : vector<8x512xf32>
    %1028 = arith.addf %1022, %1027 : vector<8x512xf32>
    %c57 = arith.constant 57 : index
    %1029 = memref.load %arg3[%c57] : memref<72xf32, #tpu.memory_space<smem>>
    %c3_314 = arith.constant 3 : index
    %c0_315 = arith.constant 0 : index
    %c0_316 = arith.constant 0 : index
    %1030 = vector.load %arg8[%c3_314, %c0_315, %c0_316] : memref<9x8x512xf32, #tpu.memory_space<vmem>>, vector<1x8x512xf32>
    %1031 = vector.shape_cast %1030 : vector<1x8x512xf32> to vector<8x512xf32>
    %1032 = vector.broadcast %1029 : f32 to vector<8x512xf32>
    %1033 = arith.mulf %1032, %1031 : vector<8x512xf32>
    %1034 = arith.addf %1028, %1033 : vector<8x512xf32>
    %c58 = arith.constant 58 : index
    %1035 = memref.load %arg3[%c58] : memref<72xf32, #tpu.memory_space<smem>>
    %c4_317 = arith.constant 4 : index
    %c0_318 = arith.constant 0 : index
    %c0_319 = arith.constant 0 : index
    %1036 = vector.load %arg8[%c4_317, %c0_318, %c0_319] : memref<9x8x512xf32, #tpu.memory_space<vmem>>, vector<1x8x512xf32>
    %1037 = vector.shape_cast %1036 : vector<1x8x512xf32> to vector<8x512xf32>
    %1038 = vector.broadcast %1035 : f32 to vector<8x512xf32>
    %1039 = arith.mulf %1038, %1037 : vector<8x512xf32>
    %1040 = arith.addf %1034, %1039 : vector<8x512xf32>
    %c59 = arith.constant 59 : index
    %1041 = memref.load %arg3[%c59] : memref<72xf32, #tpu.memory_space<smem>>
    %c5_320 = arith.constant 5 : index
    %c0_321 = arith.constant 0 : index
    %c0_322 = arith.constant 0 : index
    %1042 = vector.load %arg8[%c5_320, %c0_321, %c0_322] : memref<9x8x512xf32, #tpu.memory_space<vmem>>, vector<1x8x512xf32>
    %1043 = vector.shape_cast %1042 : vector<1x8x512xf32> to vector<8x512xf32>
    %1044 = vector.broadcast %1041 : f32 to vector<8x512xf32>
    %1045 = arith.mulf %1044, %1043 : vector<8x512xf32>
    %1046 = arith.addf %1040, %1045 : vector<8x512xf32>
    %c60 = arith.constant 60 : index
    %1047 = memref.load %arg3[%c60] : memref<72xf32, #tpu.memory_space<smem>>
    %c6_323 = arith.constant 6 : index
    %c0_324 = arith.constant 0 : index
    %c0_325 = arith.constant 0 : index
    %1048 = vector.load %arg8[%c6_323, %c0_324, %c0_325] : memref<9x8x512xf32, #tpu.memory_space<vmem>>, vector<1x8x512xf32>
    %1049 = vector.shape_cast %1048 : vector<1x8x512xf32> to vector<8x512xf32>
    %1050 = vector.broadcast %1047 : f32 to vector<8x512xf32>
    %1051 = arith.mulf %1050, %1049 : vector<8x512xf32>
    %1052 = arith.addf %1046, %1051 : vector<8x512xf32>
    %c61 = arith.constant 61 : index
    %1053 = memref.load %arg3[%c61] : memref<72xf32, #tpu.memory_space<smem>>
    %c7_326 = arith.constant 7 : index
    %c0_327 = arith.constant 0 : index
    %c0_328 = arith.constant 0 : index
    %1054 = vector.load %arg8[%c7_326, %c0_327, %c0_328] : memref<9x8x512xf32, #tpu.memory_space<vmem>>, vector<1x8x512xf32>
    %1055 = vector.shape_cast %1054 : vector<1x8x512xf32> to vector<8x512xf32>
    %1056 = vector.broadcast %1053 : f32 to vector<8x512xf32>
    %1057 = arith.mulf %1056, %1055 : vector<8x512xf32>
    %1058 = arith.addf %1052, %1057 : vector<8x512xf32>
    %c62 = arith.constant 62 : index
    %1059 = memref.load %arg3[%c62] : memref<72xf32, #tpu.memory_space<smem>>
    %c8_329 = arith.constant 8 : index
    %c0_330 = arith.constant 0 : index
    %c0_331 = arith.constant 0 : index
    %1060 = vector.load %arg8[%c8_329, %c0_330, %c0_331] : memref<9x8x512xf32, #tpu.memory_space<vmem>>, vector<1x8x512xf32>
    %1061 = vector.shape_cast %1060 : vector<1x8x512xf32> to vector<8x512xf32>
    %1062 = vector.broadcast %1059 : f32 to vector<8x512xf32>
    %1063 = arith.mulf %1062, %1061 : vector<8x512xf32>
    %1064 = arith.addf %1058, %1063 : vector<8x512xf32>
    %c1_i32_332 = arith.constant 1 : i32
    %1065 = tpu.dynamic_rotate %1064 by %c1_i32_332 dim 1 : vector<8x512xf32>, i32 -> vector<8x512xf32>
    %cst_333 = arith.constant 0.000000e+00 : f32
    %1066 = vector.shape_cast %3 : vector<1x512xi1> to vector<1x512xi1>
    %1067 = vector.broadcast %1066 : vector<1x512xi1> to vector<8x512xi1>
    %1068 = vector.broadcast %cst_333 : f32 to vector<8x512xf32>
    %1069 = arith.select %1067, %1068, %1065 : vector<8x512xi1>, vector<8x512xf32>
    %c54_334 = arith.constant 54 : index
    %1070 = memref.load %arg5[%c54_334] : memref<144xf32, #tpu.memory_space<smem>>
    %1071 = vector.broadcast %1070 : f32 to vector<8x512xf32>
    %1072 = arith.mulf %1071, %1069 : vector<8x512xf32>
    %1073 = arith.addf %1000, %1072 : vector<8x512xf32>
    %c57_335 = arith.constant 57 : index
    %1074 = memref.load %arg5[%c57_335] : memref<144xf32, #tpu.memory_space<smem>>
    %1075 = vector.broadcast %1074 : f32 to vector<8x512xf32>
    %1076 = arith.mulf %1075, %1069 : vector<8x512xf32>
    %1077 = arith.addf %1004, %1076 : vector<8x512xf32>
    %c60_336 = arith.constant 60 : index
    %1078 = memref.load %arg5[%c60_336] : memref<144xf32, #tpu.memory_space<smem>>
    %1079 = vector.broadcast %1078 : f32 to vector<8x512xf32>
    %1080 = arith.mulf %1079, %1069 : vector<8x512xf32>
    %1081 = arith.addf %1008, %1080 : vector<8x512xf32>
    %c55_337 = arith.constant 55 : index
    %1082 = memref.load %arg5[%c55_337] : memref<144xf32, #tpu.memory_space<smem>>
    %1083 = vector.broadcast %1082 : f32 to vector<8x512xf32>
    %1084 = arith.mulf %1083, %1064 : vector<8x512xf32>
    %1085 = arith.addf %1073, %1084 : vector<8x512xf32>
    %c58_338 = arith.constant 58 : index
    %1086 = memref.load %arg5[%c58_338] : memref<144xf32, #tpu.memory_space<smem>>
    %1087 = vector.broadcast %1086 : f32 to vector<8x512xf32>
    %1088 = arith.mulf %1087, %1064 : vector<8x512xf32>
    %1089 = arith.addf %1077, %1088 : vector<8x512xf32>
    %c61_339 = arith.constant 61 : index
    %1090 = memref.load %arg5[%c61_339] : memref<144xf32, #tpu.memory_space<smem>>
    %1091 = vector.broadcast %1090 : f32 to vector<8x512xf32>
    %1092 = arith.mulf %1091, %1064 : vector<8x512xf32>
    %1093 = arith.addf %1081, %1092 : vector<8x512xf32>
    %c511_i32_340 = arith.constant 511 : i32
    %1094 = tpu.dynamic_rotate %1064 by %c511_i32_340 dim 1 : vector<8x512xf32>, i32 -> vector<8x512xf32>
    %cst_341 = arith.constant 0.000000e+00 : f32
    %1095 = vector.shape_cast %5 : vector<1x512xi1> to vector<1x512xi1>
    %1096 = vector.broadcast %1095 : vector<1x512xi1> to vector<8x512xi1>
    %1097 = vector.broadcast %cst_341 : f32 to vector<8x512xf32>
    %1098 = arith.select %1096, %1097, %1094 : vector<8x512xi1>, vector<8x512xf32>
    %c56_342 = arith.constant 56 : index
    %1099 = memref.load %arg5[%c56_342] : memref<144xf32, #tpu.memory_space<smem>>
    %1100 = vector.broadcast %1099 : f32 to vector<8x512xf32>
    %1101 = arith.mulf %1100, %1098 : vector<8x512xf32>
    %1102 = arith.addf %1085, %1101 : vector<8x512xf32>
    %c59_343 = arith.constant 59 : index
    %1103 = memref.load %arg5[%c59_343] : memref<144xf32, #tpu.memory_space<smem>>
    %1104 = vector.broadcast %1103 : f32 to vector<8x512xf32>
    %1105 = arith.mulf %1104, %1098 : vector<8x512xf32>
    %1106 = arith.addf %1089, %1105 : vector<8x512xf32>
    %c62_344 = arith.constant 62 : index
    %1107 = memref.load %arg5[%c62_344] : memref<144xf32, #tpu.memory_space<smem>>
    %1108 = vector.broadcast %1107 : f32 to vector<8x512xf32>
    %1109 = arith.mulf %1108, %1098 : vector<8x512xf32>
    %1110 = arith.addf %1093, %1109 : vector<8x512xf32>
    %c7_345 = arith.constant 7 : index
    %1111 = memref.load %arg4[%c7_345] : memref<8xf32, #tpu.memory_space<smem>>
    %1112 = vector.broadcast %1111 : f32 to vector<8x512xf32>
    %c63 = arith.constant 63 : index
    %1113 = memref.load %arg3[%c63] : memref<72xf32, #tpu.memory_space<smem>>
    %c0_346 = arith.constant 0 : index
    %c0_347 = arith.constant 0 : index
    %c0_348 = arith.constant 0 : index
    %1114 = vector.load %arg8[%c0_346, %c0_347, %c0_348] : memref<9x8x512xf32, #tpu.memory_space<vmem>>, vector<1x8x512xf32>
    %1115 = vector.shape_cast %1114 : vector<1x8x512xf32> to vector<8x512xf32>
    %1116 = vector.broadcast %1113 : f32 to vector<8x512xf32>
    %1117 = arith.mulf %1116, %1115 : vector<8x512xf32>
    %1118 = arith.addf %1112, %1117 : vector<8x512xf32>
    %c64 = arith.constant 64 : index
    %1119 = memref.load %arg3[%c64] : memref<72xf32, #tpu.memory_space<smem>>
    %c1_349 = arith.constant 1 : index
    %c0_350 = arith.constant 0 : index
    %c0_351 = arith.constant 0 : index
    %1120 = vector.load %arg8[%c1_349, %c0_350, %c0_351] : memref<9x8x512xf32, #tpu.memory_space<vmem>>, vector<1x8x512xf32>
    %1121 = vector.shape_cast %1120 : vector<1x8x512xf32> to vector<8x512xf32>
    %1122 = vector.broadcast %1119 : f32 to vector<8x512xf32>
    %1123 = arith.mulf %1122, %1121 : vector<8x512xf32>
    %1124 = arith.addf %1118, %1123 : vector<8x512xf32>
    %c65 = arith.constant 65 : index
    %1125 = memref.load %arg3[%c65] : memref<72xf32, #tpu.memory_space<smem>>
    %c2_352 = arith.constant 2 : index
    %c0_353 = arith.constant 0 : index
    %c0_354 = arith.constant 0 : index
    %1126 = vector.load %arg8[%c2_352, %c0_353, %c0_354] : memref<9x8x512xf32, #tpu.memory_space<vmem>>, vector<1x8x512xf32>
    %1127 = vector.shape_cast %1126 : vector<1x8x512xf32> to vector<8x512xf32>
    %1128 = vector.broadcast %1125 : f32 to vector<8x512xf32>
    %1129 = arith.mulf %1128, %1127 : vector<8x512xf32>
    %1130 = arith.addf %1124, %1129 : vector<8x512xf32>
    %c66 = arith.constant 66 : index
    %1131 = memref.load %arg3[%c66] : memref<72xf32, #tpu.memory_space<smem>>
    %c3_355 = arith.constant 3 : index
    %c0_356 = arith.constant 0 : index
    %c0_357 = arith.constant 0 : index
    %1132 = vector.load %arg8[%c3_355, %c0_356, %c0_357] : memref<9x8x512xf32, #tpu.memory_space<vmem>>, vector<1x8x512xf32>
    %1133 = vector.shape_cast %1132 : vector<1x8x512xf32> to vector<8x512xf32>
    %1134 = vector.broadcast %1131 : f32 to vector<8x512xf32>
    %1135 = arith.mulf %1134, %1133 : vector<8x512xf32>
    %1136 = arith.addf %1130, %1135 : vector<8x512xf32>
    %c67 = arith.constant 67 : index
    %1137 = memref.load %arg3[%c67] : memref<72xf32, #tpu.memory_space<smem>>
    %c4_358 = arith.constant 4 : index
    %c0_359 = arith.constant 0 : index
    %c0_360 = arith.constant 0 : index
    %1138 = vector.load %arg8[%c4_358, %c0_359, %c0_360] : memref<9x8x512xf32, #tpu.memory_space<vmem>>, vector<1x8x512xf32>
    %1139 = vector.shape_cast %1138 : vector<1x8x512xf32> to vector<8x512xf32>
    %1140 = vector.broadcast %1137 : f32 to vector<8x512xf32>
    %1141 = arith.mulf %1140, %1139 : vector<8x512xf32>
    %1142 = arith.addf %1136, %1141 : vector<8x512xf32>
    %c68 = arith.constant 68 : index
    %1143 = memref.load %arg3[%c68] : memref<72xf32, #tpu.memory_space<smem>>
    %c5_361 = arith.constant 5 : index
    %c0_362 = arith.constant 0 : index
    %c0_363 = arith.constant 0 : index
    %1144 = vector.load %arg8[%c5_361, %c0_362, %c0_363] : memref<9x8x512xf32, #tpu.memory_space<vmem>>, vector<1x8x512xf32>
    %1145 = vector.shape_cast %1144 : vector<1x8x512xf32> to vector<8x512xf32>
    %1146 = vector.broadcast %1143 : f32 to vector<8x512xf32>
    %1147 = arith.mulf %1146, %1145 : vector<8x512xf32>
    %1148 = arith.addf %1142, %1147 : vector<8x512xf32>
    %c69 = arith.constant 69 : index
    %1149 = memref.load %arg3[%c69] : memref<72xf32, #tpu.memory_space<smem>>
    %c6_364 = arith.constant 6 : index
    %c0_365 = arith.constant 0 : index
    %c0_366 = arith.constant 0 : index
    %1150 = vector.load %arg8[%c6_364, %c0_365, %c0_366] : memref<9x8x512xf32, #tpu.memory_space<vmem>>, vector<1x8x512xf32>
    %1151 = vector.shape_cast %1150 : vector<1x8x512xf32> to vector<8x512xf32>
    %1152 = vector.broadcast %1149 : f32 to vector<8x512xf32>
    %1153 = arith.mulf %1152, %1151 : vector<8x512xf32>
    %1154 = arith.addf %1148, %1153 : vector<8x512xf32>
    %c70 = arith.constant 70 : index
    %1155 = memref.load %arg3[%c70] : memref<72xf32, #tpu.memory_space<smem>>
    %c7_367 = arith.constant 7 : index
    %c0_368 = arith.constant 0 : index
    %c0_369 = arith.constant 0 : index
    %1156 = vector.load %arg8[%c7_367, %c0_368, %c0_369] : memref<9x8x512xf32, #tpu.memory_space<vmem>>, vector<1x8x512xf32>
    %1157 = vector.shape_cast %1156 : vector<1x8x512xf32> to vector<8x512xf32>
    %1158 = vector.broadcast %1155 : f32 to vector<8x512xf32>
    %1159 = arith.mulf %1158, %1157 : vector<8x512xf32>
    %1160 = arith.addf %1154, %1159 : vector<8x512xf32>
    %c71 = arith.constant 71 : index
    %1161 = memref.load %arg3[%c71] : memref<72xf32, #tpu.memory_space<smem>>
    %c8_370 = arith.constant 8 : index
    %c0_371 = arith.constant 0 : index
    %c0_372 = arith.constant 0 : index
    %1162 = vector.load %arg8[%c8_370, %c0_371, %c0_372] : memref<9x8x512xf32, #tpu.memory_space<vmem>>, vector<1x8x512xf32>
    %1163 = vector.shape_cast %1162 : vector<1x8x512xf32> to vector<8x512xf32>
    %1164 = vector.broadcast %1161 : f32 to vector<8x512xf32>
    %1165 = arith.mulf %1164, %1163 : vector<8x512xf32>
    %1166 = arith.addf %1160, %1165 : vector<8x512xf32>
    %c1_i32_373 = arith.constant 1 : i32
    %1167 = tpu.dynamic_rotate %1166 by %c1_i32_373 dim 1 : vector<8x512xf32>, i32 -> vector<8x512xf32>
    %cst_374 = arith.constant 0.000000e+00 : f32
    %1168 = vector.shape_cast %3 : vector<1x512xi1> to vector<1x512xi1>
    %1169 = vector.broadcast %1168 : vector<1x512xi1> to vector<8x512xi1>
    %1170 = vector.broadcast %cst_374 : f32 to vector<8x512xf32>
    %1171 = arith.select %1169, %1170, %1167 : vector<8x512xi1>, vector<8x512xf32>
    %c63_375 = arith.constant 63 : index
    %1172 = memref.load %arg5[%c63_375] : memref<144xf32, #tpu.memory_space<smem>>
    %1173 = vector.broadcast %1172 : f32 to vector<8x512xf32>
    %1174 = arith.mulf %1173, %1171 : vector<8x512xf32>
    %1175 = arith.addf %1102, %1174 : vector<8x512xf32>
    %c66_376 = arith.constant 66 : index
    %1176 = memref.load %arg5[%c66_376] : memref<144xf32, #tpu.memory_space<smem>>
    %1177 = vector.broadcast %1176 : f32 to vector<8x512xf32>
    %1178 = arith.mulf %1177, %1171 : vector<8x512xf32>
    %1179 = arith.addf %1106, %1178 : vector<8x512xf32>
    %c69_377 = arith.constant 69 : index
    %1180 = memref.load %arg5[%c69_377] : memref<144xf32, #tpu.memory_space<smem>>
    %1181 = vector.broadcast %1180 : f32 to vector<8x512xf32>
    %1182 = arith.mulf %1181, %1171 : vector<8x512xf32>
    %1183 = arith.addf %1110, %1182 : vector<8x512xf32>
    %c64_378 = arith.constant 64 : index
    %1184 = memref.load %arg5[%c64_378] : memref<144xf32, #tpu.memory_space<smem>>
    %1185 = vector.broadcast %1184 : f32 to vector<8x512xf32>
    %1186 = arith.mulf %1185, %1166 : vector<8x512xf32>
    %1187 = arith.addf %1175, %1186 : vector<8x512xf32>
    %c67_379 = arith.constant 67 : index
    %1188 = memref.load %arg5[%c67_379] : memref<144xf32, #tpu.memory_space<smem>>
    %1189 = vector.broadcast %1188 : f32 to vector<8x512xf32>
    %1190 = arith.mulf %1189, %1166 : vector<8x512xf32>
    %1191 = arith.addf %1179, %1190 : vector<8x512xf32>
    %c70_380 = arith.constant 70 : index
    %1192 = memref.load %arg5[%c70_380] : memref<144xf32, #tpu.memory_space<smem>>
    %1193 = vector.broadcast %1192 : f32 to vector<8x512xf32>
    %1194 = arith.mulf %1193, %1166 : vector<8x512xf32>
    %1195 = arith.addf %1183, %1194 : vector<8x512xf32>
    %c511_i32_381 = arith.constant 511 : i32
    %1196 = tpu.dynamic_rotate %1166 by %c511_i32_381 dim 1 : vector<8x512xf32>, i32 -> vector<8x512xf32>
    %cst_382 = arith.constant 0.000000e+00 : f32
    %1197 = vector.shape_cast %5 : vector<1x512xi1> to vector<1x512xi1>
    %1198 = vector.broadcast %1197 : vector<1x512xi1> to vector<8x512xi1>
    %1199 = vector.broadcast %cst_382 : f32 to vector<8x512xf32>
    %1200 = arith.select %1198, %1199, %1196 : vector<8x512xi1>, vector<8x512xf32>
    %c65_383 = arith.constant 65 : index
    %1201 = memref.load %arg5[%c65_383] : memref<144xf32, #tpu.memory_space<smem>>
    %1202 = vector.broadcast %1201 : f32 to vector<8x512xf32>
    %1203 = arith.mulf %1202, %1200 : vector<8x512xf32>
    %1204 = arith.addf %1187, %1203 : vector<8x512xf32>
    %c68_384 = arith.constant 68 : index
    %1205 = memref.load %arg5[%c68_384] : memref<144xf32, #tpu.memory_space<smem>>
    %1206 = vector.broadcast %1205 : f32 to vector<8x512xf32>
    %1207 = arith.mulf %1206, %1200 : vector<8x512xf32>
    %1208 = arith.addf %1191, %1207 : vector<8x512xf32>
    %c71_385 = arith.constant 71 : index
    %1209 = memref.load %arg5[%c71_385] : memref<144xf32, #tpu.memory_space<smem>>
    %1210 = vector.broadcast %1209 : f32 to vector<8x512xf32>
    %1211 = arith.mulf %1210, %1200 : vector<8x512xf32>
    %1212 = arith.addf %1195, %1211 : vector<8x512xf32>
    %c1_i32_386 = arith.constant 1 : i32
    %1213 = tpu.dynamic_rotate %1204 by %c1_i32_386 dim 0 : vector<8x512xf32>, i32 -> vector<8x512xf32>
    %cst_387 = arith.constant 0.000000e+00 : f32
    %1214 = vector.broadcast %cst_387 : f32 to vector<8x512xf32>
    %1215 = arith.select %7, %1214, %1213 : vector<8x512xi1>, vector<8x512xf32>
    %1216 = arith.addf %1208, %1215 : vector<8x512xf32>
    %c7_i32_388 = arith.constant 7 : i32
    %1217 = tpu.dynamic_rotate %1212 by %c7_i32_388 dim 0 : vector<8x512xf32>, i32 -> vector<8x512xf32>
    %cst_389 = arith.constant 0.000000e+00 : f32
    %1218 = vector.broadcast %cst_389 : f32 to vector<8x512xf32>
    %1219 = arith.select %9, %1218, %1217 : vector<8x512xi1>, vector<8x512xf32>
    %1220 = arith.addf %1216, %1219 : vector<8x512xf32>
    %c0_390 = arith.constant 0 : index
    %1221 = memref.load %arg6[%c0_390] : memref<1xf32, #tpu.memory_space<smem>>
    %1222 = vector.broadcast %1221 : f32 to vector<8x512xf32>
    %1223 = arith.addf %1220, %1222 : vector<8x512xf32>
    %1224 = arith.addf %369, %381 : vector<1x512xf32>
    %1225 = arith.addf %1224, %393 : vector<1x512xf32>
    %1226 = vector.broadcast %1225 : vector<1x512xf32> to vector<8x512xf32>
    %1227 = arith.addf %1223, %1226 : vector<8x512xf32>
    %cst_391 = arith.constant 0.000000e+00 : f32
    %1228 = vector.shape_cast %369 : vector<1x512xf32> to vector<1x512xf32>
    %1229 = vector.broadcast %1228 : vector<1x512xf32> to vector<8x512xf32>
    %1230 = vector.broadcast %cst_391 : f32 to vector<8x512xf32>
    %1231 = arith.select %7, %1229, %1230 : vector<8x512xi1>, vector<8x512xf32>
    %1232 = arith.subf %1227, %1231 : vector<8x512xf32>
    %cst_392 = arith.constant 0.000000e+00 : f32
    %1233 = vector.shape_cast %393 : vector<1x512xf32> to vector<1x512xf32>
    %1234 = vector.broadcast %1233 : vector<1x512xf32> to vector<8x512xf32>
    %1235 = vector.broadcast %cst_392 : f32 to vector<8x512xf32>
    %1236 = arith.select %9, %1234, %1235 : vector<8x512xi1>, vector<8x512xf32>
    %1237 = arith.subf %1232, %1236 : vector<8x512xf32>
    %c0_393 = arith.constant 0 : index
    %c0_394 = arith.constant 0 : index
    %c0_395 = arith.constant 0 : index
    %c0_396 = arith.constant 0 : index
    %1238 = vector.load %arg7[%c0_393, %c0_394, %c0_395, %c0_396] : memref<1x1x8x512xf32, #tpu.memory_space<vmem>>, vector<1x1x8x512xf32>
    %1239 = vector.shape_cast %1238 : vector<1x1x8x512xf32> to vector<8x512xf32>
    %1240 = vector.shape_cast %1237 : vector<8x512xf32> to vector<1x1x8x512xf32>
    tpu.vector_store %arg7[%c0_393, %c0_394, %c0_395, %c0_396], %1240 {strides = array<i32>} : memref<1x1x8x512xf32, #tpu.memory_space<vmem>>, vector<1x1x8x512xf32>,
    return
  }
  func.func @transform_0(%arg0: i32) -> (i32, i32, i32) {
    %c0_i32 = arith.constant 0 : i32
    %c0_i32_0 = arith.constant 0 : i32
    %c0_i32_1 = arith.constant 0 : i32
    return %arg0, %c0_i32, %c0_i32_0 : i32, i32, i32
  }
  func.func @transform_1(%arg0: i32) -> (i32, i32, i32) {
    %c0_i32 = arith.constant 0 : i32
    %c0_i32_0 = arith.constant 0 : i32
    %c0_i32_1 = arith.constant 0 : i32
    return %arg0, %c0_i32, %c0_i32_0 : i32, i32, i32
  }
  func.func @transform_2(%arg0: i32) -> i32 {
    %c0_i32 = arith.constant 0 : i32
    %c0_i32_0 = arith.constant 0 : i32
    return %c0_i32 : i32
  }
  func.func @transform_3(%arg0: i32) -> i32 {
    %c0_i32 = arith.constant 0 : i32
    %c0_i32_0 = arith.constant 0 : i32
    return %c0_i32 : i32
  }
  func.func @transform_4(%arg0: i32) -> i32 {
    %c0_i32 = arith.constant 0 : i32
    %c0_i32_0 = arith.constant 0 : i32
    return %c0_i32 : i32
  }
  func.func @transform_5(%arg0: i32) -> i32 {
    %c0_i32 = arith.constant 0 : i32
    %c0_i32_0 = arith.constant 0 : i32
    return %c0_i32 : i32
  }
  func.func @transform_6(%arg0: i32) -> (i32, i32, i32, i32) {
    %c0_i32 = arith.constant 0 : i32
    %c0_i32_0 = arith.constant 0 : i32
    %c0_i32_1 = arith.constant 0 : i32
    %c0_i32_2 = arith.constant 0 : i32
    return %arg0, %c0_i32, %c0_i32_0, %c0_i32_1 : i32, i32, i32, i32
  }
}

</mosaic_0001>

<bundles_post_ra>
// kernel: simple_model_forward.1
= control target key start
LH: loop header
LB: loop body
LE: loop exit
PB: predicated region body
PF: predicated region fallthrough
CT: control target
= control target key end

     0   :  { %s9174_s0 = inlined_call_operand.vmem [shape: f32[2,8,512], index: 0, kind: input, shape index: {}]   ;;  %s9175_s1 = inlined_call_operand.vmem [shape: f32[2,8,512], index: 1, kind: input, shape index: {}]   ;;  %s9176_s2 = inlined_call_operand.vmem [shape: f32[72], index: 2, kind: input, shape index: {}]   ;;  %s9177_s3 = inlined_call_operand.vmem [shape: f32[8], index: 3, kind: input, shape index: {}]   ;;  %s9178_s4 = inlined_call_operand.vmem [shape: f32[144], index: 4, kind: input, shape index: {}]   ;;  %s9179_s5 = inlined_call_operand.<no memory space> [shape: f32[1], index: 5, kind: input, shape index: {}]   ;;  %s9180_s6 = inlined_call_operand.hbm [shape: f32[2,1,8,512], index: 6, kind: output, shape index: {}]  }
   0x1   :  { %9565 = sst [smem:[#allocation198_spill]] %s9174_s0 }
   0x2   :  { %9566 = sst [smem:[#allocation199_spill]] %s9175_s1 }
   0x3   :  { %9567 = sst [smem:[#allocation200_spill]] %s9176_s2 }
   0x4   :  { %9568 = sst [smem:[#allocation201_spill]] %s9177_s3 }
   0x5   :  { %9569 = sst [smem:[#allocation202_spill]] %s9178_s4 }
   0x6   :  { %9570 = sst [smem:[#allocation203_spill]] %s9180_s6 }
   0x7   :  { %11 = sst [smem:[#allocation3]] %s9179_s5 }
   0x8   :  { %12 = vsyncpa [#allocation6], 0 }
   0x9   :  { %13 = vsyncpa [#allocation8], 0 }
   0xa   :  { %14 = vsyncpa [#allocation5], 0 }
   0xb   :  { %16 = vsyncpa [#allocation5 + $0x1], 0  ;;  %s4444_s23 = smov 0   ;;  %s4446_s24 = smov 0  }
   0xc   :  { %s4448_s25 = smov 0   ;;  %s4450_s26 = smov 0  }
   0xd LB: > { %9571 = sst [smem:[#allocation14_spill]] %s4386_s23  ;;  %s4465_s5 = sadd.s32 4294967295, %s4398_s26   ;;  %s4398_s26 = sphi %s4450_s26, %s10721_s26   ;;  %s4394_s25 = sphi %s4448_s25, %s10724_s25   ;;  %s4390_s24 = sphi %s4446_s24, %s10723_s24   ;;  %s4386_s23 = sphi %s4444_s23, %s10722_s23  }
   0xe   : > { %9572 = sst [smem:[#allocation15_spill]] %s4390_s24  ;;  %s3960_s27 = sadd.s32 4294967294, %s4398_s26  }
   0xf   : > { %9573 = sst [smem:[#allocation16_spill]] %s4394_s25  ;;  %s4469_s28 = sadd.s32 1, %s4398_s26  }
  0x10   : > { %9574 = sst [smem:[#allocation17_spill]] %s4398_s26  ;;  %s165_s29 = sadd.s32 1, %s4394_s25 }
  0x11   : > { %9575 = sst [smem:[#allocation18_spill]] %s4465_s5  ;;  %s162_s30 = ssub.s32 %s4398_s26, %s4469_s28 }
  0x12   : > { %9576 = sst [smem:[#allocation19_spill]] %s4469_s28  ;;  %p175_p0 = scmp.ne.s32.totalorder %s4394_s25, %s4390_s24 }
  0x13   : > { %p163_p1 = scmp.eq.s32.totalorder %s162_s30, 0  ;;  %p176_p2 = scmp.eq.s32.totalorder %s4465_s5, 1 }
  0x14   : > { %p181_p3 = scmp.ne.s32.totalorder %s4390_s24, %s4386_s23  ;;  %p182_p4 = scmp.eq.s32.totalorder %s3960_s27, 1 }
  0x15   : > { %s4480_s7 = scalar_select %p163_p1, %s4394_s25, %s165_s29  }
  0x16   : > { %p4482_p5 = por %p176_p2, %p175_p0  ;;  %p4486_p6 = por %p182_p4, %p181_p3 }
  0x17   : > { %9577 = sst [smem:[#allocation20_spill]] %s4480_s7  ;;  %p3961_p7 = scmp.ge.s32.totalorder %s4398_s26, 1 }
  0x18   : > { %s9578_s8 = scalar_select %p4482_p5, 1, 0 }
  0x19   : > { %s9580_s9 = scalar_select %p4486_p6, 1, 0 }
  0x1a   : > { %9579 = sst [smem:[#allocation21_spill]] %s9578_s8  ;;  %p189_p8 = scmp.lt.s32.totalorder %s4398_s26, 3 }
  0x1b   : > { %9581 = sst [smem:[#allocation22_spill]] %s9580_s9  ;;  %p9181_p9 = scmp.eq.s32.totalorder %s4465_s5, 0 }
  0x1c   : > { %p4493_p10 = pnand %p3961_p7, %p189_p8  ;;  %s9583_s3 = sld [smem:[#allocation201_spill]] }
  0x1d   : > { %s9584_s2 = sld [smem:[#allocation200_spill]] }
  0x1e   : > { %s9582_s10 = scalar_select %p4493_p10, 1, 0 }
  0x1f   : > { %p4218_p11 = pneg %p4493_p10  ;;  %s9586_s4 = sld [smem:[#allocation202_spill]] }
  0x21   : > { %p4507_p12 = pnand %p9181_p9, %p4218_p11 }
  0x22   : > { %s213_s13 = sshll.u32 %s9583_s3, 4  ;;  %s214_s13 = int_to_ptr.vmem [resolvable:$true] %s213_s13 }
  0x23   : > { %s202_s16 = sshll.u32 %s9584_s2, 4  ;;  %s4285_s21 = scalar_lea.vmem %s214_s13, 16  ;;  %s203_s16 = int_to_ptr.vmem [resolvable:$true] %s202_s16 }
  0x24   : > { %p4286_p13 = scmp.ne.s32.totalorder %s214_s13, %s4285_s21  ;;  %p4287_p0 = pneg %p4507_p12 }
  0x25   : > { %s224_s20 = sshll.u32 %s9586_s4, 4  ;;  %p4293_p3 = scmp.lt.s32.totalorder %s214_s13, %s214_s13  ;;  %s4514_s20 = int_to_ptr.vmem [resolvable:$true] %s224_s20 }
  0x26   : > { %p4288_p1 = pnand %p4287_p0, %p4286_p13  ;;  %p4294_p4 = scmp.lt.s32.totalorder %s4285_s21, %s4285_s21 }
  0x28   : > { %p4289_p2 = pneg %p4288_p1  ;;  %p4295_p7 = por %p4294_p4, %p4293_p3 }
  0x2a   : > { %p4296_p8 = pnand %p4295_p7, %p4289_p2 }
  0x2c   : > { %4299 = shalt.err (!%p4296_p8)
}
  0x2d   : > { %s4400_s22 = smov [#allocation7]   ;;  %s4300_s27 = scalar_lea.vmem %s203_s16, 16 }
  0x2e   : > { %4224 = dma.vmem_to_smem (!%p4507_p12), %s214_s13, 16, %s4400_s22, [#allocation8]  }
  0x2f   : > { %p4301_p11 = scmp.ne.s32.totalorder %s203_s16, %s4300_s27  ;;  %p4308_p5 = scmp.lt.s32.totalorder %s203_s16, %s203_s16 }
  0x30   : > { %p4309_p10 = scmp.lt.s32.totalorder %s4300_s27, %s4300_s27 }
  0x31   : > { %p4303_p9 = pnand %p4301_p11, %p4287_p0 }
  0x32   : > { %p4310_p13 = por %p4309_p10, %p4308_p5 }
  0x33   : > { %p4304_p6 = pneg %p4303_p9 }
  0x35   : > { %p4311_p1 = pnand %p4310_p13, %p4304_p6 }
  0x37   : > { %4314 = shalt.err (!%p4311_p1)
}
  0x38   : > { %s4401_s29 = smov [#allocation4]   ;;  %s4315_s30 = scalar_lea.vmem %s4514_s20, 32 }
  0x39   : > { %4221 = dma.vmem_to_smem (!%p4507_p12), %s203_s16, 16, %s4401_s29, [#allocation6]  }
  0x3a   : > { %p4316_p2 = scmp.ne.s32.totalorder %s4514_s20, %s4315_s30  ;;  %p4323_p9 = scmp.lt.s32.totalorder %s4514_s20, %s4514_s20 }
  0x3b   : > { %p4324_p7 = scmp.lt.s32.totalorder %s4315_s30, %s4315_s30 }
  0x3c   : > { %p4318_p3 = pnand %p4316_p2, %p4287_p0 }
  0x3d   : > { %p4325_p5 = por %p4324_p7, %p4323_p9 }
  0x3e   : > { %p4319_p4 = pneg %p4318_p3 }
  0x40   : > { %p4326_p6 = pnand %p4325_p5, %p4319_p4 }
  0x42   : > { %4329 = shalt.err (!%p4326_p6)
}
  0x43   : > { %s4402_s11 = smov [#allocation9]   ;;  %p9587_p10 = scmp.ne.s32.totalorder %s9582_s10, 0 }
  0x44   : > { %4227 = dma.vmem_to_smem (!%p4507_p12), %s4514_s20, 32, %s4402_s11, [#allocation8]  }
  0x45   : > { %256 = sbr.rel (%p9587_p10) target bundleno = 831 (0x33f), region = 44 }
  0x4a   : > { %p9588_p8 = scmp.eq.s32.totalorder %s4465_s5, 0 }
  0x4c   : > { %4373 = dma.done.wait (%p9588_p8), [#allocation6], 16   ;;  %p9589_p0 = pmov %p9588_p8 }
  0x4e   : > { %4375 = vsyncadd (%p9589_p0), [#allocation6], 4294967280  ;;  %p9590_p11 = pmov %p9589_p0 }
  0x4f   : > { %p9591_p13 = pmov %p9589_p0 }
  0x50   : > { %4377 = dma.done.wait (%p9590_p11), [#allocation8], 48  }
  0x51   : > { %4379 = vsyncadd (%p9591_p13), [#allocation8], 4294967248 }
  0x52   : > { %270 = sfence }
  0x53   : > { %p300_p1 = scmp.lt.s32.totalorder %s4465_s5, 1  ;;  %s9592_s0 = sld [smem:[#allocation198_spill]]  ;;  %v310_v8 = vlaneseq }
  0x54   : > { %s9186_s16 = smov 1   ;;  %s9184_s17 = smov 127  }
  0x55   : > { %s301_s12 = scalar_select %p300_p1, %s4465_s5, 1  ;;  %v4678_v9 = vshrl.u32 %v310_v8, 7  ;;  %v4691_v13 = vand.u32 127, %v310_v8 }
  0x56   : > { %s9594_s1 = sld [smem:[#allocation199_spill]] }
  0x57   : > { %s4201_s13 = sshll.u32 %s301_s12, 5  ;;  %s4600_s21 = sld [smem:[#allocation7]]  ;;  %9609 = vst [vmem:[#allocation38_spill] sm:$0xff] %v4678_v9  ;;  %9611 = vst [vmem:[#allocation40_spill] sm:$0xff] %v4691_v13  ;;  %vm325_vm0 = vcmp.eq.s32.totalorder %v4678_v9, 0  ;;  %vm326_vm1 = vcmp.eq.s32.totalorder %v4678_v9, 7 }
  0x58   : > { %s4602_s22 = sld [smem:[#allocation4]]  ;;  %v4708_v17 = vadd.s32 384, %v4691_v13  ;;  %vm339_vm2 = vcmp.lt.s32.totalorder %v4691_v13, 1  ;;  %vm317_vm3 = vcmp.eq.s32.totalorder %v4691_v13, 0  ;;  %vm425_vm4 = vcmp.lt.s32.totalorder %v4691_v13, 127 }
  0x59   : > { %s4553_s15 = scalar_lea.vmem %s9592_s0, %s4201_s13  ;;  %s4604_s27 = sld [smem:[#allocation4 + $0x1]] }
  0x5a   : > { %9593 = sst [smem:[#allocation23_spill]] %s4553_s15  ;;  %v4556_v0 = vld [vmem:[%s4553_s15 + $0x10] sm:$0xff]  ;;  %v4561_v1 = vld [vmem:[%s4553_s15] sm:$0xff]  ;;  %v4566_v2 = vld [vmem:[%s4553_s15 + $0x8] sm:$0xff]  ;;  %9613 = vst [vmem:[#allocation42_spill] sm:$0xff] %v4708_v17  ;;  %vm324_vm5 = vcmp.eq.s32.totalorder %v4708_v17, 511 }
  0x5b   : > { %335 = vrot.lane.b32.xlu1 %v4556_v0, %s9186_s16  ;;  %331 = vrot.lane.b32.xlu0 %v4561_v1, %s9186_s16  ;;  %v4569_v3 = vld [vmem:[%s4553_s15 + $0x18] sm:$0xff]  ;;  %s4606_s29 = sld [smem:[#allocation4 + $0x2]]  ;;  %v387_v11 = vrot.slane %v4566_v2, 7  ;;  %v388_v12 = vrot.slane %v4556_v0, 7  ;;  %v405_v22 = vrot.slane %v4566_v2, 1  ;;  %v406_v30 = vrot.slane %v4556_v0, 1 }
  0x5c   : > { %s4582_s20 = scalar_lea.vmem %s9594_s1, %s4201_s13  ;;  %s4608_s30 = sld [smem:[#allocation4 + $0x3]]  ;;  %v389_v10 = vrot.slane %v4569_v3, 7  ;;  %v407_v14 = vrot.slane %v4569_v3, 1 }
  0x5d   : > { %9595 = sst [smem:[#allocation24_spill]] %s4582_s20  ;;  %v474_v4 = vld [vmem:[%s4582_s20 + $0x8] sm:$0xff]  ;;  %v473_v5 = vld [vmem:[%s4582_s20] sm:$0xff]  ;;  %v476_v6 = vld [vmem:[%s4582_s20 + $0x18] sm:$0xff]  ;;  %v4711_v18 = vstv %s4600_s21  ;;  %v4715_v19 = vsel %vm325_vm0, 0.0, %v387_v11  ;;  %v4728_v23 = vsel %vm325_vm0, 0.0, %v388_v12 }
  0x5e   : > { %v475_v7 = vld [vmem:[%s4582_s20 + $0x10] sm:$0xff]  ;;  %s4610_s11 = sld [smem:[#allocation4 + $0x4]]  ;;  %v4699_v15 = vsel %vm325_vm0, 0.0, %v389_v10  ;;  %9614 = vst [vmem:[#allocation43_spill] sm:$0xff] %v4711_v18  ;;  %v4720_v20 = vstv %s4602_s22  ;;  %9616 = vst [vmem:[#allocation45_spill] sm:$0xff] %v4728_v23  ;;  %v4734_v24 = vsel %vm326_vm1, 0.0, %v407_v14 }
  0x5f   : > { %333 = vrot.lane.b32.xlu1 %v4566_v2, %s9186_s16  ;;  %337 = vrot.lane.b32.xlu0 %v4569_v3, %s9186_s16  ;;  %s4612_s12 = sld [smem:[#allocation4 + $0x5]]  ;;  %v4702_v16 = vstv %s4604_s27  ;;  %9615 = vst [vmem:[#allocation44_spill] sm:$0xff] %v4720_v20  ;;  %9617 = vst [vmem:[#allocation46_spill] sm:$0xff] %v4734_v24  ;;  %v4786_v38 = vsel %vm326_vm1, 0.0, %v405_v22  ;;  %v4811_v44 = vsel %vm326_vm1, 0.0, %v406_v30 }
  0x60   : > { %s4614_s13 = sld [smem:[#allocation4 + $0x6]]  ;;  %v4738_v25 = vmul.f32 %v4702_v16, %v4699_v15  ;;  %v4753_v29 = vmul.f32 %v4702_v16, %v4715_v19  ;;  %v4773_v35 = vmul.f32 %v4702_v16, %v4728_v23  ;;  %9624 = vst [vmem:[#allocation53_spill] sm:$0xff] %v4786_v38  ;;  %9626 = vst [vmem:[#allocation54_spill] sm:$0xff] %v4811_v44 }
  0x61   : > { %s4616_s10 = sld [smem:[#allocation4 + $0x8]]  ;;  %v4741_v26 = vstv %s4606_s29 }
  0x62   : > { %s4618_s14 = sld [smem:[#allocation7 + $0x1]]  ;;  %9618 = vst [vmem:[#allocation47_spill] sm:$0xff] %v4741_v26  ;;  %v4749_v28 = vstv %s4608_s30 }
  0x63   : > { %423 = vrot.lane.b32.xlu1 %v4569_v3, %s9184_s17  ;;  %417 = vrot.lane.b32.xlu0 %v4561_v1, %s9184_s17  ;;  %s4620_s18 = sld [smem:[#allocation4 + $0x7]]  ;;  %9619 = vst [vmem:[#allocation48_spill] sm:$0xff] %v4749_v28 }
  0x64   : > { %s4622_s19 = sld [smem:[#allocation4 + $0x9]]  ;;  %v4723_v21 = vstv %s4610_s11 }
  0x65   : > { %s4628_s0 = sld [smem:[#allocation4 + $0xc]]  ;;  %v4763_v32 = vmul.f32 %v4723_v21, %v4569_v3  ;;  %v4766_v33 = vstv %s4612_s12  ;;  %v4795_v40 = vmul.f32 %v4723_v21, %v4566_v2  ;;  %v4815_v45 = vmul.f32 %v4723_v21, %v4556_v0 }
  0x66   : > { %s4630_s1 = sld [smem:[#allocation4 + $0xe]]  ;;  %9620 = vst [vmem:[#allocation49_spill] sm:$0xff] %v4766_v33  ;;  %v4769_v34 = vstv %s4614_s13 }
  0x67   : > { %421 = vrot.lane.b32.xlu1 %v4556_v0, %s9184_s17  ;;  %419 = vrot.lane.b32.xlu0 %v4566_v2, %s9184_s17  ;;  %s4632_s2 = sld [smem:[#allocation4 + $0xf]]  ;;  %9621 = vst [vmem:[#allocation50_spill] sm:$0xff] %v4769_v34  ;;  %v4782_v37 = vstv %s4616_s10  ;;  %9627 = vst [vmem:[#allocation55_spill] sm:$0xff] %v4815_v45 }
  0x68   : > { %s4634_s3 = sld [smem:[#allocation4 + $0xd]]  ;;  %9623 = vst [vmem:[#allocation52_spill] sm:$0xff] %v4782_v37  ;;  %v4789_v39 = vstv %s4618_s14 }
  0x69   : > { %s4636_s4 = sld [smem:[#allocation4 + $0x11]]  ;;  %v4744_v27 = vstv %s4620_s18 }
  0x6a   : > { %s4638_s7 = sld [smem:[#allocation7 + $0x2]]  ;;  %v4779_v36 = vmul.f32 %v4744_v27, %v4734_v24  ;;  %v4798_v41 = vstv %s4622_s19  ;;  %v4828_v48 = vmul.f32 %v4744_v27, %v4786_v38  ;;  %v4858_v56 = vmul.f32 %v4744_v27, %v4811_v44 }
  0x6b   : > { %479 = vrot.lane.b32.xlu1 %v474_v4, %s9186_s16  ;;  %477 = vrot.lane.b32.xlu0 %v473_v5, %s9186_s16  ;;  %s4640_s25 = sld [smem:[#allocation4 + $0x12]]  ;;  %v4818_v46 = vstv %s4628_s0 }
  0x6c   : > { %s4642_s28 = sld [smem:[#allocation4 + $0x13]]  ;;  %9622 = vst [vmem:[#allocation51_spill] sm:$0xff] %v4779_v36  ;;  %9629 = vst [vmem:[#allocation56_spill] sm:$0xff] %v4818_v46  ;;  %v4831_v49 = vstv %s4630_s1 }
  0x6d   : > { %s4644_s9 = sld [smem:[#allocation4 + $0x14]]  ;;  %9632 = vst [vmem:[#allocation58_spill] sm:$0xff] %v4828_v48  ;;  %9633 = vst [vmem:[#allocation59_spill] sm:$0xff] %v4831_v49  ;;  %v4834_v50 = vstv %s4632_s2 }
  0x6e   : > { %s4646_s23 = sld [smem:[#allocation4 + $0x10]]  ;;  %9635 = vst [vmem:[#allocation60_spill] sm:$0xff] %v4834_v50  ;;  %v4842_v52 = vstv %s4634_s3  ;;  %9641 = vst [vmem:[#allocation64_spill] sm:$0xff] %v4858_v56 }
  0x6f   : > { %483 = vrot.lane.b32.xlu1 %v476_v6, %s9186_s16  ;;  %481 = vrot.lane.b32.xlu0 %v475_v7, %s9186_s16  ;;  %s4626_s16 = sld [smem:[#allocation4 + $0xb]]  ;;  %v4845_v53 = vstv %s4636_s4  ;;  %v4862_v57 = vmul.f32 %v4842_v52, %v4566_v2 }
  0x70   : > { %9596 = sst [smem:[#allocation25_spill]] %s4638_s7  ;;  %9638 = vst [vmem:[#allocation61_spill] sm:$0xff] %v4845_v53 }
  0x71   : > { %9597 = sst [smem:[#allocation26_spill]] %s4640_s25  ;;  %9643 = vst [vmem:[#allocation65_spill] sm:$0xff] %v4862_v57 }
  0x72   : > { %s4648_s26 = sld [smem:[#allocation4 + $0x15]]  ;;  %v4837_v51 = vstv %s4642_s28 }
  0x73   : > { %495 = vrot.lane.b32.xlu1 %v474_v4, %s9184_s17  ;;  %493 = vrot.lane.b32.xlu0 %v473_v5, %s9184_s17  ;;  %9598 = sst [smem:[#allocation27_spill]] %s4644_s9  ;;  %v4878_v61 = vmul.f32 %v4837_v51, %v4715_v19 }
  0x74   : > { %9599 = sst [smem:[#allocation28_spill]] %s4646_s23 }
  0x75   : > { %s4650_s6 = sld [smem:[#allocation4 + $0x16]]  ;;  %v4805_v43 = vstv %s4626_s16  ;;  %9647 = vst [vmem:[#allocation68_spill] sm:$0xff] %v4878_v61 }
  0x76   : > { %s4652_s8 = sld [smem:[#allocation4 + $0x17]] }
  0x77   : > { %499 = vrot.lane.b32.xlu1 %v476_v6, %s9184_s17  ;;  %497 = vrot.lane.b32.xlu0 %v475_v7, %s9184_s17  ;;  %s4624_s17 = sld [smem:[#allocation4 + $0xa]]  ;;  %v4896_v6 = vmul.f32 %v4842_v52, %v4569_v3 }
  0x78   : > { %9600 = sst [smem:[#allocation29_spill]] %s4648_s26 }
  0x79   : > { %s4654_s5 = sld [smem:[#allocation4 + $0x18]]  ;;  %9651 = vst [vmem:[#allocation71_spill] sm:$0xff] %v4896_v6  ;;  %v4931_v6 = vmul.f32 %v4837_v51, %v4699_v15 }
  0x7a   : > { %s4656_s24 = sld [smem:[#allocation4 + $0x19]] }
  0x7b   : > { %9601 = sst [smem:[#allocation30_spill]] %s4650_s6  ;;  %9661 = vst [vmem:[#allocation79_spill] sm:$0xff] %v4931_v6 }
  0x7c   : > { %9602 = sst [smem:[#allocation31_spill]] %s4652_s8 }
  0x7d   : > { %s4658_s20 = sld [smem:[#allocation4 + $0x1a]]  ;;  %v4757_v31 = vstv %s4624_s17 }
  0x7e   : > { %s4660_s15 = sld [smem:[#allocation7 + $0x3]]  ;;  %v4802_v42 = vmul.f32 %v4757_v31, %v4715_v19  ;;  %v4822_v47 = vmul.f32 %v4757_v31, %v4699_v15  ;;  %v4852_v55 = vmul.f32 %v4757_v31, %v4728_v23 }
  0x7f   : > { %9603 = sst [smem:[#allocation32_spill]] %s4654_s5 }
  0x80   : > { %s4662_s25 = sld [smem:[#allocation4 + $0x1b]]  ;;  %9631 = vst [vmem:[#allocation57_spill] sm:$0xff] %v4822_v47  ;;  %9640 = vst [vmem:[#allocation63_spill] sm:$0xff] %v4852_v55  ;;  %v4892_v5 = vstv %s4656_s24 }
  0x81   : > { %s4664_s7 = sld [smem:[#allocation4 + $0x1c]]  ;;  %v4915_v12 = vmul.f32 %v4892_v5, %v4786_v38 }
  0x82   : > { %s4666_s9 = sld [smem:[#allocation4 + $0x1d]] }
  0x83   : > { %s4668_s23 = sld [smem:[#allocation4 + $0x1e]]  ;;  %9657 = vst [vmem:[#allocation75_spill] sm:$0xff] %v4915_v12  ;;  %v4920_v14 = vstv %s4658_s20  ;;  %v4937_v12 = vmul.f32 %v4842_v52, %v4556_v0 }
  0x84   : > { %9604 = sst [smem:[#allocation33_spill]] %s4660_s15  ;;  %9658 = vst [vmem:[#allocation76_spill] sm:$0xff] %v4920_v14 }
  0x85   : > { %s4670_s26 = sld [smem:[#allocation4 + $0x1f]]  ;;  %9663 = vst [vmem:[#allocation80_spill] sm:$0xff] %v4937_v12  ;;  %v4962_v12 = vmul.f32 %v4837_v51, %v4728_v23 }
  0x86   : > { %s4672_s6 = sld [smem:[#allocation4 + $0x20]] }
  0x87   : > { %s4674_s5 = sld [smem:[#allocation4 + $0x21]]  ;;  %v4899_v7 = vstv %s4664_s7  ;;  %9670 = vst [vmem:[#allocation85_spill] sm:$0xff] %v4962_v12 }
  0x88   : > { %9605 = sst [smem:[#allocation34_spill]] %s4666_s9 }
  0x89   : > { %s4676_s8 = sld [smem:[#allocation4 + $0x23]]  ;;  %v4952_v6 = vstv %s4668_s23 }
  0x8a   : > { %s4680_s15 = sld [smem:[#allocation4 + $0x22]]  ;;  %9668 = vst [vmem:[#allocation84_spill] sm:$0xff] %v4952_v6 }
  0x8b   : > { %9606 = sst [smem:[#allocation35_spill]] %s4670_s26 }
  0x8c   : > { %s4683_s9 = sld [smem:[#allocation7 + $0x4]] }
  0x8d   : > { %9607 = sst [smem:[#allocation36_spill]] %s4674_s5 }
  0x8e   : > { %s4686_s26 = sld [smem:[#allocation4 + $0x24]] }
  0x8f   : > { %9608 = sst [smem:[#allocation37_spill]] %s4676_s8 }
  0x90   : > { %s4689_s5 = sld [smem:[#allocation4 + $0x25]] }
  0x91   : > { %s4695_s8 = sld [smem:[#allocation4 + $0x26]] }
  0x92   : > { %s4730_s21 = sld [smem:[#allocation4 + $0x29]] }
  0x93   : > { %s4746_s22 = sld [smem:[#allocation4 + $0x2a]] }
  0x94   : > { %9610 = sst [smem:[#allocation39_spill]] %s4686_s26 }
  0x95   : > { %s4704_s26 = sld [smem:[#allocation4 + $0x27]] }
  0x96   : > { %s4759_s27 = sld [smem:[#allocation4 + $0x2b]]  ;;  %v4958_v56 = vstv %s4689_s5 }
  0x97   : > { %9612 = sst [smem:[#allocation41_spill]] %s4695_s8 }
  0x98   : > { %s4717_s8 = sld [smem:[#allocation4 + $0x28]] }
  0x99   : > { %s4775_s29 = sld [smem:[#allocation4 + $0x2c]] }
  0x9a   : > { %s4791_s17 = sld [smem:[#allocation7 + $0x5]] }
  0x9b   : > { %s9625_s30 = sld [smem:[#allocation25_spill]]  ;;  %v5015_v57 = vstv %s4704_s26 }
  0x9c   : > { %s4807_s11 = sld [smem:[#allocation4 + $0x2d]]  ;;  %9683 = vst [vmem:[#allocation97_spill] sm:$0xff] %v5015_v57 }
  0x9d   : > { %s9628_s12 = sld [smem:[#allocation28_spill]] }
  0x9e   : > { %s9630_s13 = sld [smem:[#allocation26_spill]]  ;;  %v5018_v48 = vstv %s4717_s8 }
  0x9f   : > { %s4824_s16 = sld [smem:[#allocation4 + $0x2e]]  ;;  %v5063_v14 = vstv %s4775_s29 }
  0xa0   : > { %s9634_s10 = sld [smem:[#allocation27_spill]]  ;;  %9691 = vst [vmem:[#allocation105_spill] sm:$0xff] %v5063_v14 }
  0xa1   : > { %s9636_s14 = sld [smem:[#allocation29_spill]]  ;;  %v4848_v54 = vstv %s9625_s30 }
  0xa2   : > { %s4839_s0 = sld [smem:[#allocation4 + $0x2f]]  ;;  %9639 = vst [vmem:[#allocation62_spill] sm:$0xff] %v4848_v54 }
  0xa3   : > { %s9637_s18 = sld [smem:[#allocation30_spill]]  ;;  %v4865_v58 = vstv %s9628_s12 }
  0xa4   : > { %s4854_s1 = sld [smem:[#allocation4 + $0x30]]  ;;  %v4868_v59 = vstv %s9630_s13  ;;  %v4874_v60 = vmul.f32 %v4865_v58, %v4786_v38  ;;  %v4924_v22 = vmul.f32 %v4865_v58, %v4734_v24 }
  0xa5   : > { %s9642_s2 = sld [smem:[#allocation31_spill]]  ;;  %9645 = vst [vmem:[#allocation66_spill] sm:$0xff] %v4868_v59  ;;  %v5037_v57 = vstv %s4824_s16 }
  0xa6   : > { %s9644_s3 = sld [smem:[#allocation32_spill]]  ;;  %9646 = vst [vmem:[#allocation67_spill] sm:$0xff] %v4874_v60  ;;  %v4881_v62 = vstv %s9634_s10  ;;  %9659 = vst [vmem:[#allocation77_spill] sm:$0xff] %v4924_v22  ;;  %v4940_v60 = vstv %s4662_s25  ;;  %v4944_v22 = vmul.f32 %v4899_v7, %v4715_v19 }
  0xa7   : > { %s4870_s4 = sld [smem:[#allocation4 + $0x31]]  ;;  %9649 = vst [vmem:[#allocation69_spill] sm:$0xff] %v4881_v62  ;;  %v4884_v63 = vstv %s9636_s14  ;;  %9664 = vst [vmem:[#allocation81_spill] sm:$0xff] %v4940_v60  ;;  %v4978_v60 = vstv %s4680_s15 }
  0xa8   : > { %s9648_s28 = sld [smem:[#allocation33_spill]]  ;;  %9650 = vst [vmem:[#allocation70_spill] sm:$0xff] %v4884_v63  ;;  %9666 = vst [vmem:[#allocation82_spill] sm:$0xff] %v4944_v22  ;;  %v4968_v22 = vmul.f32 %v4865_v58, %v4811_v44  ;;  %v5091_v14 = vstv %s4839_s0 }
  0xa9   : > { %s4886_s19 = sld [smem:[#allocation4 + $0x32]]  ;;  %v4889_v4 = vstv %s9637_s18  ;;  %9697 = vst [vmem:[#allocation111_spill] sm:$0xff] %v5091_v14  ;;  %v404_v14 = vrot.slane %v4561_v1, 1 }
  0xaa   : > { %s9652_s30 = sld [smem:[#allocation34_spill]]  ;;  %v4905_v8 = vmul.f32 %v4889_v4, %v4566_v2  ;;  %9672 = vst [vmem:[#allocation86_spill] sm:$0xff] %v4968_v22 }
  0xab   : > { %s4901_s12 = sld [smem:[#allocation4 + $0x33]]  ;;  %v4908_v10 = vstv %s9642_s2 }
  0xac   : > { %9653 = vst [vmem:[#allocation72_spill] sm:$0xff] %v4905_v8  ;;  %s9654_s13 = sld [smem:[#allocation35_spill]]  ;;  %9655 = vst [vmem:[#allocation73_spill] sm:$0xff] %v4908_v10  ;;  %v4911_v11 = vstv %s9644_s3  ;;  %v4987_v8 = vmul.f32 %v4978_v60, %v4786_v38 }
  0xad   : > { %9656 = vst [vmem:[#allocation74_spill] sm:$0xff] %v4911_v11  ;;  %s4917_s24 = sld [smem:[#allocation4 + $0x34]]  ;;  %v5079_v11 = vstv %s4807_s11 }
  0xae   : > { %v4927_v30 = vstv %s9648_s28  ;;  %s4933_s7 = sld [smem:[#allocation4 + $0x35]]  ;;  %9676 = vst [vmem:[#allocation90_spill] sm:$0xff] %v4987_v8  ;;  %v5007_v8 = vmul.f32 %v4889_v4, %v4569_v3  ;;  %9695 = vst [vmem:[#allocation109_spill] sm:$0xff] %v5079_v11  ;;  %s9796_s28 = smov 127  }
  0xaf   : > { %9660 = vst [vmem:[#allocation78_spill] sm:$0xff] %v4927_v30  ;;  %s9662_s10 = sld [smem:[#allocation36_spill]] }
  0xb0   : > { %s9665_s20 = sld [smem:[#allocation37_spill]]  ;;  %v4947_v30 = vstv %s9652_s30  ;;  %9681 = vst [vmem:[#allocation95_spill] sm:$0xff] %v5007_v8  ;;  %v5031_v8 = vstv %s4730_s21 }
  0xb1   : > { %9667 = vst [vmem:[#allocation83_spill] sm:$0xff] %v4947_v30  ;;  %s4949_s14 = sld [smem:[#allocation7 + $0x6]]  ;;  %v4975_v30 = vstv %s4672_s6  ;;  %9686 = vst [vmem:[#allocation100_spill] sm:$0xff] %v5031_v8 }
  0xb2   : > { %s9669_s18 = sld [smem:[#allocation39_spill]]  ;;  %v4955_v55 = vstv %s9654_s13  ;;  %9674 = vst [vmem:[#allocation88_spill] sm:$0xff] %v4975_v30  ;;  %v4996_v30 = vstv %s4683_s9 }
  0xb3   : > { %s4964_s25 = sld [smem:[#allocation4 + $0x36]]  ;;  %v4972_v6 = vmul.f32 %v4955_v55, %v4566_v2  ;;  %9678 = vst [vmem:[#allocation92_spill] sm:$0xff] %v4996_v30  ;;  %v5024_v30 = vmul.f32 %v4899_v7, %v4699_v15  ;;  %v5108_v11 = vstv %s4917_s24 }
  0xb4   : > { %s9671_s2 = sld [smem:[#allocation41_spill]]  ;;  %v5122_v61 = vstv %s4933_s7 }
  0xb5   : > { %9673 = vst [vmem:[#allocation87_spill] sm:$0xff] %v4972_v6  ;;  %s4980_s23 = sld [smem:[#allocation4 + $0x37]]  ;;  %v4983_v12 = vstv %s9662_s10  ;;  %v386_v6 = vrot.slane %v4561_v1, 7  ;;  %9684 = vst [vmem:[#allocation98_spill] sm:$0xff] %v5024_v30  ;;  %v5046_v30 = vmul.f32 %v4892_v5, %v4734_v24 }
  0xb6   : > { %9675 = vst [vmem:[#allocation89_spill] sm:$0xff] %v4983_v12  ;;  %v4990_v22 = vstv %s9665_s20  ;;  %s4992_s5 = sld [smem:[#allocation4 + $0x38]]  ;;  %v5003_v12 = vmul.f32 %v4958_v56, %v4715_v19  ;;  %9704 = vst [vmem:[#allocation118_spill] sm:$0xff] %v5122_v61 }
  0xb7   : > { %9677 = vst [vmem:[#allocation91_spill] sm:$0xff] %v4990_v22  ;;  %s5009_s6 = sld [smem:[#allocation4 + $0x39]]  ;;  %9688 = vst [vmem:[#allocation102_spill] sm:$0xff] %v5046_v30  ;;  %v5066_v30 = vstv %s4791_s17 }
  0xb8   : > { %v4999_v47 = vstv %s9669_s18  ;;  %9680 = vst [vmem:[#allocation94_spill] sm:$0xff] %v5003_v12  ;;  %s5020_s9 = sld [smem:[#allocation4 + $0x3a]]  ;;  %v5028_v12 = vmul.f32 %v5018_v48, %v4566_v2  ;;  %9692 = vst [vmem:[#allocation106_spill] sm:$0xff] %v5066_v30  ;;  %v5086_v30 = vstv %s4870_s4  ;;  %s9792_s4 = smov 1  }
  0xb9   : > { %9679 = vst [vmem:[#allocation93_spill] sm:$0xff] %v4999_v47  ;;  %s5039_s26 = sld [smem:[#allocation4 + $0x3b]]  ;;  %v5042_v47 = vstv %s4759_s27  ;;  %v5098_v45 = vmul.f32 %v5086_v30, %v4566_v2 }
  0xba   : > { %v5012_v22 = vstv %s9671_s2  ;;  %9685 = vst [vmem:[#allocation99_spill] sm:$0xff] %v5028_v12  ;;  %v5050_v12 = vmul.f32 %v4889_v4, %v4556_v0  ;;  %s5052_s8 = sld [smem:[#allocation4 + $0x3c]]  ;;  %v5060_v8 = vmul.f32 %v5042_v47, %v4786_v38 }
  0xbb   : > { %9682 = vst [vmem:[#allocation96_spill] sm:$0xff] %v5012_v22  ;;  %v5034_v22 = vstv %s4746_s22  ;;  %s5068_s15 = sld [smem:[#allocation4 + $0x3d]]  ;;  %9699 = vst [vmem:[#allocation113_spill] sm:$0xff] %v5098_v45  ;;  %v5111_v10 = vstv %s4980_s23  ;;  %v5119_v45 = vmul.f32 %v5108_v11, %v4786_v38 }
  0xbc   : > { %9687 = vst [vmem:[#allocation101_spill] sm:$0xff] %v5034_v22  ;;  %9689 = vst [vmem:[#allocation103_spill] sm:$0xff] %v5050_v12  ;;  %v5056_v22 = vsel %vm325_vm0, 0.0, %v386_v6  ;;  %v5072_v12 = vmul.f32 %v4899_v7, %v4728_v23  ;;  %v5076_v6 = vmul.f32 %v4892_v5, %v4811_v44  ;;  %s5088_s21 = sld [smem:[#allocation4 + $0x3e]]  ;;  %v5151_v61 = vstv %s4992_s5 }
  0xbd   : > { %9690 = vst [vmem:[#allocation104_spill] sm:$0xff] %v5060_v8  ;;  %v5083_v8 = vmul.f32 %v5037_v57, %v4715_v19  ;;  %9703 = vst [vmem:[#allocation117_spill] sm:$0xff] %v5119_v45  ;;  %s5128_s22 = sld [smem:[#allocation4 + $0x42]]  ;;  %v5142_v45 = vmul.f32 %v4757_v31, %v5056_v22 }
  0xbe   : > { %9693 = vst [vmem:[#allocation107_spill] sm:$0xff] %v5072_v12  ;;  %9694 = vst [vmem:[#allocation108_spill] sm:$0xff] %v5076_v6  ;;  %v5094_v12 = vstv %s4854_s1  ;;  %v5102_v6 = vmul.f32 %v4702_v16, %v5056_v22  ;;  %v5126_v16 = vmul.f32 %v4955_v55, %v4569_v3  ;;  %s5144_s27 = sld [smem:[#allocation4 + $0x3f]] }
  0xbf   : > { %9696 = vst [vmem:[#allocation110_spill] sm:$0xff] %v5083_v8  ;;  %9698 = vst [vmem:[#allocation112_spill] sm:$0xff] %v5094_v12  ;;  %v5105_v8 = vstv %s4886_s19  ;;  %v5115_v12 = vstv %s4901_s12  ;;  %s5160_s29 = sld [smem:[#allocation7 + $0x7]] }
  0xc0   : > { %9700 = vst [vmem:[#allocation114_spill] sm:$0xff] %v5102_v6  ;;  %9701 = vst [vmem:[#allocation115_spill] sm:$0xff] %v5105_v8  ;;  %v5131_v6 = vstv %s4949_s14  ;;  %v5134_v8 = vstv %s4964_s25  ;;  %s5177_s17 = sld [smem:[#allocation4 + $0x40]] }
  0xc1   : > { %9702 = vst [vmem:[#allocation116_spill] sm:$0xff] %v5115_v12  ;;  %9705 = vst [vmem:[#allocation119_spill] sm:$0xff] %v5126_v16  ;;  %v5138_v12 = vmul.f32 %v4978_v60, %v4734_v24  ;;  %v5148_v16 = vmul.f32 %v5111_v10, %v4715_v19  ;;  %v5186_v36 = vstv %s5068_s15  ;;  %s5192_s11 = sld [smem:[#allocation4 + $0x45]] }
  0xc2   : > { %9706 = vst [vmem:[#allocation120_spill] sm:$0xff] %v5131_v6  ;;  %9707 = vst [vmem:[#allocation121_spill] sm:$0xff] %v5134_v8  ;;  %v5154_v6 = vstv %s5020_s9  ;;  %v5158_v8 = vmul.f32 %v4958_v56, %v4699_v15  ;;  %s5210_s16 = sld [smem:[#allocation4 + $0x41]] }
  0xc3   : > { %9708 = vst [vmem:[#allocation122_spill] sm:$0xff] %v5138_v12  ;;  %9709 = vst [vmem:[#allocation123_spill] sm:$0xff] %v5142_v45  ;;  %v5163_v12 = vstv %s5009_s6  ;;  %v5167_v31 = vmul.f32 %v5154_v6, %v4566_v2  ;;  %v5171_v45 = vmul.f32 %v4955_v55, %v4556_v0  ;;  %v5190_v2 = vmul.f32 %v4958_v56, %v4728_v23  ;;  %s5228_s0 = sld [smem:[#allocation4 + $0x44]] }
  0xc4   : > { %9710 = vst [vmem:[#allocation124_spill] sm:$0xff] %v5148_v16  ;;  %9711 = vst [vmem:[#allocation125_spill] sm:$0xff] %v5151_v61  ;;  %v5175_v16 = vsel %vm326_vm1, 0.0, %v404_v14  ;;  %v5180_v61 = vstv %s5039_s26  ;;  %v5197_v14 = vmul.f32 %v5186_v36, %v4786_v38  ;;  %v5218_v38 = vmul.f32 %v4842_v52, %v4561_v1  ;;  %s5246_s1 = sld [smem:[#allocation4 + $0x47]] }
  0xc5   : > { %9712 = vst [vmem:[#allocation126_spill] sm:$0xff] %v5158_v8  ;;  %9713 = vst [vmem:[#allocation127_spill] sm:$0xff] %v5163_v12  ;;  %v5183_v8 = vstv %s5052_s8  ;;  %v5240_v52 = vmul.f32 %v4899_v7, %v5056_v22  ;;  %v5262_v7 = vmul.f32 %v5037_v57, %v4728_v23  ;;  %s5281_s3 = sld [smem:[#allocation4 + $0x43]] }
  0xc6   : > { %9714 = vst [vmem:[#allocation128_spill] sm:$0xff] %v5167_v31  ;;  %9715 = vst [vmem:[#allocation129_spill] sm:$0xff] %v5171_v45  ;;  %v5200_v45 = vstv %s5088_s21  ;;  %v5204_v31 = vmul.f32 %v4978_v60, %v4811_v44  ;;  %s6130_s19 = sld [smem:[#allocation4 + $0x46]] }
  0xc7   : > { %9716 = vst [vmem:[#allocation130_spill] sm:$0xff] %v5175_v16  ;;  %9717 = vst [vmem:[#allocation131_spill] sm:$0xff] %v5180_v61  ;;  %s6139_s30 = sld [smem:[#allocation9 + $0x1]] }
  0xc8   : > { %9718 = vst [vmem:[#allocation132_spill] sm:$0xff] %v5183_v8  ;;  %9719 = vst [vmem:[#allocation133_spill] sm:$0xff] %v5186_v36  ;;  %v5208_v8 = vmul.f32 %v4723_v21, %v4561_v1  ;;  %v5232_v21 = vmul.f32 %v4865_v58, %v5175_v16  ;;  %v5254_v58 = vmul.f32 %v5042_v47, %v4811_v44  ;;  %s6145_s12 = sld [smem:[#allocation9 + $0x4]] }
  0xc9   : > { %9720 = vst [vmem:[#allocation134_spill] sm:$0xff] %v5190_v2  ;;  %9721 = vst [vmem:[#allocation135_spill] sm:$0xff] %v5197_v14  ;;  %v5214_v2 = vmul.f32 %v4744_v27, %v5175_v16  ;;  %v5222_v14 = vmul.f32 %v5018_v48, %v4569_v3  ;;  %v5236_v27 = vmul.f32 %v5042_v47, %v4734_v24  ;;  %s6153_s13 = sld [smem:[#allocation9 + $0x7]] }
  0xca   : > { %9722 = vst [vmem:[#allocation136_spill] sm:$0xff] %v5200_v45  ;;  %9723 = vst [vmem:[#allocation137_spill] sm:$0xff] %v5204_v31  ;;  %v5226_v31 = vmul.f32 %v4837_v51, %v5056_v22  ;;  %v5250_v51 = vmul.f32 %v5018_v48, %v4556_v0  ;;  %v9785_v45 = vld [vmem:[#allocation55_spill] sm:$0xff]  ;;  %s6163_s24 = sld [smem:[#allocation9]] }
  0xcb   : > { %9724 = vst [vmem:[#allocation138_spill] sm:$0xff] %v5208_v8  ;;  %9725 = vst [vmem:[#allocation139_spill] sm:$0xff] %v5214_v2  ;;  %s6172_s7 = sld [smem:[#allocation9 + $0x3]] }
  0xcc   : > { %9726 = vst [vmem:[#allocation140_spill] sm:$0xff] %v5218_v38  ;;  %9727 = vst [vmem:[#allocation141_spill] sm:$0xff] %v5222_v14  ;;  %v5244_v14 = vmul.f32 %v5037_v57, %v4699_v15  ;;  %s6179_s10 = sld [smem:[#allocation9 + $0x6]] }
  0xcd   : > { %9728 = vst [vmem:[#allocation142_spill] sm:$0xff] %v5226_v31  ;;  %9729 = vst [vmem:[#allocation143_spill] sm:$0xff] %v5232_v21  ;;  %s9962_s20 = sld [smem:[#allocation23_spill]] }
  0xce   : > { %9730 = vst [vmem:[#allocation144_spill] sm:$0xff] %v5236_v27  ;;  %9731 = vst [vmem:[#allocation145_spill] sm:$0xff] %v5240_v52  ;;  %v5258_v27 = vmul.f32 %v4889_v4, %v4561_v1  ;;  %v5271_v52 = vmul.f32 %v4955_v55, %v4561_v1  ;;  %v5275_v4 = vmul.f32 %v5086_v30, %v4569_v3  ;;  %s6189_s14 = sld [smem:[#allocation9 + $0xa]] }
  0xcf   : > { %9732 = vst [vmem:[#allocation146_spill] sm:$0xff] %v5244_v14  ;;  %9733 = vst [vmem:[#allocation147_spill] sm:$0xff] %v5250_v51  ;;  %v5267_v14 = vmul.f32 %v4892_v5, %v5175_v16  ;;  %v5286_v5 = vmul.f32 %v4978_v60, %v5175_v16  ;;  %v5290_v55 = vmul.f32 %v5108_v11, %v4734_v24  ;;  %s6198_s18 = sld [smem:[#allocation9 + $0xd]] }
  0xd0   : > { %9734 = vst [vmem:[#allocation148_spill] sm:$0xff] %v5254_v58  ;;  %9735 = vst [vmem:[#allocation149_spill] sm:$0xff] %v5258_v27  ;;  %v5279_v58 = vmul.f32 %v4958_v56, %v5056_v22  ;;  %v5298_v56 = vmul.f32 %v5111_v10, %v4699_v15  ;;  %v5303_v60 = vmul.f32 %v5086_v30, %v4556_v0  ;;  %s6207_s25 = sld [smem:[#allocation9 + $0x10]] }
  0xd1   : > { %9736 = vst [vmem:[#allocation150_spill] sm:$0xff] %v5262_v7  ;;  %9737 = vst [vmem:[#allocation151_spill] sm:$0xff] %v5267_v14  ;;  %v5321_v7 = vmul.f32 %v5018_v48, %v4561_v1  ;;  %v5343_v48 = vstv %s5160_s29  ;;  %s6215_s2 = sld [smem:[#allocation9 + $0x2]] }
  0xd2   : > { %9738 = vst [vmem:[#allocation152_spill] sm:$0xff] %v5271_v52  ;;  %9739 = vst [vmem:[#allocation153_spill] sm:$0xff] %v5275_v4  ;;  %v5294_v4 = vmul.f32 %v5037_v57, %v5056_v22  ;;  %v5310_v57 = vstv %s5177_s17  ;;  %s6225_s23 = sld [smem:[#allocation9 + $0x5]] }
  0xd3   : > { %9740 = vst [vmem:[#allocation154_spill] sm:$0xff] %v5279_v58  ;;  %9741 = vst [vmem:[#allocation155_spill] sm:$0xff] %v5286_v5  ;;  %v336_v58 = vpop.permute.xlu1 %335  ;;  %v332_v5 = vpop.permute.xlu0 %331  ;;  %s6235_s5 = sld [smem:[#allocation9 + $0x8]] }
  0xd4   : > { %9742 = vst [vmem:[#allocation156_spill] sm:$0xff] %v5290_v55  ;;  %9743 = vst [vmem:[#allocation157_spill] sm:$0xff] %v5294_v4  ;;  %v5307_v55 = vmul.f32 %v5111_v10, %v4728_v23  ;;  %v5313_v4 = vstv %s5128_s22  ;;  %v5328_v23 = vstv %s5144_s27  ;;  %s6243_s6 = sld [smem:[#allocation9 + $0x13]] }
  0xd5   : > { %9744 = vst [vmem:[#allocation158_spill] sm:$0xff] %v5298_v56  ;;  %9745 = vst [vmem:[#allocation159_spill] sm:$0xff] %v5303_v60  ;;  %v5317_v56 = vmul.f32 %v5108_v11, %v4811_v44  ;;  %v5325_v60 = vmul.f32 %v5086_v30, %v4561_v1  ;;  %v5347_v30 = vmul.f32 %v5310_v57, %v5056_v22  ;;  %s6252_s9 = sld [smem:[#allocation9 + $0x16]] }
  0xd6   : > { %9746 = vst [vmem:[#allocation160_spill] sm:$0xff] %v5307_v55  ;;  %9747 = vst [vmem:[#allocation161_spill] sm:$0xff] %v5310_v57  ;;  %v5332_v55 = vmul.f32 %v5042_v47, %v5175_v16  ;;  %v5356_v47 = vstv %s5192_s11  ;;  %s6261_s26 = sld [smem:[#allocation9 + $0x19]] }
  0xd7   : > { %9748 = vst [vmem:[#allocation162_spill] sm:$0xff] %v5313_v4  ;;  %9749 = vst [vmem:[#allocation163_spill] sm:$0xff] %v5317_v56  ;;  %v5336_v4 = vmul.f32 %v5154_v6, %v4569_v3  ;;  %v5340_v56 = vmul.f32 %v5111_v10, %v5056_v22  ;;  %v5360_v3 = vmul.f32 %v5108_v11, %v5175_v16  ;;  %v338_v11 = vpop.permute.xlu0 %337  ;;  %s6270_s8 = sld [smem:[#allocation9 + $0x1c]] }
  0xd8   : > { %9750 = vst [vmem:[#allocation164_spill] sm:$0xff] %v5321_v7  ;;  %9751 = vst [vmem:[#allocation165_spill] sm:$0xff] %v5325_v60  ;;  %v5350_v60 = vstv %s5210_s16  ;;  %v5364_v10 = vmul.f32 %v5186_v36, %v4734_v24  ;;  %v5371_v22 = vmul.f32 %v5310_v57, %v4699_v15  ;;  %v5387_v24 = vmul.f32 %v5154_v6, %v4561_v1  ;;  %s6280_s15 = sld [smem:[#allocation9 + $0x9]] }
  0xd9   : > { %9752 = vst [vmem:[#allocation166_spill] sm:$0xff] %v5328_v23  ;;  %9753 = vst [vmem:[#allocation167_spill] sm:$0xff] %v5332_v55  ;;  %v5353_v23 = vstv %s5228_s0  ;;  %v334_v55 = vpop.permute.xlu1 %333  ;;  %v5404_v1 = vmul.f32 %v5310_v57, %v4715_v19  ;;  %s6287_s21 = sld [smem:[#allocation9 + $0xc]] }
  0xda   : > { %9754 = vst [vmem:[#allocation168_spill] sm:$0xff] %v5336_v4  ;;  %9755 = vst [vmem:[#allocation169_spill] sm:$0xff] %v5340_v56  ;;  %s6297_s22 = sld [smem:[#allocation9 + $0xf]] }
  0xdb   : > { %9756 = vst [vmem:[#allocation170_spill] sm:$0xff] %v5343_v48  ;;  %9757 = vst [vmem:[#allocation171_spill] sm:$0xff] %v5347_v30  ;;  %v5367_v48 = vstv %s5246_s1  ;;  %v5383_v30 = vmul.f32 %v5154_v6, %v4556_v0  ;;  %v343_v0 = vsel %vm339_vm2, %v338_v11, %v332_v5  ;;  %s6306_s27 = sld [smem:[#allocation9 + $0xb]] }
  0xdc   : > { %9758 = vst [vmem:[#allocation172_spill] sm:$0xff] %v5350_v60  ;;  %9759 = vst [vmem:[#allocation173_spill] sm:$0xff] %v5353_v23  ;;  %v5375_v23 = vsel %vm339_vm2, %v334_v55, %v336_v58  ;;  %v5398_v60 = vsel %vm339_vm2, %v336_v58, %v338_v11  ;;  %v5428_v11 = vsel %vm317_vm3, 0.0, %v343_v0  ;;  %s6316_s29 = sld [smem:[#allocation9 + $0xe]] }
  0xdd   : > { %9760 = vst [vmem:[#allocation174_spill] sm:$0xff] %v5356_v47  ;;  %9761 = vst [vmem:[#allocation175_spill] sm:$0xff] %v5360_v3  ;;  %v5379_v47 = vsel %vm339_vm2, %v332_v5, %v334_v55  ;;  %v375_v55 = vrot.slane %v5375_v23, 1  ;;  %v5416_v58 = vmul.f32 %v4749_v28, %v5375_v23  ;;  %v5420_v5 = vmul.f32 %v5186_v36, %v4811_v44  ;;  %s6324_s17 = sld [smem:[#allocation9 + $0x11]] }
  0xde   : > { %9762 = vst [vmem:[#allocation176_spill] sm:$0xff] %v5364_v10  ;;  %9763 = vst [vmem:[#allocation177_spill] sm:$0xff] %v5367_v48  ;;  %v357_v15 = vrot.slane %v5379_v47, 7  ;;  %v374_v48 = vrot.slane %v5379_v47, 1  ;;  %v5393_v10 = vstv %s5281_s3  ;;  %v376_v57 = vrot.slane %v5398_v60, 1  ;;  %s6332_s11 = sld [smem:[#allocation9 + $0x12]] }
  0xdf   : > { %9764 = vst [vmem:[#allocation178_spill] sm:$0xff] %v5371_v22  ;;  %9765 = vst [vmem:[#allocation179_spill] sm:$0xff] %v5379_v47  ;;  %v358_v22 = vrot.slane %v5375_v23, 7  ;;  %v356_v44 = vrot.slane %v5428_v11, 7  ;;  %v5442_v0 = vsel %vm326_vm1, 0.0, %v375_v55  ;;  %s6342_s16 = sld [smem:[#allocation9 + $0x15]] }
  0xe0   : > { %9766 = vst [vmem:[#allocation180_spill] sm:$0xff] %v5383_v30  ;;  %9767 = vst [vmem:[#allocation181_spill] sm:$0xff] %v5387_v24  ;;  %v5408_v6 = vsel %vm325_vm0, 0.0, %v357_v15  ;;  %v424_v24 = vpop.permute.xlu1 %423  ;;  %v359_v15 = vrot.slane %v5398_v60, 7  ;;  %v5434_v16 = vsel %vm326_vm1, 0.0, %v374_v48  ;;  %v2038_v48 = vmul.f32 %v4749_v28, %v5398_v60  ;;  %s6352_s0 = sld [smem:[#allocation9 + $0x18]] }
  0xe1   : > { %9768 = vst [vmem:[#allocation182_spill] sm:$0xff] %v5393_v10  ;;  %9769 = vst [vmem:[#allocation183_spill] sm:$0xff] %v5404_v1  ;;  %v5412_v10 = vmul.f32 %v4749_v28, %v5379_v47  ;;  %v5424_v19 = vsel %vm325_vm0, 0.0, %v358_v22  ;;  %v418_v1 = vpop.permute.xlu0 %417  ;;  %v5456_v3 = vsel %vm326_vm1, 0.0, %v376_v57  ;;  %v5464_v7 = vsel %vm325_vm0, 0.0, %v356_v44  ;;  %s6363_s1 = sld [smem:[#allocation9 + $0x14]] }
  0xe2   : > { %9770 = vst [vmem:[#allocation184_spill] sm:$0xff] %v5408_v6  ;;  %9771 = vst [vmem:[#allocation185_spill] sm:$0xff] %v5420_v5  ;;  %v373_v5 = vrot.slane %v5428_v11, 1  ;;  %v429_v22 = vsel %vm425_vm4, %v424_v24, %v418_v1  ;;  %v5446_v36 = vsel %vm325_vm0, 0.0, %v359_v15  ;;  %v1994_v15 = vmul.f32 %v4720_v20, %v5408_v6  ;;  %s6374_s3 = sld [smem:[#allocation9 + $0x17]] }
  0xe3   : > { %9772 = vst [vmem:[#allocation186_spill] sm:$0xff] %v5428_v11  ;;  %9773 = vst [vmem:[#allocation187_spill] sm:$0xff] %v5434_v16  ;;  %v5450_v30 = vsel %vm324_vm5, 0.0, %v429_v22  ;;  %v1996_v57 = vmul.f32 %v4720_v20, %v5446_v36  ;;  %v5474_v52 = vmul.f32 %v4769_v34, %v5434_v16 }
  0xe4   : > { %v445_v56 = vrot.slane %v5450_v30, 7  ;;  %v463_v55 = vrot.slane %v5450_v30, 1  ;;  %v422_v4 = vpop.permute.xlu1 %421  ;;  %9774 = vst [vmem:[#allocation188_spill] sm:$0xff] %v5464_v7  ;;  %v5478_v27 = vsel %vm326_vm1, 0.0, %v373_v5 }
  0xe5   : > { %v5468_v22 = vsel %vm425_vm4, %v422_v4, %v424_v24  ;;  %v420_v14 = vpop.permute.xlu0 %419  ;;  %9775 = vst [vmem:[#allocation189_spill] sm:$0xff] %v5478_v27  ;;  %v2000_v2 = vadd.f32 %v1996_v57, %v4711_v18  ;;  %v2080_v57 = vmul.f32 %v4769_v34, %v5456_v3 }
  0xe6   : > { %v5482_v44 = vsel %vm325_vm0, 0.0, %v445_v56  ;;  %v444_v21 = vrot.slane %v5468_v22, 7  ;;  %v462_v24 = vrot.slane %v5468_v22, 1  ;;  %v5488_v51 = vsel %vm425_vm4, %v420_v14, %v422_v4 }
  0xe7   : > { %9776 = vst [vmem:[#allocation190_spill] sm:$0xff] %v5488_v51  ;;  %v5492_v31 = vsel %vm425_vm4, %v418_v1, %v420_v14  ;;  %v2024_v5 = vmul.f32 %v4741_v26, %v5482_v44  ;;  %v5499_v56 = vsel %vm326_vm1, 0.0, %v463_v55  ;;  %v443_v8 = vrot.slane %v5488_v51, 7 }
  0xe8   : > { %9777 = vst [vmem:[#allocation191_spill] sm:$0xff] %v5492_v31  ;;  %v442_v38 = vrot.slane %v5492_v31, 7  ;;  %v2066_v4 = vmul.f32 %v4766_v33, %v5450_v30  ;;  %v460_v17 = vrot.slane %v5492_v31, 1  ;;  %v461_v14 = vrot.slane %v5488_v51, 1 }
  0xe9   : > { %v2014_v1 = vadd.f32 %v4738_v25, %v2000_v2  ;;  %v5512_v55 = vsel %vm325_vm0, 0.0, %v444_v21  ;;  %v5516_v27 = vsel %vm326_vm1, 0.0, %v462_v24  ;;  %v5520_v28 = vsel %vm325_vm0, 0.0, %v443_v8 }
  0xea   : > { %9778 = vst [vmem:[#allocation192_spill] sm:$0xff] %v5520_v28  ;;  %v1998_v31 = vadd.f32 %v1994_v15, %v4711_v18  ;;  %v5525_v25 = vsel %vm326_vm1, 0.0, %v461_v14  ;;  %v2108_v11 = vmul.f32 %v4782_v37, %v5499_v56  ;;  %v2022_v21 = vmul.f32 %v4741_v26, %v5520_v28 }
  0xeb   : > { %9779 = vst [vmem:[#allocation193_spill] sm:$0xff] %v5525_v25  ;;  %v2028_v2 = vadd.f32 %v2024_v5, %v2014_v1  ;;  %v5533_v24 = vsel %vm325_vm0, 0.0, %v442_v38  ;;  %v2064_v15 = vmul.f32 %v4766_v33, %v5488_v51  ;;  %v1995_v14 = vmul.f32 %v4720_v20, %v5424_v19 }
  0xec   : > { %9780 = vst [vmem:[#allocation194_spill] sm:$0xff] %v5533_v24  ;;  %v2012_v8 = vadd.f32 %v4753_v29, %v1998_v31  ;;  %v5542_v5 = vsel %vm326_vm1, 0.0, %v460_v17  ;;  %v2106_v7 = vmul.f32 %v4782_v37, %v5525_v25  ;;  %v2023_v38 = vmul.f32 %v4741_v26, %v5512_v55 }
  0xed   : > { %9781 = vst [vmem:[#allocation195_spill] sm:$0xff] %v5542_v5  ;;  %v2042_v1 = vadd.f32 %v2038_v48, %v2028_v2  ;;  %v1999_v29 = vadd.f32 %v1995_v14, %v4711_v18  ;;  %v2065_v31 = vmul.f32 %v4766_v33, %v5468_v22  ;;  %v2240_v20 = vmul.f32 %v4798_v41, %v5408_v6 }
  0xee   : > { %v2026_v24 = vadd.f32 %v2022_v21, %v2012_v8  ;;  %v2079_v17 = vmul.f32 %v4769_v34, %v5442_v0  ;;  %v2107_v48 = vmul.f32 %v4782_v37, %v5516_v27  ;;  %v2260_v2 = vmul.f32 %v4805_v43, %v5520_v28 }
  0xef   : > { %v2056_v9 = vadd.f32 %v4763_v32, %v2042_v1  ;;  %v2013_v8 = vadd.f32 %v4773_v35, %v1999_v29  ;;  %v2244_v14 = vadd.f32 %v2240_v20, %v4789_v39  ;;  %v2270_v5 = vmul.f32 %v4818_v46, %v5379_v47 }
  0xf0   : > { %v2040_v21 = vadd.f32 %v5412_v10, %v2026_v24  ;;  %v2290_v32 = vmul.f32 %v4831_v49, %v5488_v51  ;;  %v2300_v1 = vmul.f32 %v4834_v50, %v5434_v16  ;;  %v2454_v37 = vmul.f32 %v4868_v59, %v5408_v6 }
  0xf1   : > { %v2070_v33 = vadd.f32 %v2066_v4, %v2056_v9  ;;  %v2027_v10 = vadd.f32 %v2023_v38, %v2013_v8  ;;  %v2254_v35 = vadd.f32 %v4802_v42, %v2244_v14  ;;  %v2320_v20 = vmul.f32 %v4845_v53, %v5525_v25  ;;  %v9782_v42 = vld [vmem:[#allocation51_spill] sm:$0xff] }
  0xf2   : > { %v2054_v34 = vadd.f32 %v4795_v40, %v2040_v21  ;;  %v2458_v9 = vadd.f32 %v2454_v37, %v4848_v54  ;;  %v2474_v4 = vmul.f32 %v4881_v62, %v5520_v28  ;;  %v2484_v29 = vmul.f32 %v4884_v63, %v5379_v47  ;;  %v9783_v21 = vld [vmem:[#allocation68_spill] sm:$0xff] }
  0xf3   : > { %v2084_v24 = vadd.f32 %v2080_v57, %v2070_v33  ;;  %v2041_v18 = vadd.f32 %v5416_v58, %v2027_v10  ;;  %v2264_v13 = vadd.f32 %v2260_v2, %v2254_v35  ;;  %v2242_v40 = vmul.f32 %v4798_v41, %v5446_v36  ;;  %v9784_v33 = vld [vmem:[#allocation73_spill] sm:$0xff]  ;;  %v9787_v35 = vld [vmem:[#allocation74_spill] sm:$0xff] }
  0xf4   : > { %v2068_v26 = vadd.f32 %v2064_v15, %v2054_v34  ;;  %v2468_v8 = vadd.f32 %v9783_v21, %v2458_v9  ;;  %v2504_v37 = vmul.f32 %v9784_v33, %v5488_v51  ;;  %v2262_v57 = vmul.f32 %v4805_v43, %v5482_v44  ;;  %v9788_v9 = vld [vmem:[#allocation76_spill] sm:$0xff]  ;;  %v9789_v21 = vld [vmem:[#allocation58_spill] sm:$0xff]  ;;  %v9790_v33 = vld [vmem:[#allocation65_spill] sm:$0xff] }
  0xf5   : > { %v2098_v38 = vadd.f32 %v9782_v42, %v2084_v24  ;;  %v2055_v34 = vadd.f32 %v9785_v45, %v2041_v18  ;;  %v2274_v15 = vadd.f32 %v2270_v5, %v2264_v13  ;;  %v2246_v58 = vadd.f32 %v2242_v40, %v4789_v39 }
  0xf6   : > { %v2082_v14 = vadd.f32 %v5474_v52, %v2068_v26  ;;  %v2478_v10 = vadd.f32 %v2474_v4, %v2468_v8  ;;  %v2514_v24 = vmul.f32 %v9787_v35, %v5434_v16  ;;  %v2534_v42 = vmul.f32 %v9788_v9, %v5525_v25  ;;  %v9791_v26 = vld [vmem:[#allocation57_spill] sm:$0xff] }
  0xf7   : > { %v5592_v2 = vadd.f32 %v2108_v11, %v2098_v38  ;;  %v2069_v12 = vadd.f32 %v2065_v31, %v2055_v34  ;;  %v2284_v63 = vadd.f32 %v9790_v33, %v2274_v15  ;;  %v2256_v52 = vadd.f32 %v9791_v26, %v2246_v58  ;;  %v9794_v38 = vld [vmem:[#allocation72_spill] sm:$0xff]  ;;  %v9798_v58 = vld [vmem:[#allocation81_spill] sm:$0xff]  ;;  %v9800_v26 = vld [vmem:[#allocation67_spill] sm:$0xff] }
  0xf8   : > { %v2096_v61 = vadd.f32 %v9789_v21, %v2082_v14  ;;  %v2488_v13 = vadd.f32 %v2484_v29, %v2478_v10  ;;  %v2272_v18 = vmul.f32 %v4818_v46, %v5398_v60  ;;  %v2292_v45 = vmul.f32 %v4831_v49, %v5450_v30  ;;  %v9795_v34 = vld [vmem:[#allocation64_spill] sm:$0xff] }
  0xf9   : > { %9786 = vst [vmem:[#allocation51_spill] sm:$0xff] %v5592_v2  ;;  %2119 = vrot.lane.b32.xlu0 %v5592_v2, %s9792_s4  ;;  %v2241_v11 = vmul.f32 %v4798_v41, %v5424_v19  ;;  %v2083_v31 = vadd.f32 %v2079_v17, %v2069_v12  ;;  %v2294_v4 = vadd.f32 %v2290_v32, %v2284_v63  ;;  %v9797_v17 = vld [vmem:[#allocation63_spill] sm:$0xff] }
  0xfa   : > { %v5609_v5 = vadd.f32 %v2106_v7, %v2096_v61  ;;  %v2266_v40 = vadd.f32 %v2262_v57, %v2256_v52  ;;  %v2498_v8 = vadd.f32 %v9794_v38, %v2488_v13  ;;  %v2302_v33 = vmul.f32 %v4834_v50, %v5456_v3  ;;  %v9801_v52 = vld [vmem:[#allocation71_spill] sm:$0xff] }
  0xfb   : > { %v2245_v29 = vadd.f32 %v2241_v11, %v4789_v39  ;;  %v2261_v14 = vmul.f32 %v4805_v43, %v5512_v55  ;;  %v2097_v15 = vadd.f32 %v9795_v34, %v2083_v31  ;;  %v2304_v61 = vadd.f32 %v2300_v1, %v2294_v4 }
  0xfc   : > { %9793 = vst [vmem:[#allocation68_spill] sm:$0xff] %v5609_v5  ;;  %2115 = vrot.lane.b32.xlu1 %v5609_v5, %s9792_s4  ;;  %v2276_v7 = vadd.f32 %v2272_v18, %v2266_v40  ;;  %v2322_v63 = vmul.f32 %v4845_v53, %v5499_v56  ;;  %v2508_v12 = vadd.f32 %v2504_v37, %v2498_v8  ;;  %v9802_v37 = vld [vmem:[#allocation78_spill] sm:$0xff]  ;;  %v9803_v40 = vld [vmem:[#allocation83_spill] sm:$0xff] }
  0xfd   : > { %2191 = vrot.lane.b32.xlu0 %v5609_v5, %s9796_s28  ;;  %v2255_v32 = vadd.f32 %v9797_v17, %v2245_v29  ;;  %v2271_v57 = vmul.f32 %v4818_v46, %v5375_v23  ;;  %v2668_v10 = vmul.f32 %v9798_v58, %v5408_v6  ;;  %v5629_v21 = vadd.f32 %v2107_v48, %v2097_v15  ;;  %v9805_v15 = vld [vmem:[#allocation75_spill] sm:$0xff] }
  0xfe   : > { %v2314_v1 = vadd.f32 %v9800_v26, %v2304_v61  ;;  %v2286_v13 = vadd.f32 %v9801_v52, %v2276_v7  ;;  %v2291_v18 = vmul.f32 %v4831_v49, %v5468_v22  ;;  %v2518_v11 = vadd.f32 %v2514_v24, %v2508_v12  ;;  %v9806_v61 = vld [vmem:[#allocation82_spill] sm:$0xff]  ;;  %v9807_v12 = vld [vmem:[#allocation84_spill] sm:$0xff] }
  0xff   : > { %9799 = vst [vmem:[#allocation55_spill] sm:$0xff] %v5629_v21  ;;  %v2265_v31 = vadd.f32 %v2261_v14, %v2255_v32  ;;  %v2672_v4 = vadd.f32 %v2668_v10, %v9802_v37  ;;  %v2688_v38 = vmul.f32 %v9803_v40, %v5520_v28  ;;  %v2301_v29 = vmul.f32 %v4834_v50, %v5442_v0  ;;  %v9809_v10 = vld [vmem:[#allocation89_spill] sm:$0xff] }
 0x100   : > { %2117 = vrot.lane.b32.xlu1 %v5629_v21, %s9792_s4  ;;  %v5640_v8 = vadd.f32 %v2320_v20, %v2314_v1  ;;  %v2296_v48 = vadd.f32 %v2292_v45, %v2286_v13  ;;  %v2321_v34 = vmul.f32 %v4845_v53, %v5516_v27  ;;  %v2528_v24 = vadd.f32 %v9805_v15, %v2518_v11  ;;  %v9808_v45 = vld [vmem:[#allocation88_spill] sm:$0xff]  ;;  %v9810_v1 = vld [vmem:[#allocation93_spill] sm:$0xff] }
 0x101   : > { %v2275_v14 = vadd.f32 %v2271_v57, %v2265_v31  ;;  %v2682_v7 = vadd.f32 %v9806_v61, %v2672_v4  ;;  %v2698_v17 = vmul.f32 %v9807_v12, %v5379_v47  ;;  %v2718_v32 = vmul.f32 %v9808_v45, %v5488_v51  ;;  %v9811_v13 = vld [vmem:[#allocation80_spill] sm:$0xff]  ;;  %v9812_v31 = vld [vmem:[#allocation91_spill] sm:$0xff] }
 0x102   : > { %9804 = vst [vmem:[#allocation58_spill] sm:$0xff] %v5640_v8  ;;  %2329 = vrot.lane.b32.xlu0 %v5640_v8, %s9792_s4  ;;  %v2306_v20 = vadd.f32 %v2302_v33, %v2296_v48  ;;  %v2728_v26 = vmul.f32 %v9809_v10, %v5434_v16  ;;  %v2882_v52 = vmul.f32 %v9810_v1, %v5408_v6  ;;  %v9813_v15 = vld [vmem:[#allocation96_spill] sm:$0xff]  ;;  %v9815_v48 = vld [vmem:[#allocation77_spill] sm:$0xff] }
 0x103   : > { %v2285_v57 = vadd.f32 %v9811_v13, %v2275_v14  ;;  %v2692_v11 = vadd.f32 %v2688_v38, %v2682_v7  ;;  %v2748_v4 = vmul.f32 %v9812_v31, %v5525_v25  ;;  %v2902_v61 = vmul.f32 %v9813_v15, %v5520_v28  ;;  %v9816_v53 = vld [vmem:[#allocation92_spill] sm:$0xff]  ;;  %v9817_v1 = vld [vmem:[#allocation97_spill] sm:$0xff] }
 0x104   : > { %2195 = vrot.lane.b32.xlu1 %v5592_v2, %s9796_s28  ;;  %v5665_v33 = vadd.f32 %v2534_v42, %v2528_v24  ;;  %v2316_v5 = vadd.f32 %v9815_v48, %v2306_v20  ;;  %v2886_v50 = vadd.f32 %v2882_v52, %v9816_v53  ;;  %v2912_v49 = vmul.f32 %v9817_v1, %v5379_v47  ;;  %v9818_v7 = vld [vmem:[#allocation100_spill] sm:$0xff]  ;;  %v9819_v42 = vld [vmem:[#allocation94_spill] sm:$0xff]  ;;  %v9820_v20 = vld [vmem:[#allocation101_spill] sm:$0xff] }
 0x105   : > { %v2295_v14 = vadd.f32 %v2291_v18, %v2285_v57  ;;  %v2702_v38 = vadd.f32 %v2698_v17, %v2692_v11  ;;  %v2932_v13 = vmul.f32 %v9818_v7, %v5488_v51  ;;  %v2456_v15 = vmul.f32 %v4868_v59, %v5446_v36  ;;  %v9821_v52 = vld [vmem:[#allocation105_spill] sm:$0xff]  ;;  %v9823_v11 = vld [vmem:[#allocation87_spill] sm:$0xff] }
 0x106   : > { %9814 = vst [vmem:[#allocation65_spill] sm:$0xff] %v5665_v33  ;;  %2405 = vrot.lane.b32.xlu0 %v5640_v8, %s9796_s28  ;;  %v2896_v24 = vadd.f32 %v9819_v42, %v2886_v50  ;;  %v2942_v48 = vmul.f32 %v9820_v20, %v5434_v16  ;;  %v5682_v2 = vmul.f32 %v9821_v52, %v5525_v25  ;;  %v9824_v42 = vld [vmem:[#allocation70_spill] sm:$0xff]  ;;  %v9825_v52 = vld [vmem:[#allocation73_spill] sm:$0xff] }
 0x107   : > { %v2476_v18 = vmul.f32 %v4881_v62, %v5482_v44  ;;  %v5686_v17 = vadd.f32 %v2322_v63, %v2316_v5  ;;  %v2305_v57 = vadd.f32 %v2301_v29, %v2295_v14  ;;  %v2712_v7 = vadd.f32 %v9823_v11, %v2702_v38  ;;  %v9826_v5 = vld [vmem:[#allocation86_spill] sm:$0xff]  ;;  %v9827_v14 = vld [vmem:[#allocation79_spill] sm:$0xff] }
 0x108   : > { %v2460_v1 = vadd.f32 %v2456_v15, %v4848_v54  ;;  %2193 = vrot.lane.b32.xlu1 %v5629_v21, %s9796_s28  ;;  %v2906_v50 = vadd.f32 %v2902_v61, %v2896_v24  ;;  %v2486_v8 = vmul.f32 %v9824_v42, %v5398_v60  ;;  %v2506_v20 = vmul.f32 %v9825_v52, %v5450_v30 }
 0x109   : > { %9822 = vst [vmem:[#allocation57_spill] sm:$0xff] %v5686_v17  ;;  %v2455_v53 = vmul.f32 %v4868_v59, %v5424_v19  ;;  %v2315_v63 = vadd.f32 %v9826_v5, %v2305_v57  ;;  %v2722_v29 = vadd.f32 %v2718_v32, %v2712_v7  ;;  %v2516_v15 = vmul.f32 %v9787_v35, %v5456_v3  ;;  %v9829_v5 = vld [vmem:[#allocation85_spill] sm:$0xff] }
 0x10a   : > { %v2470_v38 = vadd.f32 %v9827_v14, %v2460_v1  ;;  %2543 = vrot.lane.b32.xlu0 %v5665_v33, %s9792_s4  ;;  %v2916_v61 = vadd.f32 %v2912_v49, %v2906_v50  ;;  %v5706_v24 = vmul.f32 %v9788_v9, %v5499_v56  ;;  %v2475_v21 = vmul.f32 %v4881_v62, %v5512_v55  ;;  %v9828_v49 = vld [vmem:[#allocation99_spill] sm:$0xff] }
 0x10b   : > { %v2459_v11 = vadd.f32 %v2455_v53, %v4848_v54  ;;  %v2732_v57 = vadd.f32 %v2728_v26, %v2722_v29  ;;  %v2485_v1 = vmul.f32 %v9824_v42, %v5375_v23  ;;  %v2505_v7 = vmul.f32 %v9825_v52, %v5468_v22  ;;  %v9830_v54 = vld [vmem:[#allocation109_spill] sm:$0xff]  ;;  %v9832_v29 = vld [vmem:[#allocation90_spill] sm:$0xff] }
 0x10c   : > { %v2480_v32 = vadd.f32 %v2476_v18, %v2470_v38  ;;  %2333 = vrot.lane.b32.xlu1 %v5686_v17, %s9792_s4  ;;  %v2926_v50 = vadd.f32 %v9828_v49, %v2916_v61  ;;  %v2515_v53 = vmul.f32 %v9787_v35, %v5442_v0  ;;  %v3096_v26 = vmul.f32 %v9830_v54, %v5408_v6  ;;  %v9833_v49 = vld [vmem:[#allocation106_spill] sm:$0xff]  ;;  %v9834_v35 = vld [vmem:[#allocation111_spill] sm:$0xff]  ;;  %v5735_v54 = vpop.permute.xlu1 %479 }
 0x10d   : > { %v2469_v14 = vadd.f32 %v9829_v5, %v2459_v11  ;;  %v5723_v18 = vadd.f32 %v2321_v34, %v2315_v63  ;;  %v2742_v38 = vadd.f32 %v9832_v29, %v2732_v57  ;;  %v5728_v52 = vmul.f32 %v9788_v9, %v5516_v27  ;;  %v9835_v34 = vld [vmem:[#allocation95_spill] sm:$0xff]  ;;  %v9838_v9 = vld [vmem:[#allocation121_spill] sm:$0xff] }
 0x10e   : > { %v2490_v42 = vadd.f32 %v2486_v8, %v2480_v32  ;;  %2619 = vrot.lane.b32.xlu0 %v5665_v33, %s9796_s28  ;;  %v2936_v61 = vadd.f32 %v2932_v13, %v2926_v50  ;;  %v3100_v5 = vadd.f32 %v3096_v26, %v9833_v49  ;;  %v3116_v62 = vmul.f32 %v9834_v35, %v5520_v28  ;;  %v9836_v8 = vld [vmem:[#allocation112_spill] sm:$0xff]  ;;  %v9837_v32 = vld [vmem:[#allocation115_spill] sm:$0xff]  ;;  %v478_v13 = vpop.permute.xlu0 %477  ;;  %v9840_v26 = vld [vmem:[#allocation110_spill] sm:$0xff] }
 0x10f   : > { %9831 = vst [vmem:[#allocation72_spill] sm:$0xff] %v5723_v18  ;;  %v2479_v11 = vadd.f32 %v2475_v21, %v2469_v14  ;;  %v3126_v57 = vmul.f32 %v9836_v8, %v5379_v47  ;;  %v3146_v29 = vmul.f32 %v9837_v32, %v5488_v51  ;;  %v3310_v33 = vmul.f32 %v9838_v9, %v5408_v6  ;;  %v9842_v35 = vld [vmem:[#allocation120_spill] sm:$0xff]  ;;  %v9843_v32 = vld [vmem:[#allocation125_spill] sm:$0xff] }
 0x110   : > { %v2500_v63 = vadd.f32 %v9835_v34, %v2490_v42  ;;  %2331 = vrot.lane.b32.xlu1 %v5723_v18, %s9792_s4  ;;  %v5746_v21 = vadd.f32 %v2748_v4, %v2742_v38  ;;  %v2946_v50 = vadd.f32 %v2942_v48, %v2936_v61  ;;  %v3110_v49 = vadd.f32 %v9840_v26, %v3100_v5  ;;  %v9841_v34 = vld [vmem:[#allocation116_spill] sm:$0xff]  ;;  %v9845_v4 = vld [vmem:[#allocation103_spill] sm:$0xff] }
 0x111   : > { %v2489_v14 = vadd.f32 %v2485_v1, %v2479_v11  ;;  %v3156_v8 = vmul.f32 %v9841_v34, %v5434_v16  ;;  %v3314_v59 = vadd.f32 %v3310_v33, %v9842_v35  ;;  %v3330_v46 = vmul.f32 %v9843_v32, %v5520_v28  ;;  %v9844_v6 = vld [vmem:[#allocation104_spill] sm:$0xff]  ;;  %v9846_v1 = vld [vmem:[#allocation118_spill] sm:$0xff] }
 0x112   : > { %9839 = vst [vmem:[#allocation64_spill] sm:$0xff] %v5746_v21  ;;  %v2510_v42 = vadd.f32 %v2506_v20, %v2500_v63  ;;  %2757 = vrot.lane.b32.xlu0 %v5746_v21, %s9792_s4  ;;  %v2956_v9 = vadd.f32 %v9844_v6, %v2946_v50  ;;  %v3120_v48 = vadd.f32 %v3116_v62, %v3110_v49  ;;  %v9847_v11 = vld [vmem:[#allocation124_spill] sm:$0xff]  ;;  %v9848_v63 = vld [vmem:[#allocation127_spill] sm:$0xff] }
 0x113   : > { %v2499_v38 = vadd.f32 %v9845_v4, %v2489_v14  ;;  %v3176_v61 = vmul.f32 %v9846_v1, %v5525_v25  ;;  %v3324_v5 = vadd.f32 %v9847_v11, %v3314_v59  ;;  %v3340_v33 = vmul.f32 %v9848_v63, %v5379_v47  ;;  %v9849_v50 = vld [vmem:[#allocation131_spill] sm:$0xff]  ;;  %v9850_v49 = vld [vmem:[#allocation132_spill] sm:$0xff] }
 0x114   : > { %v2520_v20 = vadd.f32 %v2516_v15, %v2510_v42  ;;  %v2670_v26 = vmul.f32 %v9798_v58, %v5446_v36  ;;  %2409 = vrot.lane.b32.xlu1 %v5686_v17, %s9796_s28  ;;  %v3130_v6 = vadd.f32 %v3126_v57, %v3120_v48  ;;  %v3360_v62 = vmul.f32 %v9849_v50, %v5488_v51  ;;  %v484_v15 = vpop.permute.xlu1 %483  ;;  %v9851_v59 = vld [vmem:[#allocation136_spill] sm:$0xff]  ;;  %v482_v17 = vpop.permute.xlu0 %481  ;;  %v9853_v57 = vld [vmem:[#allocation102_spill] sm:$0xff]  ;;  %v9886_v50 = vld [vmem:[#allocation129_spill] sm:$0xff] }
 0x115   : > { %v2509_v28 = vadd.f32 %v2505_v7, %v2499_v38  ;;  %v3370_v14 = vmul.f32 %v9850_v49, %v5434_v16  ;;  %v3334_v42 = vadd.f32 %v3330_v46, %v3324_v5  ;;  %v5773_v4 = vmul.f32 %v9851_v59, %v5525_v25  ;;  %v9854_v46 = vld [vmem:[#allocation113_spill] sm:$0xff]  ;;  %v9855_v25 = vld [vmem:[#allocation98_spill] sm:$0xff] }
 0x116   : > { %v2674_v11 = vadd.f32 %v2670_v26, %v9802_v37  ;;  %v2690_v47 = vmul.f32 %v9803_v40, %v5482_v44  ;;  %2833 = vrot.lane.b32.xlu0 %v5746_v21, %s9796_s28  ;;  %v5781_v7 = vadd.f32 %v5682_v2, %v2956_v9  ;;  %v2530_v38 = vadd.f32 %v9853_v57, %v2520_v20  ;;  %v9856_v21 = vld [vmem:[#allocation108_spill] sm:$0xff] }
 0x117   : > { %v2519_v48 = vadd.f32 %v2515_v53, %v2509_v28  ;;  %v3140_v5 = vadd.f32 %v9854_v46, %v3130_v6  ;;  %v3344_v16 = vadd.f32 %v3340_v33, %v3334_v42  ;;  %v2700_v26 = vmul.f32 %v9807_v12, %v5398_v60  ;;  %v9859_v53 = vld [vmem:[#allocation128_spill] sm:$0xff] }
 0x118   : > { %9852 = vst [vmem:[#allocation63_spill] sm:$0xff] %v5781_v7  ;;  %v2684_v51 = vadd.f32 %v9855_v25, %v2674_v11  ;;  %v2720_v59 = vmul.f32 %v9808_v45, %v5450_v30  ;;  %2407 = vrot.lane.b32.xlu1 %v5723_v18, %s9796_s28  ;;  %v5796_v28 = vsel %vm339_vm2, %v478_v13, %v5735_v54 }
 0x119   : > { %v2529_v2 = vadd.f32 %v9856_v21, %v2519_v48  ;;  %v3150_v9 = vadd.f32 %v3146_v29, %v3140_v5  ;;  %9858 = vst [vmem:[#allocation81_spill] sm:$0xff] %v5796_v28  ;;  %v488_v25 = vsel %vm339_vm2, %v484_v15, %v478_v13  ;;  %v3354_v33 = vadd.f32 %v9859_v53, %v3344_v16  ;;  %v494_v5 = vpop.permute.xlu0 %493  ;;  %v9874_v28 = vld [vmem:[#allocation47_spill] sm:$0xff] }
 0x11a   : > { %v2694_v6 = vadd.f32 %v2690_v47, %v2684_v51  ;;  %v2730_v42 = vmul.f32 %v9809_v10, %v5456_v3  ;;  %v2669_v11 = vmul.f32 %v9798_v58, %v5424_v19  ;;  %2971 = vrot.lane.b32.xlu0 %v5781_v7, %s9792_s4  ;;  %v5808_v29 = vadd.f32 %v5706_v24, %v2530_v38  ;;  %v496_v51 = vpop.permute.xlu1 %495 }
 0x11b   : > { %v3160_v21 = vadd.f32 %v3156_v8, %v3150_v9  ;;  %v2750_v57 = vmul.f32 %v9812_v31, %v5499_v56  ;;  %v5814_v16 = vsel %vm317_vm3, 0.0, %v488_v25  ;;  %v3364_v47 = vadd.f32 %v3360_v62, %v3354_v33  ;;  %v9863_v8 = vld [vmem:[#allocation117_spill] sm:$0xff]  ;;  %v9865_v25 = vld [vmem:[#allocation119_spill] sm:$0xff] }
 0x11c   : > { %9860 = vst [vmem:[#allocation67_spill] sm:$0xff] %v5808_v29  ;;  %9861 = vst [vmem:[#allocation71_spill] sm:$0xff] %v5814_v16  ;;  %v2704_v13 = vadd.f32 %v2700_v26, %v2694_v6  ;;  %v2673_v48 = vadd.f32 %v2669_v11, %v9802_v37  ;;  %v2689_v46 = vmul.f32 %v9803_v40, %v5512_v55  ;;  %2547 = vrot.lane.b32.xlu1 %v5808_v29, %s9792_s4  ;;  %v9866_v33 = vld [vmem:[#allocation107_spill] sm:$0xff] }
 0x11d   : > { %v5822_v24 = vadd.f32 %v5728_v52, %v2529_v2  ;;  %v3170_v38 = vadd.f32 %v9863_v8, %v3160_v21  ;;  %v2699_v9 = vmul.f32 %v9807_v12, %v5375_v23  ;;  %v5829_v62 = vsel %vm339_vm2, %v482_v17, %v484_v15  ;;  %v9868_v2 = vld [vmem:[#allocation188_spill] sm:$0xff] }
 0x11e   : > { %9864 = vst [vmem:[#allocation83_spill] sm:$0xff] %v5829_v62  ;;  %v3374_v26 = vadd.f32 %v3370_v14, %v3364_v47  ;;  %v2714_v53 = vadd.f32 %v9865_v25, %v2704_v13  ;;  %v2683_v6 = vadd.f32 %v9866_v33, %v2673_v48  ;;  %v5836_v11 = vsel %vm339_vm2, %v5735_v54, %v482_v17  ;;  %v9869_v21 = vld [vmem:[#allocation44_spill] sm:$0xff]  ;;  %v9871_v54 = vld [vmem:[#allocation135_spill] sm:$0xff]  ;;  %v9875_v62 = vld [vmem:[#allocation186_spill] sm:$0xff] }
 0x11f   : > { %9862 = vst [vmem:[#allocation78_spill] sm:$0xff] %v5822_v24  ;;  %9867 = vst [vmem:[#allocation75_spill] sm:$0xff] %v5836_v11  ;;  %3047 = vrot.lane.b32.xlu0 %v5781_v7, %s9796_s28  ;;  %v2719_v52 = vmul.f32 %v9808_v45, %v5468_v22  ;;  %v2729_v15 = vmul.f32 %v9809_v10, %v5442_v0  ;;  %v5846_v14 = vmul.f32 %v9812_v31, %v5516_v27  ;;  %v9872_v25 = vld [vmem:[#allocation43_spill] sm:$0xff]  ;;  %v9873_v11 = vld [vmem:[#allocation194_spill] sm:$0xff] }
 0x120   : > { %v1993_v47 = vmul.f32 %v9869_v21, %v9868_v2  ;;  %v5850_v13 = vadd.f32 %v3176_v61, %v3170_v38  ;;  %v3384_v17 = vadd.f32 %v9871_v54, %v3374_v26  ;;  %v2724_v48 = vadd.f32 %v2720_v59, %v2714_v53  ;;  %2545 = vrot.lane.b32.xlu1 %v5822_v24, %s9792_s4  ;;  %v9876_v7 = vld [vmem:[#allocation48_spill] sm:$0xff]  ;;  %v500_v61 = vpop.permute.xlu1 %499  ;;  %v9878_v59 = vld [vmem:[#allocation191_spill] sm:$0xff] }
 0x121   : > { %v2693_v8 = vadd.f32 %v2689_v46, %v2683_v6  ;;  %v2021_v16 = vmul.f32 %v9874_v28, %v9873_v11  ;;  %v2035_v18 = vmul.f32 %v9876_v7, %v9875_v62  ;;  %v5862_v21 = vsel %vm425_vm4, %v494_v5, %v496_v51  ;;  %v9879_v46 = vld [vmem:[#allocation49_spill] sm:$0xff]  ;;  %v9880_v7 = vld [vmem:[#allocation114_spill] sm:$0xff] }
 0x122   : > { %9870 = vst [vmem:[#allocation82_spill] sm:$0xff] %v5850_v13  ;;  %v1997_v33 = vadd.f32 %v1993_v47, %v9872_v25  ;;  %9877 = vst [vmem:[#allocation84_spill] sm:$0xff] %v5862_v21  ;;  %v2734_v38 = vadd.f32 %v2730_v42, %v2724_v48  ;;  %v2063_v53 = vmul.f32 %v9879_v46, %v9878_v59  ;;  %v498_v47 = vpop.permute.xlu0 %497  ;;  %v9881_v25 = vld [vmem:[#allocation189_spill] sm:$0xff]  ;;  %v9882_v21 = vld [vmem:[#allocation50_spill] sm:$0xff] }
 0x123   : > { %v2703_v26 = vadd.f32 %v2699_v9, %v2693_v8  ;;  %v504_v6 = vsel %vm425_vm4, %v500_v61, %v494_v5  ;;  %3185 = vrot.lane.b32.xlu0 %v5850_v13, %s9792_s4  ;;  %v5871_v28 = vadd.f32 %v5773_v4, %v3384_v17  ;;  %v2077_v49 = vmul.f32 %v9882_v21, %v9881_v25  ;;  %v9883_v42 = vld [vmem:[#allocation195_spill] sm:$0xff]  ;;  %v9884_v9 = vld [vmem:[#allocation52_spill] sm:$0xff]  ;;  %v9885_v8 = vld [vmem:[#allocation122_spill] sm:$0xff] }
 0x124   : > { %v2011_v54 = vadd.f32 %v9880_v7, %v1997_v33  ;;  %v2105_v48 = vmul.f32 %v9884_v9, %v9883_v42  ;;  %v2744_v46 = vadd.f32 %v9885_v8, %v2734_v38  ;;  %v5882_v32 = vsel %vm324_vm5, 0.0, %v504_v6  ;;  %2623 = vrot.lane.b32.xlu1 %v5808_v29, %s9796_s28  ;;  %v9892_v7 = vld [vmem:[#allocation59_spill] sm:$0xff]  ;;  %v9896_v8 = vld [vmem:[#allocation61_spill] sm:$0xff] }
 0x125   : > { %v2713_v63 = vadd.f32 %v9886_v50, %v2703_v26  ;;  %9888 = vst [vmem:[#allocation88_spill] sm:$0xff] %v5882_v32  ;;  %v2239_v4 = vmul.f32 %v4798_v41, %v9868_v2  ;;  %v5890_v33 = vsel %vm425_vm4, %v498_v47, %v500_v61  ;;  %v5894_v21 = vsel %vm425_vm4, %v496_v51, %v498_v47  ;;  %v9891_v41 = vld [vmem:[#allocation56_spill] sm:$0xff]  ;;  %v9903_v32 = vld [vmem:[#allocation101_spill] sm:$0xff] }
 0x126   : > { %v2025_v17 = vadd.f32 %v2021_v16, %v2011_v54  ;;  %9889 = vst [vmem:[#allocation89_spill] sm:$0xff] %v5890_v33  ;;  %9890 = vst [vmem:[#allocation80_spill] sm:$0xff] %v5894_v21  ;;  %v2259_v50 = vmul.f32 %v4805_v43, %v9873_v11  ;;  %v2269_v6 = vmul.f32 %v9891_v41, %v9875_v62  ;;  %v9893_v51 = vld [vmem:[#allocation60_spill] sm:$0xff]  ;;  %v9894_v43 = vld [vmem:[#allocation93_spill] sm:$0xff] }
 0x127   : > { %v2723_v38 = vadd.f32 %v2719_v52, %v2713_v63  ;;  %v2243_v26 = vadd.f32 %v2239_v4, %v4789_v39  ;;  %v2289_v16 = vmul.f32 %v9892_v7, %v9878_v59  ;;  %3261 = vrot.lane.b32.xlu0 %v5850_v13, %s9796_s28  ;;  %v5905_v61 = vadd.f32 %v2750_v57, %v2744_v46  ;;  %v9895_v39 = vld [vmem:[#allocation123_spill] sm:$0xff]  ;;  %v9897_v41 = vld [vmem:[#allocation96_spill] sm:$0xff] }
 0x128   : > { %v2039_v54 = vadd.f32 %v2035_v18, %v2025_v17  ;;  %v2299_v47 = vmul.f32 %v9893_v51, %v9881_v25  ;;  %v2884_v63 = vmul.f32 %v9894_v43, %v5446_v36  ;;  %v5914_v4 = vmul.f32 %v9896_v8, %v9883_v42  ;;  %2621 = vrot.lane.b32.xlu1 %v5822_v24, %s9796_s28  ;;  %v9898_v18 = vld [vmem:[#allocation138_spill] sm:$0xff]  ;;  %v9899_v46 = vld [vmem:[#allocation92_spill] sm:$0xff]  ;;  %v9900_v51 = vld [vmem:[#allocation97_spill] sm:$0xff] }
 0x129   : > { %v2733_v52 = vadd.f32 %v2729_v15, %v2723_v38  ;;  %v2253_v9 = vadd.f32 %v9895_v39, %v2243_v26  ;;  %v2904_v7 = vmul.f32 %v9897_v41, %v5482_v44  ;;  %v2914_v33 = vmul.f32 %v9900_v51, %v5398_v60  ;;  %v9901_v38 = vld [vmem:[#allocation137_spill] sm:$0xff]  ;;  %v9902_v8 = vld [vmem:[#allocation100_spill] sm:$0xff] }
 0x12a   : > { %v2053_v57 = vadd.f32 %v9898_v18, %v2039_v54  ;;  %v2888_v17 = vadd.f32 %v2884_v63, %v9899_v46  ;;  %v2883_v15 = vmul.f32 %v9894_v43, %v5424_v19  ;;  %v2934_v21 = vmul.f32 %v9902_v8, %v5450_v30  ;;  %v9904_v63 = vld [vmem:[#allocation126_spill] sm:$0xff]  ;;  %v9908_v24 = vld [vmem:[#allocation140_spill] sm:$0xff] }
 0x12b   : > { %v2743_v26 = vadd.f32 %v9901_v38, %v2733_v52  ;;  %v2263_v39 = vadd.f32 %v2259_v50, %v2253_v9  ;;  %v2944_v5 = vmul.f32 %v9903_v32, %v5456_v3  ;;  %3399 = vrot.lane.b32.xlu0 %v5871_v28, %s9792_s4  ;;  %v2903_v29 = vmul.f32 %v9897_v41, %v5512_v55  ;;  %v9905_v50 = vld [vmem:[#allocation105_spill] sm:$0xff] }
 0x12c   : > { %v2067_v54 = vadd.f32 %v2063_v53, %v2053_v57  ;;  %v2898_v18 = vadd.f32 %v9904_v63, %v2888_v17  ;;  %v2887_v13 = vadd.f32 %v2883_v15, %v9899_v46  ;;  %v5939_v52 = vmul.f32 %v9905_v50, %v5499_v56  ;;  %2761 = vrot.lane.b32.xlu1 %v5905_v61, %s9792_s4  ;;  %v9906_v17 = vld [vmem:[#allocation134_spill] sm:$0xff] }
 0x12d   : > { %v2273_v20 = vadd.f32 %v2269_v6, %v2263_v39  ;;  %v2913_v9 = vmul.f32 %v9900_v51, %v5375_v23  ;;  %v2933_v38 = vmul.f32 %v9902_v8, %v5468_v22  ;;  %v9907_v63 = vld [vmem:[#allocation66_spill] sm:$0xff]  ;;  %v5951_v39 = vadd.f32 %v5846_v14, %v2743_v26  ;;  %v9909_v8 = vld [vmem:[#allocation69_spill] sm:$0xff] }
 0x12e   : > { %v2081_v53 = vadd.f32 %v2077_v49, %v2067_v54  ;;  %v2908_v57 = vadd.f32 %v2904_v7, %v2898_v18  ;;  %v2897_v15 = vadd.f32 %v9906_v17, %v2887_v13  ;;  %v2453_v6 = vmul.f32 %v9907_v63, %v9868_v2  ;;  %v9910_v49 = vld [vmem:[#allocation139_spill] sm:$0xff]  ;;  %v9911_v18 = vld [vmem:[#allocation62_spill] sm:$0xff] }
 0x12f   : > { %v2283_v35 = vadd.f32 %v9908_v24, %v2273_v20  ;;  %v2943_v51 = vmul.f32 %v9903_v32, %v5442_v0  ;;  %v2473_v41 = vmul.f32 %v9909_v8, %v9873_v11  ;;  %3475 = vrot.lane.b32.xlu0 %v5871_v28, %s9796_s28  ;;  %v2963_v14 = vmul.f32 %v9905_v50, %v5516_v27  ;;  %v9912_v20 = vld [vmem:[#allocation70_spill] sm:$0xff] }
 0x130   : > { %v2095_v7 = vadd.f32 %v9910_v49, %v2081_v53  ;;  %v2918_v13 = vadd.f32 %v2914_v33, %v2908_v57  ;;  %v2907_v54 = vadd.f32 %v2903_v29, %v2897_v15  ;;  %v2457_v17 = vadd.f32 %v2453_v6, %v9911_v18  ;;  %2759 = vrot.lane.b32.xlu1 %v5951_v39, %s9792_s4  ;;  %v9913_v53 = vld [vmem:[#allocation141_spill] sm:$0xff]  ;;  %v9914_v57 = vld [vmem:[#allocation142_spill] sm:$0xff] }
 0x131   : > { %v2293_v63 = vadd.f32 %v2289_v16, %v2283_v35  ;;  %v2483_v24 = vmul.f32 %v9912_v20, %v9875_v62  ;;  %v2667_v26 = vmul.f32 %v9798_v58, %v9868_v2  ;;  %v9915_v16 = vld [vmem:[#allocation73_spill] sm:$0xff]  ;;  %v2687_v18 = vmul.f32 %v9803_v40, %v9873_v11 }
 0x132   : > { %v5970_v8 = vadd.f32 %v2105_v48, %v2095_v7  ;;  %v2928_v33 = vadd.f32 %v9913_v53, %v2918_v13  ;;  %v2917_v29 = vadd.f32 %v2913_v9, %v2907_v54  ;;  %v2467_v15 = vadd.f32 %v9914_v57, %v2457_v17  ;;  %v9916_v48 = vld [vmem:[#allocation147_spill] sm:$0xff]  ;;  %v9917_v9 = vld [vmem:[#allocation74_spill] sm:$0xff]  ;;  %v9919_v17 = vld [vmem:[#allocation76_spill] sm:$0xff] }
 0x133   : > { %v2303_v35 = vadd.f32 %v2299_v47, %v2293_v63  ;;  %v2503_v6 = vmul.f32 %v9915_v16, %v9878_v59  ;;  %v2671_v49 = vadd.f32 %v2667_v26, %v9802_v37  ;;  %v2513_v13 = vmul.f32 %v9917_v9, %v9881_v25  ;;  %v9918_v54 = vld [vmem:[#allocation143_spill] sm:$0xff]  ;;  %v9920_v53 = vld [vmem:[#allocation145_spill] sm:$0xff] }
 0x134   : > { %2113 = vrot.lane.b32.xlu0 %v5970_v8, %s9792_s4  ;;  %v2938_v58 = vadd.f32 %v2934_v21, %v2928_v33  ;;  %v2927_v7 = vadd.f32 %v9916_v48, %v2917_v29  ;;  %v2477_v20 = vadd.f32 %v2473_v41, %v2467_v15  ;;  %v2533_v63 = vmul.f32 %v9919_v17, %v9883_v42  ;;  %v9921_v41 = vld [vmem:[#allocation109_spill] sm:$0xff]  ;;  %v9922_v16 = vld [vmem:[#allocation111_spill] sm:$0xff]  ;;  %v9925_v48 = vld [vmem:[#allocation106_spill] sm:$0xff] }
 0x135   : > { %v2313_v47 = vadd.f32 %v9918_v54, %v2303_v35  ;;  %v2681_v37 = vadd.f32 %v9920_v53, %v2671_v49  ;;  %v2697_v40 = vmul.f32 %v9807_v12, %v9875_v62  ;;  %2837 = vrot.lane.b32.xlu1 %v5905_v61, %s9796_s28  ;;  %v3098_v29 = vmul.f32 %v9921_v41, %v5446_v36  ;;  %v9923_v12 = vld [vmem:[#allocation144_spill] sm:$0xff]  ;;  %v9928_v53 = vld [vmem:[#allocation146_spill] sm:$0xff] }
 0x136   : > { %v2948_v21 = vadd.f32 %v2944_v5, %v2938_v58  ;;  %v2937_v26 = vadd.f32 %v2933_v38, %v2927_v7  ;;  %v2487_v33 = vadd.f32 %v2483_v24, %v2477_v20  ;;  %v2717_v15 = vmul.f32 %v9808_v45, %v9878_v59  ;;  %v9924_v24 = vld [vmem:[#allocation149_spill] sm:$0xff]  ;;  %v9926_v20 = vld [vmem:[#allocation112_spill] sm:$0xff] }
 0x137   : > { %v2691_v57 = vadd.f32 %v2687_v18, %v2681_v37  ;;  %v2727_v35 = vmul.f32 %v9809_v10, %v9881_v25  ;;  %v3118_v49 = vmul.f32 %v9922_v16, %v5482_v44  ;;  %v3102_v7 = vadd.f32 %v3098_v29, %v9925_v48  ;;  %v9927_v54 = vld [vmem:[#allocation148_spill] sm:$0xff] }
 0x138   : > { %2189 = vrot.lane.b32.xlu0 %v5970_v8, %s9796_s28  ;;  %v2958_v5 = vadd.f32 %v9923_v12, %v2948_v21  ;;  %v2947_v38 = vadd.f32 %v2943_v51, %v2937_v26  ;;  %v2497_v58 = vadd.f32 %v9924_v24, %v2487_v33  ;;  %v6006_v18 = vadd.f32 %v5914_v4, %v2313_v47  ;;  %v9929_v21 = vld [vmem:[#allocation115_spill] sm:$0xff]  ;;  %v9930_v4 = vld [vmem:[#allocation152_spill] sm:$0xff] }
 0x139   : > { %v2701_v45 = vadd.f32 %v2697_v40, %v2691_v57  ;;  %v2747_v10 = vmul.f32 %v9812_v31, %v9883_v42  ;;  %v3128_v9 = vmul.f32 %v9926_v20, %v5398_v60  ;;  %2835 = vrot.lane.b32.xlu1 %v5951_v39, %s9796_s28  ;;  %v3112_v37 = vadd.f32 %v9928_v53, %v3102_v7 }
 0x13a   : > { %v2957_v17 = vadd.f32 %v9927_v54, %v2947_v38  ;;  %v2507_v51 = vadd.f32 %v2503_v6, %v2497_v58  ;;  %v3148_v26 = vmul.f32 %v9929_v21, %v5450_v30  ;;  %v3158_v40 = vmul.f32 %v9841_v34, %v5456_v3 }
 0x13b   : > { %v2711_v47 = vadd.f32 %v9930_v4, %v2701_v45  ;;  %v6023_v31 = vmul.f32 %v9846_v1, %v5499_v56  ;;  %v3097_v33 = vmul.f32 %v9921_v41, %v5424_v19  ;;  %v6030_v6 = vadd.f32 %v5939_v52, %v2958_v5  ;;  %v9931_v45 = vld [vmem:[#allocation151_spill] sm:$0xff]  ;;  %v9932_v5 = vld [vmem:[#allocation150_spill] sm:$0xff]  ;;  %v9934_v4 = vld [vmem:[#allocation96_spill] sm:$0xff] }
 0x13c   : > { %2327 = vrot.lane.b32.xlu0 %v6006_v18, %s9792_s4  ;;  %v2517_v29 = vadd.f32 %v2513_v13, %v2507_v51  ;;  %v3122_v57 = vadd.f32 %v3118_v49, %v3112_v37  ;;  %v3117_v12 = vmul.f32 %v9922_v16, %v5512_v55  ;;  %v6034_v38 = vadd.f32 %v2963_v14, %v2957_v17 }
 0x13d   : > { %v2721_v24 = vadd.f32 %v2717_v15, %v2711_v47  ;;  %v3101_v58 = vadd.f32 %v3097_v33, %v9925_v48  ;;  %v3127_v7 = vmul.f32 %v9926_v20, %v5375_v23  ;;  %2975 = vrot.lane.b32.xlu1 %v6030_v6, %s9792_s4  ;;  %v3147_v13 = vmul.f32 %v9929_v21, %v5468_v22  ;;  %v9936_v33 = vld [vmem:[#allocation155_spill] sm:$0xff] }
 0x13e   : > { %v2527_v54 = vadd.f32 %v9931_v45, %v2517_v29  ;;  %v3132_v52 = vadd.f32 %v3128_v9, %v3122_v57  ;;  %v2881_v49 = vmul.f32 %v9894_v43, %v9868_v2  ;;  %v3157_v17 = vmul.f32 %v9841_v34, %v5442_v0  ;;  %v9933_v9 = vld [vmem:[#allocation153_spill] sm:$0xff] }
 0x13f   : > { %v2731_v14 = vadd.f32 %v2727_v35, %v2721_v24  ;;  %v3111_v15 = vadd.f32 %v9932_v5, %v3101_v58  ;;  %v6051_v51 = vmul.f32 %v9846_v1, %v5516_v27  ;;  %v2901_v43 = vmul.f32 %v9934_v4, %v9873_v11  ;;  %v9935_v35 = vld [vmem:[#allocation97_spill] sm:$0xff]  ;;  %v9937_v24 = vld [vmem:[#allocation100_spill] sm:$0xff] }
 0x140   : > { %2403 = vrot.lane.b32.xlu0 %v6006_v18, %s9796_s28  ;;  %v3142_v53 = vadd.f32 %v9933_v9, %v3132_v52  ;;  %v2885_v37 = vadd.f32 %v2881_v49, %v9899_v46  ;;  %v2911_v47 = vmul.f32 %v9935_v35, %v9875_v62  ;;  %v2931_v58 = vmul.f32 %v9937_v24, %v9878_v59  ;;  %v9938_v49 = vld [vmem:[#allocation154_spill] sm:$0xff]  ;;  %v9944_v24 = vld [vmem:[#allocation125_spill] sm:$0xff] }
 0x141   : > { %v2741_v29 = vadd.f32 %v9936_v33, %v2731_v14  ;;  %v3121_v57 = vadd.f32 %v3117_v12, %v3111_v15  ;;  %v3095_v45 = vmul.f32 %v9921_v41, %v9868_v2  ;;  %2973 = vrot.lane.b32.xlu1 %v6034_v38, %s9792_s4  ;;  %v6068_v52 = vadd.f32 %v2533_v63, %v2527_v54 }
 0x142   : > { %v3152_v46 = vadd.f32 %v3148_v26, %v3142_v53  ;;  %v2895_v5 = vadd.f32 %v9938_v49, %v2885_v37  ;;  %v2941_v9 = vmul.f32 %v9903_v32, %v9881_v25  ;;  %v6075_v12 = vmul.f32 %v9905_v50, %v9883_v42  ;;  %v9940_v53 = vld [vmem:[#allocation157_spill] sm:$0xff] }
 0x143   : > { %v3131_v4 = vadd.f32 %v3127_v7, %v3121_v57  ;;  %v3099_v14 = vadd.f32 %v3095_v45, %v9925_v48  ;;  %v3115_v41 = vmul.f32 %v9922_v16, %v9873_v11  ;;  %v6082_v63 = vadd.f32 %v2747_v10, %v2741_v29  ;;  %v9939_v7 = vld [vmem:[#allocation159_spill] sm:$0xff]  ;;  %v9941_v37 = vld [vmem:[#allocation121_spill] sm:$0xff]  ;;  %v9942_v10 = vld [vmem:[#allocation156_spill] sm:$0xff] }
 0x144   : > { %2541 = vrot.lane.b32.xlu0 %v6068_v52, %s9792_s4  ;;  %v3162_v26 = vadd.f32 %v3158_v40, %v3152_v46  ;;  %v2905_v54 = vadd.f32 %v2901_v43, %v2895_v5  ;;  %v3125_v32 = vmul.f32 %v9926_v20, %v9875_v62  ;;  %v3145_v48 = vmul.f32 %v9929_v21, %v9878_v59  ;;  %v9943_v57 = vld [vmem:[#allocation120_spill] sm:$0xff] }
 0x145   : > { %v3141_v15 = vadd.f32 %v9939_v7, %v3131_v4  ;;  %v3109_v50 = vadd.f32 %v9940_v53, %v3099_v14  ;;  %v3312_v16 = vmul.f32 %v9941_v37, %v5446_v36  ;;  %3051 = vrot.lane.b32.xlu1 %v6030_v6, %s9796_s28  ;;  %v3155_v43 = vmul.f32 %v9841_v34, %v9881_v25  ;;  %v9945_v46 = vld [vmem:[#allocation164_spill] sm:$0xff]  ;;  %v9947_v34 = vld [vmem:[#allocation131_spill] sm:$0xff] }
 0x146   : > { %v3172_v35 = vadd.f32 %v9942_v10, %v3162_v26  ;;  %v2915_v40 = vadd.f32 %v2911_v47, %v2905_v54  ;;  %v6099_v20 = vmul.f32 %v9846_v1, %v9883_v42  ;;  %v3332_v45 = vmul.f32 %v9944_v24, %v5482_v44  ;;  %v9946_v47 = vld [vmem:[#allocation127_spill] sm:$0xff]  ;;  %v9949_v54 = vld [vmem:[#allocation132_spill] sm:$0xff] }
 0x147   : > { %v3151_v33 = vadd.f32 %v3147_v13, %v3141_v15  ;;  %v3119_v29 = vadd.f32 %v3115_v41, %v3109_v50  ;;  %v3316_v21 = vadd.f32 %v3312_v16, %v9943_v57  ;;  %v3342_v5 = vmul.f32 %v9946_v47, %v5398_v60  ;;  %v9948_v41 = vld [vmem:[#allocation158_spill] sm:$0xff]  ;;  %v9950_v10 = vld [vmem:[#allocation163_spill] sm:$0xff] }
 0x148   : > { %2617 = vrot.lane.b32.xlu0 %v6068_v52, %s9796_s28  ;;  %v2925_v49 = vadd.f32 %v9945_v46, %v2915_v40  ;;  %v3362_v4 = vmul.f32 %v9947_v34, %v5450_v30  ;;  %v3311_v1 = vmul.f32 %v9941_v37, %v5424_v19  ;;  %v3372_v7 = vmul.f32 %v9949_v54, %v5456_v3 }
 0x149   : > { %v3161_v13 = vadd.f32 %v3157_v17, %v3151_v33  ;;  %v3129_v14 = vadd.f32 %v3125_v32, %v3119_v29  ;;  %v3326_v26 = vadd.f32 %v9948_v41, %v3316_v21  ;;  %3049 = vrot.lane.b32.xlu1 %v6034_v38, %s9796_s28  ;;  %v6119_v15 = vadd.f32 %v6023_v31, %v3172_v35  ;;  %v9951_v32 = vld [vmem:[#allocation165_spill] sm:$0xff]  ;;  %v9952_v29 = vld [vmem:[#allocation136_spill] sm:$0xff] }
 0x14a   : > { %v2935_v53 = vadd.f32 %v2931_v58, %v2925_v49  ;;  %v3315_v50 = vadd.f32 %v3311_v1, %v9943_v57  ;;  %v3331_v16 = vmul.f32 %v9944_v24, %v5512_v55  ;;  %v6128_v21 = vmul.f32 %v9952_v29, %v5499_v56  ;;  %v9953_v58 = vld [vmem:[#allocation160_spill] sm:$0xff] }
 0x14b   : > { %v3171_v17 = vadd.f32 %v9950_v10, %v3161_v13  ;;  %v3139_v40 = vadd.f32 %v9951_v32, %v3129_v14  ;;  %v3336_v33 = vadd.f32 %v3332_v45, %v3326_v26  ;;  %v3341_v46 = vmul.f32 %v9946_v47, %v5375_v23 }
 0x14c   : > { %2755 = vrot.lane.b32.xlu0 %v6082_v63, %s9792_s4  ;;  %v2945_v31 = vadd.f32 %v2941_v9, %v2935_v53  ;;  %v3325_v35 = vadd.f32 %v9953_v58, %v3315_v50  ;;  %v3309_v49 = vmul.f32 %v9941_v37, %v9868_v2  ;;  %v3361_v13 = vmul.f32 %v9947_v34, %v5468_v22  ;;  %v9954_v9 = vld [vmem:[#allocation167_spill] sm:$0xff]  ;;  %v9955_v50 = vld [vmem:[#allocation168_spill] sm:$0xff]  ;;  %v9958_v58 = vld [vmem:[#allocation166_spill] sm:$0xff] }
 0x14d   : > { %v3149_v45 = vadd.f32 %v3145_v48, %v3139_v40  ;;  %v3346_v1 = vadd.f32 %v3342_v5, %v3336_v33  ;;  %v3371_v14 = vmul.f32 %v9949_v54, %v5442_v0  ;;  %3189 = vrot.lane.b32.xlu1 %v6119_v15, %s9792_s4  ;;  %v3329_v48 = vmul.f32 %v9944_v24, %v9873_v11 }
 0x14e   : > { %v2955_v41 = vadd.f32 %v9954_v9, %v2945_v31  ;;  %v3335_v26 = vadd.f32 %v3331_v16, %v3325_v35  ;;  %v3313_v37 = vadd.f32 %v3309_v49, %v9943_v57  ;;  %v6156_v5 = vadd.f32 %v6051_v51, %v3171_v17  ;;  %v9956_v16 = vld [vmem:[#allocation169_spill] sm:$0xff]  ;;  %v9963_v9 = vld [vmem:[#allocation170_spill] sm:$0xff] }
 0x14f   : > { %v3159_v53 = vadd.f32 %v3155_v43, %v3149_v45  ;;  %v3356_v10 = vadd.f32 %v9955_v50, %v3346_v1  ;;  %v6161_v32 = vmul.f32 %v9952_v29, %v5516_v27  ;;  %v3339_v40 = vmul.f32 %v9946_v47, %v9875_v62  ;;  %v9957_v43 = vld [vmem:[#allocation175_spill] sm:$0xff]  ;;  %v9960_v45 = vld [vmem:[#allocation130_spill] sm:$0xff]  ;;  %v9961_v1 = vld [vmem:[#allocation133_spill] sm:$0xff] }
 0x150   : > { %2831 = vrot.lane.b32.xlu0 %v6082_v63, %s9796_s28  ;;  %v3345_v57 = vadd.f32 %v3341_v46, %v3335_v26  ;;  %v3323_v24 = vadd.f32 %v9956_v16, %v3313_v37  ;;  %v3359_v51 = vmul.f32 %v9947_v34, %v9878_v59  ;;  %v3369_v31 = vmul.f32 %v9949_v54, %v9881_v25  ;;  %v9959_v34 = vld [vmem:[#allocation180_spill] sm:$0xff] }
 0x151   : > { %v3169_v17 = vadd.f32 %v9957_v43, %v3159_v53  ;;  %v3366_v33 = vadd.f32 %v3362_v4, %v3356_v10  ;;  %v3523_v35 = vmul.f32 %v9958_v58, %v9868_v2  ;;  %3187 = vrot.lane.b32.xlu1 %v6156_v5, %s9792_s4  ;;  %v6184_v47 = vadd.f32 %v6075_v12, %v2955_v41  ;;  %v9964_v37 = vld [vmem:[#allocation172_spill] sm:$0xff]  ;;  %v9965_v53 = vld [vmem:[#allocation162_spill] sm:$0xff] }
 0x152   : > { %v3355_v46 = vadd.f32 %v9959_v34, %v3345_v57  ;;  %v3333_v49 = vadd.f32 %v3329_v48, %v3323_v24  ;;  %v3379_v4 = vmul.f32 %v9961_v1, %v9960_v45  ;;  %v6193_v2 = vmul.f32 %v9952_v29, %v9883_v42  ;;  %v9966_v50 = vld [vmem:[#allocation176_spill] sm:$0xff]  ;;  %v9967_v57 = vld [vmem:[#allocation171_spill] sm:$0xff]  ;;  %v9968_v24 = vld [vmem:[#allocation182_spill] sm:$0xff] }
 0x153   : > { %v3376_v54 = vadd.f32 %v3372_v7, %v3366_v33  ;;  %v3527_v26 = vadd.f32 %v3523_v35, %v9963_v9  ;;  %v3543_v12 = vmul.f32 %v9964_v37, %v9873_v11  ;;  %v6203_v41 = vadd.f32 %v6099_v20, %v3169_v17  ;;  %v4276_v16 = vld [vmem:[%s9962_s20] sm:$0xff]  ;;  %v9969_v33 = vld [vmem:[#allocation173_spill] sm:$0xff] }
 0x154   : > { %2969 = vrot.lane.b32.xlu0 %v6184_v47, %s9792_s4  ;;  %v3365_v48 = vadd.f32 %v3361_v13, %v3355_v46  ;;  %v3343_v7 = vadd.f32 %v3339_v40, %v3333_v49  ;;  %v3553_v29 = vmul.f32 %v9965_v53, %v9875_v62  ;;  %v3563_v43 = vmul.f32 %v4276_v16, %v9968_v24  ;;  %v9970_v13 = vld [vmem:[#allocation181_spill] sm:$0xff]  ;;  %v9971_v46 = vld [vmem:[#allocation174_spill] sm:$0xff] }
 0x155   : > { %v3386_v10 = vadd.f32 %v9966_v50, %v3376_v54  ;;  %v3537_v11 = vadd.f32 %v9967_v57, %v3527_v26  ;;  %v3573_v35 = vmul.f32 %v9969_v33, %v9878_v59  ;;  %3265 = vrot.lane.b32.xlu1 %v6119_v15, %s9796_s28  ;;  %v6221_v40 = vstv %s6130_s19  ;;  %v9972_v1 = vld [vmem:[#allocation177_spill] sm:$0xff]  ;;  %v9974_v57 = vld [vmem:[#allocation178_spill] sm:$0xff]  ;;  %s6387_s19 = sld [smem:[#allocation9 + $0x1a]] }
 0x156   : > { %v3375_v20 = vadd.f32 %v3371_v14, %v3365_v48  ;;  %v3353_v62 = vadd.f32 %v9970_v13, %v3343_v7  ;;  %v3526_v17 = vmul.f32 %v9958_v58, %v5446_v36  ;;  %v3583_v59 = vmul.f32 %v9971_v46, %v9881_v25  ;;  %v9973_v36 = vld [vmem:[#allocation185_spill] sm:$0xff]  ;;  %v4277_v7 = vld [vmem:[%s9962_s20 + $0x18] sm:$0xff] }
 0x157   : > { %v3547_v34 = vadd.f32 %v3543_v12, %v3537_v11  ;;  %v3593_v49 = vmul.f32 %v6221_v40, %v9960_v45  ;;  %v6233_v14 = vmul.f32 %v9972_v1, %v9883_v42  ;;  %v3546_v25 = vmul.f32 %v9964_v37, %v5482_v44 }
 0x158   : > { %3045 = vrot.lane.b32.xlu0 %v6184_v47, %s9796_s28  ;;  %v3385_v54 = vadd.f32 %v9973_v36, %v3375_v20  ;;  %v3363_v26 = vadd.f32 %v3359_v51, %v3353_v62  ;;  %v3530_v12 = vadd.f32 %v3526_v17, %v9963_v9  ;;  %v6246_v45 = vadd.f32 %v6128_v21, %v3386_v10  ;;  %v9976_v10 = vld [vmem:[#allocation46_spill] sm:$0xff]  ;;  %v9977_v20 = vld [vmem:[#allocation184_spill] sm:$0xff] }
 0x159   : > { %v3557_v42 = vadd.f32 %v3553_v29, %v3547_v34  ;;  %v3556_v48 = vmul.f32 %v9965_v53, %v5398_v60  ;;  %v3566_v50 = vmul.f32 %v4277_v7, %v9968_v24  ;;  %3263 = vrot.lane.b32.xlu1 %v6156_v5, %s9796_s28  ;;  %v3576_v11 = vmul.f32 %v9969_v33, %v5450_v30  ;;  %v9979_v34 = vld [vmem:[#allocation179_spill] sm:$0xff] }
 0x15a   : > { %v3373_v51 = vadd.f32 %v3369_v31, %v3363_v26  ;;  %v3540_v44 = vadd.f32 %v9974_v57, %v3530_v12  ;;  %v3586_v21 = vmul.f32 %v9971_v46, %v5456_v3  ;;  %v6264_v60 = vadd.f32 %v6161_v32, %v3385_v54  ;;  %v9978_v32 = vld [vmem:[#allocation192_spill] sm:$0xff]  ;;  %v4278_v54 = vld [vmem:[%s9962_s20 + $0x8] sm:$0xff] }
 0x15b   : > { %v3567_v29 = vadd.f32 %v3563_v43, %v3557_v42  ;;  %v3596_v16 = vmul.f32 %v6221_v40, %v9976_v10  ;;  %v3524_v31 = vmul.f32 %v9958_v58, %v9977_v20  ;;  %v6276_v13 = vmul.f32 %v9972_v1, %v5499_v56  ;;  %v9984_v10 = vld [vmem:[#allocation45_spill] sm:$0xff] }
 0x15c   : > { %9975 = vst [vmem:[#allocation91_spill] sm:$0xff] %v6264_v60  ;;  %3183 = vrot.lane.b32.xlu0 %v6203_v41, %s9792_s4  ;;  %v3383_v30 = vadd.f32 %v3379_v4, %v3373_v51  ;;  %v3550_v3 = vadd.f32 %v3546_v25, %v3540_v44  ;;  %v3544_v43 = vmul.f32 %v9964_v37, %v9978_v32  ;;  %v9980_v4 = vld [vmem:[#allocation190_spill] sm:$0xff]  ;;  %v9981_v25 = vld [vmem:[#allocation187_spill] sm:$0xff]  ;;  %v9983_v44 = vld [vmem:[#allocation53_spill] sm:$0xff] }
 0x15d   : > { %v3577_v62 = vadd.f32 %v3573_v35, %v3567_v29  ;;  %v3528_v17 = vadd.f32 %v3524_v31, %v9963_v9  ;;  %v3554_v36 = vmul.f32 %v9965_v53, %v9979_v34  ;;  %v3564_v26 = vmul.f32 %v4278_v54, %v9968_v24  ;;  %3403 = vrot.lane.b32.xlu1 %v6246_v45, %s9792_s4  ;;  %v9982_v51 = vld [vmem:[#allocation183_spill] sm:$0xff] }
 0x15e   : > { %v3560_v56 = vadd.f32 %v3556_v48, %v3550_v3  ;;  %v3574_v12 = vmul.f32 %v9969_v33, %v9980_v4  ;;  %v3584_v35 = vmul.f32 %v9971_v46, %v9981_v25  ;;  %v3525_v42 = vmul.f32 %v9958_v58, %v5424_v19  ;;  %v9985_v48 = vld [vmem:[#allocation161_spill] sm:$0xff] }
 0x15f   : > { %v3587_v7 = vadd.f32 %v3583_v59, %v3577_v62  ;;  %v3538_v57 = vadd.f32 %v9982_v51, %v3528_v17  ;;  %v6302_v29 = vmul.f32 %v6221_v40, %v9983_v44  ;;  %v3535_v20 = vmul.f32 %v9985_v48, %v9984_v10  ;;  %v9986_v62 = vld [vmem:[#allocation193_spill] sm:$0xff] }
 0x160   : > { %3259 = vrot.lane.b32.xlu0 %v6203_v41, %s9796_s28  ;;  %v6311_v19 = vadd.f32 %v6193_v2, %v3383_v30  ;;  %v3570_v58 = vadd.f32 %v3566_v50, %v3560_v56  ;;  %v3529_v59 = vadd.f32 %v3525_v42, %v9963_v9  ;;  %v3545_v31 = vmul.f32 %v9964_v37, %v5512_v55  ;;  %v4279_v55 = vld [vmem:[%s9962_s20 + $0x10] sm:$0xff]  ;;  %v9992_v56 = vld [vmem:[#allocation51_spill] sm:$0xff]  ;;  %s6497_s20 = sld [smem:[#allocation9 + $0x20]] }
 0x161   : > { %v3597_v3 = vadd.f32 %v3593_v49, %v3587_v7  ;;  %v3548_v32 = vadd.f32 %v3544_v43, %v3538_v57  ;;  %v6320_v17 = vmul.f32 %v9972_v1, %v9986_v62  ;;  %v3555_v34 = vmul.f32 %v9965_v53, %v5375_v23  ;;  %3401 = vrot.lane.b32.xlu1 %v6264_v60, %s9792_s4  ;;  %v9987_v50 = vld [vmem:[#allocation54_spill] sm:$0xff] }
 0x162   : > { %v3580_v2 = vadd.f32 %v3576_v11, %v3570_v58  ;;  %v3539_v9 = vadd.f32 %v3535_v20, %v3529_v59  ;;  %v3565_v37 = vmul.f32 %v4279_v55, %v9968_v24  ;;  %v3575_v49 = vmul.f32 %v9969_v33, %v5468_v22 }
 0x163   : > { %v3558_v23 = vadd.f32 %v3554_v36, %v3548_v32  ;;  %v3585_v53 = vmul.f32 %v9971_v46, %v5442_v0  ;;  %v3595_v30 = vmul.f32 %v6221_v40, %v9987_v50  ;;  %v6340_v11 = vmul.f32 %v9972_v1, %v5516_v27  ;;  %v9991_v36 = vld [vmem:[#allocation55_spill] sm:$0xff] }
 0x164   : > { %3397 = vrot.lane.b32.xlu0 %v6311_v19, %s9792_s4  ;;  %v6347_v22 = vadd.f32 %v6233_v14, %v3597_v3  ;;  %v3590_v24 = vadd.f32 %v3586_v21, %v3580_v2  ;;  %v3549_v33 = vadd.f32 %v3545_v31, %v3539_v9  ;;  %v6350_v43 = vstv %s6139_s30  ;;  %s6401_s30 = sld [smem:[#allocation9 + $0x1b]] }
 0x165   : > { %v3568_v0 = vadd.f32 %v3564_v26, %v3558_v23  ;;  %v6355_v40 = vstv %s6163_s24  ;;  %v6358_v27 = vstv %s6172_s7  ;;  %v6361_v46 = vstv %s6145_s12  ;;  %3479 = vrot.lane.b32.xlu1 %v6246_v45, %s9796_s28  ;;  %s6414_s12 = sld [smem:[#allocation9 + $0x1e]] }
 0x166   : > { %9988 = vst [vmem:[#allocation77_spill] sm:$0xff] %v6347_v22  ;;  %9989 = vst [vmem:[#allocation94_spill] sm:$0xff] %v6355_v40  ;;  %v3600_v1 = vadd.f32 %v3596_v16, %v3590_v24  ;;  %v3559_v14 = vadd.f32 %v3555_v34, %v3549_v33  ;;  %v6368_v21 = vstv %s6179_s10  ;;  %v6372_v54 = vmul.f32 %v6350_v43, %v9991_v36  ;;  %s6439_s24 = sld [smem:[#allocation9 + $0x1f]]  ;;  %v9995_v34 = vld [vmem:[#allocation72_spill] sm:$0xff] }
 0x167   : > { %9990 = vst [vmem:[#allocation87_spill] sm:$0xff] %v6358_v27  ;;  %v3578_v26 = vadd.f32 %v3574_v12, %v3568_v0  ;;  %v6378_v4 = vmul.f32 %v6350_v43, %v9992_v56  ;;  %v6382_v25 = vmul.f32 %v6361_v46, %v9991_v36  ;;  %v6385_v16 = vstv %s6153_s13  ;;  %s6427_s13 = sld [smem:[#allocation9 + $0x21]] }
 0x168   : > { %3473 = vrot.lane.b32.xlu0 %v6311_v19, %s9796_s28  ;;  %v3569_v42 = vadd.f32 %v3565_v37, %v3559_v14  ;;  %v6393_v12 = vmul.f32 %v6361_v46, %v9992_v56  ;;  %v6396_v7 = vstv %s6215_s2  ;;  %v6399_v51 = vstv %s6225_s23  ;;  %s6454_s7 = sld [smem:[#allocation9 + $0x22]]  ;;  %v10001_v14 = vld [vmem:[#allocation78_spill] sm:$0xff] }
 0x169   : > { %v6404_v57 = vadd.f32 %v6276_v13, %v3600_v1  ;;  %v3588_v44 = vadd.f32 %v3584_v35, %v3578_v26  ;;  %v6408_v10 = vmul.f32 %v6385_v16, %v9991_v36  ;;  %v6412_v48 = vmul.f32 %v6385_v16, %v9992_v56  ;;  %3477 = vrot.lane.b32.xlu1 %v6264_v60, %s9796_s28  ;;  %s6482_s10 = sld [smem:[#allocation9 + $0x1d]] }
 0x16a   : > { %v3579_v20 = vadd.f32 %v3575_v49, %v3569_v42  ;;  %v6419_v58 = vstv %s6235_s5  ;;  %v6422_v13 = vstv %s6280_s15  ;;  %v6425_v35 = vstv %s6287_s21  ;;  %s6586_s2 = sld [smem:[#allocation9 + $0x2a]] }
 0x16b   : > { %9993 = vst [vmem:[#allocation86_spill] sm:$0xff] %v6404_v57  ;;  %9994 = vst [vmem:[#allocation79_spill] sm:$0xff] %v6425_v35  ;;  %v3598_v59 = vadd.f32 %v6302_v29, %v3588_v44  ;;  %v6431_v31 = vstv %s6297_s22  ;;  %v6434_v3 = vstv %s6189_s14  ;;  %v6437_v32 = vstv %s6198_s18  ;;  %v6456_v55 = vpop.permute.xlu0 %2119  ;;  %s6516_s14 = sld [smem:[#allocation9 + $0x23]] }
 0x16c   : > { %3611 = vrot.lane.b32.xlu0 %v6347_v22, %s9792_s4  ;;  %v3589_v62 = vadd.f32 %v3585_v53, %v3579_v20  ;;  %v6445_v2 = vmul.f32 %v6434_v3, %v9995_v34  ;;  %v6449_v29 = vmul.f32 %v6437_v32, %v9995_v34  ;;  %v6452_v9 = vstv %s6207_s25  ;;  %9996 = vst [vmem:[#allocation99_spill] sm:$0xff] %v6456_v55  ;;  %s6533_s18 = sld [smem:[#allocation9 + $0x25]] }
 0x16d   : > { %v6459_v37 = vadd.f32 %v6320_v17, %v3598_v59  ;;  %v6463_v49 = vmul.f32 %v6452_v9, %v9995_v34  ;;  %v6466_v23 = vstv %s6306_s27  ;;  %v6469_v53 = vstv %s6316_s29  ;;  %3617 = vrot.lane.b32.xlu1 %v6404_v57, %s9792_s4  ;;  %s6551_s25 = sld [smem:[#allocation9 + $0x24]] }
 0x16e   : > { %v3599_v50 = vadd.f32 %v3595_v30, %v3589_v62  ;;  %v6474_v24 = vstv %s6324_s17  ;;  %v6477_v33 = vstv %s6332_s11  ;;  %v6480_v17 = vstv %s6243_s6  ;;  %v6501_v26 = vpop.permute.xlu1 %2115  ;;  %s6602_s23 = sld [smem:[#allocation9 + $0x28]] }
 0x16f   : > { %9997 = vst [vmem:[#allocation85_spill] sm:$0xff] %v6459_v37  ;;  %9998 = vst [vmem:[#allocation90_spill] sm:$0xff] %v6477_v33  ;;  %v6485_v0 = vstv %s6342_s16  ;;  %v6488_v1 = vstv %s6352_s0  ;;  %v6492_v36 = vmul.f32 %v6480_v17, %v10001_v14  ;;  %v6495_v30 = vstv %s6252_s9  ;;  %v6518_v59 = vpop.permute.xlu0 %2191  ;;  %s6612_s5 = sld [smem:[#allocation9 + $0x2b]] }
 0x170   : > { %9999 = vst [vmem:[#allocation95_spill] sm:$0xff] %v6485_v0  ;;  %10000 = vst [vmem:[#allocation110_spill] sm:$0xff] %v6488_v1  ;;  %3613 = vrot.lane.b32.xlu0 %v6459_v37, %s9792_s4  ;;  %v6504_v56 = vadd.f32 %v6340_v11, %v3599_v50  ;;  %v6508_v42 = vmul.f32 %v6495_v30, %v10001_v14  ;;  %v6511_v44 = vstv %s6261_s26  ;;  %v6514_v20 = vstv %s6363_s1  ;;  %s6622_s6 = sld [smem:[#allocation9 + $0x2e]] }
 0x171   : > { %10002 = vst [vmem:[#allocation116_spill] sm:$0xff] %v6501_v26  ;;  %10005 = vst [vmem:[#allocation118_spill] sm:$0xff] %v6514_v20  ;;  %v6522_v62 = vmul.f32 %v6511_v44, %v10001_v14  ;;  %v6525_v34 = vstv %s6374_s3  ;;  %v6528_v11 = vstv %s6387_s19  ;;  %v6531_v50 = vstv %s6401_s30  ;;  %s6640_s9 = sld [smem:[#allocation9 + $0x31]] }
 0x172   : > { %10003 = vst [vmem:[#allocation104_spill] sm:$0xff] %v6504_v56  ;;  %10004 = vst [vmem:[#allocation103_spill] sm:$0xff] %v6508_v42  ;;  %3615 = vrot.lane.b32.xlu1 %v6504_v56, %s9792_s4  ;;  %v6538_v20 = vstv %s6414_s12  ;;  %v6541_v60 = vstv %s6427_s13  ;;  %v10012_v42 = vld [vmem:[#allocation68_spill] sm:$0xff]  ;;  %s6568_s4 = sld [smem:[#allocation9 + $0x27]] }
 0x173   : > { %10006 = vst [vmem:[#allocation124_spill] sm:$0xff] %v6522_v62  ;;  %10007 = vst [vmem:[#allocation102_spill] sm:$0xff] %v6525_v34  ;;  %v6545_v14 = vmul.f32 %v6350_v43, %v10012_v42  ;;  %v6559_v34 = vmul.f32 %v6350_v43, %v5970_v8  ;;  %v10024_v62 = vld [vmem:[#allocation58_spill] sm:$0xff]  ;;  %s6650_s26 = sld [smem:[#allocation9 + $0x26]] }
 0x174   : > { %10008 = vst [vmem:[#allocation113_spill] sm:$0xff] %v6528_v11  ;;  %10009 = vst [vmem:[#allocation98_spill] sm:$0xff] %v6531_v50  ;;  %v6549_v11 = vmul.f32 %v6361_v46, %v10012_v42  ;;  %v6555_v50 = vmul.f32 %v6385_v16, %v10012_v42  ;;  %3687 = vrot.lane.b32.xlu0 %v6347_v22, %s9796_s28  ;;  %v6574_v42 = vmul.f32 %v6385_v16, %v5970_v8  ;;  %s6704_s15 = sld [smem:[#allocation9 + $0x34]] }
 0x175   : > { %10010 = vst [vmem:[#allocation108_spill] sm:$0xff] %v6538_v20  ;;  %10011 = vst [vmem:[#allocation128_spill] sm:$0xff] %v6541_v60  ;;  %v6563_v60 = vmul.f32 %v6361_v46, %v5970_v8  ;;  %v6566_v20 = vstv %s6270_s8  ;;  %v6584_v46 = vstv %s6454_s7  ;;  %s6671_s8 = sld [smem:[#allocation9 + $0x29]] }
 0x176   : > { %10013 = vst [vmem:[#allocation117_spill] sm:$0xff] %v6545_v14  ;;  %10014 = vst [vmem:[#allocation119_spill] sm:$0xff] %v6549_v11  ;;  %v2118_v11 = vpop.permute.xlu1 %2117  ;;  %v6578_v43 = vmul.f32 %v6566_v20, %v5951_v39  ;;  %3693 = vrot.lane.b32.xlu1 %v6404_v57, %s9796_s28  ;;  %v6630_v57 = vstv %s6516_s14  ;;  %s6720_s21 = sld [smem:[#allocation9 + $0x37]] }
 0x177   : > { %10015 = vst [vmem:[#allocation107_spill] sm:$0xff] %v6555_v50  ;;  %10016 = vst [vmem:[#allocation188_spill] sm:$0xff] %v6559_v34  ;;  %v6581_v50 = vstv %s6439_s24  ;;  %v2121_v22 = vsel %vm339_vm2, %v2118_v11, %v6456_v55  ;;  %v2122_v8 = vsel %vm339_vm2, %v6501_v26, %v2118_v11  ;;  %v6608_v11 = vpop.permute.xlu0 %2329  ;;  %v6620_v26 = vstv %s6497_s20  ;;  %s6734_s22 = sld [smem:[#allocation9 + $0x3a]] }
 0x178   : > { %10017 = vst [vmem:[#allocation44_spill] sm:$0xff] %v6563_v60  ;;  %10018 = vst [vmem:[#allocation135_spill] sm:$0xff] %v6574_v42  ;;  %v6596_v16 = vmul.f32 %v6581_v50, %v5951_v39  ;;  %v2133_v42 = vmul.f32 %v6355_v40, %v2122_v8  ;;  %v2134_v14 = vmul.f32 %v6355_v40, %v2121_v22  ;;  %3689 = vrot.lane.b32.xlu0 %v6459_v37, %s9796_s28  ;;  %s6747_s27 = sld [smem:[#allocation9 + $0x2d]] }
 0x179   : > { %10019 = vst [vmem:[#allocation43_spill] sm:$0xff] %v6578_v43  ;;  %v6600_v43 = vmul.f32 %v6584_v46, %v5951_v39  ;;  %v2143_v34 = vmul.f32 %v6358_v27, %v2122_v8  ;;  %v2144_v55 = vmul.f32 %v6358_v27, %v2121_v22  ;;  %v2153_v39 = vmul.f32 %v6368_v21, %v2122_v8  ;;  %s6758_s29 = sld [smem:[#allocation9 + $0x30]] }
 0x17a   : > { %10021 = vst [vmem:[#allocation194_spill] sm:$0xff] %v6596_v16  ;;  %v6617_v16 = vstv %s6482_s10  ;;  %10023 = vst [vmem:[#allocation186_spill] sm:$0xff] %v6620_v26  ;;  %v2167_v40 = vadd.f32 %v6372_v54, %v2133_v42  ;;  %v6627_v27 = vpop.permute.xlu1 %2195  ;;  %v6634_v8 = vmul.f32 %v6434_v3, %v10024_v62  ;;  %v6643_v26 = vadd.f32 %v6378_v4, %v2134_v14  ;;  %s6766_s17 = sld [smem:[#allocation9 + $0x33]] }
 0x17b   : > { %10022 = vst [vmem:[#allocation47_spill] sm:$0xff] %v6600_v43  ;;  %v2154_v43 = vmul.f32 %v6368_v21, %v2121_v22  ;;  %v6638_v22 = vmul.f32 %v6437_v32, %v10024_v62  ;;  %v2177_v54 = vadd.f32 %v6382_v25, %v2143_v34  ;;  %v6647_v42 = vadd.f32 %v6393_v12, %v2144_v55  ;;  %v10029_v12 = vld [vmem:[#allocation57_spill] sm:$0xff]  ;;  %s6781_s11 = sld [smem:[#allocation9 + $0x3d]] }
 0x17c   : > { %10025 = vst [vmem:[#allocation48_spill] sm:$0xff] %v6634_v8  ;;  %v2187_v37 = vadd.f32 %v6408_v10, %v2153_v39  ;;  %3691 = vrot.lane.b32.xlu1 %v6504_v56, %s9796_s28  ;;  %v6661_v4 = vmul.f32 %v6452_v9, %v10024_v62  ;;  %v6665_v25 = vmul.f32 %v6434_v3, %v6006_v18  ;;  %s6689_s28 = sld [smem:[#allocation9 + $0x2c]]  ;;  %v6692_v14 = vstv %s6551_s25  ;;  %v10038_v56 = vld [vmem:[#allocation65_spill] sm:$0xff] }
 0x17d   : > { %10026 = vst [vmem:[#allocation191_spill] sm:$0xff] %v6638_v22  ;;  %v6653_v8 = vadd.f32 %v6412_v48, %v2154_v43  ;;  %v6655_v22 = vpop.permute.xlu0 %2405  ;;  %v6669_v10 = vmul.f32 %v6434_v3, %v10029_v12  ;;  %v6675_v48 = vmul.f32 %v6437_v32, %v6006_v18  ;;  %v6679_v55 = vmul.f32 %v6437_v32, %v10029_v12  ;;  %s6795_s16 = sld [smem:[#allocation9 + $0x40]] }
 0x17e   : > { %10027 = vst [vmem:[#allocation49_spill] sm:$0xff] %v6661_v4  ;;  %10028 = vst [vmem:[#allocation114_spill] sm:$0xff] %v6665_v25  ;;  %v6683_v62 = vmul.f32 %v6452_v9, %v6006_v18  ;;  %v6687_v34 = vmul.f32 %v6452_v9, %v10029_v12  ;;  %v2194_v3 = vpop.permute.xlu1 %2193  ;;  %v6695_v43 = vstv %s6568_s4  ;;  %v6698_v39 = vstv %s6586_s2  ;;  %s6813_s0 = sld [smem:[#allocation9 + $0x43]] }
 0x17f   : > { %10030 = vst [vmem:[#allocation189_spill] sm:$0xff] %v6669_v10  ;;  %10031 = vst [vmem:[#allocation50_spill] sm:$0xff] %v6675_v48  ;;  %v6702_v32 = vmul.f32 %v6480_v17, %v10038_v56  ;;  %v2197_v18 = vsel %vm425_vm4, %v2194_v3, %v6627_v27  ;;  %v2198_v9 = vsel %vm425_vm4, %v6518_v59, %v2194_v3  ;;  %v10043_v3 = vld [vmem:[#allocation67_spill] sm:$0xff]  ;;  %s6829_s1 = sld [smem:[#allocation9 + $0x46]] }
 0x180   : > { %10032 = vst [vmem:[#allocation195_spill] sm:$0xff] %v6679_v55  ;;  %10033 = vst [vmem:[#allocation52_spill] sm:$0xff] %v6683_v62  ;;  %v6714_v12 = vmul.f32 %v6495_v30, %v10038_v56  ;;  %v6728_v4 = vmul.f32 %v6480_v17, %v6068_v52  ;;  %v2229_v62 = vmul.f32 %v6419_v58, %v2197_v18  ;;  %s6843_s3 = sld [smem:[#allocation9 + $0x2f]]  ;;  %v6864_v55 = vstv %s6747_s27 }
 0x181   : > { %10034 = vst [vmem:[#allocation122_spill] sm:$0xff] %v6687_v34  ;;  %10035 = vst [vmem:[#allocation129_spill] sm:$0xff] %v6692_v14  ;;  %v6724_v14 = vpop.permute.xlu0 %2543  ;;  %v6745_v48 = vmul.f32 %v6495_v30, %v6068_v52  ;;  %v6756_v34 = vmul.f32 %v6495_v30, %v10043_v3  ;;  %s6856_s19 = sld [smem:[#allocation9 + $0x48]] }
 0x182   : > { %10036 = vst [vmem:[#allocation56_spill] sm:$0xff] %v6695_v43  ;;  %10037 = vst [vmem:[#allocation59_spill] sm:$0xff] %v6698_v39  ;;  %v6718_v39 = vmul.f32 %v6511_v44, %v10038_v56  ;;  %v2219_v43 = vmul.f32 %v6399_v51, %v2197_v18  ;;  %v6737_v56 = vmul.f32 %v6396_v7, %v2198_v9  ;;  %v6752_v25 = vpop.permute.xlu1 %2333  ;;  %s6866_s30 = sld [smem:[#allocation9 + $0x32]] }
 0x183   : > { %10039 = vst [vmem:[#allocation60_spill] sm:$0xff] %v6702_v32  ;;  %10040 = vst [vmem:[#allocation93_spill] sm:$0xff] %v6714_v12  ;;  %v2209_v32 = vmul.f32 %v6396_v7, %v2197_v18  ;;  %v6732_v12 = vmul.f32 %v6480_v17, %v10043_v3  ;;  %v2233_v18 = vadd.f32 %v2229_v62, %v2187_v37  ;;  %v3036_v37 = vstv %s6612_s5  ;;  %s6877_s12 = sld [smem:[#allocation9 + $0x35]] }
 0x184   : > { %10041 = vst [vmem:[#allocation123_spill] sm:$0xff] %v6718_v39  ;;  %10042 = vst [vmem:[#allocation61_spill] sm:$0xff] %v6728_v4  ;;  %v6740_v39 = vmul.f32 %v6399_v51, %v2198_v9  ;;  %v2223_v4 = vadd.f32 %v2219_v43, %v2177_v54  ;;  %v3026_v54 = vstv %s6602_s23  ;;  %v6787_v62 = vstv %s6650_s26  ;;  %s6891_s13 = sld [smem:[#allocation9 + $0x49]] }
 0x185   : > { %10044 = vst [vmem:[#allocation138_spill] sm:$0xff] %v6732_v12  ;;  %10045 = vst [vmem:[#allocation92_spill] sm:$0xff] %v6745_v48  ;;  %v2213_v17 = vadd.f32 %v2209_v32, %v2167_v40  ;;  %v6750_v12 = vmul.f32 %v6419_v58, %v2198_v9  ;;  %v6762_v48 = vmul.f32 %v6511_v44, %v6068_v52  ;;  %v3016_v40 = vstv %s6533_s18  ;;  %v6768_v43 = vpop.permute.xlu0 %2619  ;;  %s6901_s24 = sld [smem:[#allocation9 + $0x36]] }
 0x186   : > { %10046 = vst [vmem:[#allocation137_spill] sm:$0xff] %v6756_v34  ;;  %10048 = vst [vmem:[#allocation126_spill] sm:$0xff] %v6768_v43  ;;  %v6772_v32 = vmul.f32 %v6511_v44, %v10043_v3  ;;  %v6775_v30 = vmul.f32 %v3016_v40, %v6034_v38  ;;  %v6778_v9 = vmul.f32 %v3026_v54, %v6034_v38  ;;  %v6793_v34 = vstv %s6689_s28  ;;  %v2332_v44 = vpop.permute.xlu1 %2331  ;;  %v10056_v3 = vld [vmem:[#allocation64_spill] sm:$0xff]  ;;  %s6913_s7 = sld [smem:[#allocation9 + $0x39]] }
 0x187   : > { %10047 = vst [vmem:[#allocation101_spill] sm:$0xff] %v6762_v48  ;;  %v6784_v52 = vmul.f32 %v3036_v37, %v6034_v38  ;;  %10053 = vst [vmem:[#allocation69_spill] sm:$0xff] %v6787_v62  ;;  %v6790_v48 = vstv %s6671_s8  ;;  %v6807_v38 = vmul.f32 %v6584_v46, %v10056_v3  ;;  %s6923_s10 = sld [smem:[#allocation9 + $0x3c]] }
 0x188   : > { %10049 = vst [vmem:[#allocation105_spill] sm:$0xff] %v6772_v32  ;;  %10050 = vst [vmem:[#allocation134_spill] sm:$0xff] %v6775_v30  ;;  %v6799_v30 = vmul.f32 %v6566_v20, %v10056_v3  ;;  %v6854_v32 = vmul.f32 %v6584_v46, %v5905_v61  ;;  %s6935_s20 = sld [smem:[#allocation9 + $0x38]] }
 0x189   : > { %10051 = vst [vmem:[#allocation66_spill] sm:$0xff] %v6778_v9  ;;  %10052 = vst [vmem:[#allocation140_spill] sm:$0xff] %v6784_v52  ;;  %v6803_v9 = vmul.f32 %v6581_v50, %v10056_v3  ;;  %v6827_v3 = vmul.f32 %v6581_v50, %v6082_v63  ;;  %v6833_v62 = vpop.permute.xlu0 %2757  ;;  %s6947_s14 = sld [smem:[#allocation9 + $0x4a]] }
 0x18a   : > { %10054 = vst [vmem:[#allocation139_spill] sm:$0xff] %v6790_v48  ;;  %10055 = vst [vmem:[#allocation62_spill] sm:$0xff] %v6793_v34  ;;  %v6811_v48 = vmul.f32 %v6566_v20, %v6082_v63  ;;  %v2335_v34 = vsel %vm339_vm2, %v2332_v44, %v6752_v25  ;;  %s6957_s18 = sld [smem:[#allocation9 + $0x4b]] }
 0x18b   : > { %10057 = vst [vmem:[#allocation70_spill] sm:$0xff] %v6799_v30  ;;  %10058 = vst [vmem:[#allocation141_spill] sm:$0xff] %v6803_v9  ;;  %v2336_v30 = vsel %vm339_vm2, %v6608_v11, %v2332_v44  ;;  %v6823_v9 = vmul.f32 %v6566_v20, %v5905_v61  ;;  %v6837_v44 = vmul.f32 %v6581_v50, %v5905_v61  ;;  %v10070_v61 = vld [vmem:[#allocation63_spill] sm:$0xff]  ;;  %s6968_s25 = sld [smem:[#allocation9 + $0x3b]] }
 0x18c   : > { %10059 = vst [vmem:[#allocation142_spill] sm:$0xff] %v6807_v38  ;;  %10060 = vst [vmem:[#allocation73_spill] sm:$0xff] %v6811_v48  ;;  %v2347_v38 = vmul.f32 %v6422_v13, %v2336_v30  ;;  %v2357_v48 = vmul.f32 %v6425_v35, %v2336_v30  ;;  %v6841_v20 = vmul.f32 %v6584_v46, %v6082_v63  ;;  %s6984_s4 = sld [smem:[#allocation9 + $0x3e]] }
 0x18d   : > { %10061 = vst [vmem:[#allocation147_spill] sm:$0xff] %v6823_v9  ;;  %10062 = vst [vmem:[#allocation74_spill] sm:$0xff] %v6827_v3  ;;  %v6846_v3 = vmul.f32 %v6422_v13, %v2335_v34  ;;  %v6849_v9 = vmul.f32 %v6425_v35, %v2335_v34  ;;  %v2367_v52 = vmul.f32 %v6431_v31, %v2336_v30  ;;  %v6869_v35 = vstv %s6758_s29  ;;  %s6998_s2 = sld [smem:[#allocation9 + $0x4c]] }
 0x18e   : > { %10063 = vst [vmem:[#allocation143_spill] sm:$0xff] %v6833_v62  ;;  %10064 = vst [vmem:[#allocation76_spill] sm:$0xff] %v6837_v44  ;;  %v2351_v50 = vadd.f32 %v2347_v38, %v2213_v17  ;;  %v2361_v44 = vadd.f32 %v2357_v48, %v2223_v4  ;;  %v6859_v63 = vmul.f32 %v6431_v31, %v2335_v34  ;;  %v6872_v30 = vstv %s6766_s17  ;;  %v6879_v4 = vpop.permute.xlu0 %2833  ;;  %s7008_s23 = sld [smem:[#allocation9 + $0x3f]] }
 0x18f   : > { %10065 = vst [vmem:[#allocation145_spill] sm:$0xff] %v6841_v20  ;;  %10066 = vst [vmem:[#allocation109_spill] sm:$0xff] %v6854_v32  ;;  %v6861_v20 = vpop.permute.xlu1 %2409  ;;  %v2371_v10 = vadd.f32 %v2367_v52, %v2233_v18  ;;  %v6875_v46 = vmul.f32 %v3016_v40, %v10070_v61  ;;  %v6883_v34 = vmul.f32 %v3026_v54, %v10070_v61  ;;  %s7020_s5 = sld [smem:[#allocation9 + $0x42]] }
 0x190   : > { %10067 = vst [vmem:[#allocation111_spill] sm:$0xff] %v6864_v55  ;;  %10068 = vst [vmem:[#allocation144_spill] sm:$0xff] %v6869_v35  ;;  %v2381_v48 = vadd.f32 %v6445_v2, %v2351_v50  ;;  %v6886_v17 = vmul.f32 %v3036_v37, %v10070_v61  ;;  %v6889_v18 = vmul.f32 %v3016_v40, %v6184_v47  ;;  %v6960_v55 = vstv %s6866_s30  ;;  %s7054_s26 = sld [smem:[#allocation9 + $0x4e]] }
 0x191   : > { %10069 = vst [vmem:[#allocation149_spill] sm:$0xff] %v6872_v30  ;;  %10071 = vst [vmem:[#allocation106_spill] sm:$0xff] %v6875_v46  ;;  %v2391_v52 = vadd.f32 %v6449_v29, %v2361_v44  ;;  %v2401_v38 = vadd.f32 %v6463_v49, %v2371_v10  ;;  %v6896_v46 = vmul.f32 %v3016_v40, %v6030_v6  ;;  %v3230_v49 = vstv %s6622_s6  ;;  %s7032_s6 = sld [smem:[#allocation9 + $0x45]] }
 0x192   : > { %10072 = vst [vmem:[#allocation112_spill] sm:$0xff] %v6883_v34  ;;  %10073 = vst [vmem:[#allocation148_spill] sm:$0xff] %v6886_v17  ;;  %v6899_v2 = vmul.f32 %v3026_v54, %v6184_v47  ;;  %v6904_v61 = vmul.f32 %v3026_v54, %v6030_v6  ;;  %v6907_v17 = vmul.f32 %v3036_v37, %v6184_v47  ;;  %v3240_v44 = vstv %s6640_s9  ;;  %s7044_s9 = sld [smem:[#allocation9 + $0x4d]] }
 0x193   : > { %10074 = vst [vmem:[#allocation146_spill] sm:$0xff] %v6889_v18  ;;  %10075 = vst [vmem:[#allocation115_spill] sm:$0xff] %v6896_v46  ;;  %v2408_v50 = vpop.permute.xlu1 %2407  ;;  %v6910_v29 = vmul.f32 %v3036_v37, %v6030_v6  ;;  %v3250_v54 = vstv %s6704_s15  ;;  %v6927_v37 = vpop.permute.xlu0 %2971  ;;  %v6945_v34 = vmul.f32 %v3240_v44, %v6156_v5  ;;  %s7065_s8 = sld [smem:[#allocation9 + $0x4f]] }
 0x194   : > { %10076 = vst [vmem:[#allocation152_spill] sm:$0xff] %v6899_v2  ;;  %10077 = vst [vmem:[#allocation151_spill] sm:$0xff] %v6904_v61  ;;  %v2411_v10 = vsel %vm425_vm4, %v2408_v50, %v6861_v20  ;;  %v2412_v40 = vsel %vm425_vm4, %v6655_v22, %v2408_v50  ;;  %v6933_v2 = vstv %s6843_s3  ;;  %v6955_v30 = vmul.f32 %v3250_v54, %v6156_v5  ;;  %s7079_s28 = sld [smem:[#allocation9 + $0x50]] }
 0x195   : > { %10078 = vst [vmem:[#allocation150_spill] sm:$0xff] %v6907_v17  ;;  %10079 = vst [vmem:[#allocation153_spill] sm:$0xff] %v6910_v29  ;;  %v2423_v47 = vmul.f32 %v6466_v23, %v2411_v10  ;;  %v2433_v6 = vmul.f32 %v6469_v53, %v2411_v10  ;;  %v6930_v17 = vmul.f32 %v3230_v49, %v6156_v5  ;;  %s7089_s15 = sld [smem:[#allocation9 + $0x51]] }
 0x196   : > { %10081 = vst [vmem:[#allocation97_spill] sm:$0xff] %v6933_v2  ;;  %v6938_v50 = vmul.f32 %v6466_v23, %v2412_v40  ;;  %v6941_v18 = vmul.f32 %v6469_v53, %v2412_v40  ;;  %v2443_v29 = vmul.f32 %v6474_v24, %v2411_v10  ;;  %10082 = vst [vmem:[#allocation155_spill] sm:$0xff] %v6945_v34  ;;  %v6963_v10 = vstv %s6877_s12  ;;  %v10086_v34 = vld [vmem:[#allocation82_spill] sm:$0xff]  ;;  %s7129_s27 = sld [smem:[#allocation9 + $0x54]] }
 0x197   : > { %10080 = vst [vmem:[#allocation96_spill] sm:$0xff] %v6930_v17  ;;  %v2427_v61 = vadd.f32 %v2423_v47, %v2381_v48  ;;  %v2437_v17 = vadd.f32 %v2433_v6, %v2391_v52  ;;  %v6950_v46 = vmul.f32 %v6474_v24, %v2412_v40  ;;  %v6952_v2 = vpop.permute.xlu1 %2547  ;;  %10083 = vst [vmem:[#allocation100_spill] sm:$0xff] %v6955_v30  ;;  %v6970_v52 = vpop.permute.xlu0 %3047  ;;  %s10129_s29 = sld [smem:[#allocation24_spill]] }
 0x198   : > { %v2447_v35 = vadd.f32 %v2443_v29, %v2401_v38  ;;  %10084 = vst [vmem:[#allocation154_spill] sm:$0xff] %v6960_v55  ;;  %10085 = vst [vmem:[#allocation159_spill] sm:$0xff] %v6963_v10  ;;  %v6966_v48 = vmul.f32 %v3230_v49, %v10086_v34  ;;  %v6973_v5 = vmul.f32 %v3240_v44, %v10086_v34  ;;  %s7524_s17 = sld [smem:[#allocation9 + $0x55]] }
 0x199   : > { %10088 = vst [vmem:[#allocation121_spill] sm:$0xff] %v6970_v52  ;;  %v6976_v38 = vmul.f32 %v3250_v54, %v10086_v34  ;;  %v6979_v29 = vmul.f32 %v3230_v49, %v6203_v41  ;;  %v6982_v40 = vmul.f32 %v3230_v49, %v6119_v15  ;;  %v6987_v47 = vmul.f32 %v3240_v44, %v6203_v41  ;;  %v10161_v52 = vld [vmem:[#allocation128_spill] sm:$0xff]  ;;  %s7556_s3 = sld [smem:[#allocation9 + $0x5a]] }
 0x19a   : > { %10087 = vst [vmem:[#allocation157_spill] sm:$0xff] %v6966_v48  ;;  %10089 = vst [vmem:[#allocation156_spill] sm:$0xff] %v6973_v5  ;;  %v6990_v6 = vmul.f32 %v3240_v44, %v6119_v15  ;;  %v6993_v5 = vmul.f32 %v3250_v54, %v6203_v41  ;;  %v6996_v34 = vmul.f32 %v3250_v54, %v6119_v15  ;;  %v3444_v48 = vstv %s6720_s21  ;;  %s7103_s21 = sld [smem:[#allocation9 + $0x52]] }
 0x19b   : > { %10090 = vst [vmem:[#allocation120_spill] sm:$0xff] %v6976_v38  ;;  %10091 = vst [vmem:[#allocation125_spill] sm:$0xff] %v6979_v29  ;;  %v2546_v49 = vpop.permute.xlu1 %2545  ;;  %v7001_v38 = vstv %s6901_s24  ;;  %v7004_v29 = vstv %s6913_s7  ;;  %v7017_v44 = vstv %s6923_s10  ;;  %v3464_v54 = vstv %s6781_s11  ;;  %s7531_s11 = sld [smem:[#allocation9 + $0x56]] }
 0x19c   : > { %10092 = vst [vmem:[#allocation164_spill] sm:$0xff] %v6982_v40  ;;  %10093 = vst [vmem:[#allocation127_spill] sm:$0xff] %v6987_v47  ;;  %v3454_v40 = vstv %s6734_s22  ;;  %v2549_v41 = vsel %vm339_vm2, %v2546_v49, %v6952_v2  ;;  %v2550_v15 = vsel %vm339_vm2, %v6724_v14, %v2546_v49  ;;  %v7030_v47 = vstv %s6935_s20  ;;  %s7117_s22 = sld [smem:[#allocation9 + $0x53]] }
 0x19d   : > { %10094 = vst [vmem:[#allocation131_spill] sm:$0xff] %v6990_v6  ;;  %10095 = vst [vmem:[#allocation158_spill] sm:$0xff] %v6993_v5  ;;  %v7024_v5 = vpop.permute.xlu0 %3185  ;;  %v7035_v49 = vmul.f32 %v6477_v33, %v2549_v41  ;;  %v2581_v6 = vmul.f32 %v6488_v1, %v2550_v15  ;;  %v7042_v10 = vmul.f32 %v3454_v40, %v6246_v45  ;;  %s7569_s30 = sld [smem:[#allocation9 + $0x5d]] }
 0x19e   : > { %10096 = vst [vmem:[#allocation132_spill] sm:$0xff] %v6996_v34  ;;  %10097 = vst [vmem:[#allocation163_spill] sm:$0xff] %v7001_v38  ;;  %v2561_v38 = vmul.f32 %v6477_v33, %v2550_v15  ;;  %v7027_v34 = vmul.f32 %v3444_v48, %v6246_v45  ;;  %v7057_v32 = vmul.f32 %v3444_v48, %v6311_v19  ;;  %v10170_v33 = vld [vmem:[#allocation44_spill] sm:$0xff]  ;;  %s7581_s12 = sld [smem:[#allocation9 + $0x5c]] }
 0x19f   : > { %10098 = vst [vmem:[#allocation165_spill] sm:$0xff] %v7004_v29  ;;  %10099 = vst [vmem:[#allocation136_spill] sm:$0xff] %v7017_v44  ;;  %v2571_v29 = vmul.f32 %v6485_v0, %v2550_v15  ;;  %v7038_v44 = vmul.f32 %v6485_v0, %v2549_v41  ;;  %v7049_v30 = vpop.permute.xlu1 %2623  ;;  %v2585_v15 = vadd.f32 %v2581_v6, %v2447_v35  ;;  %s7595_s24 = sld [smem:[#allocation9 + $0x5f]] }
 0x1a0   : > { %10100 = vst [vmem:[#allocation160_spill] sm:$0xff] %v7024_v5  ;;  %10101 = vst [vmem:[#allocation167_spill] sm:$0xff] %v7027_v34  ;;  %v2565_v34 = vadd.f32 %v2561_v38, %v2427_v61  ;;  %v7052_v5 = vmul.f32 %v3464_v54, %v6246_v45  ;;  %v7063_v61 = vmul.f32 %v3464_v54, %v6311_v19  ;;  %v7071_v38 = vstv %s6968_s25  ;;  %s7601_s7 = sld [smem:[#allocation9 + $0x60]] }
 0x1a1   : > { %10102 = vst [vmem:[#allocation168_spill] sm:$0xff] %v7030_v47  ;;  %10103 = vst [vmem:[#allocation169_spill] sm:$0xff] %v7042_v10  ;;  %v2575_v55 = vadd.f32 %v2571_v29, %v2437_v17  ;;  %v7047_v47 = vmul.f32 %v6488_v1, %v2549_v41  ;;  %v7060_v10 = vmul.f32 %v3454_v40, %v6311_v19  ;;  %v7067_v17 = vpop.permute.xlu0 %3261  ;;  %v7074_v29 = vstv %s6984_s4  ;;  %v10113_v19 = vld [vmem:[#allocation103_spill] sm:$0xff]  ;;  %v10114_v41 = vld [vmem:[#allocation124_spill] sm:$0xff]  ;;  %s7605_s10 = sld [smem:[#allocation9 + $0x61]] }
 0x1a2   : > { %10104 = vst [vmem:[#allocation175_spill] sm:$0xff] %v7049_v30  ;;  %10105 = vst [vmem:[#allocation166_spill] sm:$0xff] %v7052_v5  ;;  %v2595_v45 = vadd.f32 %v6492_v36, %v2565_v34  ;;  %v7077_v35 = vmul.f32 %v3444_v48, %v5871_v28  ;;  %v7087_v36 = vmul.f32 %v3454_v40, %v5871_v28  ;;  %v10169_v1 = vld [vmem:[#allocation117_spill] sm:$0xff]  ;;  %s7609_s20 = sld [smem:[#allocation9 + $0x62]] }
 0x1a3   : > { %10106 = vst [vmem:[#allocation180_spill] sm:$0xff] %v7057_v32  ;;  %10107 = vst [vmem:[#allocation130_spill] sm:$0xff] %v7060_v10  ;;  %v2605_v6 = vadd.f32 %v10113_v19, %v2575_v55  ;;  %v10115_v10 = vld [vmem:[#allocation91_spill] sm:$0xff]  ;;  %v2622_v34 = vpop.permute.xlu1 %2621  ;;  %v7112_v19 = vstv %s7008_s23  ;;  %s7634_s25 = sld [smem:[#allocation9 + $0x65]] }
 0x1a4   : > { %10108 = vst [vmem:[#allocation133_spill] sm:$0xff] %v7063_v61  ;;  %10109 = vst [vmem:[#allocation170_spill] sm:$0xff] %v7067_v17  ;;  %v2615_v61 = vadd.f32 %v10114_v41, %v2585_v15  ;;  %v7084_v32 = vmul.f32 %v3444_v48, %v10115_v10  ;;  %v7098_v55 = vmul.f32 %v3464_v54, %v10115_v10  ;;  %v7101_v15 = vstv %s6795_s16  ;;  %v10125_v41 = vld [vmem:[#allocation102_spill] sm:$0xff]  ;;  %s7537_s16 = sld [smem:[#allocation9 + $0x57]] }
 0x1a5   : > { %10110 = vst [vmem:[#allocation172_spill] sm:$0xff] %v7071_v38  ;;  %10111 = vst [vmem:[#allocation162_spill] sm:$0xff] %v7074_v29  ;;  %v7095_v29 = vmul.f32 %v3464_v54, %v5871_v28  ;;  %v2625_v48 = vsel %vm425_vm4, %v2622_v34, %v7049_v30  ;;  %v7115_v28 = vstv %s6813_s0  ;;  %v10132_v38 = vld [vmem:[#allocation86_spill] sm:$0xff]  ;;  %s7543_s0 = sld [smem:[#allocation9 + $0x58]] }
 0x1a6   : > { %10112 = vst [vmem:[#allocation176_spill] sm:$0xff] %v7077_v35  ;;  %10116 = vst [vmem:[#allocation171_spill] sm:$0xff] %v7084_v32  ;;  %v7092_v35 = vmul.f32 %v3454_v40, %v10115_v10  ;;  %v2626_v40 = vsel %vm425_vm4, %v6768_v43, %v2622_v34  ;;  %v10124_v10 = vld [vmem:[#allocation118_spill] sm:$0xff]  ;;  %v7137_v5 = vmul.f32 %v7101_v15, %v10132_v38  ;;  %s7642_s4 = sld [smem:[#allocation9 + $0x66]] }
 0x1a7   : > { %10117 = vst [vmem:[#allocation182_spill] sm:$0xff] %v7087_v36  ;;  %10119 = vst [vmem:[#allocation181_spill] sm:$0xff] %v7095_v29  ;;  %v2637_v54 = vmul.f32 %v10124_v10, %v2625_v48  ;;  %v2647_v29 = vmul.f32 %v10125_v41, %v2625_v48  ;;  %v7121_v36 = vpop.permute.xlu0 %3399  ;;  %v7132_v34 = vmul.f32 %v10124_v10, %v2626_v40  ;;  %s7652_s23 = sld [smem:[#allocation9 + $0x68]] }
 0x1a8   : > { %10118 = vst [vmem:[#allocation173_spill] sm:$0xff] %v7092_v35  ;;  %10120 = vst [vmem:[#allocation174_spill] sm:$0xff] %v7098_v55  ;;  %v7124_v55 = vstv %s7020_s5  ;;  %v7127_v35 = vstv %s7032_s6  ;;  %s7657_s5 = sld [smem:[#allocation9 + $0x69]] }
 0x1a9   : > { %10121 = vst [vmem:[#allocation177_spill] sm:$0xff] %v7101_v15  ;;  %10122 = vst [vmem:[#allocation185_spill] sm:$0xff] %v7112_v19  ;;  %v10131_v19 = vld [vmem:[#allocation113_spill] sm:$0xff]  ;;  %v7152_v15 = vmul.f32 %v7115_v28, %v10132_v38  ;;  %s7660_s6 = sld [smem:[#allocation9 + $0x6a]] }
 0x1aa   : > { %10123 = vst [vmem:[#allocation178_spill] sm:$0xff] %v7115_v28  ;;  %10126 = vst [vmem:[#allocation46_spill] sm:$0xff] %v7121_v36  ;;  %v2657_v32 = vmul.f32 %v10131_v19, %v2625_v48  ;;  %v7140_v36 = vstv %s6829_s1  ;;  %v7146_v17 = vmul.f32 %v10131_v19, %v2626_v40  ;;  %v7148_v48 = vpop.permute.xlu1 %2761  ;;  %s7546_s1 = sld [smem:[#allocation9 + $0x59]] }
 0x1ab   : > { %10127 = vst [vmem:[#allocation184_spill] sm:$0xff] %v7124_v55  ;;  %10128 = vst [vmem:[#allocation192_spill] sm:$0xff] %v7127_v35  ;;  %v2641_v55 = vadd.f32 %v2637_v54, %v2595_v45  ;;  %v7143_v35 = vmul.f32 %v10125_v41, %v2626_v40  ;;  %v7159_v45 = vstv %s6856_s19  ;;  %v7162_v54 = vstv %s6891_s13  ;;  %s7562_s19 = sld [smem:[#allocation9 + $0x5b]] }
 0x1ac   : > { %10130 = vst [vmem:[#allocation179_spill] sm:$0xff] %v7132_v34  ;;  %10133 = vst [vmem:[#allocation190_spill] sm:$0xff] %v7137_v5  ;;  %v2651_v5 = vadd.f32 %v2647_v29, %v2605_v6  ;;  %v7156_v34 = vmul.f32 %v7140_v36, %v10132_v38  ;;  %v2661_v40 = vadd.f32 %v2657_v32, %v2615_v61  ;;  %v7171_v29 = vstv %s6947_s14  ;;  %s7590_s13 = sld [smem:[#allocation9 + $0x5e]] }
 0x1ad   : > { %10134 = vst [vmem:[#allocation187_spill] sm:$0xff] %v7140_v36  ;;  %10135 = vst [vmem:[#allocation183_spill] sm:$0xff] %v7143_v35  ;;  %v4280_v35 = vld [vmem:[%s10129_s29 + $0x18] sm:$0xff]  ;;  %v7174_v6 = vstv %s6957_s18  ;;  %v7177_v38 = vstv %s6998_s2  ;;  %v7180_v36 = vstv %s7044_s9  ;;  %s7617_s14 = sld [smem:[#allocation9 + $0x63]] }
 0x1ae   : > { %10136 = vst [vmem:[#allocation53_spill] sm:$0xff] %v7146_v17  ;;  %10137 = vst [vmem:[#allocation45_spill] sm:$0xff] %v7148_v48  ;;  %v7164_v17 = vpop.permute.xlu0 %3475  ;;  %v7168_v28 = vmul.f32 %v4280_v35, %v7162_v54  ;;  %v7186_v32 = vstv %s7065_s8  ;;  %v2760_v61 = vpop.permute.xlu1 %2759  ;;  %s7625_s18 = sld [smem:[#allocation9 + $0x64]] }
 0x1af   : > { %10138 = vst [vmem:[#allocation161_spill] sm:$0xff] %v7152_v15  ;;  %10139 = vst [vmem:[#allocation193_spill] sm:$0xff] %v7156_v34  ;;  %v7189_v34 = vmul.f32 %v4280_v35, %v7177_v38  ;;  %v7210_v15 = vstv %s7117_s22  ;;  %s7649_s2 = sld [smem:[#allocation9 + $0x67]] }
 0x1b0   : > { %10140 = vst [vmem:[#allocation54_spill] sm:$0xff] %v7159_v45  ;;  %10141 = vst [vmem:[#allocation55_spill] sm:$0xff] %v7162_v54  ;;  %v7183_v45 = vstv %s7054_s26  ;;  %v7192_v54 = vmul.f32 %v4280_v35, %v7186_v32  ;;  %s7664_s9 = sld [smem:[#allocation9 + $0x6b]] }
 0x1b1   : > { %10142 = vst [vmem:[#allocation51_spill] sm:$0xff] %v7164_v17  ;;  %10143 = vst [vmem:[#allocation72_spill] sm:$0xff] %v7168_v28  ;;  %v7195_v28 = vstv %s7079_s28  ;;  %s7674_s26 = sld [smem:[#allocation9 + $0x6c]] }
 0x1b2   : > { %10144 = vst [vmem:[#allocation78_spill] sm:$0xff] %v7171_v29  ;;  %10145 = vst [vmem:[#allocation68_spill] sm:$0xff] %v7174_v6  ;;  %v7198_v29 = vstv %s7089_s15  ;;  %v7207_v6 = vstv %s7103_s21  ;;  %v2114_v17 = vpop.permute.xlu0 %2113  ;;  %s7681_s8 = sld [smem:[#allocation9 + $0x6d]] }
 0x1b3   : > { %10146 = vst [vmem:[#allocation58_spill] sm:$0xff] %v7177_v38  ;;  %10147 = vst [vmem:[#allocation57_spill] sm:$0xff] %v7180_v36  ;;  %v2763_v36 = vsel %vm339_vm2, %v2760_v61, %v7148_v48  ;;  %v10156_v38 = vld [vmem:[#allocation98_spill] sm:$0xff]  ;;  %s7687_s28 = sld [smem:[#allocation9 + $0x6e]] }
 0x1b4   : > { %10148 = vst [vmem:[#allocation65_spill] sm:$0xff] %v7183_v45  ;;  %10149 = vst [vmem:[#allocation67_spill] sm:$0xff] %v7186_v32  ;;  %v2764_v45 = vsel %vm339_vm2, %v6833_v62, %v2760_v61  ;;  %v10157_v32 = vld [vmem:[#allocation108_spill] sm:$0xff]  ;;  %v7221_v48 = vmul.f32 %v10156_v38, %v2763_v36  ;;  %s7696_s15 = sld [smem:[#allocation9 + $0x6f]] }
 0x1b5   : > { %10150 = vst [vmem:[#allocation64_spill] sm:$0xff] %v7189_v34  ;;  %10151 = vst [vmem:[#allocation63_spill] sm:$0xff] %v7192_v54  ;;  %v2775_v34 = vmul.f32 %v10156_v38, %v2764_v45  ;;  %v2785_v54 = vmul.f32 %v10157_v32, %v2764_v45  ;;  %v2795_v19 = vmul.f32 %v10161_v52, %v2764_v45  ;;  %v10162_v61 = vld [vmem:[#allocation116_spill] sm:$0xff]  ;;  %v10167_v38 = vld [vmem:[#allocation87_spill] sm:$0xff]  ;;  %s7699_s21 = sld [smem:[#allocation9 + $0x70]] }
 0x1b6   : > { %10152 = vst [vmem:[#allocation82_spill] sm:$0xff] %v7195_v28  ;;  %10153 = vst [vmem:[#allocation103_spill] sm:$0xff] %v7198_v29  ;;  %v7215_v28 = vmul.f32 %v4280_v35, %v7207_v6  ;;  %v7218_v29 = vstv %s7129_s27  ;;  %v2123_v62 = vsel %vm339_vm2, %v2114_v17, %v10162_v61  ;;  %v7231_v30 = vmul.f32 %v10157_v32, %v2763_v36  ;;  %s7706_s22 = sld [smem:[#allocation9 + $0x71]] }
 0x1b7   : > { %10154 = vst [vmem:[#allocation124_spill] sm:$0xff] %v7207_v6  ;;  %10155 = vst [vmem:[#allocation91_spill] sm:$0xff] %v7210_v15  ;;  %v10163_v15 = vld [vmem:[#allocation99_spill] sm:$0xff]  ;;  %v2779_v10 = vadd.f32 %v2775_v34, %v2641_v55  ;;  %v10165_v6 = vld [vmem:[#allocation94_spill] sm:$0xff]  ;;  %v7239_v45 = vmul.f32 %v10161_v52, %v2763_v36  ;;  %v2789_v55 = vadd.f32 %v2785_v54, %v2651_v5  ;;  %s7712_s27 = sld [smem:[#allocation9 + $0x72]] }
 0x1b8   : > { %10158 = vst [vmem:[#allocation86_spill] sm:$0xff] %v7215_v28  ;;  %10159 = vst [vmem:[#allocation196_spill] sm:$0xff] %v7218_v29  ;;  %v2124_v41 = vsel %vm339_vm2, %v10163_v15, %v2114_v17  ;;  %v2132_v29 = vmul.f32 %v10165_v6, %v2123_v62  ;;  %v7236_v28 = vpop.permute.xlu1 %2837  ;;  %v2142_v17 = vmul.f32 %v10167_v38, %v2123_v62  ;;  %v10171_v52 = vld [vmem:[#allocation135_spill] sm:$0xff] }
 0x1b9   : > { %10160 = vst [vmem:[#allocation197_spill] sm:$0xff] %v7221_v48  ;;  %10164 = vst [vmem:[#allocation116_spill] sm:$0xff] %v7231_v30  ;;  %v2125_v35 = vsel %vm317_vm3, 0.0, %v2124_v41  ;;  %v2799_v15 = vadd.f32 %v2795_v19, %v2661_v40  ;;  %v2152_v32 = vmul.f32 %v6368_v21, %v2123_v62  ;;  %v2190_v41 = vpop.permute.xlu0 %2189  ;;  %v10168_v30 = vld [vmem:[#allocation188_spill] sm:$0xff]  ;;  %v10172_v62 = vld [vmem:[#allocation43_spill] sm:$0xff] }
 0x1ba   : > { %10166 = vst [vmem:[#allocation99_spill] sm:$0xff] %v7239_v45  ;;  %v2131_v61 = vmul.f32 %v10165_v6, %v2125_v35  ;;  %v2141_v48 = vmul.f32 %v10167_v38, %v2125_v35  ;;  %v2151_v34 = vmul.f32 %v6368_v21, %v2125_v35  ;;  %v2166_v0 = vadd.f32 %v10169_v1, %v2132_v29  ;;  %v10175_v35 = vld [vmem:[#allocation107_spill] sm:$0xff]  ;;  %v10417_v60 = vld [vmem:[#allocation57_spill] sm:$0xff] }
 0x1bb   : > { %v2199_v6 = vsel %vm425_vm4, %v2190_v41, %v6518_v59  ;;  %v2200_v5 = vsel %vm425_vm4, %v6627_v27, %v2190_v41  ;;  %v2809_v54 = vadd.f32 %v10172_v62, %v2779_v10  ;;  %10275 = sst [smem:[#allocation25_spill]] %s7699_s21 }
 0x1bc   : > { %v2165_v43 = vadd.f32 %v10168_v30, %v2131_v61  ;;  %v2175_v36 = vadd.f32 %v10170_v33, %v2141_v48  ;;  %v2185_v45 = vadd.f32 %v10171_v52, %v2151_v34  ;;  %v2207_v19 = vmul.f32 %v6396_v7, %v2199_v6  ;;  %v2836_v21 = vpop.permute.xlu1 %2835  ;;  %v10173_v30 = vld [vmem:[#allocation119_spill] sm:$0xff]  ;;  %10278 = sst [smem:[#allocation28_spill]] %s7706_s22 }
 0x1bd   : > { %v2176_v40 = vadd.f32 %v10173_v30, %v2142_v17  ;;  %v2204_v33 = vsel %vm324_vm5, 0.0, %v2200_v5  ;;  %v2217_v48 = vmul.f32 %v6399_v51, %v2199_v6  ;;  %v2227_v59 = vmul.f32 %v6419_v58, %v2199_v6  ;;  %10282 = sst [smem:[#allocation26_spill]] %s7712_s27 }
 0x1be   : > { %v2210_v52 = vmul.f32 %v6396_v7, %v2204_v33  ;;  %v2211_v29 = vadd.f32 %v2207_v19, %v2165_v43  ;;  %v2220_v38 = vmul.f32 %v6399_v51, %v2204_v33  ;;  %v2230_v27 = vmul.f32 %v6419_v58, %v2204_v33  ;;  %v2328_v51 = vpop.permute.xlu0 %2327  ;;  %v10176_v58 = vld [vmem:[#allocation194_spill] sm:$0xff]  ;;  %s7719_s22 = sld [smem:[#allocation9 + $0x73]] }
 0x1bf   : > { %v2186_v61 = vadd.f32 %v10175_v35, %v2152_v32  ;;  %v2221_v34 = vadd.f32 %v2217_v48, %v2175_v36  ;;  %v2231_v10 = vadd.f32 %v2227_v59, %v2185_v45  ;;  %v2839_v17 = vsel %vm425_vm4, %v2836_v21, %v7236_v28  ;;  %v10177_v32 = vld [vmem:[#allocation47_spill] sm:$0xff]  ;;  %v10178_v19 = vld [vmem:[#allocation186_spill] sm:$0xff]  ;;  %s7724_s21 = sld [smem:[#allocation9 + $0x74]] }
 0x1c0   : > { %v2214_v41 = vadd.f32 %v2210_v52, %v6643_v26  ;;  %v2224_v5 = vadd.f32 %v2220_v38, %v6647_v42  ;;  %v2234_v6 = vadd.f32 %v2230_v27, %v6653_v8  ;;  %v2840_v7 = vsel %vm425_vm4, %v6879_v4, %v2836_v21  ;;  %v7293_v48 = vpop.permute.xlu1 %2975  ;;  %s7726_s27 = sld [smem:[#allocation9 + $0x75]] }
 0x1c1   : > { %v2819_v43 = vadd.f32 %v10176_v58, %v2789_v55  ;;  %v2829_v36 = vadd.f32 %v10177_v32, %v2799_v15  ;;  %v2851_v45 = vmul.f32 %v6617_v16, %v2839_v17  ;;  %v2861_v62 = vmul.f32 %v10178_v19, %v2839_v17 }
 0x1c2   : > { %v2352_v30 = vadd.f32 %v6846_v3, %v2214_v41  ;;  %v2362_v26 = vadd.f32 %v6849_v9, %v2224_v5  ;;  %v2372_v42 = vadd.f32 %v6859_v63, %v2234_v6  ;;  %v7284_v8 = vmul.f32 %v6617_v16, %v2840_v7  ;;  %v2404_v27 = vpop.permute.xlu0 %2403  ;;  %v10180_v41 = vld [vmem:[#allocation189_spill] sm:$0xff] }
 0x1c3   : > { %v2855_v33 = vadd.f32 %v2851_v45, %v2809_v54  ;;  %v7287_v21 = vmul.f32 %v10178_v19, %v2840_v7  ;;  %v7290_v55 = vmul.f32 %v6630_v57, %v2840_v7  ;;  %v2212_v15 = vadd.f32 %v6737_v56, %v2166_v0  ;;  %v10179_v56 = vld [vmem:[#allocation79_spill] sm:$0xff] }
 0x1c4   : > { %v2222_v3 = vadd.f32 %v6740_v39, %v2176_v40  ;;  %v2232_v9 = vadd.f32 %v6750_v12, %v2186_v61  ;;  %v2337_v63 = vsel %vm339_vm2, %v2328_v51, %v6608_v11  ;;  %v2338_v54 = vsel %vm339_vm2, %v6752_v25, %v2328_v51 }
 0x1c5   : > { %v2865_v59 = vadd.f32 %v2861_v62, %v2819_v43  ;;  %v2339_v52 = vsel %vm317_vm3, 0.0, %v2338_v54  ;;  %v2346_v0 = vmul.f32 %v6422_v13, %v2337_v63  ;;  %v2356_v38 = vmul.f32 %v10179_v56, %v2337_v63  ;;  %v10181_v43 = vld [vmem:[#allocation48_spill] sm:$0xff]  ;;  %v10183_v62 = vld [vmem:[#allocation195_spill] sm:$0xff]  ;;  %10287 = sst [smem:[#allocation27_spill]] %s7724_s21 }
 0x1c6   : > { %v2345_v39 = vmul.f32 %v6422_v13, %v2339_v52  ;;  %v2355_v12 = vmul.f32 %v10179_v56, %v2339_v52  ;;  %v2365_v40 = vmul.f32 %v6431_v31, %v2339_v52  ;;  %v2366_v11 = vmul.f32 %v6431_v31, %v2337_v63  ;;  %v10182_v13 = vld [vmem:[#allocation191_spill] sm:$0xff]  ;;  %v2974_v63 = vpop.permute.xlu1 %2973  ;;  %10288 = sst [smem:[#allocation29_spill]] %s7726_s27 }
 0x1c7   : > { %v2871_v35 = vmul.f32 %v6630_v57, %v2839_v17  ;;  %v2350_v25 = vadd.f32 %v2346_v0, %v2212_v15  ;;  %v2360_v61 = vadd.f32 %v2356_v38, %v2222_v3  ;;  %v2382_v5 = vadd.f32 %v10180_v41, %v2352_v30  ;;  %v10184_v17 = vld [vmem:[#allocation122_spill] sm:$0xff]  ;;  %s7741_s27 = sld [smem:[#allocation9 + $0x77]] }
 0x1c8   : > { %v2349_v6 = vadd.f32 %v2345_v39, %v2211_v29  ;;  %v2359_v7 = vadd.f32 %v2355_v12, %v2221_v34  ;;  %v2369_v51 = vadd.f32 %v2365_v40, %v2231_v10  ;;  %v2370_v58 = vadd.f32 %v2366_v11, %v2232_v9  ;;  %v10185_v3 = vld [vmem:[#allocation114_spill] sm:$0xff]  ;;  %v10187_v34 = vld [vmem:[#allocation52_spill] sm:$0xff]  ;;  %s7781_s21 = sld [smem:[#allocation9 + $0x7d]] }
 0x1c9   : > { %v2380_v32 = vadd.f32 %v10181_v43, %v2350_v25  ;;  %v2390_v45 = vadd.f32 %v10182_v13, %v2360_v61  ;;  %v2392_v54 = vadd.f32 %v10183_v62, %v2362_v26  ;;  %v2413_v31 = vsel %vm425_vm4, %v2404_v27, %v6655_v22  ;;  %v10186_v30 = vld [vmem:[#allocation50_spill] sm:$0xff]  ;;  %v10188_v25 = vld [vmem:[#allocation49_spill] sm:$0xff] }
 0x1ca   : > { %v2402_v15 = vadd.f32 %v10184_v17, %v2372_v42  ;;  %v2379_v52 = vadd.f32 %v10185_v3, %v2349_v6  ;;  %v2389_v29 = vadd.f32 %v10186_v30, %v2359_v7  ;;  %v2399_v10 = vadd.f32 %v10187_v34, %v2369_v51  ;;  %v10189_v7 = vld [vmem:[#allocation129_spill] sm:$0xff]  ;;  %v10193_v30 = vld [vmem:[#allocation95_spill] sm:$0xff] }
 0x1cb   : > { %v2414_v9 = vsel %vm425_vm4, %v6861_v20, %v2404_v27  ;;  %v2421_v0 = vmul.f32 %v6466_v23, %v2413_v31  ;;  %v2431_v26 = vmul.f32 %v6469_v53, %v2413_v31  ;;  %v2441_v56 = vmul.f32 %v6474_v24, %v2413_v31  ;;  %v2542_v27 = vpop.permute.xlu0 %2541  ;;  %v10190_v31 = vld [vmem:[#allocation56_spill] sm:$0xff] }
 0x1cc   : > { %v2418_v22 = vsel %vm324_vm5, 0.0, %v2414_v9  ;;  %v7334_v42 = vsel %vm339_vm2, %v2974_v63, %v7293_v48  ;;  %v2978_v38 = vsel %vm339_vm2, %v6927_v37, %v2974_v63  ;;  %v2426_v20 = vadd.f32 %v6938_v50, %v2380_v32  ;;  %v10191_v32 = vld [vmem:[#allocation59_spill] sm:$0xff]  ;;  %v10197_v9 = vld [vmem:[#allocation105_spill] sm:$0xff] }
 0x1cd   : > { %v2424_v39 = vmul.f32 %v6466_v23, %v2418_v22  ;;  %v2425_v12 = vadd.f32 %v2421_v0, %v2379_v52  ;;  %v2434_v40 = vmul.f32 %v6469_v53, %v2418_v22  ;;  %v2435_v11 = vadd.f32 %v2431_v26, %v2389_v29  ;;  %10292 = sst [smem:[#allocation31_spill]] %s7741_s27 }
 0x1ce   : > { %v2400_v61 = vadd.f32 %v10188_v25, %v2370_v58  ;;  %v2444_v41 = vmul.f32 %v6474_v24, %v2418_v22  ;;  %v2445_v6 = vadd.f32 %v2441_v56, %v2399_v10  ;;  %v2989_v51 = vmul.f32 %v10189_v7, %v2978_v38  ;;  %v10196_v10 = vld [vmem:[#allocation137_spill] sm:$0xff]  ;;  %v10199_v25 = vld [vmem:[#allocation175_spill] sm:$0xff]  ;;  %s7754_s27 = sld [smem:[#allocation9 + $0x79]] }
 0x1cf   : > { %v2875_v43 = vadd.f32 %v2871_v35, %v2829_v36  ;;  %v2428_v13 = vadd.f32 %v2424_v39, %v2382_v5  ;;  %v2438_v62 = vadd.f32 %v2434_v40, %v2392_v54  ;;  %v2999_v63 = vmul.f32 %v10190_v31, %v2978_v38  ;;  %v10198_v40 = vld [vmem:[#allocation126_spill] sm:$0xff]  ;;  %10305 = sst [smem:[#allocation36_spill]] %s7781_s21 }
 0x1d0   : > { %v2448_v50 = vadd.f32 %v2444_v41, %v2402_v15  ;;  %v7348_v23 = vmul.f32 %v10189_v7, %v7334_v42  ;;  %v2993_v53 = vadd.f32 %v2989_v51, %v2855_v33  ;;  %v3009_v17 = vmul.f32 %v10191_v32, %v2978_v38  ;;  %v10192_v15 = vld [vmem:[#allocation90_spill] sm:$0xff]  ;;  %s7798_s21 = sld [smem:[#allocation9 + $0x7f]] }
 0x1d1   : > { %v2566_v58 = vadd.f32 %v7035_v49, %v2428_v13  ;;  %v2576_v24 = vadd.f32 %v7038_v44, %v2438_v62  ;;  %v3003_v3 = vadd.f32 %v2999_v63, %v2865_v59  ;;  %v2436_v52 = vadd.f32 %v6941_v18, %v2390_v45  ;;  %v10194_v59 = vld [vmem:[#allocation110_spill] sm:$0xff]  ;;  %v2618_v18 = vpop.permute.xlu0 %2617  ;;  %v7367_v45 = vpop.permute.xlu1 %3051  ;;  %v10201_v62 = vld [vmem:[#allocation93_spill] sm:$0xff] }
 0x1d2   : > { %v2586_v36 = vadd.f32 %v7047_v47, %v2448_v50  ;;  %v3013_v35 = vadd.f32 %v3009_v17, %v2875_v43  ;;  %v2446_v5 = vadd.f32 %v6950_v46, %v2400_v61  ;;  %v2551_v54 = vsel %vm339_vm2, %v2542_v27, %v6724_v14  ;;  %v10195_v46 = vld [vmem:[#allocation138_spill] sm:$0xff]  ;;  %v10200_v43 = vld [vmem:[#allocation60_spill] sm:$0xff]  ;;  %v10202_v50 = vld [vmem:[#allocation123_spill] sm:$0xff] }
 0x1d3   : > { %v2552_v33 = vsel %vm339_vm2, %v6952_v2, %v2542_v27  ;;  %v2560_v49 = vmul.f32 %v10192_v15, %v2551_v54  ;;  %v2570_v44 = vmul.f32 %v10193_v30, %v2551_v54  ;;  %v2580_v29 = vmul.f32 %v10194_v59, %v2551_v54  ;;  %v10205_v54 = vld [vmem:[#allocation92_spill] sm:$0xff] }
 0x1d4   : > { %v2553_v47 = vsel %vm317_vm3, 0.0, %v2552_v33  ;;  %v2596_v34 = vadd.f32 %v10195_v46, %v2566_v58  ;;  %v2606_v14 = vadd.f32 %v10196_v10, %v2576_v24  ;;  %v2616_v0 = vadd.f32 %v10197_v9, %v2586_v36  ;;  %v10203_v24 = vld [vmem:[#allocation118_spill] sm:$0xff]  ;;  %v10204_v36 = vld [vmem:[#allocation61_spill] sm:$0xff]  ;;  %10296 = sst [smem:[#allocation33_spill]] %s7754_s27 }
 0x1d5   : > { %v2559_v2 = vmul.f32 %v10192_v15, %v2553_v47  ;;  %v2564_v26 = vadd.f32 %v2560_v49, %v2426_v20  ;;  %v2569_v56 = vmul.f32 %v10193_v30, %v2553_v47  ;;  %v2574_v22 = vadd.f32 %v2570_v44, %v2436_v52  ;;  %v10207_v49 = vld [vmem:[#allocation101_spill] sm:$0xff]  ;;  %v10209_v9 = vld [vmem:[#allocation134_spill] sm:$0xff]  ;;  %s7771_s27 = sld [smem:[#allocation9 + $0x7b]] }
 0x1d6   : > { %v2579_v38 = vmul.f32 %v10194_v59, %v2553_v47  ;;  %v2584_v39 = vadd.f32 %v2580_v29, %v2446_v5  ;;  %v2627_v27 = vsel %vm425_vm4, %v2618_v18, %v10198_v40  ;;  %v2628_v61 = vsel %vm425_vm4, %v10199_v25, %v2618_v18  ;;  %v3050_v18 = vpop.permute.xlu1 %3049  ;;  %v10211_v25 = vld [vmem:[#allocation140_spill] sm:$0xff] }
 0x1d7   : > { %v2563_v41 = vadd.f32 %v2559_v2, %v2425_v12  ;;  %v2573_v51 = vadd.f32 %v2569_v56, %v2435_v11  ;;  %v2594_v13 = vadd.f32 %v10200_v43, %v2564_v26  ;;  %v2604_v20 = vadd.f32 %v10201_v62, %v2574_v22  ;;  %v10206_v12 = vld [vmem:[#allocation102_spill] sm:$0xff]  ;;  %v10215_v62 = vld [vmem:[#allocation69_spill] sm:$0xff] }
 0x1d8   : > { %v2583_v63 = vadd.f32 %v2579_v38, %v2445_v6  ;;  %v2614_v17 = vadd.f32 %v10202_v50, %v2584_v39  ;;  %v2632_v58 = vsel %vm324_vm5, 0.0, %v2628_v61  ;;  %v2635_v52 = vmul.f32 %v10203_v24, %v2627_v27  ;;  %v10208_v6 = vld [vmem:[#allocation113_spill] sm:$0xff]  ;;  %v10210_v38 = vld [vmem:[#allocation66_spill] sm:$0xff] }
 0x1d9   : > { %v2593_v5 = vadd.f32 %v10204_v36, %v2563_v41  ;;  %v2603_v33 = vadd.f32 %v10205_v54, %v2573_v51  ;;  %v2638_v15 = vmul.f32 %v10203_v24, %v2632_v58  ;;  %v2645_v11 = vmul.f32 %v10206_v12, %v2627_v27  ;;  %v10212_v41 = vld [vmem:[#allocation121_spill] sm:$0xff]  ;;  %v10214_v51 = vld [vmem:[#allocation116_spill] sm:$0xff]  ;;  %v10217_v24 = vld [vmem:[#allocation139_spill] sm:$0xff] }
 0x1da   : > { %v2613_v30 = vadd.f32 %v10207_v49, %v2583_v63  ;;  %v2648_v44 = vmul.f32 %v10206_v12, %v2632_v58  ;;  %v2655_v59 = vmul.f32 %v10208_v6, %v2627_v27  ;;  %v2658_v29 = vmul.f32 %v10208_v6, %v2632_v58 }
 0x1db   : > { %v2639_v47 = vadd.f32 %v2635_v52, %v2593_v5  ;;  %v2642_v46 = vadd.f32 %v2638_v15, %v2596_v34  ;;  %v2649_v10 = vadd.f32 %v2645_v11, %v2603_v33  ;;  %v3023_v2 = vadd.f32 %v10209_v9, %v2993_v53  ;;  %v2756_v53 = vpop.permute.xlu0 %2755  ;;  %v10218_v5 = vld [vmem:[#allocation62_spill] sm:$0xff]  ;;  %v10220_v15 = vld [vmem:[#allocation183_spill] sm:$0xff]  ;;  %v10221_v11 = vld [vmem:[#allocation53_spill] sm:$0xff]  ;;  %10304 = sst [smem:[#allocation35_spill]] %s7771_s27 }
 0x1dc   : > { %v2652_v26 = vadd.f32 %v2648_v44, %v2606_v14  ;;  %v2659_v56 = vadd.f32 %v2655_v59, %v2613_v30  ;;  %v2662_v22 = vadd.f32 %v2658_v29, %v2616_v0  ;;  %v3033_v39 = vadd.f32 %v10210_v38, %v3003_v3  ;;  %v10213_v3 = vld [vmem:[#allocation197_spill] sm:$0xff]  ;;  %v7427_v30 = vpop.permute.xlu1 %3189  ;;  %v10223_v59 = vld [vmem:[#allocation143_spill] sm:$0xff]  ;;  %s7791_s27 = sld [smem:[#allocation9 + $0x7e]] }
 0x1dd   : > { %v7399_v40 = vmul.f32 %v10190_v31, %v7334_v42  ;;  %v3043_v61 = vadd.f32 %v10211_v25, %v3013_v35  ;;  %v3053_v27 = vsel %vm425_vm4, %v3050_v18, %v7367_v45  ;;  %v3054_v34 = vsel %vm425_vm4, %v10212_v41, %v3050_v18  ;;  %v10216_v35 = vld [vmem:[#allocation99_spill] sm:$0xff]  ;;  %v10224_v18 = vld [vmem:[#allocation45_spill] sm:$0xff] }
 0x1de   : > { %v7410_v14 = vmul.f32 %v10191_v32, %v7334_v42  ;;  %v2780_v0 = vadd.f32 %v10213_v3, %v2642_v46  ;;  %v2790_v43 = vadd.f32 %v10214_v51, %v2652_v26  ;;  %v3065_v63 = vmul.f32 %v10215_v62, %v3053_v27  ;;  %v10219_v42 = vld [vmem:[#allocation179_spill] sm:$0xff] }
 0x1df   : > { %v2800_v50 = vadd.f32 %v10216_v35, %v2662_v22  ;;  %v7417_v58 = vmul.f32 %v10215_v62, %v3054_v34  ;;  %v7420_v52 = vmul.f32 %v10217_v24, %v3054_v34  ;;  %v3075_v36 = vmul.f32 %v10217_v24, %v3053_v27  ;;  %v10227_v22 = vld [vmem:[#allocation128_spill] sm:$0xff]  ;;  %v2832_v3 = vpop.permute.xlu0 %2831  ;;  %v10228_v35 = vld [vmem:[#allocation147_spill] sm:$0xff] }
 0x1e0   : > { %v3085_v54 = vmul.f32 %v10218_v5, %v3053_v27  ;;  %v2640_v33 = vadd.f32 %v10219_v42, %v2594_v13  ;;  %v2650_v12 = vadd.f32 %v10220_v15, %v2604_v20  ;;  %v2660_v49 = vadd.f32 %v10221_v11, %v2614_v17  ;;  %v10225_v20 = vld [vmem:[#allocation98_spill] sm:$0xff]  ;;  %v10226_v17 = vld [vmem:[#allocation108_spill] sm:$0xff] }
 0x1e1   : > { %v3069_v44 = vadd.f32 %v3065_v63, %v3023_v2  ;;  %v7430_v6 = vmul.f32 %v10218_v5, %v3054_v34  ;;  %v2765_v29 = vsel %vm339_vm2, %v2756_v53, %v10223_v59  ;;  %v2766_v46 = vsel %vm339_vm2, %v10224_v18, %v2756_v53 }
 0x1e2   : > { %v2767_v13 = vsel %vm317_vm3, 0.0, %v2766_v46  ;;  %v2774_v9 = vmul.f32 %v10225_v20, %v2765_v29  ;;  %v2784_v26 = vmul.f32 %v10226_v17, %v2765_v29  ;;  %v2794_v2 = vmul.f32 %v10227_v22, %v2765_v29  ;;  %v10229_v46 = vld [vmem:[#allocation70_spill] sm:$0xff]  ;;  %v10230_v29 = vld [vmem:[#allocation76_spill] sm:$0xff]  ;;  %10310 = sst [smem:[#allocation37_spill]] %s7791_s27 }
 0x1e3   : > { %10222 = vst [vmem:[#allocation94_spill] sm:$0xff] %v7430_v6  ;;  %v3079_v38 = vadd.f32 %v3075_v36, %v3033_v39  ;;  %v2773_v25 = vmul.f32 %v10225_v20, %v2767_v13  ;;  %v2783_v27 = vmul.f32 %v10226_v17, %v2767_v13  ;;  %v2793_v34 = vmul.f32 %v10227_v22, %v2767_v13  ;;  %v10231_v36 = vld [vmem:[#allocation109_spill] sm:$0xff]  ;;  %v3188_v17 = vpop.permute.xlu1 %3187  ;;  %s7814_s27 = sld [smem:[#allocation9 + $0x80]] }
 0x1e4   : > { %v3089_v51 = vadd.f32 %v3085_v54, %v3043_v61  ;;  %v2778_v63 = vadd.f32 %v2774_v9, %v2640_v33  ;;  %v2788_v53 = vadd.f32 %v2784_v26, %v2650_v12  ;;  %v2810_v42 = vadd.f32 %v10228_v35, %v2780_v0  ;;  %v10232_v61 = vld [vmem:[#allocation73_spill] sm:$0xff]  ;;  %v10233_v33 = vld [vmem:[#allocation74_spill] sm:$0xff] }
 0x1e5   : > { %v2777_v15 = vadd.f32 %v2773_v25, %v2639_v47  ;;  %v2787_v11 = vadd.f32 %v2783_v27, %v2649_v10  ;;  %v2797_v59 = vadd.f32 %v2793_v34, %v2659_v56  ;;  %v2798_v18 = vadd.f32 %v2794_v2, %v2660_v49  ;;  %v10234_v0 = vld [vmem:[#allocation145_spill] sm:$0xff]  ;;  %v10236_v25 = vld [vmem:[#allocation142_spill] sm:$0xff] }
 0x1e6   : > { %v2808_v6 = vadd.f32 %v10229_v46, %v2778_v63  ;;  %v2820_v39 = vadd.f32 %v10230_v29, %v2790_v43  ;;  %v2830_v20 = vadd.f32 %v10231_v36, %v2800_v50  ;;  %v2841_v13 = vsel %vm425_vm4, %v2832_v3, %v6879_v4 }
 0x1e7   : > { %v2807_v54 = vadd.f32 %v10232_v61, %v2777_v15  ;;  %v2817_v12 = vadd.f32 %v10233_v33, %v2787_v11  ;;  %v2827_v47 = vadd.f32 %v10234_v0, %v2797_v59  ;;  %v2842_v10 = vsel %vm425_vm4, %v7236_v28, %v2832_v3  ;;  %v10235_v28 = vld [vmem:[#allocation141_spill] sm:$0xff]  ;;  %v10237_v3 = vld [vmem:[#allocation160_spill] sm:$0xff] }
 0x1e8   : > { %v2846_v56 = vsel %vm324_vm5, 0.0, %v2842_v10  ;;  %v2849_v43 = vmul.f32 %v6617_v16, %v2841_v13  ;;  %v2859_v50 = vmul.f32 %v10178_v19, %v2841_v13  ;;  %v2869_v4 = vmul.f32 %v6630_v57, %v2841_v13 }
 0x1e9   : > { %v2852_v49 = vmul.f32 %v6617_v16, %v2846_v56  ;;  %v2862_v9 = vmul.f32 %v10178_v19, %v2846_v56  ;;  %v2872_v26 = vmul.f32 %v6630_v57, %v2846_v56  ;;  %v7470_v22 = vsel %vm339_vm2, %v3188_v17, %v7427_v30  ;;  %v10238_v19 = vld [vmem:[#allocation111_spill] sm:$0xff]  ;;  %v2970_v57 = vpop.permute.xlu0 %2969  ;;  %10315 = sst [smem:[#allocation39_spill]] %s7814_s27 }
 0x1ea   : > { %v2818_v2 = vadd.f32 %v10235_v28, %v2788_v53  ;;  %v2828_v27 = vadd.f32 %v10236_v25, %v2798_v18  ;;  %v2853_v34 = vadd.f32 %v2849_v43, %v2807_v54  ;;  %v3192_v63 = vsel %vm339_vm2, %v10237_v3, %v3188_v17  ;;  %v10239_v53 = vld [vmem:[#allocation144_spill] sm:$0xff]  ;;  %v10242_v28 = vld [vmem:[#allocation151_spill] sm:$0xff]  ;;  %v10243_v25 = vld [vmem:[#allocation106_spill] sm:$0xff]  ;;  %s7832_s27 = sld [smem:[#allocation9 + $0x82]] }
 0x1eb   : > { %v2856_v35 = vadd.f32 %v2852_v49, %v2810_v42  ;;  %v2866_v16 = vadd.f32 %v2862_v9, %v2820_v39  ;;  %v2876_v15 = vadd.f32 %v2872_v26, %v2830_v20  ;;  %v3203_v11 = vmul.f32 %v10238_v19, %v3192_v63  ;;  %v10240_v39 = vld [vmem:[#allocation149_spill] sm:$0xff] }
 0x1ec   : > { %v2863_v59 = vadd.f32 %v2859_v50, %v2817_v12  ;;  %v2873_v46 = vadd.f32 %v2869_v4, %v2827_v47  ;;  %v7480_v29 = vmul.f32 %v10238_v19, %v7470_v22  ;;  %v3213_v36 = vmul.f32 %v10239_v53, %v3192_v63  ;;  %v7492_v12 = vpop.permute.xlu1 %3265  ;;  %v10241_v50 = vld [vmem:[#allocation115_spill] sm:$0xff] }
 0x1ed   : > { %v2994_v18 = vadd.f32 %v7348_v23, %v2856_v35  ;;  %v3004_v13 = vadd.f32 %v7399_v40, %v2866_v16  ;;  %v7487_v42 = vmul.f32 %v10239_v53, %v7470_v22  ;;  %v3223_v20 = vmul.f32 %v10240_v39, %v3192_v63  ;;  %v3046_v10 = vpop.permute.xlu0 %3045  ;;  %v10246_v16 = vld [vmem:[#allocation146_spill] sm:$0xff] }
 0x1ee   : > { %v3014_v17 = vadd.f32 %v7410_v14, %v2876_v15  ;;  %v3207_v61 = vadd.f32 %v3203_v11, %v3069_v44  ;;  %v3217_v54 = vadd.f32 %v3213_v36, %v3079_v38  ;;  %v2854_v33 = vadd.f32 %v7284_v8, %v2808_v6  ;;  %v10247_v11 = vld [vmem:[#allocation152_spill] sm:$0xff] }
 0x1ef   : > { %v2864_v0 = vadd.f32 %v7287_v21, %v2818_v2  ;;  %v2874_v23 = vadd.f32 %v7290_v55, %v2828_v27  ;;  %v2979_v40 = vsel %vm339_vm2, %v2970_v57, %v6927_v37  ;;  %v2980_v47 = vsel %vm339_vm2, %v7293_v48, %v2970_v57 }
 0x1f0   : > { %v2981_v14 = vsel %vm317_vm3, 0.0, %v2980_v47  ;;  %v2988_v44 = vmul.f32 %v10189_v7, %v2979_v40  ;;  %v2998_v8 = vmul.f32 %v10190_v31, %v2979_v40  ;;  %v3008_v6 = vmul.f32 %v10191_v32, %v2979_v40  ;;  %v10250_v40 = vld [vmem:[#allocation148_spill] sm:$0xff] }
 0x1f1   : > { %v3227_v21 = vadd.f32 %v3223_v20, %v3089_v51  ;;  %v2987_v55 = vmul.f32 %v10189_v7, %v2981_v14  ;;  %v2997_v38 = vmul.f32 %v10190_v31, %v2981_v14  ;;  %v3007_v37 = vmul.f32 %v10191_v32, %v2981_v14  ;;  %v10244_v51 = vld [vmem:[#allocation112_spill] sm:$0xff]  ;;  %v10245_v7 = vld [vmem:[#allocation153_spill] sm:$0xff]  ;;  %v3264_v32 = vpop.permute.xlu1 %3263 }
 0x1f2   : > { %v2992_v56 = vadd.f32 %v2988_v44, %v2854_v33  ;;  %v3002_v43 = vadd.f32 %v2998_v8, %v2864_v0  ;;  %v3012_v48 = vadd.f32 %v3008_v6, %v2874_v23  ;;  %v3024_v4 = vadd.f32 %v10241_v50, %v2994_v18  ;;  %v10251_v44 = vld [vmem:[#allocation155_spill] sm:$0xff] }
 0x1f3   : > { %v2991_v49 = vadd.f32 %v2987_v55, %v2853_v34  ;;  %v3001_v9 = vadd.f32 %v2997_v38, %v2863_v59  ;;  %v3011_v26 = vadd.f32 %v3007_v37, %v2873_v46  ;;  %v3034_v2 = vadd.f32 %v10242_v28, %v3004_v13  ;;  %v10248_v34 = vld [vmem:[#allocation150_spill] sm:$0xff] }
 0x1f4   : > { %v3022_v27 = vadd.f32 %v10243_v25, %v2992_v56  ;;  %v3032_v63 = vadd.f32 %v10244_v51, %v3002_v43  ;;  %v3044_v35 = vadd.f32 %v10245_v7, %v3014_v17  ;;  %v3055_v31 = vsel %vm425_vm4, %v3046_v10, %v10212_v41  ;;  %v10253_v37 = vld [vmem:[#allocation170_spill] sm:$0xff] }
 0x1f5   : > { %v3021_v15 = vadd.f32 %v10246_v16, %v2991_v49  ;;  %v3031_v57 = vadd.f32 %v10247_v11, %v3001_v9  ;;  %v3041_v59 = vadd.f32 %v10248_v34, %v3011_v26  ;;  %v3056_v46 = vsel %vm425_vm4, %v7367_v45, %v3046_v10  ;;  %v10249_v45 = vld [vmem:[#allocation96_spill] sm:$0xff]  ;;  %v7554_v56 = vpop.permute.xlu1 %3403  ;;  %v10254_v49 = vld [vmem:[#allocation97_spill] sm:$0xff]  ;;  %v10255_v28 = vld [vmem:[#allocation154_spill] sm:$0xff] }
 0x1f6   : > { %v3060_v36 = vsel %vm324_vm5, 0.0, %v3056_v46  ;;  %v3063_v18 = vmul.f32 %v10215_v62, %v3055_v31  ;;  %v3073_v41 = vmul.f32 %v10217_v24, %v3055_v31  ;;  %v3083_v13 = vmul.f32 %v10218_v5, %v3055_v31  ;;  %v10257_v51 = vld [vmem:[#allocation94_spill] sm:$0xff] }
 0x1f7   : > { %v3066_v20 = vmul.f32 %v10215_v62, %v3060_v36  ;;  %v3076_v17 = vmul.f32 %v10217_v24, %v3060_v36  ;;  %v3086_v33 = vmul.f32 %v10218_v5, %v3060_v36  ;;  %v3237_v0 = vadd.f32 %v10249_v45, %v3207_v61  ;;  %v10252_v24 = vld [vmem:[#allocation100_spill] sm:$0xff] }
 0x1f8   : > { %v3224_v23 = vmul.f32 %v10240_v39, %v7470_v22  ;;  %v3042_v47 = vadd.f32 %v10250_v40, %v3012_v48  ;;  %v3067_v14 = vadd.f32 %v3063_v18, %v3021_v15  ;;  %v3247_v8 = vadd.f32 %v10251_v44, %v3217_v54  ;;  %v3184_v54 = vpop.permute.xlu0 %3183  ;;  %v10262_v40 = vld [vmem:[#allocation127_spill] sm:$0xff]  ;;  %v10263_v44 = vld [vmem:[#allocation132_spill] sm:$0xff] }
 0x1f9   : > { %v3070_v6 = vadd.f32 %v3066_v20, %v3024_v4  ;;  %v3080_v62 = vadd.f32 %v3076_v17, %v3034_v2  ;;  %v3090_v55 = vadd.f32 %v3086_v33, %v3044_v35  ;;  %v3257_v38 = vadd.f32 %v10252_v24, %v3227_v21  ;;  %v10259_v17 = vld [vmem:[#allocation131_spill] sm:$0xff] }
 0x1fa   : > { %v3077_v5 = vadd.f32 %v3073_v41, %v3031_v57  ;;  %v3087_v61 = vadd.f32 %v3083_v13, %v3041_v59  ;;  %v3267_v22 = vsel %vm425_vm4, %v3264_v32, %v7492_v12  ;;  %v3268_v10 = vsel %vm425_vm4, %v10253_v37, %v3264_v32  ;;  %v3402_v59 = vpop.permute.xlu1 %3401  ;;  %v10258_v13 = vld [vmem:[#allocation164_spill] sm:$0xff] }
 0x1fb   : > { %v3208_v43 = vadd.f32 %v7480_v29, %v3070_v6  ;;  %v3218_v21 = vadd.f32 %v7487_v42, %v3080_v62  ;;  %v3068_v48 = vadd.f32 %v7417_v58, %v3022_v27  ;;  %v3078_v50 = vadd.f32 %v7420_v52, %v3032_v63  ;;  %v10256_v42 = vld [vmem:[#allocation159_spill] sm:$0xff]  ;;  %v10264_v6 = vld [vmem:[#allocation158_spill] sm:$0xff] }
 0x1fc   : > { %v3228_v4 = vadd.f32 %v3224_v23, %v3090_v55  ;;  %v7565_v9 = vmul.f32 %v10254_v49, %v3268_v10  ;;  %v3279_v26 = vmul.f32 %v10254_v49, %v3267_v22  ;;  %v3289_v2 = vmul.f32 %v10255_v28, %v3267_v22  ;;  %v3260_v34 = vpop.permute.xlu0 %3259 }
 0x1fd   : > { %v7572_v29 = vmul.f32 %v10255_v28, %v3268_v10  ;;  %v3299_v25 = vmul.f32 %v10256_v42, %v3267_v22  ;;  %v3193_v58 = vsel %vm339_vm2, %v3184_v54, %v10237_v3  ;;  %v3194_v52 = vsel %vm339_vm2, %v7427_v30, %v3184_v54 }
 0x1fe   : > { %v7584_v27 = vmul.f32 %v10256_v42, %v3268_v10  ;;  %v3088_v63 = vadd.f32 %v10257_v51, %v3042_v47  ;;  %v3195_v7 = vsel %vm317_vm3, 0.0, %v3194_v52  ;;  %v3202_v35 = vmul.f32 %v10238_v19, %v3193_v58 }
 0x1ff   : > { %v3283_v31 = vadd.f32 %v3279_v26, %v3237_v0  ;;  %v3201_v3 = vmul.f32 %v10238_v19, %v3195_v7  ;;  %v3211_v32 = vmul.f32 %v10239_v53, %v3195_v7  ;;  %v3212_v30 = vmul.f32 %v10239_v53, %v3193_v58  ;;  %v10261_v0 = vld [vmem:[#allocation125_spill] sm:$0xff] }
 0x200   : > { %v7597_v16 = vadd.f32 %v3289_v2, %v3247_v8  ;;  %v3206_v15 = vadd.f32 %v3202_v35, %v3068_v48  ;;  %v3221_v11 = vmul.f32 %v10240_v39, %v3195_v7  ;;  %v3222_v57 = vmul.f32 %v10240_v39, %v3193_v58  ;;  %v10260_v39 = vld [vmem:[#allocation157_spill] sm:$0xff]  ;;  %v7640_v48 = vpop.permute.xlu1 %3479  ;;  %v10267_v2 = vld [vmem:[#allocation46_spill] sm:$0xff]  ;;  %v10268_v58 = vld [vmem:[#allocation163_spill] sm:$0xff] }
 0x201   : > { %v7603_v46 = vadd.f32 %v3299_v25, %v3257_v38  ;;  %v3205_v19 = vadd.f32 %v3201_v3, %v3067_v14  ;;  %v3215_v36 = vadd.f32 %v3211_v32, %v3077_v5  ;;  %v3216_v18 = vadd.f32 %v3212_v30, %v3078_v50  ;;  %v10265_v38 = vld [vmem:[#allocation156_spill] sm:$0xff]  ;;  %v10269_v7 = vld [vmem:[#allocation165_spill] sm:$0xff] }
 0x202   : > { %v3225_v53 = vadd.f32 %v3221_v11, %v3087_v61  ;;  %v3226_v41 = vadd.f32 %v3222_v57, %v3088_v63  ;;  %v3238_v20 = vadd.f32 %v10258_v13, %v3208_v43  ;;  %v3248_v33 = vadd.f32 %v10259_v17, %v3218_v21  ;;  %v3398_v21 = vpop.permute.xlu0 %3397  ;;  %v10266_v50 = vld [vmem:[#allocation120_spill] sm:$0xff] }
 0x203   : > { %v3236_v45 = vadd.f32 %v10260_v39, %v3206_v15  ;;  %v3235_v23 = vadd.f32 %v10261_v0, %v3205_v19  ;;  %v3245_v47 = vadd.f32 %v10262_v40, %v3215_v36  ;;  %v3269_v14 = vsel %vm425_vm4, %v3260_v34, %v10253_v37  ;;  %v10270_v32 = vld [vmem:[#allocation136_spill] sm:$0xff]  ;;  %v10273_v39 = vld [vmem:[#allocation166_spill] sm:$0xff] }
 0x204   : > { %v3258_v8 = vadd.f32 %v10263_v44, %v3228_v4  ;;  %v3255_v62 = vadd.f32 %v10264_v6, %v3225_v53  ;;  %v3270_v55 = vsel %vm425_vm4, %v7492_v12, %v3260_v34  ;;  %v3277_v24 = vmul.f32 %v10254_v49, %v3269_v14 }
 0x205   : > { %v3246_v5 = vadd.f32 %v10265_v38, %v3216_v18  ;;  %v3274_v61 = vsel %vm324_vm5, 0.0, %v3270_v55  ;;  %v3287_v22 = vmul.f32 %v10255_v28, %v3269_v14  ;;  %v3405_v37 = vsel %vm339_vm2, %v3402_v59, %v7554_v56 }
 0x206   : > { %v3280_v10 = vmul.f32 %v10254_v49, %v3274_v61  ;;  %v3290_v12 = vmul.f32 %v10255_v28, %v3274_v61  ;;  %v3297_v54 = vmul.f32 %v10256_v42, %v3269_v14  ;;  %v3300_v43 = vmul.f32 %v10256_v42, %v3274_v61  ;;  %v3474_v17 = vpop.permute.xlu0 %3473 }
 0x207   : > { %v3256_v4 = vadd.f32 %v10266_v50, %v3226_v41  ;;  %v3281_v26 = vadd.f32 %v3277_v24, %v3235_v23  ;;  %v3406_v25 = vsel %vm339_vm2, %v10267_v2, %v3402_v59  ;;  %v3418_v49 = vmul.f32 %v10268_v58, %v3405_v37  ;;  %v10271_v41 = vld [vmem:[#allocation167_spill] sm:$0xff] }
 0x208   : > { %v3284_v28 = vadd.f32 %v3280_v10, %v3238_v20  ;;  %v3294_v52 = vadd.f32 %v3290_v12, %v3248_v33  ;;  %v3304_v51 = vadd.f32 %v3300_v43, %v3258_v8  ;;  %v3417_v42 = vmul.f32 %v10268_v58, %v3406_v25  ;;  %v3478_v33 = vpop.permute.xlu1 %3477  ;;  %v10274_v8 = vld [vmem:[#allocation51_spill] sm:$0xff]  ;;  %v10277_v10 = vld [vmem:[#allocation172_spill] sm:$0xff] }
 0x209   : > { %v3291_v63 = vadd.f32 %v3287_v22, %v3245_v47  ;;  %v3427_v35 = vmul.f32 %v10269_v7, %v3406_v25  ;;  %v3428_v3 = vmul.f32 %v10269_v7, %v3405_v37  ;;  %v3438_v30 = vmul.f32 %v10270_v32, %v3405_v37  ;;  %v10276_v22 = vld [vmem:[#allocation168_spill] sm:$0xff] }
 0x20a   : > { %v3301_v15 = vadd.f32 %v3297_v54, %v3255_v62  ;;  %v3421_v11 = vadd.f32 %v3417_v42, %v3283_v31  ;;  %v3422_v57 = vadd.f32 %v3418_v49, %v3284_v28  ;;  %v3437_v34 = vmul.f32 %v10270_v32, %v3406_v25  ;;  %v10279_v54 = vld [vmem:[#allocation180_spill] sm:$0xff]  ;;  %v10283_v28 = vld [vmem:[#allocation162_spill] sm:$0xff] }
 0x20b   : > { %v3432_v59 = vadd.f32 %v3428_v3, %v3294_v52  ;;  %v3442_v19 = vadd.f32 %v3438_v30, %v3304_v51  ;;  %v3282_v36 = vadd.f32 %v7565_v9, %v3236_v45  ;;  %v3292_v18 = vadd.f32 %v7572_v29, %v3246_v5  ;;  %v10272_v9 = vld [vmem:[#allocation169_spill] sm:$0xff]  ;;  %v10286_v3 = vld [vmem:[#allocation171_spill] sm:$0xff] }
 0x20c   : > { %v3431_v53 = vadd.f32 %v3427_v35, %v7597_v16  ;;  %v3452_v13 = vadd.f32 %v10271_v41, %v3422_v57  ;;  %v3407_v31 = vsel %vm339_vm2, %v3398_v21, %v10267_v2  ;;  %v3408_v20 = vsel %vm339_vm2, %v7554_v56, %v3398_v21  ;;  %v10280_v21 = vld [vmem:[#allocation130_spill] sm:$0xff]  ;;  %v3618_v49 = vpop.permute.xlu1 %3617 }
 0x20d   : > { %v3462_v29 = vadd.f32 %v10272_v9, %v3432_v59  ;;  %v3472_v45 = vadd.f32 %v10273_v39, %v3442_v19  ;;  %v3409_v16 = vsel %vm317_vm3, 0.0, %v3408_v20  ;;  %v3416_v0 = vmul.f32 %v10268_v58, %v3407_v31  ;;  %v10289_v19 = vld [vmem:[#allocation173_spill] sm:$0xff]  ;;  %v10293_v9 = vld [vmem:[#allocation182_spill] sm:$0xff] }
 0x20e   : > { %v3441_v23 = vadd.f32 %v3437_v34, %v7603_v46  ;;  %v3415_v40 = vmul.f32 %v10268_v58, %v3409_v16  ;;  %v3425_v56 = vmul.f32 %v10269_v7, %v3409_v16  ;;  %v3435_v47 = vmul.f32 %v10270_v32, %v3409_v16  ;;  %v3612_v58 = vpop.permute.xlu0 %3611 }
 0x20f   : > { %v3420_v14 = vadd.f32 %v3416_v0, %v3282_v36  ;;  %v3426_v44 = vmul.f32 %v10269_v7, %v3407_v31  ;;  %v3483_v6 = vsel %vm425_vm4, %v3474_v17, %v10274_v8  ;;  %v3484_v62 = vsel %vm425_vm4, %v7640_v48, %v3474_v17  ;;  %v10285_v7 = vld [vmem:[#allocation176_spill] sm:$0xff] }
 0x210   : > { %v3419_v46 = vadd.f32 %v3415_v40, %v3281_v26  ;;  %v3429_v55 = vadd.f32 %v3425_v56, %v3291_v63  ;;  %v3436_v24 = vmul.f32 %v10270_v32, %v3407_v31  ;;  %v3439_v38 = vadd.f32 %v3435_v47, %v3301_v15  ;;  %v10281_v26 = vld [vmem:[#allocation133_spill] sm:$0xff]  ;;  %v3616_v0 = vpop.permute.xlu1 %3615 }
 0x211   : > { %v3302_v5 = vadd.f32 %v7584_v27, %v3256_v4  ;;  %v3488_v61 = vsel %vm324_vm5, 0.0, %v3484_v62  ;;  %v3491_v37 = vmul.f32 %v10276_v22, %v3483_v6  ;;  %v3501_v12 = vmul.f32 %v10277_v10, %v3483_v6  ;;  %v10302_v62 = vld [vmem:[#allocation184_spill] sm:$0xff] }
 0x212   : > { %v3449_v43 = vadd.f32 %v10279_v54, %v3419_v46  ;;  %v3459_v50 = vadd.f32 %v10280_v21, %v3429_v55  ;;  %v3469_v2 = vadd.f32 %v10281_v26, %v3439_v38  ;;  %v3494_v25 = vmul.f32 %v10276_v22, %v3488_v61  ;;  %v3614_v16 = vpop.permute.xlu0 %3613  ;;  %v10303_v55 = vld [vmem:[#allocation192_spill] sm:$0xff] }
 0x213   : > { %v3430_v27 = vadd.f32 %v3426_v44, %v3292_v18  ;;  %v3504_v4 = vmul.f32 %v10277_v10, %v3488_v61  ;;  %v3511_v52 = vmul.f32 %v10283_v28, %v3483_v6  ;;  %v7717_v51 = vstv %s7524_s17  ;;  %v10290_v18 = vld [vmem:[#allocation174_spill] sm:$0xff]  ;;  %s7733_s17 = sld [smem:[#allocation9 + $0x76]] }
 0x214   : > { %10284 = vst [vmem:[#allocation87_spill] sm:$0xff] %v7717_v51  ;;  %v3440_v42 = vadd.f32 %v3436_v24, %v3302_v5  ;;  %v3514_v63 = vmul.f32 %v10283_v28, %v3488_v61  ;;  %v3450_v35 = vadd.f32 %v10285_v7, %v3420_v14  ;;  %v3451_v32 = vadd.f32 %v10286_v3, %v3421_v11 }
 0x215   : > { %v3495_v30 = vadd.f32 %v3491_v37, %v3449_v43  ;;  %v3498_v15 = vadd.f32 %v3494_v25, %v3452_v13  ;;  %v3505_v57 = vadd.f32 %v3501_v12, %v3459_v50  ;;  %v3508_v34 = vadd.f32 %v3504_v4, %v3462_v29 }
 0x216   : > { %v3515_v59 = vadd.f32 %v3511_v52, %v3469_v2  ;;  %v3461_v36 = vadd.f32 %v10289_v19, %v3431_v53  ;;  %v3471_v41 = vadd.f32 %v10290_v18, %v3441_v23  ;;  %v3481_v31 = vsel %vm425_vm4, %v3478_v33, %v7640_v48  ;;  %v10323_v18 = vld [vmem:[#allocation161_spill] sm:$0xff] }
 0x217   : > { %v3482_v11 = vsel %vm425_vm4, %v10274_v8, %v3478_v33  ;;  %v3493_v13 = vmul.f32 %v10276_v22, %v3481_v31  ;;  %v3503_v20 = vmul.f32 %v10277_v10, %v3481_v31  ;;  %v3513_v17 = vmul.f32 %v10283_v28, %v3481_v31  ;;  %v10295_v33 = vld [vmem:[#allocation181_spill] sm:$0xff] }
 0x218   : > { %v3518_v53 = vadd.f32 %v3514_v63, %v3472_v45  ;;  %v3460_v29 = vadd.f32 %v10293_v9, %v3430_v27  ;;  %v3492_v39 = vmul.f32 %v10276_v22, %v3482_v11  ;;  %v3622_v48 = vsel %vm339_vm2, %v3618_v49, %v3612_v58  ;;  %v10300_v8 = vld [vmem:[#allocation185_spill] sm:$0xff]  ;;  %v7808_v63 = vld [vmem:[%s10129_s29 + $0x18] sm:$0xff]  ;;  %s7823_s29 = sld [smem:[#allocation9 + $0x81]] }
 0x219   : > { %10291 = sst [smem:[#allocation30_spill]] %s7733_s17  ;;  %v3470_v23 = vadd.f32 %v10295_v33, %v3440_v42  ;;  %v3502_v40 = vmul.f32 %v10277_v10, %v3482_v11  ;;  %v3512_v56 = vmul.f32 %v10283_v28, %v3482_v11  ;;  %v3623_v45 = vsel %vm317_vm3, 0.0, %v3622_v48 }
 0x21a   : > { %s7747_s17 = sld [smem:[#allocation9 + $0x78]]  ;;  %v7756_v47 = vadd.f32 %v3493_v13, %v3451_v32  ;;  %v7758_v14 = vadd.f32 %v3503_v20, %v3461_v36  ;;  %v7760_v44 = vadd.f32 %v3513_v17, %v3471_v41  ;;  %v3629_v6 = vmul.f32 %v10300_v8, %v3623_v45  ;;  %v10317_v32 = vld [vmem:[#allocation190_spill] sm:$0xff]  ;;  %v10327_v20 = vld [vmem:[#allocation193_spill] sm:$0xff] }
 0x21b   : > { %v3639_v46 = vmul.f32 %v10302_v62, %v3623_v45  ;;  %v3649_v24 = vmul.f32 %v10303_v55, %v3623_v45  ;;  %v3621_v38 = vsel %vm339_vm2, %v3612_v58, %v3614_v16  ;;  %v3619_v5 = vsel %vm339_vm2, %v3616_v0, %v3618_v49 }
 0x21c   : > { %10297 = vst [vmem:[#allocation188_spill] sm:$0xff] %v7756_v47  ;;  %10298 = vst [vmem:[#allocation117_spill] sm:$0xff] %v7758_v14  ;;  %v3496_v61 = vadd.f32 %v3492_v39, %v3450_v35  ;;  %v3630_v22 = vmul.f32 %v10300_v8, %v3621_v38  ;;  %v3640_v37 = vmul.f32 %v10302_v62, %v3621_v38  ;;  %v7827_v36 = vstv %s7531_s11  ;;  %s7861_s11 = sld [smem:[#allocation9 + $0x84]] }
 0x21d   : > { %10299 = vst [vmem:[#allocation44_spill] sm:$0xff] %v7760_v44  ;;  %v3650_v10 = vmul.f32 %v10303_v55, %v3621_v38  ;;  %v3506_v12 = vadd.f32 %v3502_v40, %v3460_v29  ;;  %v3516_v54 = vadd.f32 %v3512_v56, %v3470_v23  ;;  %v3620_v43 = vsel %vm339_vm2, %v3614_v16, %v3616_v0 }
 0x21e   : > { %v3632_v21 = vmul.f32 %v10300_v8, %v3619_v5  ;;  %v7783_v50 = vadd.f32 %v3629_v6, %v3495_v30  ;;  %v7785_v26 = vadd.f32 %v3639_v46, %v3505_v57  ;;  %v7787_v2 = vadd.f32 %v3649_v24, %v3515_v59  ;;  %10320 = sst [smem:[#allocation41_spill]] %s7823_s29  ;;  %10321 = vst [vmem:[#allocation191_spill] sm:$0xff] %v7827_v36 }
 0x21f   : > { %v7789_v25 = vadd.f32 %v3630_v22, %v3496_v61  ;;  %v7793_v58 = vadd.f32 %v3640_v37, %v3506_v12  ;;  %v7795_v49 = vadd.f32 %v3650_v10, %v3516_v54  ;;  %v3642_v4 = vmul.f32 %v10302_v62, %v3619_v5  ;;  %s7846_s29 = sld [smem:[#allocation9 + $0x83]] }
 0x220   : > { %10294 = sst [smem:[#allocation32_spill]] %s7747_s17  ;;  %10306 = vst [vmem:[#allocation135_spill] sm:$0xff] %v7783_v50  ;;  %10307 = vst [vmem:[#allocation43_spill] sm:$0xff] %v7785_v26  ;;  %v3636_v27 = vadd.f32 %v3632_v21, %v3498_v15  ;;  %v7801_v28 = vmul.f32 %v10300_v8, %v3620_v43  ;;  %v7804_v52 = vmul.f32 %v10302_v62, %v3620_v43  ;;  %v10319_v15 = vld [vmem:[#allocation86_spill] sm:$0xff]  ;;  %v7838_v31 = vstv %s7543_s0 }
 0x221   : > { %s7763_s17 = sld [smem:[#allocation9 + $0x7a]]  ;;  %10308 = vst [vmem:[#allocation119_spill] sm:$0xff] %v7787_v2  ;;  %10309 = vst [vmem:[#allocation107_spill] sm:$0xff] %v7789_v25  ;;  %v3652_v42 = vmul.f32 %v10303_v55, %v3619_v5  ;;  %v7812_v7 = vmul.f32 %v7808_v63, %v7717_v51  ;;  %v3646_v35 = vadd.f32 %v3642_v4, %v3508_v34  ;;  %v7830_v34 = vstv %s7537_s16 }
 0x222   : > { %10311 = vst [vmem:[#allocation194_spill] sm:$0xff] %v7793_v58  ;;  %10312 = vst [vmem:[#allocation47_spill] sm:$0xff] %v7795_v49  ;;  %v7817_v3 = vmul.f32 %v10303_v55, %v3620_v43  ;;  %v7820_v30 = vadd.f32 %v10317_v32, %v3636_v27  ;;  %v7841_v11 = vstv %s7546_s1  ;;  %v7844_v13 = vstv %s7556_s3  ;;  %s7876_s16 = sld [smem:[#allocation9 + $0x85]] }
 0x223   : > { %10313 = vst [vmem:[#allocation186_spill] sm:$0xff] %v7801_v28  ;;  %10314 = vst [vmem:[#allocation79_spill] sm:$0xff] %v7804_v52  ;;  %v3656_v59 = vadd.f32 %v3652_v42, %v3518_v53  ;;  %v7835_v41 = vadd.f32 %v10323_v18, %v3646_v35  ;;  %v7853_v53 = vmul.f32 %v7808_v63, %v7838_v31  ;;  %v7856_v9 = vstv %s7562_s19  ;;  %s7889_s0 = sld [smem:[#allocation9 + $0x86]] }
 0x224   : > { %10316 = vst [vmem:[#allocation189_spill] sm:$0xff] %v7817_v3  ;;  %10318 = vst [vmem:[#allocation48_spill] sm:$0xff] %v7820_v30  ;;  %v7859_v29 = vstv %s7581_s12  ;;  %v7865_v39 = vmul.f32 %v7808_v63, %v7856_v9  ;;  %v7868_v48 = vstv %s7569_s30  ;;  %v7871_v16 = vstv %s7590_s13  ;;  %s7902_s1 = sld [smem:[#allocation9 + $0x87]] }
 0x225   : > { %10322 = vst [vmem:[#allocation195_spill] sm:$0xff] %v7830_v34  ;;  %10324 = vst [vmem:[#allocation122_spill] sm:$0xff] %v7835_v41  ;;  %v7849_v17 = vadd.f32 %v10327_v20, %v3656_v59  ;;  %v7874_v0 = vstv %s7595_s24  ;;  %v7881_v23 = vmul.f32 %v7808_v63, %v7871_v16  ;;  %v7884_v40 = vstv %s7601_s7  ;;  %s7914_s3 = sld [smem:[#allocation9 + $0x88]] }
 0x226   : > { %10325 = vst [vmem:[#allocation114_spill] sm:$0xff] %v7838_v31  ;;  %10326 = vst [vmem:[#allocation50_spill] sm:$0xff] %v7841_v11  ;;  %v7887_v56 = vstv %s7605_s10  ;;  %v7897_v6 = vstv %s7609_s20  ;;  %v7900_v62 = vstv %s7617_s14  ;;  %v7906_v55 = vstv %s7625_s18  ;;  %s7927_s19 = sld [smem:[#allocation9 + $0x89]] }
 0x227   : > { %10301 = sst [smem:[#allocation34_spill]] %s7763_s17  ;;  %10328 = vst [vmem:[#allocation52_spill] sm:$0xff] %v7849_v17  ;;  %10329 = vst [vmem:[#allocation49_spill] sm:$0xff] %v7856_v9  ;;  %v7894_v8 = vmul.f32 %v7808_v63, %v7887_v56  ;;  %v7909_v24 = vstv %s7634_s25  ;;  %v7912_v38 = vstv %s7642_s4  ;;  %v7919_v61 = vmul.f32 %v7808_v63, %v7906_v55 }
 0x228   : > { %s7776_s17 = sld [smem:[#allocation9 + $0x7c]]  ;;  %10330 = vst [vmem:[#allocation129_spill] sm:$0xff] %v7871_v16  ;;  %10331 = vst [vmem:[#allocation56_spill] sm:$0xff] %v7874_v0  ;;  %v7922_v22 = vstv %s7649_s2  ;;  %v7925_v37 = vstv %s7652_s23  ;;  %v7934_v12 = vstv %s7657_s5  ;;  %v7937_v54 = vstv %s7660_s6 }
 0x229   : > { %10332 = vst [vmem:[#allocation59_spill] sm:$0xff] %v7884_v40  ;;  %10333 = vst [vmem:[#allocation90_spill] sm:$0xff] %v7887_v56  ;;  %v7931_v10 = vmul.f32 %v7808_v63, %v7922_v22  ;;  %s10341_s30 = sld [smem:[#allocation25_spill]]  ;;  %v7940_v43 = vstv %s7664_s9  ;;  %v7947_v27 = vmul.f32 %v7808_v63, %v7937_v54  ;;  %v7950_v4 = vstv %s7674_s26 }
 0x22a   : > { %10334 = vst [vmem:[#allocation95_spill] sm:$0xff] %v7897_v6  ;;  %10335 = vst [vmem:[#allocation110_spill] sm:$0xff] %v7900_v62  ;;  %s10343_s12 = sld [smem:[#allocation28_spill]]  ;;  %v7953_v42 = vstv %s7681_s8  ;;  %v7963_v59 = vstv %s7687_s28  ;;  %v7966_v18 = vstv %s7696_s15  ;;  %v7988_v33 = vstv %s7719_s22 }
 0x22b   : > { %10336 = vst [vmem:[#allocation138_spill] sm:$0xff] %v7906_v55  ;;  %10337 = vst [vmem:[#allocation137_spill] sm:$0xff] %v7909_v24  ;;  %s10345_s13 = sld [smem:[#allocation26_spill]]  ;;  %v7960_v32 = vmul.f32 %v7808_v63, %v7953_v42  ;;  %v7997_v19 = vmul.f32 %v7808_v63, %v7988_v33  ;;  %v8069_v47 = vstv %s7832_s27  ;;  %v8091_v16 = vstv %s7889_s0  ;;  %v10412_v55 = vld [vmem:[#allocation83_spill] sm:$0xff] }
 0x22c   : > { %10338 = vst [vmem:[#allocation105_spill] sm:$0xff] %v7912_v38  ;;  %10339 = vst [vmem:[#allocation126_spill] sm:$0xff] %v7922_v22  ;;  %s7942_s24 = sld [smem:[#allocation9 + $0x8a]]  ;;  %v8080_v22 = vstv %s7861_s11  ;;  %v8098_v9 = vstv %s7914_s3  ;;  %v8101_v31 = vstv %s7927_s19 }
 0x22d   : > { %10340 = vst [vmem:[#allocation175_spill] sm:$0xff] %v7925_v37  ;;  %10342 = vst [vmem:[#allocation60_spill] sm:$0xff] %v7934_v12  ;;  %s10348_s7 = sld [smem:[#allocation27_spill]] }
 0x22e   : > { %10344 = vst [vmem:[#allocation93_spill] sm:$0xff] %v7937_v54  ;;  %10346 = vst [vmem:[#allocation123_spill] sm:$0xff] %v7940_v43  ;;  %s7955_s10 = sld [smem:[#allocation9 + $0x8b]]  ;;  %v8038_v14 = vstv %s7776_s17  ;;  %v8077_v54 = vmul.f32 %v7808_v63, %v8069_v47 }
 0x22f   : > { %10347 = vst [vmem:[#allocation118_spill] sm:$0xff] %v7950_v4  ;;  %10349 = vst [vmem:[#allocation61_spill] sm:$0xff] %v7953_v42  ;;  %s10350_s20 = sld [smem:[#allocation29_spill]]  ;;  %v7972_v21 = vstv %s10341_s30  ;;  %v8094_v42 = vstv %s7902_s1 }
 0x230   : > { %s10351_s14 = sld [smem:[#allocation30_spill]]  ;;  %10352 = vst [vmem:[#allocation92_spill] sm:$0xff] %v7963_v59  ;;  %10354 = vst [vmem:[#allocation102_spill] sm:$0xff] %v7966_v18  ;;  %v7975_v5 = vstv %s10343_s12  ;;  %v7985_v45 = vmul.f32 %v7808_v63, %v7972_v21 }
 0x231   : > { %s10353_s18 = sld [smem:[#allocation31_spill]]  ;;  %10355 = vst [vmem:[#allocation101_spill] sm:$0xff] %v7972_v21  ;;  %10357 = vst [vmem:[#allocation113_spill] sm:$0xff] %v7975_v5  ;;  %v7978_v35 = vstv %s10345_s13 }
 0x232   : > { %s7968_s25 = sld [smem:[#allocation9 + $0x8c]]  ;;  %10359 = vst [vmem:[#allocation134_spill] sm:$0xff] %v7978_v35  ;;  %10360 = vst [vmem:[#allocation66_spill] sm:$0xff] %v7985_v45  ;;  %v8104_v51 = vstv %s7942_s24 }
 0x233   : > { %s10356_s4 = sld [smem:[#allocation32_spill]]  ;;  %10362 = vst [vmem:[#allocation140_spill] sm:$0xff] %v7988_v33  ;;  %v7991_v20 = vstv %s10348_s7  ;;  %10365 = vst [vmem:[#allocation197_spill] sm:$0xff] %v7997_v19 }
 0x234   : > { %s10358_s2 = sld [smem:[#allocation33_spill]]  ;;  %10364 = vst [vmem:[#allocation121_spill] sm:$0xff] %v7991_v20  ;;  %10379 = vst [vmem:[#allocation45_spill] sm:$0xff] %v8038_v14  ;;  %v8112_v17 = vstv %s7955_s10 }
 0x235   : > { %s7980_s23 = sld [smem:[#allocation9 + $0x8d]]  ;;  %v8000_v57 = vstv %s10350_s20  ;;  %10387 = vst [vmem:[#allocation73_spill] sm:$0xff] %v8069_v47  ;;  %10389 = vst [vmem:[#allocation145_spill] sm:$0xff] %v8077_v54  ;;  %v8119_v47 = vmul.f32 %v7808_v63, %v8112_v17 }
 0x236   : > { %s10361_s5 = sld [smem:[#allocation34_spill]]  ;;  %10366 = vst [vmem:[#allocation116_spill] sm:$0xff] %v8000_v57  ;;  %v8003_v46 = vstv %s10351_s14  ;;  %10390 = vst [vmem:[#allocation141_spill] sm:$0xff] %v8080_v22 }
 0x237   : > { %s10363_s6 = sld [smem:[#allocation35_spill]]  ;;  %10368 = vst [vmem:[#allocation69_spill] sm:$0xff] %v8003_v46  ;;  %v8006_v49 = vstv %s10353_s18  ;;  %v8013_v25 = vmul.f32 %v7808_v63, %v8003_v46  ;;  %v8054_v46 = vstv %s7798_s21  ;;  %10393 = vst [vmem:[#allocation111_spill] sm:$0xff] %v8091_v16 }
 0x238   : > { %s7993_s9 = sld [smem:[#allocation9 + $0x8e]]  ;;  %10370 = vst [vmem:[#allocation99_spill] sm:$0xff] %v8006_v49  ;;  %10383 = vst [vmem:[#allocation147_spill] sm:$0xff] %v8054_v46  ;;  %v8063_v33 = vmul.f32 %v7808_v63, %v8054_v46  ;;  %v8083_v46 = vstv %s7876_s16  ;;  %v8115_v41 = vstv %s7968_s25  ;;  %s4405_s25 = smov [#allocation10]  }
 0x239   : > { %s10367_s26 = sld [smem:[#allocation36_spill]]  ;;  %10371 = vst [vmem:[#allocation139_spill] sm:$0xff] %v8013_v25  ;;  %v8016_v2 = vstv %s10356_s4  ;;  %10391 = vst [vmem:[#allocation142_spill] sm:$0xff] %v8083_v46  ;;  %v8088_v56 = vmul.f32 %v7808_v63, %v8083_v46  ;;  %v8109_v46 = vmul.f32 %v7808_v63, %v8098_v9  ;;  %s4334_s4 = sshll.u32 %s4405_s25, 4  ;;  %s4335_s4 = int_to_ptr.vmem [resolvable:$false] %s4334_s4 }
 0x23a   : > { %s10369_s8 = sld [smem:[#allocation37_spill]]  ;;  %10372 = vst [vmem:[#allocation62_spill] sm:$0xff] %v8016_v2  ;;  %v8019_v26 = vstv %s10358_s2  ;;  %10385 = vst [vmem:[#allocation76_spill] sm:$0xff] %v8063_v33  ;;  %s4336_s2 = scalar_lea.vmem %s4335_s4, 1024 }
 0x23b   : > { %s8008_s28 = sld [smem:[#allocation9 + $0x8f]]  ;;  %10374 = vst [vmem:[#allocation179_spill] sm:$0xff] %v8019_v26  ;;  %v8026_v3 = vmul.f32 %v7808_v63, %v8019_v26  ;;  %v8051_v26 = vmul.f32 %v7808_v63, %v8038_v14  ;;  %v8072_v14 = vstv %s7846_s29  ;;  %10392 = vst [vmem:[#allocation160_spill] sm:$0xff] %v8088_v56  ;;  %v8122_v30 = vstv %s7980_s23 }
 0x23c   : > { %s10373_s15 = sld [smem:[#allocation39_spill]]  ;;  %v8029_v58 = vstv %s10361_s5  ;;  %10388 = vst [vmem:[#allocation74_spill] sm:$0xff] %v8072_v14  ;;  %10394 = vst [vmem:[#allocation144_spill] sm:$0xff] %v8094_v42 }
 0x23d   : > { %s8021_s22 = sld [smem:[#allocation9 + $0x41]]  ;;  %10376 = vst [vmem:[#allocation183_spill] sm:$0xff] %v8026_v3  ;;  %10377 = vst [vmem:[#allocation53_spill] sm:$0xff] %v8029_v58  ;;  %v8032_v44 = vstv %s10363_s6 }
 0x23e   : > { %s10375_s30 = sld [smem:[#allocation41_spill]]  ;;  %10378 = vst [vmem:[#allocation143_spill] sm:$0xff] %v8032_v44  ;;  %10382 = vst [vmem:[#allocation128_spill] sm:$0xff] %v8051_v26  ;;  %v8125_v54 = vstv %s7993_s9 }
 0x23f   : > { %s8034_s12 = sld [smem:[#allocation9 + $0x44]]  ;;  %v8041_v50 = vstv %s10367_s26  ;;  %10395 = vst [vmem:[#allocation149_spill] sm:$0xff] %v8098_v9  ;;  %10396 = vst [vmem:[#allocation115_spill] sm:$0xff] %v8101_v31  ;;  %v8133_v9 = vmul.f32 %v7808_v63, %v8125_v54  ;;  %v10414_v63 = vld [vmem:[#allocation88_spill] sm:$0xff] }
 0x240   : > { %10380 = vst [vmem:[#allocation98_spill] sm:$0xff] %v8041_v50  ;;  %v8044_v28 = vstv %s10369_s8  ;;  %s8046_s13 = sld [smem:[#allocation9 + $0x47]]  ;;  %10397 = vst [vmem:[#allocation151_spill] sm:$0xff] %v8104_v51  ;;  %v10421_v51 = vld [vmem:[#allocation72_spill] sm:$0xff] }
 0x241   : > { %10381 = vst [vmem:[#allocation108_spill] sm:$0xff] %v8044_v28  ;;  %s8059_s17 = sld [smem:[#allocation3]]  ;;  %10398 = vst [vmem:[#allocation106_spill] sm:$0xff] %v8109_v46  ;;  %v8128_v33 = vstv %s8008_s28  ;;  %v10413_v46 = vld [vmem:[#allocation54_spill] sm:$0xff]  ;;  %v10422_v31 = vld [vmem:[#allocation64_spill] sm:$0xff] }
 0x242   : > { %v8057_v52 = vstv %s10373_s15  ;;  %10399 = vst [vmem:[#allocation112_spill] sm:$0xff] %v8112_v17  ;;  %10400 = vst [vmem:[#allocation153_spill] sm:$0xff] %v8115_v41  ;;  %v514_v25 = vmul.f32 %v10413_v46, %v10412_v55  ;;  %s10458_s29 = sld [smem:[#allocation24_spill]] }
 0x243   : > { %10384 = vst [vmem:[#allocation70_spill] sm:$0xff] %v8057_v52  ;;  %10401 = vst [vmem:[#allocation146_spill] sm:$0xff] %v8119_v47  ;;  %v8136_v56 = vstv %s8021_s22  ;;  %v564_v47 = vmul.f32 %v10417_v60, %v10414_v63  ;;  %v10425_v60 = vld [vmem:[#allocation63_spill] sm:$0xff]  ;;  %s10699_s21 = sld [smem:[#allocation15_spill]] }
 0x244   : > { %v8066_v21 = vstv %s10375_s30  ;;  %10402 = vst [vmem:[#allocation152_spill] sm:$0xff] %v8122_v30  ;;  %10403 = vst [vmem:[#allocation150_spill] sm:$0xff] %v8125_v54  ;;  %v10410_v30 = vld [vmem:[#allocation38_spill] sm:$0xff]  ;;  %v10415_v54 = vld [vmem:[#allocation78_spill] sm:$0xff]  ;;  %v528_v46 = vadd.f32 %v10421_v51, %v514_v25  ;;  %s10709_s16 = sld [smem:[#allocation18_spill]] }
 0x245   : > { %10386 = vst [vmem:[#allocation109_spill] sm:$0xff] %v8066_v21  ;;  %10404 = vst [vmem:[#allocation96_spill] sm:$0xff] %v8128_v33  ;;  %v8139_v1 = vstv %s8034_s12  ;;  %v8149_v3 = vsub.s32 0, %v10410_v30  ;;  %v534_v41 = vmul.f32 %v10415_v54, %v10414_v63  ;;  %v10419_v30 = vld [vmem:[#allocation82_spill] sm:$0xff]  ;;  %v10420_v33 = vld [vmem:[#allocation103_spill] sm:$0xff]  ;;  %s10714_s3 = sld [smem:[#allocation21_spill]] }
 0x246   : > { %10405 = vst [vmem:[#allocation148_spill] sm:$0xff] %v8133_v9  ;;  %10406 = vst [vmem:[#allocation155_spill] sm:$0xff] %v8136_v56  ;;  %v8143_v17 = vstv %s8046_s13  ;;  %v10416_v56 = vld [vmem:[#allocation68_spill] sm:$0xff]  ;;  %v604_v9 = vmul.f32 %v10420_v33, %v10412_v55  ;;  %v10423_v54 = vld [vmem:[#allocation91_spill] sm:$0xff]  ;;  %s10715_s10 = sld [smem:[#allocation203_spill]] }
 0x247   : > { %10407 = vst [vmem:[#allocation100_spill] sm:$0xff] %v8139_v1  ;;  %10408 = vst [vmem:[#allocation170_spill] sm:$0xff] %v8143_v17  ;;  %v8146_v26 = vstv %s8059_s17  ;;  %v544_v1 = vmul.f32 %v10416_v56, %v10412_v55  ;;  %v10418_v17 = vld [vmem:[#allocation65_spill] sm:$0xff]  ;;  %v648_v16 = vmul.f32 %v10423_v54, %v10414_v63  ;;  %v10424_v56 = vld [vmem:[#allocation196_spill] sm:$0xff]  ;;  %v538_v33 = vadd.f32 %v534_v41, %v528_v46 }
 0x248   : > { %10409 = vst [vmem:[#allocation97_spill] sm:$0xff] %v8146_v26  ;;  %10411 = vst [vmem:[#allocation154_spill] sm:$0xff] %v8149_v3  ;;  %v574_v26 = vmul.f32 %v10418_v17, %v10412_v55  ;;  %v594_v3 = vmul.f32 %v10419_v30, %v10414_v63  ;;  %v670_v22 = vmul.f32 %v10424_v56, %v10412_v55  ;;  %v612_v19 = vrot.slane %v604_v9, 1 }
 0x249   : > { %v558_v42 = vadd.f32 %v10422_v31, %v544_v1  ;;  %v714_v17 = vmul.f32 %v7827_v36, %v10414_v63  ;;  %v736_v30 = vmul.f32 %v7830_v34, %v10412_v55  ;;  %v656_v51 = vrot.slane %v648_v16, 1  ;;  %s297_s27 = sand.u32 1, %s10699_s21  }
 0x24a   : > { %v588_v14 = vadd.f32 %v10425_v60, %v574_v26  ;;  %v678_v25 = vrot.slane %v670_v22, 1  ;;  %v780_v54 = vmul.f32 %v7841_v11, %v10414_v63  ;;  %v620_v56 = vadd.f32 %v612_v19, %v538_v33  ;;  %s3970_s11 = sshll.u32 %s297_s27, 5  ;;  %s4203_s1 = sshll.u32 %s10709_s16, 9 }
 0x24b   : > { %v568_v21 = vadd.f32 %v564_v47, %v558_v42  ;;  %v722_v31 = vrot.slane %v714_v17, 1  ;;  %v744_v52 = vrot.slane %v736_v30, 1  ;;  %v802_v60 = vmul.f32 %v7844_v13, %v10412_v55  ;;  %s299_s0 = scalar_lea.vmem [#allocation10], %s3970_s11  ;;  %s3844_s14 = scalar_lea.sflag [#allocation5], %s297_s27 }
 0x24c   : > { %v598_v1 = vadd.f32 %v594_v3, %v588_v14  ;;  %v846_v26 = vmul.f32 %v7859_v29, %v10414_v63  ;;  %v788_v34 = vrot.slane %v780_v54, 1  ;;  %v868_v47 = vmul.f32 %v7868_v48, %v10412_v55  ;;  %s3858_s19 = sshll.u32 %s299_s0, 4  ;;  %s9137_s20 = scalar_lea.hbm %s10715_s10, %s4203_s1  ;;  %s3859_s19 = int_to_ptr.vmem [resolvable:$true] %s3858_s19 }
 0x24d   : > { %v686_v45 = vadd.f32 %v678_v25, %v568_v21  ;;  %v912_v14 = vmul.f32 %v7874_v0, %v10414_v63  ;;  %v10426_v3 = vrot.slane %v10319_v15, 1  ;;  %v10427_v19 = vrot.slane %v7812_v7, 1  ;;  %s4330_s18 = scalar_lea.vmem %s3859_s19, 512  ;;  %p10716_p2 = scmp.ne.s32.totalorder %s10714_s3, 0 }
 0x24e   : > { %v752_v9 = vadd.f32 %v744_v52, %v598_v1  ;;  %v810_v17 = vrot.slane %v802_v60, 2  ;;  %v854_v16 = vrot.slane %v846_v26, 2  ;;  %v10428_v33 = vrot.slane %v7853_v53, 1  ;;  %p4331_p12 = scmp.ne.s32.totalorder %s3859_s19, %s4330_s18  ;;  %p4337_p9 = scmp.lt.s32.totalorder %s3859_s19, %s4335_s4 }
 0x24f   : > { %v642_v30 = vadd.f32 %v10426_v3, %v620_v56  ;;  %v708_v41 = vadd.f32 %v10427_v19, %v686_v45  ;;  %v876_v22 = vrot.slane %v868_v47, 2  ;;  %v920_v52 = vrot.slane %v912_v14, 2  ;;  %p4338_p7 = scmp.lt.s32.totalorder %s4336_s2, %s4330_s18 }
 0x250   : > { %v774_v46 = vadd.f32 %v10428_v33, %v752_v9  ;;  %v934_v54 = vmul.f32 %v7884_v40, %v10412_v55  ;;  %v978_v25 = vmul.f32 %v7897_v6, %v10414_v63  ;;  %v1000_v15 = vmul.f32 %v7900_v62, %v10412_v55  ;;  %p4332_p3 = pnand %p4331_p12, %p10716_p2 }
 0x251   : > { %v664_v21 = vadd.f32 %v656_v51, %v642_v30  ;;  %v730_v42 = vadd.f32 %v722_v31, %v708_v41  ;;  %v1044_v45 = vmul.f32 %v7909_v24, %v10414_v63  ;;  %v1066_v53 = vmul.f32 %v7912_v38, %v10412_v55  ;;  %p4339_p5 = por %p4338_p7, %p4337_p9 }
 0x252   : > { %v796_v7 = vadd.f32 %v788_v34, %v774_v46  ;;  %v942_v56 = vrot.slane %v934_v54, 2  ;;  %v986_v26 = vrot.slane %v978_v25, 2  ;;  %v1008_v9 = vrot.slane %v1000_v15, 3  ;;  %p4333_p4 = pneg %p4332_p3 }
 0x253   : > { %v818_v1 = vadd.f32 %v810_v17, %v664_v21  ;;  %v884_v60 = vadd.f32 %v876_v22, %v730_v42  ;;  %v1052_v31 = vrot.slane %v1044_v45, 3  ;;  %v1074_v47 = vrot.slane %v1066_v53, 3 }
 0x254   : > { %v950_v51 = vadd.f32 %v942_v56, %v796_v7  ;;  %v1110_v14 = vmul.f32 %v7925_v37, %v10414_v63  ;;  %v10429_v3 = vrot.slane %v7865_v39, 2  ;;  %v10430_v30 = vrot.slane %v7881_v23, 2  ;;  %p4340_p6 = pnand %p4339_p5, %p4333_p4 }
 0x255   : > { %v1132_v41 = vmul.f32 %v7934_v12, %v10412_v55  ;;  %v1176_v17 = vmul.f32 %v7940_v43, %v10414_v63  ;;  %v10431_v33 = vrot.slane %v7894_v8, 2  ;;  %v1198_v54 = vmul.f32 %v7950_v4, %v10412_v55 }
 0x256   : > { %v840_v34 = vadd.f32 %v10429_v3, %v818_v1  ;;  %v906_v19 = vadd.f32 %v10430_v30, %v884_v60  ;;  %v1118_v22 = vrot.slane %v1110_v14, 3  ;;  %v1242_v39 = vmul.f32 %v7963_v59, %v10414_v63 }
 0x257   : > { %v972_v46 = vadd.f32 %v10431_v33, %v950_v51  ;;  %v1140_v23 = vrot.slane %v1132_v41, 3  ;;  %v1184_v25 = vrot.slane %v1176_v17, 3  ;;  %v1206_v7 = vrot.slane %v1198_v54, 4 }
 0x258   : > { %v862_v21 = vadd.f32 %v854_v16, %v840_v34  ;;  %v928_v42 = vadd.f32 %v920_v52, %v906_v19  ;;  %v1250_v56 = vrot.slane %v1242_v39, 4  ;;  %v1264_v45 = vmul.f32 %v7966_v18, %v10412_v55 }
 0x259   : > { %v994_v15 = vadd.f32 %v986_v26, %v972_v46  ;;  %v1308_v1 = vmul.f32 %v7975_v5, %v10414_v63  ;;  %v1330_v60 = vmul.f32 %v7978_v35, %v10412_v55  ;;  %v1374_v16 = vmul.f32 %v7991_v20, %v10414_v63 }
 0x25a   : > { %v1016_v53 = vadd.f32 %v1008_v9, %v862_v21  ;;  %v1082_v8 = vadd.f32 %v1074_v47, %v928_v42  ;;  %v1272_v14 = vrot.slane %v1264_v45, 4  ;;  %v1396_v52 = vmul.f32 %v8000_v57, %v10412_v55 }
 0x25b   : > { %v1148_v51 = vadd.f32 %v1140_v23, %v994_v15  ;;  %v10432_v26 = vrot.slane %v7919_v61, 3  ;;  %v10433_v9 = vrot.slane %v7931_v10, 3  ;;  %v1316_v34 = vrot.slane %v1308_v1, 4 }
 0x25c   : > { %v1338_v30 = vrot.slane %v1330_v60, 4  ;;  %v10434_v19 = vrot.slane %v7947_v27, 3  ;;  %v1382_v17 = vrot.slane %v1374_v16, 4  ;;  %v1404_v33 = vrot.slane %v1396_v52, 5  ;;  %v10436_v16 = vld [vmem:[#allocation66_spill] sm:$0xff] }
 0x25d   : > { %v1038_v3 = vadd.f32 %v10432_v26, %v1016_v53  ;;  %v1104_v47 = vadd.f32 %v10433_v9, %v1082_v8  ;;  %v1440_v46 = vmul.f32 %v8006_v49, %v10414_v63  ;;  %v1462_v21 = vmul.f32 %v8016_v2, %v10412_v55 }
 0x25e   : > { %v1170_v41 = vadd.f32 %v10434_v19, %v1148_v51  ;;  %v1506_v61 = vmul.f32 %v8029_v58, %v10414_v63  ;;  %v1528_v23 = vmul.f32 %v8032_v44, %v10412_v55  ;;  %v1572_v27 = vmul.f32 %v8041_v50, %v10414_v63 }
 0x25f   : > { %v1060_v54 = vadd.f32 %v1052_v31, %v1038_v3  ;;  %v1126_v39 = vadd.f32 %v1118_v22, %v1104_v47  ;;  %v1448_v42 = vrot.slane %v1440_v46, 5  ;;  %v1470_v53 = vrot.slane %v1462_v21, 5  ;;  %v10438_v3 = vld [vmem:[#allocation70_spill] sm:$0xff]  ;;  %v10440_v47 = vld [vmem:[#allocation197_spill] sm:$0xff] }
 0x260   : > { %v1192_v10 = vadd.f32 %v1184_v25, %v1170_v41  ;;  %v1514_v8 = vrot.slane %v1506_v61, 5  ;;  %v1536_v22 = vrot.slane %v1528_v23, 5  ;;  %v1580_v1 = vrot.slane %v1572_v27, 5  ;;  %v10442_v46 = vld [vmem:[#allocation74_spill] sm:$0xff] }
 0x261   : > { %v1214_v15 = vadd.f32 %v1206_v7, %v1060_v54  ;;  %v1280_v45 = vadd.f32 %v1272_v14, %v1126_v39  ;;  %v1594_v60 = vmul.f32 %v8044_v28, %v10412_v55  ;;  %v10435_v51 = vrot.slane %v7960_v32, 4  ;;  %v10439_v7 = vld [vmem:[#allocation109_spill] sm:$0xff] }
 0x262   : > { %v1346_v31 = vadd.f32 %v1338_v30, %v1192_v10  ;;  %v10437_v52 = vrot.slane %v10436_v16, 4  ;;  %v1638_v9 = vmul.f32 %v10438_v3, %v10414_v63  ;;  %v1660_v14 = vmul.f32 %v10439_v7, %v10412_v55  ;;  %v10443_v39 = vld [vmem:[#allocation141_spill] sm:$0xff] }
 0x263   : > { %v1236_v25 = vadd.f32 %v10435_v51, %v1214_v15  ;;  %v10441_v19 = vrot.slane %v10440_v47, 4  ;;  %v1602_v41 = vrot.slane %v1594_v60, 6  ;;  %v1704_v54 = vmul.f32 %v10442_v46, %v10414_v63  ;;  %v10444_v51 = vld [vmem:[#allocation111_spill] sm:$0xff] }
 0x264   : > { %v1302_v26 = vadd.f32 %v10437_v52, %v1280_v45  ;;  %v1726_v32 = vmul.f32 %v10443_v39, %v10412_v55  ;;  %v1646_v10 = vrot.slane %v1638_v9, 6  ;;  %v1668_v23 = vrot.slane %v1660_v14, 6  ;;  %v8269_v39 = vpop.permute.xlu1 %3693  ;;  %v10450_v14 = vld [vmem:[#allocation139_spill] sm:$0xff] }
 0x265   : > { %v1368_v30 = vadd.f32 %v10441_v19, %v1346_v31  ;;  %v1258_v21 = vadd.f32 %v1250_v56, %v1236_v25  ;;  %v1712_v15 = vrot.slane %v1704_v54, 6  ;;  %v1770_v16 = vmul.f32 %v10444_v51, %v10414_v63  ;;  %v10445_v31 = vld [vmem:[#allocation144_spill] sm:$0xff]  ;;  %v10446_v19 = vld [vmem:[#allocation115_spill] sm:$0xff]  ;;  %10447 = vst [vmem:[#allocation159_spill] sm:$0xff] %v8269_v39 }
 0x266   : > { %v1324_v61 = vadd.f32 %v1316_v34, %v1302_v26  ;;  %v1734_v45 = vrot.slane %v1726_v32, 6  ;;  %v1792_v60 = vmul.f32 %v10445_v31, %v10412_v55  ;;  %v8267_v46 = vmul.f32 %v10446_v19, %v10414_v63  ;;  %v10449_v26 = vld [vmem:[#allocation153_spill] sm:$0xff]  ;;  %v8280_v19 = vpop.permute.xlu0 %3687  ;;  %v10455_v31 = vld [vmem:[#allocation128_spill] sm:$0xff] }
 0x267   : > { %v1390_v27 = vadd.f32 %v1382_v17, %v1368_v30  ;;  %v1412_v52 = vadd.f32 %v1404_v33, %v1258_v21  ;;  %v1778_v34 = vrot.slane %v1770_v16, 6  ;;  %v10448_v17 = vld [vmem:[#allocation151_spill] sm:$0xff]  ;;  %v1902_v9 = vmul.f32 %v10449_v26, %v10414_v63  ;;  %10454 = vst [vmem:[#allocation94_spill] sm:$0xff] %v8280_v19 }
 0x268   : > { %v1478_v47 = vadd.f32 %v1470_v53, %v1324_v61  ;;  %v1858_v25 = vmul.f32 %v10448_v17, %v10412_v55  ;;  %v10451_v33 = vrot.slane %v10450_v14, 5  ;;  %v10452_v30 = vld [vmem:[#allocation183_spill] sm:$0xff]  ;;  %v1800_v21 = vrot.slane %v1792_v60, 7  ;;  %v10457_v17 = vld [vmem:[#allocation152_spill] sm:$0xff] }
 0x269   : > { %v1544_v56 = vadd.f32 %v1536_v22, %v1390_v27  ;;  %v10453_v54 = vrot.slane %v10452_v30, 5  ;;  %v1844_v61 = vrot.slane %v8267_v46, 7  ;;  %v10456_v22 = vrot.slane %v10455_v31, 5 }
 0x26a   : > { %v1434_v53 = vadd.f32 %v10451_v33, %v1412_v52  ;;  %v1866_v16 = vrot.slane %v1858_v25, 7  ;;  %v1910_v51 = vrot.slane %v1902_v9, 7  ;;  %v1924_v7 = vmul.f32 %v10457_v17, %v10412_v55  ;;  %v10459_v52 = vld [vmem:[#allocation96_spill] sm:$0xff]  ;;  %v10462_v25 = vld [vmem:[#allocation71_spill] sm:$0xff]  ;;  %v10463_v9 = vld [vmem:[#allocation54_spill] sm:$0xff] }
 0x26b   : > { %v1500_v32 = vadd.f32 %v10453_v54, %v1478_v47  ;;  %v1566_v27 = vadd.f32 %v10456_v22, %v1544_v56  ;;  %v1968_v33 = vmul.f32 %v10459_v52, %v10414_v63  ;;  %v3698_v46 = vsel %vm425_vm4, %v8269_v39, %v8280_v19  ;;  %v10465_v63 = vld [vmem:[#allocation100_spill] sm:$0xff]  ;;  %v10466_v17 = vld [vmem:[#allocation170_spill] sm:$0xff]  ;;  %v10470_v39 = vld [vmem:[#allocation145_spill] sm:$0xff] }
 0x26c   : > { %v1456_v26 = vadd.f32 %v1448_v42, %v1434_v53  ;;  %v1932_v30 = vrot.slane %v1924_v7, 7  ;;  %v3702_v56 = vsel %vm324_vm5, 0.0, %v3698_v46  ;;  %v511_v54 = vmul.f32 %v10463_v9, %v10462_v25  ;;  %v8300_v47 = vld [vmem:[%s10458_s29] sm:$0xff] }
 0x26d   : > { %v1522_v14 = vadd.f32 %v1514_v8, %v1500_v32  ;;  %v1588_v60 = vadd.f32 %v1580_v1, %v1566_v27  ;;  %v1976_v42 = vrot.slane %v1968_v33, 7  ;;  %v10464_v8 = vld [vmem:[#allocation155_spill] sm:$0xff]  ;;  %v3718_v52 = vmul.f32 %v10465_v63, %v3702_v56  ;;  %v10468_v27 = vld [vmem:[#allocation76_spill] sm:$0xff]  ;;  %v10474_v33 = vld [vmem:[#allocation78_spill] sm:$0xff] }
 0x26e   : > { %v1610_v55 = vadd.f32 %v1602_v41, %v1456_v26  ;;  %v3708_v53 = vmul.f32 %v10464_v8, %v3702_v56  ;;  %v3728_v3 = vmul.f32 %v10466_v17, %v3702_v56  ;;  %v10467_v1 = vld [vmem:[#allocation55_spill] sm:$0xff]  ;;  %v10469_v46 = vrot.slane %v10468_v27, 6  ;;  %v10477_v56 = vld [vmem:[#allocation122_spill] sm:$0xff]  ;;  %v10478_v19 = vld [vmem:[#allocation52_spill] sm:$0xff] }
 0x26f   : > { %v1676_v22 = vadd.f32 %v1668_v23, %v1522_v14  ;;  %v1742_v32 = vadd.f32 %v1734_v45, %v1588_v60  ;;  %v521_v7 = vmul.f32 %v8300_v47, %v10467_v1  ;;  %v10471_v9 = vrot.slane %v10470_v39, 6  ;;  %v10472_v23 = vld [vmem:[#allocation48_spill] sm:$0xff] }
 0x270   : > { %v1632_v31 = vadd.f32 %v10469_v46, %v1610_v55  ;;  %v3712_v26 = vadd.f32 %v3708_v53, %v10472_v23  ;;  %v10473_v14 = vld [vmem:[#allocation84_spill] sm:$0xff]  ;;  %v3722_v17 = vadd.f32 %v3718_v52, %v10477_v56  ;;  %v3732_v28 = vadd.f32 %v3728_v3, %v10478_v19  ;;  %v10480_v46 = vld [vmem:[#allocation58_spill] sm:$0xff]  ;;  %v10482_v3 = vld [vmem:[#allocation57_spill] sm:$0xff] }
 0x271   : > { %v1698_v41 = vadd.f32 %v10471_v9, %v1676_v22  ;;  %v531_v45 = vmul.f32 %v10474_v33, %v10473_v14  ;;  %v10475_v60 = vld [vmem:[#allocation160_spill] sm:$0xff]  ;;  %v525_v50 = vadd.f32 %v521_v7, %v511_v54  ;;  %v551_v23 = vmul.f32 %v8300_v47, %v10480_v46  ;;  %v10491_v56 = vld [vmem:[#allocation82_spill] sm:$0xff] }
 0x272   : > { %v10476_v63 = vrot.slane %v10475_v60, 6  ;;  %v1654_v1 = vadd.f32 %v1646_v10, %v1632_v31  ;;  %v3736_v27 = vrot.slane %v3712_v26, 7  ;;  %v10479_v55 = vld [vmem:[#allocation68_spill] sm:$0xff]  ;;  %v3748_v22 = vrot.slane %v3732_v28, 1 }
 0x273   : > { %v1720_v44 = vadd.f32 %v1712_v15, %v1698_v41  ;;  %v541_v39 = vmul.f32 %v10479_v55, %v10462_v25  ;;  %v535_v53 = vadd.f32 %v531_v45, %v525_v50  ;;  %v561_v19 = vmul.f32 %v10482_v3, %v10473_v14  ;;  %v10489_v41 = vld [vmem:[#allocation148_spill] sm:$0xff] }
 0x274   : > { %v1764_v8 = vadd.f32 %v10476_v63, %v1742_v32  ;;  %v1808_v33 = vadd.f32 %v1800_v21, %v1654_v1  ;;  %v3740_v52 = vsel %vm325_vm0, 0.0, %v3736_v27  ;;  %v3752_v54 = vsel %vm326_vm1, 0.0, %v3748_v22  ;;  %v10493_v22 = vld [vmem:[#allocation103_spill] sm:$0xff]  ;;  %v10586_v32 = vld [vmem:[#allocation89_spill] sm:$0xff] }
 0x275   : > { %v1874_v60 = vadd.f32 %v1866_v16, %v1720_v44  ;;  %v3744_v15 = vadd.f32 %v3740_v52, %v3722_v17  ;;  %v555_v63 = vadd.f32 %v551_v23, %v541_v39  ;;  %v10487_v44 = vld [vmem:[#allocation65_spill] sm:$0xff]  ;;  %v10488_v16 = vld [vmem:[#allocation67_spill] sm:$0xff]  ;;  %v10490_v26 = vrot.slane %v10489_v41, 7 }
 0x276   : > { %v1786_v9 = vadd.f32 %v1778_v34, %v1764_v8  ;;  %v10483_v34 = vld [vmem:[#allocation106_spill] sm:$0xff]  ;;  %v571_v21 = vmul.f32 %v10487_v44, %v10462_v25  ;;  %v581_v1 = vmul.f32 %v8300_v47, %v10488_v16  ;;  %v591_v27 = vmul.f32 %v10491_v56, %v10473_v14  ;;  %v10495_v52 = vld [vmem:[#allocation97_spill] sm:$0xff] }
 0x277   : > { %v10484_v28 = vrot.slane %v10483_v34, 7  ;;  %v10485_v8 = vld [vmem:[#allocation146_spill] sm:$0xff]  ;;  %v3756_v17 = vadd.f32 %v3752_v54, %v3744_v15  ;;  %v565_v45 = vadd.f32 %v561_v19, %v555_v63  ;;  %v601_v23 = vmul.f32 %v10493_v22, %v10462_v25 }
 0x278   : > { %v1940_v10 = vadd.f32 %v1932_v30, %v1786_v9  ;;  %v10486_v7 = vrot.slane %v10485_v8, 7  ;;  %v585_v9 = vadd.f32 %v581_v1, %v571_v21  ;;  %v711_v21 = vmul.f32 %v7827_v36, %v10473_v14 }
 0x279   : > { %v1830_v50 = vadd.f32 %v10484_v28, %v1808_v33  ;;  %v3762_v34 = vadd.f32 %v10495_v52, %v3756_v17  ;;  %v10496_v28 = vld [vmem:[#allocation124_spill] sm:$0xff] }
 0x27a   : > { %v1896_v31 = vadd.f32 %v10486_v7, %v1874_v60  ;;  %v1962_v30 = vadd.f32 %v10490_v26, %v1940_v10  ;;  %v623_v8 = vmul.f32 %v8300_v47, %v10496_v28  ;;  %v10497_v10 = vld [vmem:[#allocation91_spill] sm:$0xff]  ;;  %v595_v54 = vadd.f32 %v591_v27, %v585_v9  ;;  %v10501_v9 = vld [vmem:[#allocation114_spill] sm:$0xff] }
 0x27b   : > { %v8337_v39 = vadd.f32 %v1844_v61, %v1830_v50  ;;  %v645_v19 = vmul.f32 %v10497_v10, %v10473_v14  ;;  %v609_v61 = vrot.slane %v601_v23, 1  ;;  %v755_v23 = vmul.f32 %v8300_v47, %v10501_v9 }
 0x27c   : > { %v1918_v33 = vadd.f32 %v1910_v51, %v1896_v31  ;;  %v8341_v60 = vadd.f32 %v1976_v42, %v1962_v30  ;;  %v10498_v51 = vld [vmem:[#allocation196_spill] sm:$0xff]  ;;  %v631_v50 = vrot.slane %v623_v8, 1  ;;  %v10499_v31 = vld [vmem:[#allocation87_spill] sm:$0xff]  ;;  %v777_v8 = vmul.f32 %v7841_v11, %v10473_v14 }
 0x27d   : > { %10492 = vst [vmem:[#allocation164_spill] sm:$0xff] %v8337_v39  ;;  %v667_v63 = vmul.f32 %v10498_v51, %v10462_v25  ;;  %v653_v7 = vrot.slane %v645_v19, 1  ;;  %v689_v42 = vmul.f32 %v8300_v47, %v10499_v31  ;;  %v617_v41 = vadd.f32 %v609_v61, %v535_v53  ;;  %v10500_v30 = vld [vmem:[#allocation195_spill] sm:$0xff]  ;;  %v10502_v19 = vld [vmem:[#allocation154_spill] sm:$0xff]  ;;  %v10503_v61 = vld [vmem:[#allocation49_spill] sm:$0xff] }
 0x27e   : > { %10494 = vst [vmem:[#allocation131_spill] sm:$0xff] %v8341_v60  ;;  %v3766_v15 = vadd.f32 %v1918_v33, %v8337_v39  ;;  %v733_v17 = vmul.f32 %v10500_v30, %v10462_v25  ;;  %v719_v33 = vrot.slane %v711_v21, 1  ;;  %v763_v22 = vrot.slane %v755_v23, 1  ;;  %v10506_v23 = vld [vmem:[#allocation90_spill] sm:$0xff] }
 0x27f   : > { %v675_v26 = vrot.slane %v667_v63, 1  ;;  %v697_v27 = vrot.slane %v689_v42, 1  ;;  %v639_v51 = vadd.f32 %v631_v50, %v617_v41  ;;  %v799_v53 = vmul.f32 %v7844_v13, %v10462_v25 }
 0x280   : > { %v3770_v1 = vadd.f32 %v3766_v15, %v8341_v60  ;;  %v741_v36 = vrot.slane %v733_v17, 1  ;;  %v785_v15 = vrot.slane %v777_v8, 1  ;;  %v821_v63 = vmul.f32 %v8300_v47, %v10503_v61 }
 0x281   : > { %v683_v10 = vadd.f32 %v675_v26, %v565_v45  ;;  %v661_v21 = vadd.f32 %v653_v7, %v639_v51  ;;  %v807_v56 = vrot.slane %v799_v53, 2  ;;  %v843_v50 = vmul.f32 %v7859_v29, %v10473_v14  ;;  %v10505_v26 = vld [vmem:[#allocation129_spill] sm:$0xff] }
 0x282   : > { %v3786_v39 = vrot.slane %v3770_v1, %v10502_v19  ;;  %v749_v30 = vadd.f32 %v741_v36, %v595_v54  ;;  %v829_v11 = vrot.slane %v821_v63, 2  ;;  %v865_v45 = vmul.f32 %v7868_v48, %v10462_v25  ;;  %v10507_v63 = vld [vmem:[#allocation138_spill] sm:$0xff] }
 0x283   : > { %v705_v60 = vadd.f32 %v697_v27, %v683_v10  ;;  %v887_v17 = vmul.f32 %v8300_v47, %v10505_v26  ;;  %v851_v51 = vrot.slane %v843_v50, 2  ;;  %v931_v36 = vmul.f32 %v7884_v40, %v10462_v25 }
 0x284   : > { %v8367_v42 = vadd.f32 %v3786_v39, %v3762_v34  ;;  %v771_v41 = vadd.f32 %v763_v22, %v749_v30  ;;  %v909_v39 = vmul.f32 %v7874_v0, %v10473_v14  ;;  %v815_v34 = vadd.f32 %v807_v56, %v661_v21 }
 0x285   : > { %v727_v1 = vadd.f32 %v719_v33, %v705_v60  ;;  %v873_v10 = vrot.slane %v865_v45, 2  ;;  %v895_v7 = vrot.slane %v887_v17, 2  ;;  %v953_v8 = vmul.f32 %v8300_v47, %v10506_v23 }
 0x286   : > { %10504 = vst [vmem:[#allocation157_spill] sm:$0xff] %v8367_v42  ;;  %v793_v54 = vadd.f32 %v785_v15, %v771_v41  ;;  %v917_v27 = vrot.slane %v909_v39, 2  ;;  %v837_v60 = vadd.f32 %v829_v11, %v815_v34  ;;  %v939_v30 = vrot.slane %v931_v36, 2 }
 0x287   : > { %v881_v22 = vadd.f32 %v873_v10, %v727_v1  ;;  %v975_v33 = vmul.f32 %v7897_v6, %v10473_v14  ;;  %v961_v53 = vrot.slane %v953_v8, 2  ;;  %v997_v56 = vmul.f32 %v7900_v62, %v10462_v25  ;;  %v10508_v8 = vld [vmem:[#allocation126_spill] sm:$0xff] }
 0x288   : > { %v1019_v21 = vmul.f32 %v8300_v47, %v10507_v63  ;;  %v1041_v15 = vmul.f32 %v7909_v24, %v10473_v14  ;;  %v859_v50 = vadd.f32 %v851_v51, %v837_v60  ;;  %v947_v41 = vadd.f32 %v939_v30, %v793_v54  ;;  %v10509_v54 = vld [vmem:[#allocation93_spill] sm:$0xff] }
 0x289   : > { %v903_v45 = vadd.f32 %v895_v7, %v881_v22  ;;  %v983_v17 = vrot.slane %v975_v33, 2  ;;  %v1005_v11 = vrot.slane %v997_v56, 3  ;;  %v1063_v34 = vmul.f32 %v7912_v38, %v10462_v25 }
 0x28a   : > { %v1027_v1 = vrot.slane %v1019_v21, 3  ;;  %v1049_v39 = vrot.slane %v1041_v15, 3  ;;  %v969_v36 = vadd.f32 %v961_v53, %v947_v41  ;;  %v1085_v42 = vmul.f32 %v8300_v47, %v10508_v8 }
 0x28b   : > { %v925_v10 = vadd.f32 %v917_v27, %v903_v45  ;;  %v1107_v62 = vmul.f32 %v7925_v37, %v10473_v14  ;;  %v1013_v6 = vadd.f32 %v1005_v11, %v859_v50  ;;  %v1071_v24 = vrot.slane %v1063_v34, 3  ;;  %v10510_v45 = vld [vmem:[#allocation61_spill] sm:$0xff] }
 0x28c   : > { %v1129_v51 = vmul.f32 %v7934_v12, %v10462_v25  ;;  %v1151_v7 = vmul.f32 %v8300_v47, %v10509_v54  ;;  %v991_v60 = vadd.f32 %v983_v17, %v969_v36  ;;  %v1093_v22 = vrot.slane %v1085_v42, 3 }
 0x28d   : > { %v1115_v30 = vrot.slane %v1107_v62, 3  ;;  %v1173_v27 = vmul.f32 %v7940_v43, %v10473_v14  ;;  %v1035_v33 = vadd.f32 %v1027_v1, %v1013_v6  ;;  %v1079_v53 = vadd.f32 %v1071_v24, %v925_v10  ;;  %v10511_v10 = vld [vmem:[#allocation101_spill] sm:$0xff] }
 0x28e   : > { %v1137_v56 = vrot.slane %v1129_v51, 3  ;;  %v1159_v21 = vrot.slane %v1151_v7, 3  ;;  %v1195_v50 = vmul.f32 %v7950_v4, %v10462_v25  ;;  %v1217_v41 = vmul.f32 %v8300_v47, %v10510_v45 }
 0x28f   : > { %v1181_v15 = vrot.slane %v1173_v27, 3  ;;  %v1239_v11 = vmul.f32 %v7963_v59, %v10473_v14  ;;  %v1057_v17 = vadd.f32 %v1049_v39, %v1035_v33  ;;  %v1101_v42 = vadd.f32 %v1093_v22, %v1079_v53 }
 0x290   : > { %v1145_v62 = vadd.f32 %v1137_v56, %v991_v60  ;;  %v1261_v34 = vmul.f32 %v7966_v18, %v10462_v25  ;;  %v1203_v6 = vrot.slane %v1195_v50, 4  ;;  %v1225_v24 = vrot.slane %v1217_v41, 4  ;;  %v10512_v60 = vld [vmem:[#allocation140_spill] sm:$0xff]  ;;  %v10529_v18 = vld [vmem:[#allocation115_spill] sm:$0xff] }
 0x291   : > { %v1247_v1 = vrot.slane %v1239_v11, 4  ;;  %v1283_v36 = vmul.f32 %v8300_v47, %v10511_v10  ;;  %v1123_v51 = vadd.f32 %v1115_v30, %v1101_v42  ;;  %v1305_v4 = vmul.f32 %v7975_v5, %v10473_v14 }
 0x292   : > { %v1167_v7 = vadd.f32 %v1159_v21, %v1145_v62  ;;  %v1269_v27 = vrot.slane %v1261_v34, 4  ;;  %v1211_v43 = vadd.f32 %v1203_v6, %v1057_v17  ;;  %v1327_v39 = vmul.f32 %v7978_v35, %v10462_v25  ;;  %v10513_v62 = vld [vmem:[#allocation69_spill] sm:$0xff] }
 0x293   : > { %v1291_v59 = vrot.slane %v1283_v36, 4  ;;  %v1349_v22 = vmul.f32 %v8300_v47, %v10512_v60  ;;  %v1313_v56 = vrot.slane %v1305_v4, 4  ;;  %v1371_v50 = vmul.f32 %v7991_v20, %v10473_v14  ;;  %v10520_v20 = vld [vmem:[#allocation70_spill] sm:$0xff] }
 0x294   : > { %v1189_v33 = vadd.f32 %v1181_v15, %v1167_v7  ;;  %v1277_v53 = vadd.f32 %v1269_v27, %v1123_v51  ;;  %v1233_v30 = vadd.f32 %v1225_v24, %v1211_v43  ;;  %v1335_v21 = vrot.slane %v1327_v39, 4  ;;  %v10514_v27 = vld [vmem:[#allocation179_spill] sm:$0xff] }
 0x295   : > { %v1357_v41 = vrot.slane %v1349_v22, 4  ;;  %v1393_v11 = vmul.f32 %v8000_v57, %v10462_v25  ;;  %v1379_v42 = vrot.slane %v1371_v50, 4  ;;  %v1415_v34 = vmul.f32 %v8300_v47, %v10513_v62 }
 0x296   : > { %v1299_v17 = vadd.f32 %v1291_v59, %v1277_v53  ;;  %v1437_v6 = vmul.f32 %v8006_v49, %v10473_v14  ;;  %v1255_v15 = vadd.f32 %v1247_v1, %v1233_v30  ;;  %v1343_v36 = vadd.f32 %v1335_v21, %v1189_v33  ;;  %v10515_v1 = vld [vmem:[#allocation143_spill] sm:$0xff]  ;;  %v10516_v30 = vld [vmem:[#allocation45_spill] sm:$0xff] }
 0x297   : > { %v1401_v4 = vrot.slane %v1393_v11, 5  ;;  %v1459_v51 = vmul.f32 %v8016_v2, %v10462_v25  ;;  %v1423_v24 = vrot.slane %v1415_v34, 5  ;;  %v1481_v39 = vmul.f32 %v8300_v47, %v10514_v27  ;;  %v10519_v49 = vld [vmem:[#allocation147_spill] sm:$0xff] }
 0x298   : > { %v1321_v43 = vadd.f32 %v1313_v56, %v1299_v17  ;;  %v1445_v7 = vrot.slane %v1437_v6, 5  ;;  %v1365_v59 = vadd.f32 %v1357_v41, %v1343_v36  ;;  %v1503_v50 = vmul.f32 %v8029_v58, %v10473_v14  ;;  %v10517_v56 = vld [vmem:[#allocation98_spill] sm:$0xff] }
 0x299   : > { %v1409_v22 = vadd.f32 %v1401_v4, %v1255_v15  ;;  %v1467_v53 = vrot.slane %v1459_v51, 5  ;;  %v1489_v57 = vrot.slane %v1481_v39, 5  ;;  %v1525_v33 = vmul.f32 %v10515_v1, %v10462_v25  ;;  %v10518_v4 = vld [vmem:[#allocation108_spill] sm:$0xff] }
 0x29a   : > { %v1547_v21 = vmul.f32 %v8300_v47, %v10516_v30  ;;  %v1569_v11 = vmul.f32 %v10517_v56, %v10473_v14  ;;  %v1387_v17 = vadd.f32 %v1379_v42, %v1365_v59  ;;  %v1511_v2 = vrot.slane %v1503_v50, 5  ;;  %v10521_v42 = vld [vmem:[#allocation109_spill] sm:$0xff] }
 0x29b   : > { %v1431_v34 = vadd.f32 %v1423_v24, %v1409_v22  ;;  %v1475_v6 = vadd.f32 %v1467_v53, %v1321_v43  ;;  %v1533_v41 = vrot.slane %v1525_v33, 5  ;;  %v1591_v51 = vmul.f32 %v10518_v4, %v10462_v25  ;;  %v10522_v24 = vld [vmem:[#allocation73_spill] sm:$0xff] }
 0x29c   : > { %v1555_v15 = vrot.slane %v1547_v21, 5  ;;  %v1577_v36 = vrot.slane %v1569_v11, 5  ;;  %v1613_v1 = vmul.f32 %v8300_v47, %v10519_v49  ;;  %v1635_v35 = vmul.f32 %v10520_v20, %v10473_v14  ;;  %v10526_v20 = vld [vmem:[#allocation111_spill] sm:$0xff] }
 0x29d   : > { %v1453_v39 = vadd.f32 %v1445_v7, %v1431_v34  ;;  %v1497_v58 = vadd.f32 %v1489_v57, %v1475_v6  ;;  %v1541_v5 = vadd.f32 %v1533_v41, %v1387_v17  ;;  %v1599_v56 = vrot.slane %v1591_v51, 6  ;;  %v10523_v7 = vld [vmem:[#allocation74_spill] sm:$0xff]  ;;  %v10524_v17 = vld [vmem:[#allocation141_spill] sm:$0xff] }
 0x29e   : > { %v1657_v43 = vmul.f32 %v10521_v42, %v10462_v25  ;;  %v1679_v59 = vmul.f32 %v8300_v47, %v10522_v24  ;;  %v1621_v53 = vrot.slane %v1613_v1, 6  ;;  %v1643_v50 = vrot.slane %v1635_v35, 6  ;;  %v10525_v51 = vld [vmem:[#allocation142_spill] sm:$0xff]  ;;  %v10527_v1 = vld [vmem:[#allocation144_spill] sm:$0xff] }
 0x29f   : > { %v1519_v22 = vadd.f32 %v1511_v2, %v1497_v58  ;;  %v1701_v57 = vmul.f32 %v10523_v7, %v10473_v14  ;;  %v1563_v33 = vadd.f32 %v1555_v15, %v1541_v5  ;;  %v1607_v21 = vadd.f32 %v1599_v56, %v1453_v39  ;;  %v10528_v39 = vld [vmem:[#allocation149_spill] sm:$0xff] }
 0x2a0   : > { %v1665_v11 = vrot.slane %v1657_v43, 6  ;;  %v1687_v34 = vrot.slane %v1679_v59, 6  ;;  %v1723_v41 = vmul.f32 %v10524_v17, %v10462_v25  ;;  %v1745_v42 = vmul.f32 %v8300_v47, %v10525_v51 }
 0x2a1   : > { %v1709_v6 = vrot.slane %v1701_v57, 6  ;;  %v1767_v4 = vmul.f32 %v10526_v20, %v10473_v14  ;;  %v1585_v2 = vadd.f32 %v1577_v36, %v1563_v33  ;;  %v1629_v58 = vadd.f32 %v1621_v53, %v1607_v21  ;;  %v10530_v36 = vld [vmem:[#allocation151_spill] sm:$0xff]  ;;  %v10531_v53 = vld [vmem:[#allocation112_spill] sm:$0xff] }
 0x2a2   : > { %v1673_v35 = vadd.f32 %v1665_v11, %v1519_v22  ;;  %v1789_v7 = vmul.f32 %v10527_v1, %v10462_v25  ;;  %v1731_v5 = vrot.slane %v1723_v41, 6  ;;  %v1753_v56 = vrot.slane %v1745_v42, 6  ;;  %v10532_v11 = vld [vmem:[#allocation153_spill] sm:$0xff] }
 0x2a3   : > { %v1775_v15 = vrot.slane %v1767_v4, 6  ;;  %v1811_v43 = vmul.f32 %v8300_v47, %v10528_v39  ;;  %v1651_v59 = vadd.f32 %v1643_v50, %v1629_v58  ;;  %v1833_v12 = vmul.f32 %v10529_v18, %v10473_v14  ;;  %v10533_v58 = vld [vmem:[#allocation152_spill] sm:$0xff]  ;;  %v10537_v18 = vld [vmem:[#allocation150_spill] sm:$0xff] }
 0x2a4   : > { %v1695_v57 = vadd.f32 %v1687_v34, %v1673_v35  ;;  %v1797_v17 = vrot.slane %v1789_v7, 7  ;;  %v1739_v37 = vadd.f32 %v1731_v5, %v1585_v2  ;;  %v1855_v22 = vmul.f32 %v10530_v36, %v10462_v25  ;;  %v10534_v2 = vld [vmem:[#allocation188_spill] sm:$0xff]  ;;  %v10535_v5 = vld [vmem:[#allocation186_spill] sm:$0xff] }
 0x2a5   : > { %v1819_v20 = vrot.slane %v1811_v43, 7  ;;  %v1877_v33 = vmul.f32 %v8300_v47, %v10531_v53  ;;  %v1841_v4 = vrot.slane %v1833_v12, 7  ;;  %v1899_v41 = vmul.f32 %v10532_v11, %v10473_v14 }
 0x2a6   : > { %v1717_v21 = vadd.f32 %v1709_v6, %v1695_v57  ;;  %v1805_v42 = vadd.f32 %v1797_v17, %v1651_v59  ;;  %v1761_v50 = vadd.f32 %v1753_v56, %v1739_v37  ;;  %v1863_v34 = vrot.slane %v1855_v22, 7  ;;  %v10538_v6 = vld [vmem:[#allocation96_spill] sm:$0xff]  ;;  %v8477_v56 = vpop.permute.xlu0 %3689  ;;  %v10540_v22 = vld [vmem:[#allocation117_spill] sm:$0xff] }
 0x2a7   : > { %v1885_v7 = vrot.slane %v1877_v33, 7  ;;  %v1921_v35 = vmul.f32 %v10533_v58, %v10462_v25  ;;  %v8471_v43 = vadd.f32 %v10535_v5, %v10534_v2  ;;  %v1943_v1 = vmul.f32 %v8300_v47, %v10537_v18  ;;  %10539 = vst [vmem:[#allocation127_spill] sm:$0xff] %v8477_v56  ;;  %v10541_v33 = vld [vmem:[#allocation79_spill] sm:$0xff]  ;;  %v10543_v58 = vld [vmem:[#allocation44_spill] sm:$0xff]  ;;  %v10544_v2 = vld [vmem:[#allocation189_spill] sm:$0xff] }
 0x2a8   : > { %v1827_v36 = vadd.f32 %v1819_v20, %v1805_v42  ;;  %v1965_v12 = vmul.f32 %v10538_v6, %v10473_v14  ;;  %v1783_v17 = vadd.f32 %v1775_v15, %v1761_v50  ;;  %v1871_v59 = vadd.f32 %v1863_v34, %v1717_v21  ;;  %v10546_v14 = vld [vmem:[#allocation77_spill] sm:$0xff]  ;;  %v10549_v34 = vld [vmem:[#allocation187_spill] sm:$0xff]  ;;  %v10556_v6 = vld [vmem:[#allocation100_spill] sm:$0xff] }
 0x2a9   : > { %10536 = vst [vmem:[#allocation125_spill] sm:$0xff] %v8471_v43  ;;  %v1907_v57 = vrot.slane %v1899_v41, 7  ;;  %v1929_v37 = vrot.slane %v1921_v35, 7  ;;  %v8481_v25 = vadd.f32 %v10541_v33, %v10540_v22  ;;  %v8485_v5 = vadd.f32 %v10544_v2, %v10543_v58  ;;  %v10547_v15 = vld [vmem:[#allocation177_spill] sm:$0xff]  ;;  %v10548_v41 = vld [vmem:[#allocation178_spill] sm:$0xff] }
 0x2aa   : > { %v1849_v20 = vadd.f32 %v1841_v4, %v1827_v36  ;;  %v1951_v42 = vrot.slane %v1943_v1, 7  ;;  %v1893_v47 = vadd.f32 %v1885_v7, %v1871_v59  ;;  %v1973_v11 = vrot.slane %v1965_v12, 7  ;;  %v10550_v58 = vld [vmem:[#allocation94_spill] sm:$0xff]  ;;  %v10552_v7 = vld [vmem:[#allocation135_spill] sm:$0xff] }
 0x2ab   : > { %10542 = vst [vmem:[#allocation132_spill] sm:$0xff] %v8481_v25  ;;  %10545 = vst [vmem:[#allocation158_spill] sm:$0xff] %v8485_v5  ;;  %v1937_v43 = vadd.f32 %v1929_v37, %v1783_v17  ;;  %v3659_v21 = vmul.f32 %v10547_v15, %v10546_v14  ;;  %v3669_v50 = vmul.f32 %v10548_v41, %v10546_v14  ;;  %v10553_v17 = vld [vmem:[#allocation155_spill] sm:$0xff] }
 0x2ac   : > { %v3679_v35 = vmul.f32 %v10549_v34, %v10546_v14  ;;  %v3794_v22 = vrot.slane %v1849_v20, %v10502_v19  ;;  %v3697_v1 = vsel %vm425_vm4, %v10550_v58, %v8477_v56  ;;  %v1915_v36 = vadd.f32 %v1907_v57, %v1893_v47  ;;  %v10554_v37 = vld [vmem:[#allocation43_spill] sm:$0xff]  ;;  %v10557_v34 = vld [vmem:[#allocation170_spill] sm:$0xff]  ;;  %v8507_v58 = vld [vmem:[%s10458_s29 + $0x8] sm:$0xff] }
 0x2ad   : > { %v1959_v4 = vadd.f32 %v1951_v42, %v1937_v43  ;;  %v3663_v12 = vadd.f32 %v3659_v21, %v10552_v7  ;;  %v3705_v59 = vmul.f32 %v10553_v17, %v3697_v1  ;;  %v3673_v2 = vadd.f32 %v3669_v50, %v10554_v37  ;;  %v10555_v25 = vld [vmem:[#allocation119_spill] sm:$0xff]  ;;  %v10582_v56 = vld [vmem:[#allocation54_spill] sm:$0xff] }
 0x2ae   : > { %v3683_v5 = vadd.f32 %v3679_v35, %v10555_v25  ;;  %v3715_v14 = vmul.f32 %v10556_v6, %v3697_v1  ;;  %v3725_v38 = vmul.f32 %v10557_v34, %v3697_v1  ;;  %v3763_v0 = vadd.f32 %v1915_v36, %v1849_v20  ;;  %v10559_v57 = vld [vmem:[#allocation55_spill] sm:$0xff]  ;;  %v8518_v25 = vld [vmem:[%s10458_s29 + $0x10] sm:$0xff] }
 0x2af   : > { %v8504_v40 = vadd.f32 %v1973_v11, %v1959_v4  ;;  %v3709_v33 = vadd.f32 %v3705_v59, %v3663_v12  ;;  %v8511_v43 = vmul.f32 %v8507_v58, %v10559_v57  ;;  %v8515_v42 = vsel %vm325_vm0, %v3794_v22, 0.0 }
 0x2b0   : > { %10560 = vst [vmem:[#allocation120_spill] sm:$0xff] %v8515_v42  ;;  %v3729_v47 = vadd.f32 %v3725_v38, %v3683_v5  ;;  %v8522_v21 = vmul.f32 %v8518_v25, %v10559_v57  ;;  %v8526_v11 = vmul.f32 %v8507_v58, %v10480_v46  ;;  %v3719_v50 = vadd.f32 %v3715_v14, %v3673_v2 }
 0x2b1   : > { %10558 = vst [vmem:[#allocation156_spill] sm:$0xff] %v8504_v40  ;;  %v3767_v20 = vadd.f32 %v3763_v0, %v8504_v40  ;;  %v3733_v35 = vrot.slane %v3709_v33, 7  ;;  %v8531_v1 = vmul.f32 %v8507_v58, %v10496_v28  ;;  %v8535_v38 = vmul.f32 %v8518_v25, %v10480_v46 }
 0x2b2   : > { %v3745_v22 = vrot.slane %v3729_v47, 1  ;;  %v8539_v5 = vmul.f32 %v8507_v58, %v10488_v16  ;;  %v8543_v36 = vmul.f32 %v8518_v25, %v10496_v28  ;;  %v8549_v33 = vmul.f32 %v8507_v58, %v10499_v31 }
 0x2b3   : > { %v3737_v0 = vsel %vm325_vm0, 0.0, %v3733_v35  ;;  %v8553_v4 = vmul.f32 %v8518_v25, %v10499_v31  ;;  %v8557_v46 = vmul.f32 %v8507_v58, %v10501_v9  ;;  %v3774_v7 = vrot.slane %v3767_v20, %v10502_v19 }
 0x2b4   : > { %v3741_v12 = vadd.f32 %v3737_v0, %v3719_v50  ;;  %v8562_v28 = vmul.f32 %v8518_v25, %v10488_v16  ;;  %v3749_v37 = vsel %vm326_vm1, 0.0, %v3745_v22  ;;  %v8570_v31 = vmul.f32 %v8518_v25, %v10501_v9 }
 0x2b5   : > { %v8574_v14 = vmul.f32 %v8507_v58, %v10503_v61  ;;  %v8578_v16 = vmul.f32 %v8518_v25, %v10503_v61  ;;  %v8582_v47 = vmul.f32 %v8507_v58, %v10505_v26  ;;  %v8586_v20 = vmul.f32 %v8518_v25, %v10505_v26 }
 0x2b6   : > { %v3753_v57 = vadd.f32 %v3749_v37, %v3741_v12  ;;  %v8593_v22 = vmul.f32 %v8507_v58, %v10506_v23  ;;  %v8600_v26 = vmul.f32 %v8518_v25, %v10506_v23  ;;  %v8606_v35 = vmul.f32 %v8507_v58, %v10507_v63 }
 0x2b7   : > { %v8610_v9 = vmul.f32 %v8518_v25, %v10507_v63  ;;  %v8617_v23 = vmul.f32 %v8507_v58, %v10508_v8  ;;  %v8621_v37 = vmul.f32 %v8518_v25, %v10508_v8  ;;  %v8626_v0 = vmul.f32 %v8507_v58, %v10509_v54 }
 0x2b8   : > { %v3759_v61 = vadd.f32 %v10495_v52, %v3753_v57  ;;  %v8630_v63 = vmul.f32 %v8518_v25, %v10509_v54  ;;  %v8645_v54 = vmul.f32 %v8518_v25, %v10510_v45  ;;  %v8649_v52 = vmul.f32 %v8507_v58, %v10511_v10 }
 0x2b9   : > { %v8657_v12 = vmul.f32 %v8507_v58, %v10512_v60  ;;  %v8661_v2 = vmul.f32 %v8518_v25, %v10512_v60  ;;  %v8679_v40 = vmul.f32 %v8507_v58, %v10514_v27  ;;  %v8685_v8 = vmul.f32 %v8518_v25, %v10514_v27  ;;  %v10585_v27 = vld [vmem:[#allocation78_spill] sm:$0xff] }
 0x2ba   : > { %v8612_v57 = vadd.f32 %v3774_v7, %v3759_v61  ;;  %v8634_v7 = vmul.f32 %v8507_v58, %v10510_v45  ;;  %v8653_v61 = vmul.f32 %v8518_v25, %v10511_v10  ;;  %v8665_v45 = vmul.f32 %v8507_v58, %v10513_v62 }
 0x2bb   : > { %v8672_v10 = vmul.f32 %v8518_v25, %v10513_v62  ;;  %v8689_v62 = vmul.f32 %v8507_v58, %v10516_v30  ;;  %v8694_v60 = vmul.f32 %v8518_v25, %v10516_v30  ;;  %v8698_v42 = vmul.f32 %v8507_v58, %v10519_v49 }
 0x2bc   : > { %10561 = vst [vmem:[#allocation46_spill] sm:$0xff] %v8612_v57  ;;  %v8702_v50 = vmul.f32 %v8518_v25, %v10519_v49  ;;  %v8707_v59 = vmul.f32 %v8507_v58, %v10522_v24  ;;  %v8711_v57 = vmul.f32 %v8518_v25, %v10522_v24  ;;  %v8715_v30 = vmul.f32 %v8507_v58, %v10525_v51 }
 0x2bd   : > { %10562 = vst [vmem:[#allocation163_spill] sm:$0xff] %v8689_v62  ;;  %10563 = vst [vmem:[#allocation165_spill] sm:$0xff] %v8694_v60  ;;  %v8725_v24 = vmul.f32 %v8518_v25, %v10525_v51  ;;  %v8729_v17 = vmul.f32 %v8507_v58, %v10528_v39  ;;  %v8733_v19 = vmul.f32 %v8518_v25, %v10528_v39 }
 0x2be   : > { %10564 = vst [vmem:[#allocation136_spill] sm:$0xff] %v8698_v42  ;;  %10565 = vst [vmem:[#allocation167_spill] sm:$0xff] %v8702_v50  ;;  %v8737_v49 = vmul.f32 %v8507_v58, %v10531_v53  ;;  %v8741_v34 = vmul.f32 %v8518_v25, %v10531_v53  ;;  %v8745_v51 = vmul.f32 %v8507_v58, %v10537_v18  ;;  %v10576_v42 = vld [vmem:[#allocation85_spill] sm:$0xff] }
 0x2bf   : > { %10566 = vst [vmem:[#allocation169_spill] sm:$0xff] %v8707_v59  ;;  %10567 = vst [vmem:[#allocation166_spill] sm:$0xff] %v8711_v57  ;;  %v8752_v39 = vmul.f32 %v8518_v25, %v10537_v18  ;;  %v8759_v58 = vmul.f32 %v10547_v15, %v10576_v42  ;;  %v10578_v18 = vld [vmem:[#allocation104_spill] sm:$0xff]  ;;  %v8771_v50 = vmul.f32 %v10548_v41, %v10576_v42  ;;  %v10581_v53 = vld [vmem:[#allocation81_spill] sm:$0xff]  ;;  %v10594_v59 = vrot.slane %v8543_v36, 1 }
 0x2c0   : > { %10568 = vst [vmem:[#allocation51_spill] sm:$0xff] %v8715_v30  ;;  %10569 = vst [vmem:[#allocation168_spill] sm:$0xff] %v8725_v24  ;;  %v8767_v25 = vmul.f32 %v10547_v15, %v10578_v18  ;;  %v533_v30 = vmul.f32 %v10585_v27, %v10586_v32  ;;  %v542_v15 = vmul.f32 %v10479_v55, %v10581_v53  ;;  %v10591_v24 = vld [vmem:[#allocation191_spill] sm:$0xff] }
 0x2c1   : > { %10570 = vst [vmem:[#allocation172_spill] sm:$0xff] %v8729_v17  ;;  %10571 = vst [vmem:[#allocation180_spill] sm:$0xff] %v8733_v19  ;;  %v512_v19 = vmul.f32 %v10582_v56, %v10581_v53  ;;  %v572_v41 = vmul.f32 %v10487_v44, %v10581_v53 }
 0x2c2   : > { %10572 = vst [vmem:[#allocation130_spill] sm:$0xff] %v8737_v49  ;;  %10573 = vst [vmem:[#allocation133_spill] sm:$0xff] %v8741_v34  ;;  %v10584_v49 = vld [vmem:[#allocation80_spill] sm:$0xff]  ;;  %v556_v42 = vadd.f32 %v8526_v11, %v542_v15 }
 0x2c3   : > { %10574 = vst [vmem:[#allocation162_spill] sm:$0xff] %v8745_v51  ;;  %10575 = vst [vmem:[#allocation176_spill] sm:$0xff] %v8752_v39  ;;  %v532_v34 = vmul.f32 %v10585_v27, %v10584_v49  ;;  %v586_v11 = vadd.f32 %v8539_v5, %v572_v41  ;;  %v712_v57 = vmul.f32 %v10591_v24, %v10584_v49 }
 0x2c4   : > { %10577 = vst [vmem:[#allocation171_spill] sm:$0xff] %v8759_v58  ;;  %10579 = vst [vmem:[#allocation173_spill] sm:$0xff] %v8767_v25  ;;  %v10583_v58 = vld [vmem:[#allocation75_spill] sm:$0xff]  ;;  %v562_v25 = vmul.f32 %v10482_v3, %v10584_v49 }
 0x2c5   : > { %10580 = vst [vmem:[#allocation174_spill] sm:$0xff] %v8771_v50  ;;  %v513_v6 = vmul.f32 %v10582_v56, %v10583_v58  ;;  %v543_v39 = vmul.f32 %v10479_v55, %v10583_v58  ;;  %v526_v50 = vadd.f32 %v8511_v43, %v512_v19  ;;  %v563_v56 = vmul.f32 %v10482_v3, %v10586_v32 }
 0x2c6   : > { %v573_v55 = vmul.f32 %v10487_v44, %v10583_v58  ;;  %v566_v17 = vadd.f32 %v562_v25, %v556_v42  ;;  %v10590_v42 = vld [vmem:[#allocation196_spill] sm:$0xff] }
 0x2c7   : > { %v527_v51 = vadd.f32 %v8522_v21, %v513_v6  ;;  %v557_v27 = vadd.f32 %v8535_v38, %v543_v39  ;;  %v536_v18 = vadd.f32 %v532_v34, %v526_v50  ;;  %v10587_v6 = vld [vmem:[#allocation82_spill] sm:$0xff]  ;;  %v10588_v39 = vld [vmem:[#allocation103_spill] sm:$0xff]  ;;  %v668_v25 = vmul.f32 %v10590_v42, %v10581_v53 }
 0x2c8   : > { %v592_v43 = vmul.f32 %v10587_v6, %v10584_v49  ;;  %v593_v21 = vmul.f32 %v10587_v6, %v10586_v32  ;;  %v587_v38 = vadd.f32 %v8562_v28, %v573_v55  ;;  %v602_v15 = vmul.f32 %v10588_v39, %v10581_v53  ;;  %v10589_v34 = vld [vmem:[#allocation91_spill] sm:$0xff] }
 0x2c9   : > { %v537_v19 = vadd.f32 %v533_v30, %v527_v51  ;;  %v567_v3 = vadd.f32 %v563_v56, %v557_v27  ;;  %v603_v44 = vmul.f32 %v10588_v39, %v10583_v58  ;;  %v646_v50 = vmul.f32 %v10589_v34, %v10584_v49 }
 0x2ca   : > { %v647_v30 = vmul.f32 %v10589_v34, %v10586_v32  ;;  %v596_v51 = vadd.f32 %v592_v43, %v586_v11  ;;  %v597_v6 = vadd.f32 %v593_v21, %v587_v38  ;;  %v669_v41 = vmul.f32 %v10590_v42, %v10583_v58  ;;  %v10592_v11 = vld [vmem:[#allocation195_spill] sm:$0xff] }
 0x2cb   : > { %v610_v5 = vrot.slane %v602_v15, 1  ;;  %v611_v28 = vrot.slane %v603_v44, 1  ;;  %v654_v56 = vrot.slane %v646_v50, 1  ;;  %v676_v55 = vrot.slane %v668_v25, 1 }
 0x2cc   : > { %v655_v27 = vrot.slane %v647_v30, 1  ;;  %v677_v39 = vrot.slane %v669_v41, 1  ;;  %v713_v34 = vmul.f32 %v10591_v24, %v10586_v32  ;;  %v734_v38 = vmul.f32 %v10592_v11, %v10581_v53 }
 0x2cd   : > { %v618_v43 = vadd.f32 %v610_v5, %v536_v18  ;;  %v619_v21 = vadd.f32 %v611_v28, %v537_v19  ;;  %v735_v42 = vmul.f32 %v10592_v11, %v10583_v58  ;;  %v684_v15 = vadd.f32 %v676_v55, %v566_v17  ;;  %v10597_v11 = vld [vmem:[#allocation50_spill] sm:$0xff] }
 0x2ce   : > { %v685_v44 = vadd.f32 %v677_v39, %v567_v3  ;;  %v720_v50 = vrot.slane %v712_v57, 1  ;;  %v721_v30 = vrot.slane %v713_v34, 1  ;;  %v10593_v25 = vrot.slane %v8531_v1, 1 }
 0x2cf   : > { %v641_v60 = vadd.f32 %v10594_v59, %v619_v21  ;;  %v742_v62 = vrot.slane %v734_v38, 1  ;;  %v743_v24 = vrot.slane %v735_v42, 1  ;;  %v10595_v18 = vrot.slane %v8549_v33, 1 }
 0x2d0   : > { %v640_v41 = vadd.f32 %v10593_v25, %v618_v43  ;;  %v10596_v5 = vrot.slane %v8553_v4, 1  ;;  %v778_v17 = vmul.f32 %v10597_v11, %v10584_v49  ;;  %v779_v57 = vmul.f32 %v10597_v11, %v10586_v32 }
 0x2d1   : > { %v706_v19 = vadd.f32 %v10595_v18, %v684_v15  ;;  %v663_v1 = vadd.f32 %v655_v27, %v641_v60  ;;  %v750_v55 = vadd.f32 %v742_v62, %v596_v51  ;;  %v751_v39 = vadd.f32 %v743_v24, %v597_v6  ;;  %v10600_v24 = vld [vmem:[#allocation56_spill] sm:$0xff] }
 0x2d2   : > { %v707_v28 = vadd.f32 %v10596_v5, %v685_v44  ;;  %v662_v3 = vadd.f32 %v654_v56, %v640_v41  ;;  %v786_v34 = vrot.slane %v778_v17, 1  ;;  %v787_v43 = vrot.slane %v779_v57, 1 }
 0x2d3   : > { %v728_v36 = vadd.f32 %v720_v50, %v706_v19  ;;  %v10598_v33 = vrot.slane %v8557_v46, 1  ;;  %v10599_v4 = vrot.slane %v8570_v31, 1  ;;  %v800_v42 = vmul.f32 %v7844_v13, %v10581_v53 }
 0x2d4   : > { %v729_v59 = vadd.f32 %v721_v30, %v707_v28  ;;  %v801_v15 = vmul.f32 %v7844_v13, %v10583_v58  ;;  %v844_v60 = vmul.f32 %v7859_v29, %v10584_v49  ;;  %v845_v62 = vmul.f32 %v7859_v29, %v10586_v32 }
 0x2d5   : > { %v772_v21 = vadd.f32 %v10598_v33, %v750_v55  ;;  %v773_v38 = vadd.f32 %v10599_v4, %v751_v39  ;;  %v866_v51 = vmul.f32 %v7868_v48, %v10581_v53  ;;  %v867_v46 = vmul.f32 %v7868_v48, %v10583_v58  ;;  %v10601_v48 = vld [vmem:[#allocation59_spill] sm:$0xff] }
 0x2d6   : > { %v808_v56 = vrot.slane %v800_v42, 2  ;;  %v809_v27 = vrot.slane %v801_v15, 2  ;;  %v852_v44 = vrot.slane %v844_v60, 2  ;;  %v853_v50 = vrot.slane %v845_v62, 2  ;;  %v10606_v42 = vld [vmem:[#allocation95_spill] sm:$0xff] }
 0x2d7   : > { %v794_v31 = vadd.f32 %v786_v34, %v772_v21  ;;  %v795_v6 = vadd.f32 %v787_v43, %v773_v38  ;;  %v874_v30 = vrot.slane %v866_v51, 2  ;;  %v875_v13 = vrot.slane %v867_v46, 2 }
 0x2d8   : > { %v816_v25 = vadd.f32 %v808_v56, %v662_v3  ;;  %v817_v41 = vadd.f32 %v809_v27, %v663_v1  ;;  %v910_v18 = vmul.f32 %v10600_v24, %v10584_v49  ;;  %v911_v29 = vmul.f32 %v10600_v24, %v10586_v32  ;;  %v10607_v56 = vld [vmem:[#allocation110_spill] sm:$0xff] }
 0x2d9   : > { %v882_v19 = vadd.f32 %v874_v30, %v728_v36  ;;  %v883_v5 = vadd.f32 %v875_v13, %v729_v59  ;;  %v932_v28 = vmul.f32 %v10601_v48, %v10581_v53  ;;  %v933_v11 = vmul.f32 %v10601_v48, %v10583_v58 }
 0x2da   : > { %v10602_v17 = vrot.slane %v8574_v14, 2  ;;  %v10603_v3 = vrot.slane %v8578_v16, 2  ;;  %v918_v55 = vrot.slane %v910_v18, 2  ;;  %v919_v39 = vrot.slane %v911_v29, 2  ;;  %v10611_v18 = vld [vmem:[#allocation105_spill] sm:$0xff] }
 0x2db   : > { %v10604_v34 = vrot.slane %v8582_v47, 2  ;;  %v10605_v36 = vrot.slane %v8586_v20, 2  ;;  %v940_v33 = vrot.slane %v932_v28, 2  ;;  %v941_v21 = vrot.slane %v933_v11, 2 }
 0x2dc   : > { %v838_v57 = vadd.f32 %v10602_v17, %v816_v25  ;;  %v839_v1 = vadd.f32 %v10603_v3, %v817_v41  ;;  %v976_v15 = vmul.f32 %v10606_v42, %v10584_v49  ;;  %v977_v14 = vmul.f32 %v10606_v42, %v10586_v32  ;;  %v10610_v25 = vld [vmem:[#allocation137_spill] sm:$0xff]  ;;  %v10612_v3 = vld [vmem:[#allocation175_spill] sm:$0xff] }
 0x2dd   : > { %v904_v43 = vadd.f32 %v10604_v34, %v882_v19  ;;  %v905_v59 = vadd.f32 %v10605_v36, %v883_v5  ;;  %v948_v62 = vadd.f32 %v940_v33, %v794_v31  ;;  %v949_v51 = vadd.f32 %v941_v21, %v795_v6 }
 0x2de   : > { %v860_v4 = vadd.f32 %v852_v44, %v838_v57  ;;  %v861_v38 = vadd.f32 %v853_v50, %v839_v1  ;;  %v984_v46 = vrot.slane %v976_v15, 2  ;;  %v985_v47 = vrot.slane %v977_v14, 2 }
 0x2df   : > { %v926_v16 = vadd.f32 %v918_v55, %v904_v43  ;;  %v927_v60 = vadd.f32 %v919_v39, %v905_v59  ;;  %v998_v20 = vmul.f32 %v10607_v56, %v10581_v53  ;;  %v999_v27 = vmul.f32 %v10607_v56, %v10583_v58  ;;  %v10613_v39 = vld [vmem:[#allocation60_spill] sm:$0xff] }
 0x2e0   : > { %v10608_v44 = vrot.slane %v8593_v22, 2  ;;  %v10609_v30 = vrot.slane %v8600_v26, 2  ;;  %v1042_v41 = vmul.f32 %v10610_v25, %v10584_v49  ;;  %v1043_v31 = vmul.f32 %v10610_v25, %v10586_v32 }
 0x2e1   : > { %v1006_v6 = vrot.slane %v998_v20, 3  ;;  %v1007_v24 = vrot.slane %v999_v27, 3  ;;  %v1064_v29 = vmul.f32 %v10611_v18, %v10581_v53  ;;  %v1065_v19 = vmul.f32 %v10611_v18, %v10583_v58 }
 0x2e2   : > { %v970_v50 = vadd.f32 %v10608_v44, %v948_v62  ;;  %v971_v13 = vadd.f32 %v10609_v30, %v949_v51  ;;  %v1050_v48 = vrot.slane %v1042_v41, 3  ;;  %v1051_v28 = vrot.slane %v1043_v31, 3 }
 0x2e3   : > { %v1014_v26 = vadd.f32 %v1006_v6, %v860_v4  ;;  %v1015_v11 = vadd.f32 %v1007_v24, %v861_v38  ;;  %v1072_v17 = vrot.slane %v1064_v29, 3  ;;  %v1073_v57 = vrot.slane %v1065_v19, 3 }
 0x2e4   : > { %v992_v5 = vadd.f32 %v984_v46, %v970_v50  ;;  %v993_v22 = vadd.f32 %v985_v47, %v971_v13  ;;  %v1108_v1 = vmul.f32 %v10612_v3, %v10584_v49  ;;  %v1109_v55 = vmul.f32 %v10612_v3, %v10586_v32  ;;  %v10618_v50 = vld [vmem:[#allocation123_spill] sm:$0xff]  ;;  %v10619_v13 = vld [vmem:[#allocation118_spill] sm:$0xff] }
 0x2e5   : > { %v1130_v34 = vmul.f32 %v10613_v39, %v10581_v53  ;;  %v1131_v43 = vmul.f32 %v10613_v39, %v10583_v58  ;;  %v10614_v36 = vrot.slane %v8606_v35, 3  ;;  %v10615_v33 = vrot.slane %v8610_v9, 3 }
 0x2e6   : > { %v1080_v4 = vadd.f32 %v1072_v17, %v926_v16  ;;  %v1081_v38 = vadd.f32 %v1073_v57, %v927_v60  ;;  %v1116_v42 = vrot.slane %v1108_v1, 3  ;;  %v1117_v15 = vrot.slane %v1109_v55, 3 }
 0x2e7   : > { %v1036_v59 = vadd.f32 %v10614_v36, %v1014_v26  ;;  %v1037_v21 = vadd.f32 %v10615_v33, %v1015_v11  ;;  %v1138_v14 = vrot.slane %v1130_v34, 3  ;;  %v1139_v62 = vrot.slane %v1131_v43, 3  ;;  %v10623_v11 = vld [vmem:[#allocation102_spill] sm:$0xff]  ;;  %v10624_v34 = vld [vmem:[#allocation113_spill] sm:$0xff] }
 0x2e8   : > { %v10616_v47 = vrot.slane %v8617_v23, 3  ;;  %v10617_v20 = vrot.slane %v8621_v37, 3  ;;  %v1174_v9 = vmul.f32 %v10618_v50, %v10584_v49  ;;  %v1175_v16 = vmul.f32 %v10618_v50, %v10586_v32  ;;  %v10630_v50 = vld [vmem:[#allocation121_spill] sm:$0xff] }
 0x2e9   : > { %v1058_v51 = vadd.f32 %v1050_v48, %v1036_v59  ;;  %v1059_v46 = vadd.f32 %v1051_v28, %v1037_v21  ;;  %v1146_v44 = vadd.f32 %v1138_v14, %v992_v5  ;;  %v1147_v35 = vadd.f32 %v1139_v62, %v993_v22  ;;  %v10622_v5 = vld [vmem:[#allocation92_spill] sm:$0xff] }
 0x2ea   : > { %v1102_v56 = vadd.f32 %v10616_v47, %v1080_v4  ;;  %v1103_v27 = vadd.f32 %v10617_v20, %v1081_v38  ;;  %v1196_v25 = vmul.f32 %v10619_v13, %v10581_v53  ;;  %v1197_v23 = vmul.f32 %v10619_v13, %v10583_v58  ;;  %v10627_v38 = vld [vmem:[#allocation134_spill] sm:$0xff]  ;;  %v10631_v13 = vld [vmem:[#allocation116_spill] sm:$0xff] }
 0x2eb   : > { %v10620_v41 = vrot.slane %v8626_v0, 3  ;;  %v10621_v31 = vrot.slane %v8630_v63, 3  ;;  %v1182_v24 = vrot.slane %v1174_v9, 3  ;;  %v1183_v18 = vrot.slane %v1175_v16, 3 }
 0x2ec   : > { %v1124_v60 = vadd.f32 %v1116_v42, %v1102_v56  ;;  %v1125_v30 = vadd.f32 %v1117_v15, %v1103_v27  ;;  %v1204_v29 = vrot.slane %v1196_v25, 4  ;;  %v1205_v19 = vrot.slane %v1197_v23, 4 }
 0x2ed   : > { %v1168_v37 = vadd.f32 %v10620_v41, %v1146_v44  ;;  %v1169_v6 = vadd.f32 %v10621_v31, %v1147_v35  ;;  %v1240_v22 = vmul.f32 %v10622_v5, %v10584_v49  ;;  %v1241_v48 = vmul.f32 %v10622_v5, %v10586_v32  ;;  %v10634_v5 = vld [vmem:[#allocation99_spill] sm:$0xff] }
 0x2ee   : > { %v1262_v17 = vmul.f32 %v10623_v11, %v10581_v53  ;;  %v1263_v0 = vmul.f32 %v10623_v11, %v10583_v58  ;;  %v1212_v63 = vadd.f32 %v1204_v29, %v1058_v51  ;;  %v1213_v57 = vadd.f32 %v1205_v19, %v1059_v46 }
 0x2ef   : > { %v1190_v28 = vadd.f32 %v1182_v24, %v1168_v37  ;;  %v1191_v26 = vadd.f32 %v1183_v18, %v1169_v6  ;;  %v1248_v3 = vrot.slane %v1240_v22, 4  ;;  %v1249_v1 = vrot.slane %v1241_v48, 4 }
 0x2f0   : > { %v1270_v55 = vrot.slane %v1262_v17, 4  ;;  %v1271_v39 = vrot.slane %v1263_v0, 4  ;;  %v1306_v43 = vmul.f32 %v10624_v34, %v10584_v49  ;;  %v1307_v36 = vmul.f32 %v10624_v34, %v10586_v32 }
 0x2f1   : > { %v10625_v59 = vrot.slane %v8634_v7, 4  ;;  %v10626_v21 = vrot.slane %v8645_v54, 4  ;;  %v1328_v42 = vmul.f32 %v10627_v38, %v10581_v53  ;;  %v1329_v15 = vmul.f32 %v10627_v38, %v10583_v58  ;;  %v10639_v38 = vld [vmem:[#allocation143_spill] sm:$0xff] }
 0x2f2   : > { %v1278_v14 = vadd.f32 %v1270_v55, %v1124_v60  ;;  %v1279_v62 = vadd.f32 %v1271_v39, %v1125_v30  ;;  %v1314_v51 = vrot.slane %v1306_v43, 4  ;;  %v1315_v46 = vrot.slane %v1307_v36, 4  ;;  %v10638_v36 = vld [vmem:[#allocation53_spill] sm:$0xff] }
 0x2f3   : > { %v1234_v33 = vadd.f32 %v10625_v59, %v1212_v63  ;;  %v1235_v4 = vadd.f32 %v10626_v21, %v1213_v57  ;;  %v1336_v20 = vrot.slane %v1328_v42, 4  ;;  %v1337_v27 = vrot.slane %v1329_v15, 4 }
 0x2f4   : > { %v10628_v7 = vrot.slane %v8649_v52, 4  ;;  %v10629_v54 = vrot.slane %v8653_v61, 4  ;;  %v1372_v9 = vmul.f32 %v10630_v50, %v10584_v49  ;;  %v1373_v16 = vmul.f32 %v10630_v50, %v10586_v32 }
 0x2f5   : > { %v1256_v47 = vadd.f32 %v1248_v3, %v1234_v33  ;;  %v1257_v56 = vadd.f32 %v1249_v1, %v1235_v4  ;;  %v1344_v60 = vadd.f32 %v1336_v20, %v1190_v28  ;;  %v1345_v30 = vadd.f32 %v1337_v27, %v1191_v26  ;;  %v10635_v28 = vld [vmem:[#allocation62_spill] sm:$0xff] }
 0x2f6   : > { %v1300_v44 = vadd.f32 %v10628_v7, %v1278_v14  ;;  %v1301_v35 = vadd.f32 %v10629_v54, %v1279_v62  ;;  %v1394_v25 = vmul.f32 %v10631_v13, %v10581_v53  ;;  %v1395_v23 = vmul.f32 %v10631_v13, %v10583_v58  ;;  %v10642_v7 = vld [vmem:[#allocation98_spill] sm:$0xff] }
 0x2f7   : > { %v1380_v37 = vrot.slane %v1372_v9, 4  ;;  %v1381_v31 = vrot.slane %v1373_v16, 4  ;;  %v10632_v61 = vrot.slane %v8657_v12, 4  ;;  %v10633_v24 = vrot.slane %v8661_v2, 4 }
 0x2f8   : > { %v1322_v41 = vadd.f32 %v1314_v51, %v1300_v44  ;;  %v1323_v52 = vadd.f32 %v1315_v46, %v1301_v35  ;;  %v1402_v29 = vrot.slane %v1394_v25, 5  ;;  %v1403_v19 = vrot.slane %v1395_v23, 5  ;;  %v10643_v35 = vld [vmem:[#allocation108_spill] sm:$0xff] }
 0x2f9   : > { %v1366_v6 = vadd.f32 %v10632_v61, %v1344_v60  ;;  %v1367_v18 = vadd.f32 %v10633_v24, %v1345_v30  ;;  %v1438_v22 = vmul.f32 %v10634_v5, %v10584_v49  ;;  %v1439_v48 = vmul.f32 %v10634_v5, %v10586_v32  ;;  %v10648_v24 = vld [vmem:[#allocation70_spill] sm:$0xff] }
 0x2fa   : > { %v1460_v26 = vmul.f32 %v10635_v28, %v10581_v53  ;;  %v1461_v11 = vmul.f32 %v10635_v28, %v10583_v58  ;;  %v1410_v0 = vadd.f32 %v1402_v29, %v1256_v47  ;;  %v1411_v63 = vadd.f32 %v1403_v19, %v1257_v56 }
 0x2fb   : > { %v1388_v17 = vadd.f32 %v1380_v37, %v1366_v6  ;;  %v1389_v12 = vadd.f32 %v1381_v31, %v1367_v18  ;;  %v1446_v2 = vrot.slane %v1438_v22, 5  ;;  %v1447_v57 = vrot.slane %v1439_v48, 5  ;;  %v10646_v31 = vld [vmem:[#allocation165_spill] sm:$0xff] }
 0x2fc   : > { %v1468_v3 = vrot.slane %v1460_v26, 5  ;;  %v1469_v1 = vrot.slane %v1461_v11, 5  ;;  %v10636_v55 = vrot.slane %v8665_v45, 5  ;;  %v10637_v34 = vrot.slane %v8672_v10, 5  ;;  %v10649_v22 = vld [vmem:[#allocation109_spill] sm:$0xff] }
 0x2fd   : > { %v1504_v59 = vmul.f32 %v10638_v36, %v10584_v49  ;;  %v1505_v33 = vmul.f32 %v10638_v36, %v10586_v32  ;;  %v1526_v42 = vmul.f32 %v10639_v38, %v10581_v53  ;;  %v1527_v15 = vmul.f32 %v10639_v38, %v10583_v58 }
 0x2fe   : > { %v1432_v39 = vadd.f32 %v10636_v55, %v1410_v0  ;;  %v1433_v43 = vadd.f32 %v10637_v34, %v1411_v63  ;;  %v1476_v21 = vadd.f32 %v1468_v3, %v1322_v41  ;;  %v1477_v4 = vadd.f32 %v1469_v1, %v1323_v52  ;;  %v10644_v41 = vld [vmem:[#allocation163_spill] sm:$0xff]  ;;  %v10650_v0 = vld [vmem:[#allocation136_spill] sm:$0xff]  ;;  %v10654_v34 = vld [vmem:[#allocation74_spill] sm:$0xff] }
 0x2ff   : > { %v1512_v62 = vrot.slane %v1504_v59, 5  ;;  %v1513_v51 = vrot.slane %v1505_v33, 5  ;;  %v10640_v10 = vrot.slane %v8679_v40, 5  ;;  %v10641_v47 = vrot.slane %v8685_v8, 5  ;;  %v10655_v59 = vld [vmem:[#allocation141_spill] sm:$0xff] }
 0x300   : > { %v1454_v14 = vadd.f32 %v1446_v2, %v1432_v39  ;;  %v1455_v45 = vadd.f32 %v1447_v57, %v1433_v43  ;;  %v1534_v20 = vrot.slane %v1526_v42, 5  ;;  %v1535_v27 = vrot.slane %v1527_v15, 5  ;;  %v10652_v57 = vld [vmem:[#allocation167_spill] sm:$0xff] }
 0x301   : > { %v1498_v46 = vadd.f32 %v10640_v10, %v1476_v21  ;;  %v1499_v56 = vadd.f32 %v10641_v47, %v1477_v4  ;;  %v1570_v44 = vmul.f32 %v10642_v7, %v10584_v49  ;;  %v1571_v54 = vmul.f32 %v10642_v7, %v10586_v32  ;;  %v10656_v10 = vld [vmem:[#allocation169_spill] sm:$0xff]  ;;  %v10660_v7 = vld [vmem:[#allocation111_spill] sm:$0xff] }
 0x302   : > { %v1592_v50 = vmul.f32 %v10643_v35, %v10581_v53  ;;  %v1593_v9 = vmul.f32 %v10643_v35, %v10583_v58  ;;  %v1542_v60 = vadd.f32 %v1534_v20, %v1388_v17  ;;  %v1543_v30 = vadd.f32 %v1535_v27, %v1389_v12 }
 0x303   : > { %v1520_v16 = vadd.f32 %v1512_v62, %v1498_v46  ;;  %v1521_v40 = vadd.f32 %v1513_v51, %v1499_v56  ;;  %v1578_v8 = vrot.slane %v1570_v44, 5  ;;  %v1579_v13 = vrot.slane %v1571_v54, 5  ;;  %v10658_v56 = vld [vmem:[#allocation166_spill] sm:$0xff] }
 0x304   : > { %v1600_v25 = vrot.slane %v1592_v50, 6  ;;  %v1601_v23 = vrot.slane %v1593_v9, 6  ;;  %v10645_v52 = vrot.slane %v10644_v41, 5  ;;  %v10647_v61 = vrot.slane %v10646_v31, 5  ;;  %v10661_v9 = vld [vmem:[#allocation144_spill] sm:$0xff] }
 0x305   : > { %v1636_v18 = vmul.f32 %v10648_v24, %v10584_v49  ;;  %v1637_v29 = vmul.f32 %v10648_v24, %v10586_v32  ;;  %v1658_v48 = vmul.f32 %v10649_v22, %v10581_v53  ;;  %v1659_v28 = vmul.f32 %v10649_v22, %v10583_v58  ;;  %v10666_v24 = vld [vmem:[#allocation115_spill] sm:$0xff] }
 0x306   : > { %v1564_v37 = vadd.f32 %v10645_v52, %v1542_v60  ;;  %v1565_v6 = vadd.f32 %v10647_v61, %v1543_v30  ;;  %v1608_v19 = vadd.f32 %v1600_v25, %v1454_v14  ;;  %v1609_v5 = vadd.f32 %v1601_v23, %v1455_v45  ;;  %v10662_v25 = vld [vmem:[#allocation51_spill] sm:$0xff]  ;;  %v10664_v52 = vld [vmem:[#allocation168_spill] sm:$0xff] }
 0x307   : > { %v1644_v17 = vrot.slane %v1636_v18, 6  ;;  %v1645_v12 = vrot.slane %v1637_v29, 6  ;;  %v10651_v63 = vrot.slane %v10650_v0, 6  ;;  %v10653_v3 = vrot.slane %v10652_v57, 6 }
 0x308   : > { %v1586_v26 = vadd.f32 %v1578_v8, %v1564_v37  ;;  %v1587_v11 = vadd.f32 %v1579_v13, %v1565_v6  ;;  %v1666_v55 = vrot.slane %v1658_v48, 6  ;;  %v1667_v39 = vrot.slane %v1659_v28, 6 }
 0x309   : > { %v1630_v2 = vadd.f32 %v10651_v63, %v1608_v19  ;;  %v1631_v1 = vadd.f32 %v10653_v3, %v1609_v5  ;;  %v1702_v43 = vmul.f32 %v10654_v34, %v10584_v49  ;;  %v1703_v36 = vmul.f32 %v10654_v34, %v10586_v32  ;;  %v10667_v19 = vld [vmem:[#allocation151_spill] sm:$0xff]  ;;  %v10672_v34 = vld [vmem:[#allocation153_spill] sm:$0xff] }
 0x30a   : > { %v1724_v33 = vmul.f32 %v10655_v59, %v10581_v53  ;;  %v1725_v21 = vmul.f32 %v10655_v59, %v10583_v58  ;;  %v1674_v42 = vadd.f32 %v1666_v55, %v1520_v16  ;;  %v1675_v15 = vadd.f32 %v1667_v39, %v1521_v40 }
 0x30b   : > { %v1652_v4 = vadd.f32 %v1644_v17, %v1630_v2  ;;  %v1653_v38 = vadd.f32 %v1645_v12, %v1631_v1  ;;  %v1710_v14 = vrot.slane %v1702_v43, 6  ;;  %v1711_v45 = vrot.slane %v1703_v36, 6  ;;  %v10668_v2 = vld [vmem:[#allocation172_spill] sm:$0xff] }
 0x30c   : > { %v1732_v62 = vrot.slane %v1724_v33, 6  ;;  %v1733_v51 = vrot.slane %v1725_v21, 6  ;;  %v10657_v46 = vrot.slane %v10656_v10, 6  ;;  %v10659_v20 = vrot.slane %v10658_v56, 6  ;;  %v10670_v1 = vld [vmem:[#allocation180_spill] sm:$0xff]  ;;  %v10676_v10 = vld [vmem:[#allocation130_spill] sm:$0xff] }
 0x30d   : > { %v1768_v44 = vmul.f32 %v10660_v7, %v10584_v49  ;;  %v1769_v54 = vmul.f32 %v10660_v7, %v10586_v32  ;;  %v1790_v16 = vmul.f32 %v10661_v9, %v10581_v53  ;;  %v1791_v40 = vmul.f32 %v10661_v9, %v10583_v58  ;;  %v10673_v21 = vld [vmem:[#allocation152_spill] sm:$0xff]  ;;  %v10678_v56 = vld [vmem:[#allocation133_spill] sm:$0xff] }
 0x30e   : > { %v1696_v47 = vadd.f32 %v10657_v46, %v1674_v42  ;;  %v1697_v27 = vadd.f32 %v10659_v20, %v1675_v15  ;;  %v1740_v35 = vadd.f32 %v1732_v62, %v1586_v26  ;;  %v1741_v50 = vadd.f32 %v1733_v51, %v1587_v11  ;;  %v10674_v42 = vld [vmem:[#allocation104_spill] sm:$0xff]  ;;  %v10675_v15 = vld [vmem:[#allocation178_spill] sm:$0xff] }
 0x30f   : > { %v1776_v8 = vrot.slane %v1768_v44, 6  ;;  %v1777_v13 = vrot.slane %v1769_v54, 6  ;;  %v10663_v23 = vrot.slane %v10662_v25, 6  ;;  %v10665_v37 = vrot.slane %v10664_v52, 6  ;;  %v10680_v54 = vld [vmem:[#allocation85_spill] sm:$0xff]  ;;  %v10684_v52 = vld [vmem:[#allocation171_spill] sm:$0xff] }
 0x310   : > { %v1718_v60 = vadd.f32 %v1710_v14, %v1696_v47  ;;  %v1719_v30 = vadd.f32 %v1711_v45, %v1697_v27  ;;  %v1798_v61 = vrot.slane %v1790_v16, 7  ;;  %v1799_v6 = vrot.slane %v1791_v40, 7  ;;  %v3692_v40 = vpop.permute.xlu1 %3691 }
 0x311   : > { %v1762_v41 = vadd.f32 %v10663_v23, %v1740_v35  ;;  %v1763_v31 = vadd.f32 %v10665_v37, %v1741_v50  ;;  %v1834_v18 = vmul.f32 %v10666_v24, %v10584_v49  ;;  %v1835_v29 = vmul.f32 %v10666_v24, %v10586_v32  ;;  %v10682_v50 = vld [vmem:[#allocation96_spill] sm:$0xff]  ;;  %v10687_v24 = vld [vmem:[#allocation162_spill] sm:$0xff] }
 0x312   : > { %v1856_v5 = vmul.f32 %v10667_v19, %v10581_v53  ;;  %v1857_v22 = vmul.f32 %v10667_v19, %v10583_v58  ;;  %v1806_v26 = vadd.f32 %v1798_v61, %v1652_v4  ;;  %v1807_v11 = vadd.f32 %v1799_v6, %v1653_v38  ;;  %v10686_v61 = vld [vmem:[#allocation173_spill] sm:$0xff] }
 0x313   : > { %v1784_v48 = vadd.f32 %v1776_v8, %v1762_v41  ;;  %v1785_v28 = vadd.f32 %v1777_v13, %v1763_v31  ;;  %v1842_v17 = vrot.slane %v1834_v18, 7  ;;  %v1843_v12 = vrot.slane %v1835_v29, 7  ;;  %v10683_v41 = vld [vmem:[#allocation107_spill] sm:$0xff]  ;;  %v10685_v31 = vld [vmem:[#allocation125_spill] sm:$0xff]  ;;  %v10689_v29 = vld [vmem:[#allocation176_spill] sm:$0xff] }
 0x314   : > { %v1864_v0 = vrot.slane %v1856_v5, 7  ;;  %v1865_v63 = vrot.slane %v1857_v22, 7  ;;  %v10669_v57 = vrot.slane %v10668_v2, 7  ;;  %v10671_v55 = vrot.slane %v10670_v1, 7  ;;  %v10691_v22 = vld [vmem:[#allocation194_spill] sm:$0xff] }
 0x315   : > { %v1900_v43 = vmul.f32 %v10672_v34, %v10584_v49  ;;  %v1901_v36 = vmul.f32 %v10672_v34, %v10586_v32  ;;  %v1922_v4 = vmul.f32 %v10673_v21, %v10581_v53  ;;  %v1923_v38 = vmul.f32 %v10673_v21, %v10583_v58  ;;  %v10681_v53 = vld [vmem:[#allocation187_spill] sm:$0xff]  ;;  %v10697_v1 = vld [vmem:[#allocation158_spill] sm:$0xff] }
 0x316   : > { %v1828_v3 = vadd.f32 %v10669_v57, %v1806_v26  ;;  %v1829_v39 = vadd.f32 %v10671_v55, %v1807_v11  ;;  %v1872_v59 = vadd.f32 %v1864_v0, %v1718_v60  ;;  %v1873_v33 = vadd.f32 %v1865_v63, %v1719_v30  ;;  %v10692_v26 = vld [vmem:[#allocation174_spill] sm:$0xff]  ;;  %v10696_v63 = vld [vmem:[#allocation127_spill] sm:$0xff] }
 0x317   : > { %v3671_v14 = vmul.f32 %v10675_v15, %v10674_v42  ;;  %v1908_v62 = vrot.slane %v1900_v43, 7  ;;  %v1909_v51 = vrot.slane %v1901_v36, 7  ;;  %v10677_v46 = vrot.slane %v10676_v10, 7  ;;  %v10700_v36 = vld [vmem:[#allocation100_spill] sm:$0xff]  ;;  %v10701_v21 = vld [vmem:[#allocation170_spill] sm:$0xff] }
 0x318   : > { %v9045_v45 = vadd.f32 %v1842_v17, %v1828_v3  ;;  %v10679_v20 = vrot.slane %v10678_v56, 7  ;;  %v1930_v7 = vrot.slane %v1922_v4, 7  ;;  %v1931_v44 = vrot.slane %v1923_v38, 7  ;;  %v10694_v17 = vld [vmem:[#allocation159_spill] sm:$0xff] }
 0x319   : > { %v1894_v47 = vadd.f32 %v10677_v46, %v1872_v59  ;;  %v3680_v35 = vmul.f32 %v10681_v53, %v10680_v54  ;;  %v3681_v58 = vmul.f32 %v10681_v53, %v10674_v42  ;;  %v1966_v9 = vmul.f32 %v10682_v50, %v10584_v49  ;;  %v10702_v42 = vld [vmem:[#allocation132_spill] sm:$0xff] }
 0x31a   : > { %v1895_v27 = vadd.f32 %v10679_v20, %v1873_v33  ;;  %v1967_v16 = vmul.f32 %v10682_v50, %v10586_v32  ;;  %v9059_v60 = vadd.f32 %v1843_v12, %v1829_v39  ;;  %v1938_v8 = vadd.f32 %v1930_v7, %v1784_v48  ;;  %v10693_v48 = vld [vmem:[#allocation47_spill] sm:$0xff] }
 0x31b   : > { %v1916_v30 = vadd.f32 %v1908_v62, %v1894_v47  ;;  %v1939_v13 = vadd.f32 %v1931_v44, %v1785_v28  ;;  %v1974_v23 = vrot.slane %v1966_v9, 7  ;;  %v3664_v37 = vadd.f32 %v10684_v52, %v10683_v41  ;;  %v10698_v39 = vld [vmem:[#allocation155_spill] sm:$0xff]  ;;  %v10704_v9 = vld [vmem:[#allocation154_spill] sm:$0xff] }
 0x31c   : > { %v1917_v25 = vadd.f32 %v1909_v51, %v1895_v27  ;;  %v3665_v6 = vadd.f32 %v10686_v61, %v10685_v31  ;;  %v10688_v18 = vrot.slane %v10687_v24, 7  ;;  %v10690_v19 = vrot.slane %v10689_v29, 7  ;;  %v10707_v24 = vld [vmem:[#allocation157_spill] sm:$0xff] }
 0x31d   : > { %v1975_v5 = vrot.slane %v1967_v16, 7  ;;  %v3674_v11 = vadd.f32 %v10692_v26, %v10691_v22  ;;  %v3684_v28 = vadd.f32 %v3680_v35, %v10693_v48  ;;  %v3695_v0 = vsel %vm425_vm4, %v3692_v40, %v10694_v17  ;;  %v10705_v16 = vld [vmem:[#allocation164_spill] sm:$0xff]  ;;  %v10710_v22 = vld [vmem:[#allocation97_spill] sm:$0xff] }
 0x31e   : > { %v1960_v49 = vadd.f32 %v10688_v18, %v1938_v8  ;;  %v1961_v32 = vadd.f32 %v10690_v19, %v1939_v13  ;;  %v3696_v2 = vsel %vm425_vm4, %v10696_v63, %v3692_v40  ;;  %v3764_v57 = vadd.f32 %v1916_v30, %v9045_v45  ;;  %v10706_v30 = vld [vmem:[#allocation156_spill] sm:$0xff]  ;;  %v10708_v19 = vld [vmem:[#allocation131_spill] sm:$0xff] }
 0x31f   : > { %v3685_v55 = vadd.f32 %v3681_v58, %v10697_v1  ;;  %v3706_v34 = vmul.f32 %v10698_v39, %v3696_v2  ;;  %v3707_v43 = vmul.f32 %v10698_v39, %v3695_v0  ;;  %v3716_v59 = vmul.f32 %v10700_v36, %v3696_v2  ;;  %v10712_v17 = vld [vmem:[#allocation120_spill] sm:$0xff] }
 0x320   : > { %v1982_v3 = vadd.f32 %v1974_v23, %v1960_v49  ;;  %v3717_v33 = vmul.f32 %v10700_v36, %v3695_v0  ;;  %v3726_v4 = vmul.f32 %v10701_v21, %v3696_v2  ;;  %v3727_v38 = vmul.f32 %v10701_v21, %v3695_v0 }
 0x321   : > { %v3675_v15 = vadd.f32 %v3671_v14, %v10702_v42  ;;  %v3710_v62 = vadd.f32 %v3706_v34, %v3664_v37  ;;  %v3711_v51 = vadd.f32 %v3707_v43, %v3665_v6  ;;  %v1983_v46 = vadd.f32 %v1975_v5, %v1961_v32 }
 0x322   : > { %v3768_v10 = vadd.f32 %v3764_v57, %v1982_v3  ;;  %v3730_v47 = vadd.f32 %v3726_v4, %v3684_v28  ;;  %v3731_v56 = vadd.f32 %v3727_v38, %v3685_v55  ;;  %v3765_v20 = vadd.f32 %v1917_v25, %v9059_v60  ;;  %v10711_v28 = vld [vmem:[#allocation46_spill] sm:$0xff] }
 0x323   : > { %v3734_v27 = vrot.slane %v3710_v62, 7  ;;  %v3735_v7 = vrot.slane %v3711_v51, 7  ;;  %v3720_v44 = vadd.f32 %v3716_v59, %v3674_v11  ;;  %v3721_v54 = vadd.f32 %v3717_v33, %v3675_v15 }
 0x324   : > { %v3746_v53 = vrot.slane %v3730_v47, 1  ;;  %v3747_v35 = vrot.slane %v3731_v56, 1  ;;  %v3806_v40 = vrot.slane %v10705_v16, %v10704_v9  ;;  %v3818_v8 = vrot.slane %v10706_v30, %v10704_v9 }
 0x325   : > { %v3738_v50 = vsel %vm325_vm0, 0.0, %v3734_v27  ;;  %v3739_v14 = vsel %vm325_vm0, 0.0, %v3735_v7  ;;  %v3769_v23 = vadd.f32 %v3765_v20, %v1983_v46  ;;  %v3778_v6 = vrot.slane %v3768_v10, %v10704_v9 }
 0x326   : > { %v3742_v13 = vadd.f32 %v3738_v50, %v3720_v44  ;;  %v3743_v25 = vadd.f32 %v3739_v14, %v3721_v54  ;;  %v3750_v41 = vsel %vm326_vm1, 0.0, %v3746_v53  ;;  %v3751_v52 = vsel %vm326_vm1, 0.0, %v3747_v35 }
 0x327   : > { %v3810_v37 = vsel %vm325_vm0, %v3806_v40, 0.0  ;;  %v3798_v49 = vrot.slane %v9045_v45, %v10704_v9  ;;  %v3802_v29 = vrot.slane %v9059_v60, %v10704_v9  ;;  %v3830_v32 = vrot.slane %v10708_v19, %v10704_v9 }
 0x328   : > { %v3754_v31 = vadd.f32 %v3750_v41, %v3742_v13  ;;  %v3755_v61 = vadd.f32 %v3751_v52, %v3743_v25  ;;  %v3814_v18 = vsub.f32 %v10707_v24, %v3810_v37  ;;  %v3831_v5 = vsel %vm326_vm1, %v3818_v8, 0.0 }
 0x329   : > { %v3782_v48 = vrot.slane %v3769_v23, %v10704_v9  ;;  %v10713_v12 = vsub.f32 %v10711_v28, %v10712_v17  ;;  %v3822_v0 = vrot.slane %v1982_v3, %v10704_v9  ;;  %v3826_v60 = vrot.slane %v1983_v46, %v10704_v9 }
 0x32a   : > { %v3760_v26 = vadd.f32 %v10710_v22, %v3754_v31  ;;  %v3761_v11 = vadd.f32 %v10710_v22, %v3755_v61  ;;  %v3834_v63 = vsel %vm326_vm1, %v3830_v32, 0.0  ;;  %v3808_v55 = vsel %vm325_vm0, %v3798_v49, 0.0 }
 0x32b   : > { %v3835_v45 = vsub.f32 %v10713_v12, %v3831_v5  ;;  %v3838_v1 = vsub.f32 %v3814_v18, %v3834_v63  ;;  %v3809_v39 = vsel %vm325_vm0, %v3802_v29, 0.0  ;;  %v3832_v43 = vsel %vm326_vm1, %v3822_v0, 0.0 }
 0x32c   : > { %v3788_v2 = vadd.f32 %v3778_v6, %v3760_v26  ;;  %v3789_v57 = vadd.f32 %v3782_v48, %v3761_v11  ;;  %v3833_v36 = vsel %vm326_vm1, %v3826_v60, 0.0 }
 0x32d   : > { %3839 = vst [vmem:[%s299_s0] sm:$0xff] %v3835_v45  ;;  %3842 = vst [vmem:[%s299_s0 + $0x18] sm:$0xff] %v3838_v1 }
 0x32e   : > { %v3812_v3 = vsub.f32 %v3788_v2, %v3808_v55  ;;  %v3813_v34 = vsub.f32 %v3789_v57, %v3809_v39 }
 0x330   : > { %v3836_v59 = vsub.f32 %v3812_v3, %v3832_v43  ;;  %v3837_v33 = vsub.f32 %v3813_v34, %v3833_v36 }
 0x332   : > { %3840 = vst [vmem:[%s299_s0 + $0x8] sm:$0xff] %v3836_v59  ;;  %3841 = vst [vmem:[%s299_s0 + $0x10] sm:$0xff] %v3837_v33 }
 0x333   : > { %4343 = shalt.err (!%p4340_p6)
}
 0x334   : > { %s4344_s23 = scalar_lea.hbm %s9137_s20, 512  ;;  %s4348_s9 = scalar_lea.hbm %s10715_s10, 1024 }
 0x335   : > { %p4345_p10 = scmp.ne.s32.totalorder %s9137_s20, %s4344_s23  ;;  %p4349_p11 = scmp.lt.s32.totalorder %s9137_s20, %s10715_s10 }
 0x336   : > { %p4350_p13 = scmp.lt.s32.totalorder %s4348_s9, %s4344_s23 }
 0x337   : > { %p4346_p8 = pnand %p4345_p10, %p10716_p2 }
 0x338   : > { %p4351_p1 = por %p4350_p13, %p4349_p11 }
 0x339   : > { %p4347_p0 = pneg %p4346_p8 }
 0x33b   : > { %p4352_p12 = pnand %p4351_p1, %p4347_p0 }
 0x33d   : > { %4355 = shalt.err (!%p4352_p12)
}
 0x33e   : > { %4216 = dma.vmem_to_hbm [thread:$0]  (%p10716_p2), %s3859_s19, 512, %s9137_s20, %s3844_s14  }
 0x33f PF: > { %s10717_s28 = sld [smem:[#allocation17_spill]] }
 0x340   : > { %s10718_s15 = sld [smem:[#allocation14_spill]] }
 0x341   : > { %s10719_s22 = sld [smem:[#allocation22_spill]] }
 0x345   : > { %p4238_p3 = scmp.ge.s32.totalorder %s10717_s28, 2 }
 0x346   : > { %s3870_s30 = sand.u32 1, %s10718_s15  }
 0x347   : > { %p10720_p4 = scmp.ne.s32.totalorder %s10719_s22, 0  ;;  %s3871_s12 = scalar_lea.sflag [#allocation5], %s3870_s30 }
 0x349   : > { %p4229_p9 = pnand %p4238_p3, %p10720_p4 }
 0x34b   : > { %p4230_p7 = pneg %p4229_p9 }
 0x34d   : > { %4381 = dma.done.wait (%p4230_p7), %s3871_s12, 512  }
 0x34e   : > { %4383 = vsyncadd (%p4230_p7), %s3871_s12, 4294966784  ;;  %s10721_s26 = sld [smem:[#allocation19_spill]] }
 0x34f   : > { %s10722_s23 = sld [smem:[#allocation15_spill]] }
 0x350   : > { %s10723_s24 = sld [smem:[#allocation16_spill]] }
 0x351   : > { %s10724_s25 = sld [smem:[#allocation20_spill]] }
 0x354   : > { %p19_p5 = scmp.ge.s32.totalorder %s10721_s26, 4  }
 0x356   :  { %21 = sbr.rel (!%p19_p5) target bundleno = 13 (0xd), region = 103 }
 0x35b   :  { %3876 = vsyncpa [#allocation5], 1 }
 0x35c   :  { %3878 = vsyncpa [#allocation5 + $0x1], 1 }
 0x35d   :  { %3879 = vsyncpa [#allocation6], 1 }
 0x35e   :  { %3881 = vsyncpa [#allocation6 + $0x1], 1 }
 0x35f   :  { %3882 = vsyncpa [#allocation8], 1 }

</bundles_post_ra>
